<compile_context>
chip_gen: v7x
topology: tpu7x:2x2x1
jax: 0.10.0
libtpu: 0.0.40
codegen_flags: <defaults>
</compile_context>

<pallas_src>
import math
import functools

import jax
import jax.numpy as jnp
from jax.experimental import pallas as pl
from jax.experimental.pallas import tpu as pltpu

EPS_LN = 1e-6
EPS_RMS = 1e-6
VMEM_LIMIT = 64 * 1024 * 1024  # fits v7x's 64 MiB physical VMEM


# ----------------------------------------------------------------------------
# tiling helpers (always pick tiles that exactly divide, or use the full dim)
# ----------------------------------------------------------------------------
def _seq_tile(n, pref=256):
    """Row/sequence tile: multiple of 8 that divides n, or the full dim."""
    if n <= pref:
        return n
    for t in range(pref - pref % 8, 7, -8):
        if n % t == 0:
            return t
    return n


def _col_tile(n, pref=512):
    """Column tile: multiple of 128 that divides n, or the full dim."""
    if n <= pref:
        return n
    for t in range(pref, 127, -128):
        if n % t == 0:
            return t
    return n


def _gelu_tanh(x):
    c = math.sqrt(2.0 / math.pi)
    return 0.5 * x * (1.0 + jnp.tanh(c * (x + 0.044715 * x * x * x)))


# ----------------------------------------------------------------------------
# Pallas kernels
# ----------------------------------------------------------------------------
def _linear_kernel(x_ref, w_ref, b_ref, o_ref):
    o_ref[...] = (
        jnp.dot(x_ref[...], w_ref[...], preferred_element_type=jnp.float32)
        + b_ref[...]
    ).astype(o_ref.dtype)


def _rmsnorm_kernel(x_ref, w_ref, o_ref):
    x = x_ref[...].astype(jnp.float32)
    var = jnp.mean(x * x, axis=-1, keepdims=True)
    o_ref[...] = (x * jax.lax.rsqrt(var + EPS_RMS) * w_ref[...]).astype(o_ref.dtype)


def _mod_matmul_kernel(x_ref, sc_ref, sh_ref, tsc_ref, tsh_ref, w_ref, b_ref,
                       o_ref, *, num_tokens, tm):
    # fused: LayerNorm(no affine) -> token-replace modulate -> matmul (+bias)
    x = x_ref[0].astype(jnp.float32)                       # (TM, D)
    mean = jnp.mean(x, axis=-1, keepdims=True)
    xc = x - mean
    var = jnp.mean(xc * xc, axis=-1, keepdims=True)
    xn = xc * jax.lax.rsqrt(var + EPS_LN)

    rows = pl.program_id(1) * tm + jax.lax.broadcasted_iota(jnp.int32, (tm, 1), 0)
    use_tr = rows < num_tokens                              # (TM, 1)
    sc = jnp.where(use_tr, tsc_ref[0], sc_ref[0])           # (TM, D)
    sh = jnp.where(use_tr, tsh_ref[0], sh_ref[0])
    xm = (xn * (1.0 + sc) + sh).astype(w_ref.dtype)         # bf16 for MXU

    y = jnp.dot(xm, w_ref[...], preferred_element_type=jnp.float32) + b_ref[...]
    o_ref[0] = y.astype(o_ref.dtype)


def _proj_residual_kernel(a_ref, r_ref, g_ref, tg_ref, w_ref, b_ref, o_ref,
                          *, num_tokens, tm):
    # fused: (attn @ W_out + b) then token-replace gated residual add
    y = jnp.dot(a_ref[0], w_ref[...], preferred_element_type=jnp.float32) + b_ref[...]
    rows = pl.program_id(1) * tm + jax.lax.broadcasted_iota(jnp.int32, (tm, 1), 0)
    g = jnp.where(rows < num_tokens, tg_ref[0], g_ref[0])
    o_ref[0] = (r_ref[0].astype(jnp.float32) + g * y).astype(o_ref.dtype)


def _ffn_fused_kernel(x_ref, sc_ref, sh_ref, g_ref, tsc_ref, tsh_ref, tg_ref,
                      w1_ref, b1_ref, w2_ref, b2_ref, o_ref, acc_ref,
                      *, num_tokens, tm):
    # fused: LN -> modulate -> FF1 -> GELU(tanh) -> FF2 (inner tiled reduction)
    #        -> token-replace gated residual add
    ki = pl.program_id(2)

    @pl.when(ki == 0)
    def _():
        acc_ref[...] = jnp.zeros(acc_ref.shape, acc_ref.dtype)

    x = x_ref[0].astype(jnp.float32)                        # (TM, D)
    mean = jnp.mean(x, axis=-1, keepdims=True)
    xc = x - mean
    var = jnp.mean(xc * xc, axis=-1, keepdims=True)
    xn = xc * jax.lax.rsqrt(var + EPS_LN)

    rows = pl.program_id(1) * tm + jax.lax.broadcasted_iota(jnp.int32, (tm, 1), 0)
    use_tr = rows < num_tokens
    sc = jnp.where(use_tr, tsc_ref[0], sc_ref[0])
    sh = jnp.where(use_tr, tsh_ref[0], sh_ref[0])
    xm = (xn * (1.0 + sc) + sh).astype(w1_ref.dtype)

    h = jnp.dot(xm, w1_ref[...], preferred_element_type=jnp.float32) + b1_ref[...]
    h = _gelu_tanh(h)
    acc_ref[...] += jnp.dot(h.astype(w2_ref.dtype), w2_ref[...],
                            preferred_element_type=jnp.float32)

    @pl.when(ki == pl.num_programs(2) - 1)
    def _():
        y = acc_ref[...] + b2_ref[...]
        g = jnp.where(use_tr, tg_ref[0], g_ref[0])
        o_ref[0] = (x + g * y).astype(o_ref.dtype)


def _flash_attn_kernel(q_ref, k_ref, v_ref, o_ref, m_ref, l_ref, acc_ref, *, scale):
    # one (batch, head, q-tile) slice; KV-tiled online softmax
    ki = pl.program_id(3)

    @pl.when(ki == 0)
    def _():
        m_ref[...] = jnp.full(m_ref.shape, -jnp.inf, m_ref.dtype)
        l_ref[...] = jnp.zeros(l_ref.shape, l_ref.dtype)
        acc_ref[...] = jnp.zeros(acc_ref.shape, acc_ref.dtype)

    q = (q_ref[0, 0].astype(jnp.float32) * scale).astype(k_ref.dtype)  # (tq, Dh)
    k = k_ref[0, 0]                                                    # (tk, Dh)
    v = v_ref[0, 0]                                                    # (tk, Dh)

    s = jax.lax.dot_general(q, k, (((1,), (1,)), ((), ())),
                            preferred_element_type=jnp.float32)        # (tq, tk)

    m_prev = m_ref[...]
    m_new = jnp.maximum(m_prev, jnp.max(s, axis=-1, keepdims=True))
    alpha = jnp.exp(m_prev - m_new)
    p = jnp.exp(s - m_new)
    l_ref[...] = alpha * l_ref[...] + jnp.sum(p, axis=-1, keepdims=True)
    acc_ref[...] = alpha * acc_ref[...] + jnp.dot(
        p.astype(v.dtype), v, preferred_element_type=jnp.float32)
    m_ref[...] = m_new

    @pl.when(ki == pl.num_programs(3) - 1)
    def _():
        o_ref[0, 0] = (acc_ref[...] *
                       pl.reciprocal(l_ref[...], approx=True)).astype(o_ref.dtype)


# ----------------------------------------------------------------------------
# Pallas wrappers
# ----------------------------------------------------------------------------
def pallas_linear(x2, w, b, out_dtype=jnp.float32):
    """y = x @ W + b.  x2: [M, K] (bf16), W: [K, N] (bf16), b: [N] (f32)."""
    M, K = x2.shape
    N = w.shape[1]
    TM = _seq_tile(M, 256)
    TN = _col_tile(N, 512)
    return pl.pallas_call(
        _linear_kernel,
        out_shape=jax.ShapeDtypeStruct((M, N), out_dtype),
        grid=(M // TM, N // TN),
        in_specs=[
            pl.BlockSpec((TM, K), lambda i, j: (i, 0)),
            pl.BlockSpec((K, TN), lambda i, j: (0, j)),
            pl.BlockSpec((1, TN), lambda i, j: (0, j)),
        ],
        out_specs=pl.BlockSpec((TM, TN), lambda i, j: (i, j)),
        compiler_params=pltpu.CompilerParams(
            dimension_semantics=("parallel", "parallel"),
            vmem_limit_bytes=VMEM_LIMIT),
    )(x2, w, b.reshape(1, N))


def pallas_rmsnorm(x, w, out_dtype=jnp.bfloat16):
    """RMSNorm over last dim with learnable weight (q/k norm)."""
    orig_shape = x.shape
    Dh = orig_shape[-1]
    x2 = x.reshape(-1, Dh)
    M = x2.shape[0]
    TM = _seq_tile(M, 512)
    out = pl.pallas_call(
        _rmsnorm_kernel,
        out_shape=jax.ShapeDtypeStruct((M, Dh), out_dtype),
        grid=(M // TM,),
        in_specs=[
            pl.BlockSpec((TM, Dh), lambda i: (i, 0)),
            pl.BlockSpec((1, Dh), lambda i: (0, 0)),
        ],
        out_specs=pl.BlockSpec((TM, Dh), lambda i: (i, 0)),
        compiler_params=pltpu.CompilerParams(dimension_semantics=("parallel",)),
    )(x2, w.reshape(1, Dh))
    return out.reshape(orig_shape)


def pallas_mod_matmul(x, scale, shift, tr_scale, tr_shift, w, b, num_tokens,
                      out_dtype=jnp.bfloat16):
    """Fused LayerNorm + token-replace modulate + linear projection."""
    B, N, D = x.shape
    Nout = w.shape[1]
    TM = _seq_tile(N, 256)
    TN = _col_tile(Nout, 512)
    kern = functools.partial(_mod_matmul_kernel, num_tokens=num_tokens, tm=TM)
    vec = lambda v: v.reshape(B, 1, D)
    vec_spec = pl.BlockSpec((1, 1, D), lambda bi, i, j: (bi, 0, 0))
    return pl.pallas_call(
        kern,
        out_shape=jax.ShapeDtypeStruct((B, N, Nout), out_dtype),
        grid=(B, N // TM, Nout // TN),
        in_specs=[
            pl.BlockSpec((1, TM, D), lambda bi, i, j: (bi, i, 0)),
            vec_spec, vec_spec, vec_spec, vec_spec,
            pl.BlockSpec((D, TN), lambda bi, i, j: (0, j)),
            pl.BlockSpec((1, TN), lambda bi, i, j: (0, j)),
        ],
        out_specs=pl.BlockSpec((1, TM, TN), lambda bi, i, j: (bi, i, j)),
        compiler_params=pltpu.CompilerParams(
            dimension_semantics=("parallel", "parallel", "parallel"),
            vmem_limit_bytes=VMEM_LIMIT),
    )(x, vec(scale), vec(shift), vec(tr_scale), vec(tr_shift), w,
      b.reshape(1, Nout))


def pallas_proj_gated_residual(attn, res, gate, tr_gate, w, b, num_tokens,
                               out_dtype=jnp.float32):
    """Fused out-projection + token-replace gated residual add."""
    B, N, D = res.shape
    K = attn.shape[-1]
    Nout = w.shape[1]
    TM = _seq_tile(N, 256)
    TN = _col_tile(Nout, 512)
    kern = functools.partial(_proj_residual_kernel, num_tokens=num_tokens, tm=TM)
    vec = lambda v: v.reshape(B, 1, Nout)
    vec_spec = pl.BlockSpec((1, 1, TN), lambda bi, i, j: (bi, 0, j))
    return pl.pallas_call(
        kern,
        out_shape=jax.ShapeDtypeStruct((B, N, Nout), out_dtype),
        grid=(B, N // TM, Nout // TN),
        in_specs=[
            pl.BlockSpec((1, TM, K), lambda bi, i, j: (bi, i, 0)),
            pl.BlockSpec((1, TM, TN), lambda bi, i, j: (bi, i, j)),
            vec_spec, vec_spec,
            pl.BlockSpec((K, TN), lambda bi, i, j: (0, j)),
            pl.BlockSpec((1, TN), lambda bi, i, j: (0, j)),
        ],
        out_specs=pl.BlockSpec((1, TM, TN), lambda bi, i, j: (bi, i, j)),
        compiler_params=pltpu.CompilerParams(
            dimension_semantics=("parallel", "parallel", "parallel"),
            vmem_limit_bytes=VMEM_LIMIT),
    )(attn, res, vec(gate), vec(tr_gate), w, b.reshape(1, Nout))


def pallas_ffn_gated_residual(x, scale, shift, gate, tr_scale, tr_shift, tr_gate,
                              w1, b1, w2, b2, num_tokens, out_dtype=jnp.float32):
    """Fused LN + modulate + FF1 + GELU + FF2 (tiled inner reduction) + gated add."""
    B, N, D = x.shape
    inner = w1.shape[1]
    TM = _seq_tile(N, 256)
    TK = _col_tile(inner, 512)
    kern = functools.partial(_ffn_fused_kernel, num_tokens=num_tokens, tm=TM)
    vec = lambda v: v.reshape(B, 1, D)
    vec_spec = pl.BlockSpec((1, 1, D), lambda bi, i, k: (bi, 0, 0))
    return pl.pallas_call(
        kern,
        out_shape=jax.ShapeDtypeStruct((B, N, D), out_dtype),
        grid=(B, N // TM, inner // TK),
        in_specs=[
            pl.BlockSpec((1, TM, D), lambda bi, i, k: (bi, i, 0)),
            vec_spec, vec_spec, vec_spec, vec_spec, vec_spec, vec_spec,
            pl.BlockSpec((D, TK), lambda bi, i, k: (0, k)),
            pl.BlockSpec((1, TK), lambda bi, i, k: (0, k)),
            pl.BlockSpec((TK, D), lambda bi, i, k: (k, 0)),
            pl.BlockSpec((1, D), lambda bi, i, k: (0, 0)),
        ],
        out_specs=pl.BlockSpec((1, TM, D), lambda bi, i, k: (bi, i, 0)),
        scratch_shapes=[pltpu.VMEM((TM, D), jnp.float32)],
        compiler_params=pltpu.CompilerParams(
            dimension_semantics=("parallel", "parallel", "arbitrary"),
            vmem_limit_bytes=VMEM_LIMIT),
    )(x, vec(scale), vec(shift), vec(gate), vec(tr_scale), vec(tr_shift),
      vec(tr_gate), w1, b1.reshape(1, inner), w2, b2.reshape(1, D))


def pallas_flash_attention(q, k, v, out_dtype=jnp.bfloat16):
    """Flash-style full attention.  q,k,v: [B, H, S, Dh] (bf16)."""
    B, H, S, Dh = q.shape
    scale = 1.0 / math.sqrt(Dh)
    tq = _seq_tile(S, 256)
    tk = _seq_tile(S, 256)
    kern = functools.partial(_flash_attn_kernel, scale=scale)
    return pl.pallas_call(
        kern,
        out_shape=jax.ShapeDtypeStruct((B, H, S, Dh), out_dtype),
        grid=(B, H, S // tq, S // tk),
        in_specs=[
            pl.BlockSpec((1, 1, tq, Dh), lambda b, h, qi, ki: (b, h, qi, 0)),
            pl.BlockSpec((1, 1, tk, Dh), lambda b, h, qi, ki: (b, h, ki, 0)),
            pl.BlockSpec((1, 1, tk, Dh), lambda b, h, qi, ki: (b, h, ki, 0)),
        ],
        out_specs=pl.BlockSpec((1, 1, tq, Dh), lambda b, h, qi, ki: (b, h, qi, 0)),
        scratch_shapes=[
            pltpu.VMEM((tq, 1), jnp.float32),
            pltpu.VMEM((tq, 1), jnp.float32),
            pltpu.VMEM((tq, Dh), jnp.float32),
        ],
        compiler_params=pltpu.CompilerParams(
            dimension_semantics=("parallel", "parallel", "parallel", "arbitrary"),
            vmem_limit_bytes=VMEM_LIMIT),
    )(q, k, v)


# ----------------------------------------------------------------------------
# JAX glue: RoPE (diffusers apply_rotary_emb, interleaved real/imag convention)
# ----------------------------------------------------------------------------
def apply_rope(x, cos, sin):
    # x: [B, S, H, Dh], cos/sin: [S, Dh]
    # TODO(synk): RoPE + head layout transposes stay in plain JAX (layout plumbing).
    xf = x.astype(jnp.float32)
    xr = xf.reshape(*x.shape[:-1], x.shape[-1] // 2, 2)
    x_real = xr[..., 0]
    x_imag = xr[..., 1]
    x_rot = jnp.stack([-x_imag, x_real], axis=-1).reshape(x.shape)
    return xf * cos[None, :, None, :] + x_rot * sin[None, :, None, :]


# ----------------------------------------------------------------------------
# Parameter init (deterministic, synthetic; fused QKV weights)
# ----------------------------------------------------------------------------
def init_params(key, D, Dh, inner):
    def dense(k, din, dout):
        kw, kb = jax.random.split(k)
        w = 0.02 * jax.random.normal(kw, (din, dout), jnp.float32)
        b = 0.02 * jax.random.normal(kb, (dout,), jnp.float32)
        return (w, b)

    keys = jax.random.split(key, 14)
    p = {}
    p["norm1_lin"] = dense(keys[0], D, 6 * D)
    p["norm1c_lin"] = dense(keys[1], D, 6 * D)
    p["qkv"] = dense(keys[2], D, 3 * D)        # fused to_q | to_k | to_v
    p["add_qkv"] = dense(keys[3], D, 3 * D)    # fused add_q | add_k | add_v
    p["to_out"] = dense(keys[4], D, D)
    p["to_add_out"] = dense(keys[5], D, D)
    p["ff1"] = dense(keys[6], D, inner)
    p["ff2"] = dense(keys[7], inner, D)
    p["ffc1"] = dense(keys[8], D, inner)
    p["ffc2"] = dense(keys[9], inner, D)
    p["norm_q_w"] = 1.0 + 0.01 * jax.random.normal(keys[10], (Dh,), jnp.float32)
    p["norm_k_w"] = 1.0 + 0.01 * jax.random.normal(keys[11], (Dh,), jnp.float32)
    p["norm_added_q_w"] = 1.0 + 0.01 * jax.random.normal(keys[12], (Dh,), jnp.float32)
    p["norm_added_k_w"] = 1.0 + 0.01 * jax.random.normal(keys[13], (Dh,), jnp.float32)
    return p


# ----------------------------------------------------------------------------
# Forward pass of HunyuanVideoTokenReplaceTransformerBlock
# ----------------------------------------------------------------------------
def transformer_block_forward(
    params,
    hidden_states,            # [B, N_img, D]  (f32 residual stream)
    encoder_hidden_states,    # [B, N_txt, D]
    temb,                     # [B, D]
    freqs_cos, freqs_sin,     # [N_img, Dh] each
    token_replace_emb,        # [B, D]
    num_tokens,               # int: first-frame token count (static)
    num_heads, head_dim,
):
    B, N, D = hidden_states.shape
    Nt = encoder_hidden_states.shape[1]
    bf16 = jnp.bfloat16
    silu = jax.nn.silu

    def wb(name):
        w, b = params[name]
        return w.astype(bf16), b

    # ---- adaLN projections (tiny [B,D] -> [B,6D] matmuls) ----------------------
    w1, b1 = wb("norm1_lin")
    t_in = jnp.concatenate([silu(temb), silu(token_replace_emb)], axis=0).astype(bf16)
    both6 = pallas_linear(t_in, w1, b1)                      # [2B, 6D] f32
    emb6, tr6 = both6[:B], both6[B:]
    (shift_msa, scale_msa, gate_msa,
     shift_mlp, scale_mlp, gate_mlp) = jnp.split(emb6, 6, axis=1)
    (tr_shift_msa, tr_scale_msa, tr_gate_msa,
     tr_shift_mlp, tr_scale_mlp, tr_gate_mlp) = jnp.split(tr6, 6, axis=1)

    wc, bc = wb("norm1c_lin")
    c6 = pallas_linear(silu(temb).astype(bf16), wc, bc)      # [B, 6D]
    (c_shift_msa, c_scale_msa, c_gate_msa,
     c_shift_mlp, c_scale_mlp, c_gate_mlp) = jnp.split(c6, 6, axis=1)

    # ---- fused LN + token-replace modulate + QKV projection --------------------
    wqkv, bqkv = wb("qkv")
    qkv = pallas_mod_matmul(hidden_states, scale_msa, shift_msa,
                            tr_scale_msa, tr_shift_msa, wqkv, bqkv,
                            num_tokens)                       # [B, N, 3D] bf16
    waqkv, baqkv = wb("add_qkv")
    eqkv = pallas_mod_matmul(encoder_hidden_states, c_scale_msa, c_shift_msa,
                             c_scale_msa, c_shift_msa, waqkv, baqkv,
                             0)                               # [B, Nt, 3D] bf16

    q, k, v = qkv[..., :D], qkv[..., D:2 * D], qkv[..., 2 * D:]
    eq, ek, ev = eqkv[..., :D], eqkv[..., D:2 * D], eqkv[..., 2 * D:]

    def to_heads(x):          # [B, S, D] -> [B, S, H, Dh]
        return x.reshape(B, -1, num_heads, head_dim)

    q = pallas_rmsnorm(to_heads(q), params["norm_q_w"])
    k = pallas_rmsnorm(to_heads(k), params["norm_k_w"])
    v = to_heads(v)
    eq = pallas_rmsnorm(to_heads(eq), params["norm_added_q_w"])
    ek = pallas_rmsnorm(to_heads(ek), params["norm_added_k_w"])
    ev = to_heads(ev)

    # RoPE on the latent (image) stream only
    q = apply_rope(q, freqs_cos, freqs_sin)
    k = apply_rope(k, freqs_cos, freqs_sin)

    def hm(x):                # [B, S, H, Dh] -> [B, H, S, Dh]
        return x.transpose(0, 2, 1, 3)

    q_all = jnp.concatenate([hm(q), hm(eq)], axis=2).astype(bf16)
    k_all = jnp.concatenate([hm(k), hm(ek)], axis=2).astype(bf16)
    v_all = jnp.concatenate([hm(v), hm(ev)], axis=2).astype(bf16)

    attn = pallas_flash_attention(q_all, k_all, v_all)        # [B, H, N+Nt, Dh] bf16
    attn = attn.transpose(0, 2, 1, 3).reshape(B, N + Nt, D)   # [B, S, D] bf16

    # ---- fused out-projection + token-replace gated residual -------------------
    wo, bo = wb("to_out")
    hidden_states = pallas_proj_gated_residual(
        attn[:, :N], hidden_states, gate_msa, tr_gate_msa, wo, bo, num_tokens)
    wao, bao = wb("to_add_out")
    encoder_hidden_states = pallas_proj_gated_residual(
        attn[:, N:], encoder_hidden_states, c_gate_msa, c_gate_msa, wao, bao, 0)

    # ---- fused norm2 + modulate + FFN + gated residual --------------------------
    w_f1, b_f1 = wb("ff1")
    w_f2, b_f2 = wb("ff2")
    hidden_states = pallas_ffn_gated_residual(
        hidden_states, scale_mlp, shift_mlp, gate_mlp,
        tr_scale_mlp, tr_shift_mlp, tr_gate_mlp,
        w_f1, b_f1, w_f2, b_f2, num_tokens)

    w_c1, b_c1 = wb("ffc1")
    w_c2, b_c2 = wb("ffc2")
    encoder_hidden_states = pallas_ffn_gated_residual(
        encoder_hidden_states, c_scale_mlp, c_shift_mlp, c_gate_mlp,
        c_scale_mlp, c_shift_mlp, c_gate_mlp,
        w_c1, b_c1, w_c2, b_c2, 0)

    # TODO(synk): attention_mask path not exercised (None, as in typical usage).
    return hidden_states, encoder_hidden_states


# ----------------------------------------------------------------------------
# Example run
# ----------------------------------------------------------------------------
if __name__ == "__main__":
    num_attention_heads = 4
    attention_head_dim = 16
    mlp_ratio = 4.0
    D = num_attention_heads * attention_head_dim        # 64
    inner = int(D * mlp_ratio)                           # 256

    B = 2
    N_img = 32          # image/latent tokens
    num_tokens = 8      # first-frame token count (token replace region)
    N_txt = 16          # text/encoder tokens

    key = jax.random.PRNGKey(0)
    k_par, k_h, k_e, k_t, k_tr = jax.random.split(key, 5)

    params = init_params(k_par, D, attention_head_dim, inner)

    hidden_states = jax.random.normal(k_h, (B, N_img, D), jnp.float32)
    encoder_hidden_states = jax.random.normal(k_e, (B, N_txt, D), jnp.float32)
    temb = jax.random.normal(k_t, (B, D), jnp.float32)
    token_replace_emb = jax.random.normal(k_tr, (B, D), jnp.float32)

    # rotary tables for the image stream (repeat-interleaved real convention)
    half = attention_head_dim // 2
    freqs = 1.0 / (10000.0 ** (jnp.arange(half, dtype=jnp.float32) / half))
    angles = jnp.arange(N_img, dtype=jnp.float32)[:, None] * freqs[None, :]
    freqs_cos = jnp.repeat(jnp.cos(angles), 2, axis=-1)  # [N_img, Dh]
    freqs_sin = jnp.repeat(jnp.sin(angles), 2, axis=-1)  # [N_img, Dh]

    fwd = jax.jit(
        transformer_block_forward,
        static_argnames=("num_tokens", "num_heads", "head_dim"),
    )
    out_hidden, out_encoder = fwd(
        params, hidden_states, encoder_hidden_states, temb,
        freqs_cos, freqs_sin, token_replace_emb,
        num_tokens=num_tokens, num_heads=num_attention_heads,
        head_dim=attention_head_dim,
    )
    jax.block_until_ready((out_hidden, out_encoder))

    assert out_hidden.shape == (B, N_img, D)
    assert out_encoder.shape == (B, N_txt, D)
    assert bool(jnp.all(jnp.isfinite(out_hidden)))
    assert bool(jnp.all(jnp.isfinite(out_encoder)))
    print("KERNEL_OK")
</pallas_src>

<mosaic_0001>
module attributes {stable_mosaic.version = 11 : i64} {
  func.func @_linear_kernel(%arg0: i32, %arg1: i32, %arg2: memref<4x64xbf16, #tpu.memory_space<vmem>>, %arg3: memref<64x384xbf16, #tpu.memory_space<vmem>>, %arg4: memref<1x384xf32, #tpu.memory_space<vmem>>, %arg5: memref<4x384xf32, #tpu.memory_space<vmem>>) attributes {dimension_semantics = [#tpu.dimension_semantics<parallel>, #tpu.dimension_semantics<parallel>], iteration_bounds = array<i64: 1, 1>, scalar_prefetch = 0 : i64, scratch_operands = 0 : i64, tpu.core_type = #tpu.core_type<tc>, window_params = [{transform_indices = @transform_0, window_bounds = array<i64: 4, 64>}, {transform_indices = @transform_1, window_bounds = array<i64: 64, 384>}, {transform_indices = @transform_2, window_bounds = array<i64: 1, 384>}, {transform_indices = @transform_3, window_bounds = array<i64: 4, 384>}]} {
    %c0 = arith.constant 0 : index
    %c0_0 = arith.constant 0 : index
    %0 = vector.load %arg2[%c0, %c0_0] : memref<4x64xbf16, #tpu.memory_space<vmem>>, vector<4x64xbf16>
    %c0_1 = arith.constant 0 : index
    %c0_2 = arith.constant 0 : index
    %1 = vector.load %arg3[%c0_1, %c0_2] : memref<64x384xbf16, #tpu.memory_space<vmem>>, vector<64x384xbf16>
    %cst = arith.constant dense<0.000000e+00> : vector<4x384xf32>
    %2 = tpu.matmul %0, %1, %cst {dimension_numbers = #tpu.dot_dimension_numbers<[1], [0], [0], [1], [0, 0, 1, 1], [], []>} : vector<4x64xbf16>, vector<64x384xbf16>, vector<4x384xf32> -> vector<4x384xf32>
    %c0_3 = arith.constant 0 : index
    %c0_4 = arith.constant 0 : index
    %3 = vector.load %arg4[%c0_3, %c0_4] : memref<1x384xf32, #tpu.memory_space<vmem>>, vector<1x384xf32>
    %4 = vector.broadcast %3 : vector<1x384xf32> to vector<4x384xf32>
    %5 = arith.addf %2, %4 : vector<4x384xf32>
    %c0_5 = arith.constant 0 : index
    %c0_6 = arith.constant 0 : index
    %6 = vector.load %arg5[%c0_5, %c0_6] : memref<4x384xf32, #tpu.memory_space<vmem>>, vector<4x384xf32>
    tpu.vector_store %arg5[%c0_5, %c0_6], %5 {strides = array<i32>} : memref<4x384xf32, #tpu.memory_space<vmem>>, vector<4x384xf32>,
    return
  }
  func.func @transform_0(%arg0: i32, %arg1: i32) -> (i32, i32) {
    %c0_i32 = arith.constant 0 : i32
    %c0_i32_0 = arith.constant 0 : i32
    return %arg0, %c0_i32 : i32, i32
  }
  func.func @transform_1(%arg0: i32, %arg1: i32) -> (i32, i32) {
    %c0_i32 = arith.constant 0 : i32
    %c0_i32_0 = arith.constant 0 : i32
    return %c0_i32, %arg1 : i32, i32
  }
  func.func @transform_2(%arg0: i32, %arg1: i32) -> (i32, i32) {
    %c0_i32 = arith.constant 0 : i32
    %c0_i32_0 = arith.constant 0 : i32
    return %c0_i32, %arg1 : i32, i32
  }
  func.func @transform_3(%arg0: i32, %arg1: i32) -> (i32, i32) {
    %c0_i32 = arith.constant 0 : i32
    return %arg0, %arg1 : i32, i32
  }
}

module attributes {stable_mosaic.version = 11 : i64} {
  func.func @_mod_matmul_kernel(%arg0: i32, %arg1: i32, %arg2: i32, %arg3: memref<1x32x64xf32, #tpu.memory_space<vmem>>, %arg4: memref<1x1x64xf32, #tpu.memory_space<vmem>>, %arg5: memref<1x1x64xf32, #tpu.memory_space<vmem>>, %arg6: memref<1x1x64xf32, #tpu.memory_space<vmem>>, %arg7: memref<1x1x64xf32, #tpu.memory_space<vmem>>, %arg8: memref<64x192xbf16, #tpu.memory_space<vmem>>, %arg9: memref<1x192xf32, #tpu.memory_space<vmem>>, %arg10: memref<1x32x192xbf16, #tpu.memory_space<vmem>>) attributes {dimension_semantics = [#tpu.dimension_semantics<parallel>, #tpu.dimension_semantics<parallel>, #tpu.dimension_semantics<parallel>], iteration_bounds = array<i64: 2, 1, 1>, scalar_prefetch = 0 : i64, scratch_operands = 0 : i64, tpu.core_type = #tpu.core_type<tc>, window_params = [{transform_indices = @transform_0, window_bounds = array<i64: 1, 32, 64>}, {transform_indices = @transform_1, window_bounds = array<i64: 1, 1, 64>}, {transform_indices = @transform_2, window_bounds = array<i64: 1, 1, 64>}, {transform_indices = @transform_3, window_bounds = array<i64: 1, 1, 64>}, {transform_indices = @transform_4, window_bounds = array<i64: 1, 1, 64>}, {transform_indices = @transform_5, window_bounds = array<i64: 64, 192>}, {transform_indices = @transform_6, window_bounds = array<i64: 1, 192>}, {transform_indices = @transform_7, window_bounds = array<i64: 1, 32, 192>}]} {
    %c0 = arith.constant 0 : index
    %c0_0 = arith.constant 0 : index
    %c0_1 = arith.constant 0 : index
    %0 = vector.load %arg3[%c0, %c0_0, %c0_1] : memref<1x32x64xf32, #tpu.memory_space<vmem>>, vector<1x32x64xf32>
    %1 = vector.shape_cast %0 : vector<1x32x64xf32> to vector<32x64xf32>
    %cst = arith.constant dense<0.000000e+00> : vector<32xf32>
    %2 = vector.multi_reduction <add>, %1, %cst [1] : vector<32x64xf32> to vector<32xf32>
    %3 = vector.shape_cast %2 : vector<32xf32> to vector<32x1xf32>
    %cst_2 = arith.constant 6.400000e+01 : f32
    %4 = vector.broadcast %cst_2 : f32 to vector<32x1xf32>
    %5 = arith.divf %3, %4 : vector<32x1xf32>
    %6 = vector.broadcast %5 : vector<32x1xf32> to vector<32x64xf32>
    %7 = arith.subf %1, %6 : vector<32x64xf32>
    %8 = arith.mulf %7, %7 : vector<32x64xf32>
    %cst_3 = arith.constant dense<0.000000e+00> : vector<32xf32>
    %9 = vector.multi_reduction <add>, %8, %cst_3 [1] : vector<32x64xf32> to vector<32xf32>
    %10 = vector.shape_cast %9 : vector<32xf32> to vector<32x1xf32>
    %cst_4 = arith.constant 6.400000e+01 : f32
    %11 = vector.broadcast %cst_4 : f32 to vector<32x1xf32>
    %12 = arith.divf %10, %11 : vector<32x1xf32>
    %cst_5 = arith.constant 9.99999997E-7 : f32
    %13 = vector.broadcast %cst_5 : f32 to vector<32x1xf32>
    %14 = arith.addf %12, %13 : vector<32x1xf32>
    %15 = math.rsqrt %14 : vector<32x1xf32>
    %16 = vector.broadcast %15 : vector<32x1xf32> to vector<32x64xf32>
    %17 = arith.mulf %7, %16 : vector<32x64xf32>
    %c32_i32 = arith.constant 32 : i32
    %18 = arith.muli %arg1, %c32_i32 : i32
    %19 = tpu.iota {dimensions = array<i32: 0>} : vector<32x1xi32>
    %20 = vector.broadcast %18 : i32 to vector<32x1xi32>
    %21 = arith.addi %20, %19 : vector<32x1xi32>
    %c8_i32 = arith.constant 8 : i32
    %22 = vector.broadcast %c8_i32 : i32 to vector<32x1xi32>
    %23 = arith.cmpi slt, %21, %22 : vector<32x1xi32>
    %c0_6 = arith.constant 0 : index
    %c0_7 = arith.constant 0 : index
    %c0_8 = arith.constant 0 : index
    %24 = vector.load %arg6[%c0_6, %c0_7, %c0_8] : memref<1x1x64xf32, #tpu.memory_space<vmem>>, vector<1x1x64xf32>
    %25 = vector.shape_cast %24 : vector<1x1x64xf32> to vector<1x64xf32>
    %c0_9 = arith.constant 0 : index
    %c0_10 = arith.constant 0 : index
    %c0_11 = arith.constant 0 : index
    %26 = vector.load %arg4[%c0_9, %c0_10, %c0_11] : memref<1x1x64xf32, #tpu.memory_space<vmem>>, vector<1x1x64xf32>
    %27 = vector.shape_cast %26 : vector<1x1x64xf32> to vector<1x64xf32>
    %28 = vector.shape_cast %23 : vector<32x1xi1> to vector<32x1xi1>
    %29 = vector.broadcast %28 : vector<32x1xi1> to vector<32x64xi1>
    %30 = vector.shape_cast %25 : vector<1x64xf32> to vector<1x64xf32>
    %31 = vector.broadcast %30 : vector<1x64xf32> to vector<32x64xf32>
    %32 = vector.shape_cast %27 : vector<1x64xf32> to vector<1x64xf32>
    %33 = vector.broadcast %32 : vector<1x64xf32> to vector<32x64xf32>
    %34 = arith.select %29, %31, %33 : vector<32x64xi1>, vector<32x64xf32>
    %c0_12 = arith.constant 0 : index
    %c0_13 = arith.constant 0 : index
    %c0_14 = arith.constant 0 : index
    %35 = vector.load %arg7[%c0_12, %c0_13, %c0_14] : memref<1x1x64xf32, #tpu.memory_space<vmem>>, vector<1x1x64xf32>
    %36 = vector.shape_cast %35 : vector<1x1x64xf32> to vector<1x64xf32>
    %c0_15 = arith.constant 0 : index
    %c0_16 = arith.constant 0 : index
    %c0_17 = arith.constant 0 : index
    %37 = vector.load %arg5[%c0_15, %c0_16, %c0_17] : memref<1x1x64xf32, #tpu.memory_space<vmem>>, vector<1x1x64xf32>
    %38 = vector.shape_cast %37 : vector<1x1x64xf32> to vector<1x64xf32>
    %39 = vector.shape_cast %23 : vector<32x1xi1> to vector<32x1xi1>
    %40 = vector.broadcast %39 : vector<32x1xi1> to vector<32x64xi1>
    %41 = vector.shape_cast %36 : vector<1x64xf32> to vector<1x64xf32>
    %42 = vector.broadcast %41 : vector<1x64xf32> to vector<32x64xf32>
    %43 = vector.shape_cast %38 : vector<1x64xf32> to vector<1x64xf32>
    %44 = vector.broadcast %43 : vector<1x64xf32> to vector<32x64xf32>
    %45 = arith.select %40, %42, %44 : vector<32x64xi1>, vector<32x64xf32>
    %cst_18 = arith.constant 1.000000e+00 : f32
    %46 = vector.broadcast %cst_18 : f32 to vector<32x64xf32>
    %47 = arith.addf %46, %34 : vector<32x64xf32>
    %48 = arith.mulf %17, %47 : vector<32x64xf32>
    %49 = arith.addf %48, %45 : vector<32x64xf32>
    %50 = arith.truncf %49 : vector<32x64xf32> to vector<32x64xbf16>
    %c0_19 = arith.constant 0 : index
    %c0_20 = arith.constant 0 : index
    %51 = vector.load %arg8[%c0_19, %c0_20] : memref<64x192xbf16, #tpu.memory_space<vmem>>, vector<64x192xbf16>
    %cst_21 = arith.constant dense<0.000000e+00> : vector<32x192xf32>
    %52 = tpu.matmul %50, %51, %cst_21 {dimension_numbers = #tpu.dot_dimension_numbers<[1], [0], [0], [1], [0, 0, 1, 1], [], []>} : vector<32x64xbf16>, vector<64x192xbf16>, vector<32x192xf32> -> vector<32x192xf32>
    %c0_22 = arith.constant 0 : index
    %c0_23 = arith.constant 0 : index
    %53 = vector.load %arg9[%c0_22, %c0_23] : memref<1x192xf32, #tpu.memory_space<vmem>>, vector<1x192xf32>
    %54 = vector.broadcast %53 : vector<1x192xf32> to vector<32x192xf32>
    %55 = arith.addf %52, %54 : vector<32x192xf32>
    %56 = arith.truncf %55 : vector<32x192xf32> to vector<32x192xbf16>
    %c0_24 = arith.constant 0 : index
    %c0_25 = arith.constant 0 : index
    %c0_26 = arith.constant 0 : index
    %57 = vector.load %arg10[%c0_24, %c0_25, %c0_26] : memref<1x32x192xbf16, #tpu.memory_space<vmem>>, vector<1x32x192xbf16>
    %58 = vector.shape_cast %57 : vector<1x32x192xbf16> to vector<32x192xbf16>
    %59 = vector.shape_cast %56 : vector<32x192xbf16> to vector<1x32x192xbf16>
    tpu.vector_store %arg10[%c0_24, %c0_25, %c0_26], %59 {strides = array<i32>} : memref<1x32x192xbf16, #tpu.memory_space<vmem>>, vector<1x32x192xbf16>,
    return
  }
  func.func @transform_0(%arg0: i32, %arg1: i32, %arg2: i32) -> (i32, i32, i32) {
    %c0_i32 = arith.constant 0 : i32
    %c0_i32_0 = arith.constant 0 : i32
    return %arg0, %arg1, %c0_i32 : i32, i32, i32
  }
  func.func @transform_1(%arg0: i32, %arg1: i32, %arg2: i32) -> (i32, i32, i32) {
    %c0_i32 = arith.constant 0 : i32
    %c0_i32_0 = arith.constant 0 : i32
    %c0_i32_1 = arith.constant 0 : i32
    return %arg0, %c0_i32, %c0_i32_0 : i32, i32, i32
  }
  func.func @transform_2(%arg0: i32, %arg1: i32, %arg2: i32) -> (i32, i32, i32) {
    %c0_i32 = arith.constant 0 : i32
    %c0_i32_0 = arith.constant 0 : i32
    %c0_i32_1 = arith.constant 0 : i32
    return %arg0, %c0_i32, %c0_i32_0 : i32, i32, i32
  }
  func.func @transform_3(%arg0: i32, %arg1: i32, %arg2: i32) -> (i32, i32, i32) {
    %c0_i32 = arith.constant 0 : i32
    %c0_i32_0 = arith.constant 0 : i32
    %c0_i32_1 = arith.constant 0 : i32
    return %arg0, %c0_i32, %c0_i32_0 : i32, i32, i32
  }
  func.func @transform_4(%arg0: i32, %arg1: i32, %arg2: i32) -> (i32, i32, i32) {
    %c0_i32 = arith.constant 0 : i32
    %c0_i32_0 = arith.constant 0 : i32
    %c0_i32_1 = arith.constant 0 : i32
    return %arg0, %c0_i32, %c0_i32_0 : i32, i32, i32
  }
  func.func @transform_5(%arg0: i32, %arg1: i32, %arg2: i32) -> (i32, i32) {
    %c0_i32 = arith.constant 0 : i32
    %c0_i32_0 = arith.constant 0 : i32
    return %c0_i32, %arg2 : i32, i32
  }
  func.func @transform_6(%arg0: i32, %arg1: i32, %arg2: i32) -> (i32, i32) {
    %c0_i32 = arith.constant 0 : i32
    %c0_i32_0 = arith.constant 0 : i32
    return %c0_i32, %arg2 : i32, i32
  }
  func.func @transform_7(%arg0: i32, %arg1: i32, %arg2: i32) -> (i32, i32, i32) {
    %c0_i32 = arith.constant 0 : i32
    return %arg0, %arg1, %arg2 : i32, i32, i32
  }
}

module attributes {stable_mosaic.version = 11 : i64} {
  func.func @_rmsnorm_kernel(%arg0: i32, %arg1: memref<256x16xbf16, #tpu.memory_space<vmem>>, %arg2: memref<1x16xf32, #tpu.memory_space<vmem>>, %arg3: memref<256x16xbf16, #tpu.memory_space<vmem>>) attributes {dimension_semantics = [#tpu.dimension_semantics<parallel>], iteration_bounds = array<i64: 1>, scalar_prefetch = 0 : i64, scratch_operands = 0 : i64, tpu.core_type = #tpu.core_type<tc>, window_params = [{transform_indices = @transform_0, window_bounds = array<i64: 256, 16>}, {pipeline_mode = #tpu.pipeline_mode<synchronous>, transform_indices = @transform_1, window_bounds = array<i64: 1, 16>}, {transform_indices = @transform_2, window_bounds = array<i64: 256, 16>}]} {
    %c0 = arith.constant 0 : index
    %c0_0 = arith.constant 0 : index
    %0 = vector.load %arg1[%c0, %c0_0] : memref<256x16xbf16, #tpu.memory_space<vmem>>, vector<256x16xbf16>
    %1 = arith.extf %0 : vector<256x16xbf16> to vector<256x16xf32>
    %2 = arith.mulf %1, %1 : vector<256x16xf32>
    %cst = arith.constant dense<0.000000e+00> : vector<256xf32>
    %3 = vector.multi_reduction <add>, %2, %cst [1] : vector<256x16xf32> to vector<256xf32>
    %4 = vector.shape_cast %3 : vector<256xf32> to vector<256x1xf32>
    %cst_1 = arith.constant 1.600000e+01 : f32
    %5 = vector.broadcast %cst_1 : f32 to vector<256x1xf32>
    %6 = arith.divf %4, %5 : vector<256x1xf32>
    %cst_2 = arith.constant 9.99999997E-7 : f32
    %7 = vector.broadcast %cst_2 : f32 to vector<256x1xf32>
    %8 = arith.addf %6, %7 : vector<256x1xf32>
    %9 = math.rsqrt %8 : vector<256x1xf32>
    %10 = vector.broadcast %9 : vector<256x1xf32> to vector<256x16xf32>
    %11 = arith.mulf %1, %10 : vector<256x16xf32>
    %c0_3 = arith.constant 0 : index
    %c0_4 = arith.constant 0 : index
    %12 = vector.load %arg2[%c0_3, %c0_4] : memref<1x16xf32, #tpu.memory_space<vmem>>, vector<1x16xf32>
    %13 = vector.broadcast %12 : vector<1x16xf32> to vector<256x16xf32>
    %14 = arith.mulf %11, %13 : vector<256x16xf32>
    %15 = arith.truncf %14 : vector<256x16xf32> to vector<256x16xbf16>
    %c0_5 = arith.constant 0 : index
    %c0_6 = arith.constant 0 : index
    %16 = vector.load %arg3[%c0_5, %c0_6] : memref<256x16xbf16, #tpu.memory_space<vmem>>, vector<256x16xbf16>
    tpu.vector_store %arg3[%c0_5, %c0_6], %15 {strides = array<i32>} : memref<256x16xbf16, #tpu.memory_space<vmem>>, vector<256x16xbf16>,
    return
  }
  func.func @transform_0(%arg0: i32) -> (i32, i32) {
    %c0_i32 = arith.constant 0 : i32
    %c0_i32_0 = arith.constant 0 : i32
    return %arg0, %c0_i32 : i32, i32
  }
  func.func @transform_1(%arg0: i32) -> (i32, i32) {
    %c0_i32 = arith.constant 0 : i32
    %c0_i32_0 = arith.constant 0 : i32
    %c0_i32_1 = arith.constant 0 : i32
    return %c0_i32, %c0_i32_0 : i32, i32
  }
  func.func @transform_2(%arg0: i32) -> (i32, i32) {
    %c0_i32 = arith.constant 0 : i32
    %c0_i32_0 = arith.constant 0 : i32
    return %arg0, %c0_i32 : i32, i32
  }
}

module attributes {stable_mosaic.version = 11 : i64} {
  func.func @_linear_kernel(%arg0: i32, %arg1: i32, %arg2: memref<2x64xbf16, #tpu.memory_space<vmem>>, %arg3: memref<64x384xbf16, #tpu.memory_space<vmem>>, %arg4: memref<1x384xf32, #tpu.memory_space<vmem>>, %arg5: memref<2x384xf32, #tpu.memory_space<vmem>>) attributes {dimension_semantics = [#tpu.dimension_semantics<parallel>, #tpu.dimension_semantics<parallel>], iteration_bounds = array<i64: 1, 1>, scalar_prefetch = 0 : i64, scratch_operands = 0 : i64, tpu.core_type = #tpu.core_type<tc>, window_params = [{transform_indices = @transform_0, window_bounds = array<i64: 2, 64>}, {transform_indices = @transform_1, window_bounds = array<i64: 64, 384>}, {transform_indices = @transform_2, window_bounds = array<i64: 1, 384>}, {transform_indices = @transform_3, window_bounds = array<i64: 2, 384>}]} {
    %c0 = arith.constant 0 : index
    %c0_0 = arith.constant 0 : index
    %0 = vector.load %arg2[%c0, %c0_0] : memref<2x64xbf16, #tpu.memory_space<vmem>>, vector<2x64xbf16>
    %c0_1 = arith.constant 0 : index
    %c0_2 = arith.constant 0 : index
    %1 = vector.load %arg3[%c0_1, %c0_2] : memref<64x384xbf16, #tpu.memory_space<vmem>>, vector<64x384xbf16>
    %cst = arith.constant dense<0.000000e+00> : vector<2x384xf32>
    %2 = tpu.matmul %0, %1, %cst {dimension_numbers = #tpu.dot_dimension_numbers<[1], [0], [0], [1], [0, 0, 1, 1], [], []>} : vector<2x64xbf16>, vector<64x384xbf16>, vector<2x384xf32> -> vector<2x384xf32>
    %c0_3 = arith.constant 0 : index
    %c0_4 = arith.constant 0 : index
    %3 = vector.load %arg4[%c0_3, %c0_4] : memref<1x384xf32, #tpu.memory_space<vmem>>, vector<1x384xf32>
    %4 = vector.broadcast %3 : vector<1x384xf32> to vector<2x384xf32>
    %5 = arith.addf %2, %4 : vector<2x384xf32>
    %c0_5 = arith.constant 0 : index
    %c0_6 = arith.constant 0 : index
    %6 = vector.load %arg5[%c0_5, %c0_6] : memref<2x384xf32, #tpu.memory_space<vmem>>, vector<2x384xf32>
    tpu.vector_store %arg5[%c0_5, %c0_6], %5 {strides = array<i32>} : memref<2x384xf32, #tpu.memory_space<vmem>>, vector<2x384xf32>,
    return
  }
  func.func @transform_0(%arg0: i32, %arg1: i32) -> (i32, i32) {
    %c0_i32 = arith.constant 0 : i32
    %c0_i32_0 = arith.constant 0 : i32
    return %arg0, %c0_i32 : i32, i32
  }
  func.func @transform_1(%arg0: i32, %arg1: i32) -> (i32, i32) {
    %c0_i32 = arith.constant 0 : i32
    %c0_i32_0 = arith.constant 0 : i32
    return %c0_i32, %arg1 : i32, i32
  }
  func.func @transform_2(%arg0: i32, %arg1: i32) -> (i32, i32) {
    %c0_i32 = arith.constant 0 : i32
    %c0_i32_0 = arith.constant 0 : i32
    return %c0_i32, %arg1 : i32, i32
  }
  func.func @transform_3(%arg0: i32, %arg1: i32) -> (i32, i32) {
    %c0_i32 = arith.constant 0 : i32
    return %arg0, %arg1 : i32, i32
  }
}

module attributes {stable_mosaic.version = 11 : i64} {
  func.func @_mod_matmul_kernel(%arg0: i32, %arg1: i32, %arg2: i32, %arg3: memref<1x16x64xf32, #tpu.memory_space<vmem>>, %arg4: memref<1x1x64xf32, #tpu.memory_space<vmem>>, %arg5: memref<1x1x64xf32, #tpu.memory_space<vmem>>, %arg6: memref<1x1x64xf32, #tpu.memory_space<vmem>>, %arg7: memref<1x1x64xf32, #tpu.memory_space<vmem>>, %arg8: memref<64x192xbf16, #tpu.memory_space<vmem>>, %arg9: memref<1x192xf32, #tpu.memory_space<vmem>>, %arg10: memref<1x16x192xbf16, #tpu.memory_space<vmem>>) attributes {dimension_semantics = [#tpu.dimension_semantics<parallel>, #tpu.dimension_semantics<parallel>, #tpu.dimension_semantics<parallel>], iteration_bounds = array<i64: 2, 1, 1>, scalar_prefetch = 0 : i64, scratch_operands = 0 : i64, tpu.core_type = #tpu.core_type<tc>, window_params = [{transform_indices = @transform_0, window_bounds = array<i64: 1, 16, 64>}, {transform_indices = @transform_1, window_bounds = array<i64: 1, 1, 64>}, {transform_indices = @transform_2, window_bounds = array<i64: 1, 1, 64>}, {transform_indices = @transform_3, window_bounds = array<i64: 1, 1, 64>}, {transform_indices = @transform_4, window_bounds = array<i64: 1, 1, 64>}, {transform_indices = @transform_5, window_bounds = array<i64: 64, 192>}, {transform_indices = @transform_6, window_bounds = array<i64: 1, 192>}, {transform_indices = @transform_7, window_bounds = array<i64: 1, 16, 192>}]} {
    %c0 = arith.constant 0 : index
    %c0_0 = arith.constant 0 : index
    %c0_1 = arith.constant 0 : index
    %0 = vector.load %arg3[%c0, %c0_0, %c0_1] : memref<1x16x64xf32, #tpu.memory_space<vmem>>, vector<1x16x64xf32>
    %1 = vector.shape_cast %0 : vector<1x16x64xf32> to vector<16x64xf32>
    %cst = arith.constant dense<0.000000e+00> : vector<16xf32>
    %2 = vector.multi_reduction <add>, %1, %cst [1] : vector<16x64xf32> to vector<16xf32>
    %3 = vector.shape_cast %2 : vector<16xf32> to vector<16x1xf32>
    %cst_2 = arith.constant 6.400000e+01 : f32
    %4 = vector.broadcast %cst_2 : f32 to vector<16x1xf32>
    %5 = arith.divf %3, %4 : vector<16x1xf32>
    %6 = vector.broadcast %5 : vector<16x1xf32> to vector<16x64xf32>
    %7 = arith.subf %1, %6 : vector<16x64xf32>
    %8 = arith.mulf %7, %7 : vector<16x64xf32>
    %cst_3 = arith.constant dense<0.000000e+00> : vector<16xf32>
    %9 = vector.multi_reduction <add>, %8, %cst_3 [1] : vector<16x64xf32> to vector<16xf32>
    %10 = vector.shape_cast %9 : vector<16xf32> to vector<16x1xf32>
    %cst_4 = arith.constant 6.400000e+01 : f32
    %11 = vector.broadcast %cst_4 : f32 to vector<16x1xf32>
    %12 = arith.divf %10, %11 : vector<16x1xf32>
    %cst_5 = arith.constant 9.99999997E-7 : f32
    %13 = vector.broadcast %cst_5 : f32 to vector<16x1xf32>
    %14 = arith.addf %12, %13 : vector<16x1xf32>
    %15 = math.rsqrt %14 : vector<16x1xf32>
    %16 = vector.broadcast %15 : vector<16x1xf32> to vector<16x64xf32>
    %17 = arith.mulf %7, %16 : vector<16x64xf32>
    %c16_i32 = arith.constant 16 : i32
    %18 = arith.muli %arg1, %c16_i32 : i32
    %19 = tpu.iota {dimensions = array<i32: 0>} : vector<16x1xi32>
    %20 = vector.broadcast %18 : i32 to vector<16x1xi32>
    %21 = arith.addi %20, %19 : vector<16x1xi32>
    %c0_i32 = arith.constant 0 : i32
    %22 = vector.broadcast %c0_i32 : i32 to vector<16x1xi32>
    %23 = arith.cmpi slt, %21, %22 : vector<16x1xi32>
    %c0_6 = arith.constant 0 : index
    %c0_7 = arith.constant 0 : index
    %c0_8 = arith.constant 0 : index
    %24 = vector.load %arg6[%c0_6, %c0_7, %c0_8] : memref<1x1x64xf32, #tpu.memory_space<vmem>>, vector<1x1x64xf32>
    %25 = vector.shape_cast %24 : vector<1x1x64xf32> to vector<1x64xf32>
    %c0_9 = arith.constant 0 : index
    %c0_10 = arith.constant 0 : index
    %c0_11 = arith.constant 0 : index
    %26 = vector.load %arg4[%c0_9, %c0_10, %c0_11] : memref<1x1x64xf32, #tpu.memory_space<vmem>>, vector<1x1x64xf32>
    %27 = vector.shape_cast %26 : vector<1x1x64xf32> to vector<1x64xf32>
    %28 = vector.shape_cast %23 : vector<16x1xi1> to vector<16x1xi1>
    %29 = vector.broadcast %28 : vector<16x1xi1> to vector<16x64xi1>
    %30 = vector.shape_cast %25 : vector<1x64xf32> to vector<1x64xf32>
    %31 = vector.broadcast %30 : vector<1x64xf32> to vector<16x64xf32>
    %32 = vector.shape_cast %27 : vector<1x64xf32> to vector<1x64xf32>
    %33 = vector.broadcast %32 : vector<1x64xf32> to vector<16x64xf32>
    %34 = arith.select %29, %31, %33 : vector<16x64xi1>, vector<16x64xf32>
    %c0_12 = arith.constant 0 : index
    %c0_13 = arith.constant 0 : index
    %c0_14 = arith.constant 0 : index
    %35 = vector.load %arg7[%c0_12, %c0_13, %c0_14] : memref<1x1x64xf32, #tpu.memory_space<vmem>>, vector<1x1x64xf32>
    %36 = vector.shape_cast %35 : vector<1x1x64xf32> to vector<1x64xf32>
    %c0_15 = arith.constant 0 : index
    %c0_16 = arith.constant 0 : index
    %c0_17 = arith.constant 0 : index
    %37 = vector.load %arg5[%c0_15, %c0_16, %c0_17] : memref<1x1x64xf32, #tpu.memory_space<vmem>>, vector<1x1x64xf32>
    %38 = vector.shape_cast %37 : vector<1x1x64xf32> to vector<1x64xf32>
    %39 = vector.shape_cast %23 : vector<16x1xi1> to vector<16x1xi1>
    %40 = vector.broadcast %39 : vector<16x1xi1> to vector<16x64xi1>
    %41 = vector.shape_cast %36 : vector<1x64xf32> to vector<1x64xf32>
    %42 = vector.broadcast %41 : vector<1x64xf32> to vector<16x64xf32>
    %43 = vector.shape_cast %38 : vector<1x64xf32> to vector<1x64xf32>
    %44 = vector.broadcast %43 : vector<1x64xf32> to vector<16x64xf32>
    %45 = arith.select %40, %42, %44 : vector<16x64xi1>, vector<16x64xf32>
    %cst_18 = arith.constant 1.000000e+00 : f32
    %46 = vector.broadcast %cst_18 : f32 to vector<16x64xf32>
    %47 = arith.addf %46, %34 : vector<16x64xf32>
    %48 = arith.mulf %17, %47 : vector<16x64xf32>
    %49 = arith.addf %48, %45 : vector<16x64xf32>
    %50 = arith.truncf %49 : vector<16x64xf32> to vector<16x64xbf16>
    %c0_19 = arith.constant 0 : index
    %c0_20 = arith.constant 0 : index
    %51 = vector.load %arg8[%c0_19, %c0_20] : memref<64x192xbf16, #tpu.memory_space<vmem>>, vector<64x192xbf16>
    %cst_21 = arith.constant dense<0.000000e+00> : vector<16x192xf32>
    %52 = tpu.matmul %50, %51, %cst_21 {dimension_numbers = #tpu.dot_dimension_numbers<[1], [0], [0], [1], [0, 0, 1, 1], [], []>} : vector<16x64xbf16>, vector<64x192xbf16>, vector<16x192xf32> -> vector<16x192xf32>
    %c0_22 = arith.constant 0 : index
    %c0_23 = arith.constant 0 : index
    %53 = vector.load %arg9[%c0_22, %c0_23] : memref<1x192xf32, #tpu.memory_space<vmem>>, vector<1x192xf32>
    %54 = vector.broadcast %53 : vector<1x192xf32> to vector<16x192xf32>
    %55 = arith.addf %52, %54 : vector<16x192xf32>
    %56 = arith.truncf %55 : vector<16x192xf32> to vector<16x192xbf16>
    %c0_24 = arith.constant 0 : index
    %c0_25 = arith.constant 0 : index
    %c0_26 = arith.constant 0 : index
    %57 = vector.load %arg10[%c0_24, %c0_25, %c0_26] : memref<1x16x192xbf16, #tpu.memory_space<vmem>>, vector<1x16x192xbf16>
    %58 = vector.shape_cast %57 : vector<1x16x192xbf16> to vector<16x192xbf16>
    %59 = vector.shape_cast %56 : vector<16x192xbf16> to vector<1x16x192xbf16>
    tpu.vector_store %arg10[%c0_24, %c0_25, %c0_26], %59 {strides = array<i32>} : memref<1x16x192xbf16, #tpu.memory_space<vmem>>, vector<1x16x192xbf16>,
    return
  }
  func.func @transform_0(%arg0: i32, %arg1: i32, %arg2: i32) -> (i32, i32, i32) {
    %c0_i32 = arith.constant 0 : i32
    %c0_i32_0 = arith.constant 0 : i32
    return %arg0, %arg1, %c0_i32 : i32, i32, i32
  }
  func.func @transform_1(%arg0: i32, %arg1: i32, %arg2: i32) -> (i32, i32, i32) {
    %c0_i32 = arith.constant 0 : i32
    %c0_i32_0 = arith.constant 0 : i32
    %c0_i32_1 = arith.constant 0 : i32
    return %arg0, %c0_i32, %c0_i32_0 : i32, i32, i32
  }
  func.func @transform_2(%arg0: i32, %arg1: i32, %arg2: i32) -> (i32, i32, i32) {
    %c0_i32 = arith.constant 0 : i32
    %c0_i32_0 = arith.constant 0 : i32
    %c0_i32_1 = arith.constant 0 : i32
    return %arg0, %c0_i32, %c0_i32_0 : i32, i32, i32
  }
  func.func @transform_3(%arg0: i32, %arg1: i32, %arg2: i32) -> (i32, i32, i32) {
    %c0_i32 = arith.constant 0 : i32
    %c0_i32_0 = arith.constant 0 : i32
    %c0_i32_1 = arith.constant 0 : i32
    return %arg0, %c0_i32, %c0_i32_0 : i32, i32, i32
  }
  func.func @transform_4(%arg0: i32, %arg1: i32, %arg2: i32) -> (i32, i32, i32) {
    %c0_i32 = arith.constant 0 : i32
    %c0_i32_0 = arith.constant 0 : i32
    %c0_i32_1 = arith.constant 0 : i32
    return %arg0, %c0_i32, %c0_i32_0 : i32, i32, i32
  }
  func.func @transform_5(%arg0: i32, %arg1: i32, %arg2: i32) -> (i32, i32) {
    %c0_i32 = arith.constant 0 : i32
    %c0_i32_0 = arith.constant 0 : i32
    return %c0_i32, %arg2 : i32, i32
  }
  func.func @transform_6(%arg0: i32, %arg1: i32, %arg2: i32) -> (i32, i32) {
    %c0_i32 = arith.constant 0 : i32
    %c0_i32_0 = arith.constant 0 : i32
    return %c0_i32, %arg2 : i32, i32
  }
  func.func @transform_7(%arg0: i32, %arg1: i32, %arg2: i32) -> (i32, i32, i32) {
    %c0_i32 = arith.constant 0 : i32
    return %arg0, %arg1, %arg2 : i32, i32, i32
  }
}

module attributes {stable_mosaic.version = 11 : i64} {
  func.func @_rmsnorm_kernel(%arg0: i32, %arg1: memref<128x16xbf16, #tpu.memory_space<vmem>>, %arg2: memref<1x16xf32, #tpu.memory_space<vmem>>, %arg3: memref<128x16xbf16, #tpu.memory_space<vmem>>) attributes {dimension_semantics = [#tpu.dimension_semantics<parallel>], iteration_bounds = array<i64: 1>, scalar_prefetch = 0 : i64, scratch_operands = 0 : i64, tpu.core_type = #tpu.core_type<tc>, window_params = [{transform_indices = @transform_0, window_bounds = array<i64: 128, 16>}, {pipeline_mode = #tpu.pipeline_mode<synchronous>, transform_indices = @transform_1, window_bounds = array<i64: 1, 16>}, {transform_indices = @transform_2, window_bounds = array<i64: 128, 16>}]} {
    %c0 = arith.constant 0 : index
    %c0_0 = arith.constant 0 : index
    %0 = vector.load %arg1[%c0, %c0_0] : memref<128x16xbf16, #tpu.memory_space<vmem>>, vector<128x16xbf16>
    %1 = arith.extf %0 : vector<128x16xbf16> to vector<128x16xf32>
    %2 = arith.mulf %1, %1 : vector<128x16xf32>
    %cst = arith.constant dense<0.000000e+00> : vector<128xf32>
    %3 = vector.multi_reduction <add>, %2, %cst [1] : vector<128x16xf32> to vector<128xf32>
    %4 = vector.shape_cast %3 : vector<128xf32> to vector<128x1xf32>
    %cst_1 = arith.constant 1.600000e+01 : f32
    %5 = vector.broadcast %cst_1 : f32 to vector<128x1xf32>
    %6 = arith.divf %4, %5 : vector<128x1xf32>
    %cst_2 = arith.constant 9.99999997E-7 : f32
    %7 = vector.broadcast %cst_2 : f32 to vector<128x1xf32>
    %8 = arith.addf %6, %7 : vector<128x1xf32>
    %9 = math.rsqrt %8 : vector<128x1xf32>
    %10 = vector.broadcast %9 : vector<128x1xf32> to vector<128x16xf32>
    %11 = arith.mulf %1, %10 : vector<128x16xf32>
    %c0_3 = arith.constant 0 : index
    %c0_4 = arith.constant 0 : index
    %12 = vector.load %arg2[%c0_3, %c0_4] : memref<1x16xf32, #tpu.memory_space<vmem>>, vector<1x16xf32>
    %13 = vector.broadcast %12 : vector<1x16xf32> to vector<128x16xf32>
    %14 = arith.mulf %11, %13 : vector<128x16xf32>
    %15 = arith.truncf %14 : vector<128x16xf32> to vector<128x16xbf16>
    %c0_5 = arith.constant 0 : index
    %c0_6 = arith.constant 0 : index
    %16 = vector.load %arg3[%c0_5, %c0_6] : memref<128x16xbf16, #tpu.memory_space<vmem>>, vector<128x16xbf16>
    tpu.vector_store %arg3[%c0_5, %c0_6], %15 {strides = array<i32>} : memref<128x16xbf16, #tpu.memory_space<vmem>>, vector<128x16xbf16>,
    return
  }
  func.func @transform_0(%arg0: i32) -> (i32, i32) {
    %c0_i32 = arith.constant 0 : i32
    %c0_i32_0 = arith.constant 0 : i32
    return %arg0, %c0_i32 : i32, i32
  }
  func.func @transform_1(%arg0: i32) -> (i32, i32) {
    %c0_i32 = arith.constant 0 : i32
    %c0_i32_0 = arith.constant 0 : i32
    %c0_i32_1 = arith.constant 0 : i32
    return %c0_i32, %c0_i32_0 : i32, i32
  }
  func.func @transform_2(%arg0: i32) -> (i32, i32) {
    %c0_i32 = arith.constant 0 : i32
    %c0_i32_0 = arith.constant 0 : i32
    return %arg0, %c0_i32 : i32, i32
  }
}

module attributes {stable_mosaic.version = 11 : i64} {
  func.func @_flash_attn_kernel(%arg0: i32, %arg1: i32, %arg2: i32, %arg3: i32, %arg4: memref<1x1x48x16xbf16, #tpu.memory_space<vmem>>, %arg5: memref<1x1x48x16xbf16, #tpu.memory_space<vmem>>, %arg6: memref<1x1x48x16xbf16, #tpu.memory_space<vmem>>, %arg7: memref<1x1x48x16xbf16, #tpu.memory_space<vmem>>, %arg8: memref<48x1xf32, #tpu.memory_space<vmem>>, %arg9: memref<48x1xf32, #tpu.memory_space<vmem>>, %arg10: memref<48x16xf32, #tpu.memory_space<vmem>>) attributes {dimension_semantics = [#tpu.dimension_semantics<parallel>, #tpu.dimension_semantics<parallel>, #tpu.dimension_semantics<parallel>, #tpu.dimension_semantics<arbitrary>], iteration_bounds = array<i64: 2, 4, 1, 1>, scalar_prefetch = 0 : i64, scratch_operands = 3 : i64, tpu.core_type = #tpu.core_type<tc>, window_params = [{transform_indices = @transform_0, window_bounds = array<i64: 1, 1, 48, 16>}, {transform_indices = @transform_1, window_bounds = array<i64: 1, 1, 48, 16>}, {transform_indices = @transform_2, window_bounds = array<i64: 1, 1, 48, 16>}, {transform_indices = @transform_3, window_bounds = array<i64: 1, 1, 48, 16>}]} {
    %c0_i32 = arith.constant 0 : i32
    %0 = arith.cmpi eq, %arg3, %c0_i32 : i32
    %1 = arith.extui %0 : i1 to i32
    %c0_i32_0 = arith.constant 0 : i32
    %2 = arith.cmpi ne, %1, %c0_i32_0 : i32
    scf.if %2 {
      %cst_30 = arith.constant 0xFF800000 : f32
      %40 = vector.broadcast %cst_30 : f32 to vector<48x1xf32>
      %c0_31 = arith.constant 0 : index
      %c0_32 = arith.constant 0 : index
      %41 = vector.load %arg8[%c0_31, %c0_32] : memref<48x1xf32, #tpu.memory_space<vmem>>, vector<48x1xf32>
      tpu.vector_store %arg8[%c0_31, %c0_32], %40 {strides = array<i32>} : memref<48x1xf32, #tpu.memory_space<vmem>>, vector<48x1xf32>,
      %cst_33 = arith.constant 0.000000e+00 : f32
      %42 = vector.broadcast %cst_33 : f32 to vector<48x1xf32>
      %c0_34 = arith.constant 0 : index
      %c0_35 = arith.constant 0 : index
      %43 = vector.load %arg9[%c0_34, %c0_35] : memref<48x1xf32, #tpu.memory_space<vmem>>, vector<48x1xf32>
      tpu.vector_store %arg9[%c0_34, %c0_35], %42 {strides = array<i32>} : memref<48x1xf32, #tpu.memory_space<vmem>>, vector<48x1xf32>,
      %cst_36 = arith.constant 0.000000e+00 : f32
      %44 = vector.broadcast %cst_36 : f32 to vector<48x16xf32>
      %c0_37 = arith.constant 0 : index
      %c0_38 = arith.constant 0 : index
      %45 = vector.load %arg10[%c0_37, %c0_38] : memref<48x16xf32, #tpu.memory_space<vmem>>, vector<48x16xf32>
      tpu.vector_store %arg10[%c0_37, %c0_38], %44 {strides = array<i32>} : memref<48x16xf32, #tpu.memory_space<vmem>>, vector<48x16xf32>,
    } else {
    }
    %c0 = arith.constant 0 : index
    %c0_1 = arith.constant 0 : index
    %c0_2 = arith.constant 0 : index
    %c0_3 = arith.constant 0 : index
    %3 = vector.load %arg4[%c0, %c0_1, %c0_2, %c0_3] : memref<1x1x48x16xbf16, #tpu.memory_space<vmem>>, vector<1x1x48x16xbf16>
    %4 = vector.shape_cast %3 : vector<1x1x48x16xbf16> to vector<48x16xbf16>
    %5 = arith.extf %4 : vector<48x16xbf16> to vector<48x16xf32>
    %cst = arith.constant 2.500000e-01 : f32
    %6 = vector.broadcast %cst : f32 to vector<48x16xf32>
    %7 = arith.mulf %5, %6 : vector<48x16xf32>
    %8 = arith.truncf %7 : vector<48x16xf32> to vector<48x16xbf16>
    %c0_4 = arith.constant 0 : index
    %c0_5 = arith.constant 0 : index
    %c0_6 = arith.constant 0 : index
    %c0_7 = arith.constant 0 : index
    %9 = vector.load %arg5[%c0_4, %c0_5, %c0_6, %c0_7] : memref<1x1x48x16xbf16, #tpu.memory_space<vmem>>, vector<1x1x48x16xbf16>
    %10 = vector.shape_cast %9 : vector<1x1x48x16xbf16> to vector<48x16xbf16>
    %c0_8 = arith.constant 0 : index
    %c0_9 = arith.constant 0 : index
    %c0_10 = arith.constant 0 : index
    %c0_11 = arith.constant 0 : index
    %11 = vector.load %arg6[%c0_8, %c0_9, %c0_10, %c0_11] : memref<1x1x48x16xbf16, #tpu.memory_space<vmem>>, vector<1x1x48x16xbf16>
    %12 = vector.shape_cast %11 : vector<1x1x48x16xbf16> to vector<48x16xbf16>
    %cst_12 = arith.constant dense<0.000000e+00> : vector<48x48xf32>
    %13 = tpu.matmul %8, %10, %cst_12 {dimension_numbers = #tpu.dot_dimension_numbers<[1], [1], [0], [0], [0, 0, 1, 0], [], []>} : vector<48x16xbf16>, vector<48x16xbf16>, vector<48x48xf32> -> vector<48x48xf32>
    %c0_13 = arith.constant 0 : index
    %c0_14 = arith.constant 0 : index
    %14 = vector.load %arg8[%c0_13, %c0_14] : memref<48x1xf32, #tpu.memory_space<vmem>>, vector<48x1xf32>
    %cst_15 = arith.constant dense<0xFF800000> : vector<48xf32>
    %15 = vector.multi_reduction <maximumf>, %13, %cst_15 [1] : vector<48x48xf32> to vector<48xf32>
    %16 = vector.shape_cast %15 : vector<48xf32> to vector<48x1xf32>
    %17 = arith.maximumf %14, %16 : vector<48x1xf32>
    %18 = arith.subf %14, %17 : vector<48x1xf32>
    %19 = math.exp %18 : vector<48x1xf32>
    %20 = vector.broadcast %17 : vector<48x1xf32> to vector<48x48xf32>
    %21 = arith.subf %13, %20 : vector<48x48xf32>
    %22 = math.exp %21 : vector<48x48xf32>
    %c0_16 = arith.constant 0 : index
    %c0_17 = arith.constant 0 : index
    %23 = vector.load %arg9[%c0_16, %c0_17] : memref<48x1xf32, #tpu.memory_space<vmem>>, vector<48x1xf32>
    %24 = arith.mulf %19, %23 : vector<48x1xf32>
    %cst_18 = arith.constant dense<0.000000e+00> : vector<48xf32>
    %25 = vector.multi_reduction <add>, %22, %cst_18 [1] : vector<48x48xf32> to vector<48xf32>
    %26 = vector.shape_cast %25 : vector<48xf32> to vector<48x1xf32>
    %27 = arith.addf %24, %26 : vector<48x1xf32>
    %c0_19 = arith.constant 0 : index
    %c0_20 = arith.constant 0 : index
    %28 = vector.load %arg9[%c0_19, %c0_20] : memref<48x1xf32, #tpu.memory_space<vmem>>, vector<48x1xf32>
    tpu.vector_store %arg9[%c0_19, %c0_20], %27 {strides = array<i32>} : memref<48x1xf32, #tpu.memory_space<vmem>>, vector<48x1xf32>,
    %c0_21 = arith.constant 0 : index
    %c0_22 = arith.constant 0 : index
    %29 = vector.load %arg10[%c0_21, %c0_22] : memref<48x16xf32, #tpu.memory_space<vmem>>, vector<48x16xf32>
    %30 = vector.broadcast %19 : vector<48x1xf32> to vector<48x16xf32>
    %31 = arith.mulf %30, %29 : vector<48x16xf32>
    %32 = arith.truncf %22 : vector<48x48xf32> to vector<48x48xbf16>
    %cst_23 = arith.constant dense<0.000000e+00> : vector<48x16xf32>
    %33 = tpu.matmul %32, %12, %cst_23 {dimension_numbers = #tpu.dot_dimension_numbers<[1], [0], [0], [1], [0, 0, 1, 1], [], []>} : vector<48x48xbf16>, vector<48x16xbf16>, vector<48x16xf32> -> vector<48x16xf32>
    %34 = arith.addf %31, %33 : vector<48x16xf32>
    %c0_24 = arith.constant 0 : index
    %c0_25 = arith.constant 0 : index
    %35 = vector.load %arg10[%c0_24, %c0_25] : memref<48x16xf32, #tpu.memory_space<vmem>>, vector<48x16xf32>
    tpu.vector_store %arg10[%c0_24, %c0_25], %34 {strides = array<i32>} : memref<48x16xf32, #tpu.memory_space<vmem>>, vector<48x16xf32>,
    %c0_26 = arith.constant 0 : index
    %c0_27 = arith.constant 0 : index
    %36 = vector.load %arg8[%c0_26, %c0_27] : memref<48x1xf32, #tpu.memory_space<vmem>>, vector<48x1xf32>
    tpu.vector_store %arg8[%c0_26, %c0_27], %17 {strides = array<i32>} : memref<48x1xf32, #tpu.memory_space<vmem>>, vector<48x1xf32>,
    %c0_i32_28 = arith.constant 0 : i32
    %37 = arith.cmpi eq, %arg3, %c0_i32_28 : i32
    %38 = arith.extui %37 : i1 to i32
    %c0_i32_29 = arith.constant 0 : i32
    %39 = arith.cmpi ne, %38, %c0_i32_29 : i32
    scf.if %39 {
      %c0_30 = arith.constant 0 : index
      %c0_31 = arith.constant 0 : index
      %40 = vector.load %arg10[%c0_30, %c0_31] : memref<48x16xf32, #tpu.memory_space<vmem>>, vector<48x16xf32>
      %c0_32 = arith.constant 0 : index
      %c0_33 = arith.constant 0 : index
      %41 = vector.load %arg9[%c0_32, %c0_33] : memref<48x1xf32, #tpu.memory_space<vmem>>, vector<48x1xf32>
      %42 = tpu.reciprocal %41 {approx = true} : vector<48x1xf32> -> vector<48x1xf32>
      %43 = vector.broadcast %42 : vector<48x1xf32> to vector<48x16xf32>
      %44 = arith.mulf %40, %43 : vector<48x16xf32>
      %45 = arith.truncf %44 : vector<48x16xf32> to vector<48x16xbf16>
      %c0_34 = arith.constant 0 : index
      %c0_35 = arith.constant 0 : index
      %c0_36 = arith.constant 0 : index
      %c0_37 = arith.constant 0 : index
      %46 = vector.load %arg7[%c0_34, %c0_35, %c0_36, %c0_37] : memref<1x1x48x16xbf16, #tpu.memory_space<vmem>>, vector<1x1x48x16xbf16>
      %47 = vector.shape_cast %46 : vector<1x1x48x16xbf16> to vector<48x16xbf16>
      %48 = vector.shape_cast %45 : vector<48x16xbf16> to vector<1x1x48x16xbf16>
      tpu.vector_store %arg7[%c0_34, %c0_35, %c0_36, %c0_37], %48 {strides = array<i32>} : memref<1x1x48x16xbf16, #tpu.memory_space<vmem>>, vector<1x1x48x16xbf16>,
    } else {
    }
    return
  }
  func.func @transform_0(%arg0: i32, %arg1: i32, %arg2: i32, %arg3: i32) -> (i32, i32, i32, i32) {
    %c0_i32 = arith.constant 0 : i32
    %c0_i32_0 = arith.constant 0 : i32
    return %arg0, %arg1, %arg2, %c0_i32 : i32, i32, i32, i32
  }
  func.func @transform_1(%arg0: i32, %arg1: i32, %arg2: i32, %arg3: i32) -> (i32, i32, i32, i32) {
    %c0_i32 = arith.constant 0 : i32
    %c0_i32_0 = arith.constant 0 : i32
    return %arg0, %arg1, %arg3, %c0_i32 : i32, i32, i32, i32
  }
  func.func @transform_2(%arg0: i32, %arg1: i32, %arg2: i32, %arg3: i32) -> (i32, i32, i32, i32) {
    %c0_i32 = arith.constant 0 : i32
    %c0_i32_0 = arith.constant 0 : i32
    return %arg0, %arg1, %arg3, %c0_i32 : i32, i32, i32, i32
  }
  func.func @transform_3(%arg0: i32, %arg1: i32, %arg2: i32, %arg3: i32) -> (i32, i32, i32, i32) {
    %c0_i32 = arith.constant 0 : i32
    %c0_i32_0 = arith.constant 0 : i32
    return %arg0, %arg1, %arg2, %c0_i32 : i32, i32, i32, i32
  }
}

module attributes {stable_mosaic.version = 11 : i64} {
  func.func @_proj_residual_kernel(%arg0: i32, %arg1: i32, %arg2: i32, %arg3: memref<1x16x64xbf16, #tpu.memory_space<vmem>>, %arg4: memref<1x16x64xf32, #tpu.memory_space<vmem>>, %arg5: memref<1x1x64xf32, #tpu.memory_space<vmem>>, %arg6: memref<1x1x64xf32, #tpu.memory_space<vmem>>, %arg7: memref<64x64xbf16, #tpu.memory_space<vmem>>, %arg8: memref<1x64xf32, #tpu.memory_space<vmem>>, %arg9: memref<1x16x64xf32, #tpu.memory_space<vmem>>) attributes {dimension_semantics = [#tpu.dimension_semantics<parallel>, #tpu.dimension_semantics<parallel>, #tpu.dimension_semantics<parallel>], iteration_bounds = array<i64: 2, 1, 1>, scalar_prefetch = 0 : i64, scratch_operands = 0 : i64, tpu.core_type = #tpu.core_type<tc>, window_params = [{transform_indices = @transform_0, window_bounds = array<i64: 1, 16, 64>}, {transform_indices = @transform_1, window_bounds = array<i64: 1, 16, 64>}, {transform_indices = @transform_2, window_bounds = array<i64: 1, 1, 64>}, {transform_indices = @transform_3, window_bounds = array<i64: 1, 1, 64>}, {transform_indices = @transform_4, window_bounds = array<i64: 64, 64>}, {transform_indices = @transform_5, window_bounds = array<i64: 1, 64>}, {transform_indices = @transform_6, window_bounds = array<i64: 1, 16, 64>}]} {
    %c0 = arith.constant 0 : index
    %c0_0 = arith.constant 0 : index
    %c0_1 = arith.constant 0 : index
    %0 = vector.load %arg3[%c0, %c0_0, %c0_1] : memref<1x16x64xbf16, #tpu.memory_space<vmem>>, vector<1x16x64xbf16>
    %1 = vector.shape_cast %0 : vector<1x16x64xbf16> to vector<16x64xbf16>
    %c0_2 = arith.constant 0 : index
    %c0_3 = arith.constant 0 : index
    %2 = vector.load %arg7[%c0_2, %c0_3] : memref<64x64xbf16, #tpu.memory_space<vmem>>, vector<64x64xbf16>
    %cst = arith.constant dense<0.000000e+00> : vector<16x64xf32>
    %3 = tpu.matmul %1, %2, %cst {dimension_numbers = #tpu.dot_dimension_numbers<[1], [0], [0], [1], [0, 0, 1, 1], [], []>} : vector<16x64xbf16>, vector<64x64xbf16>, vector<16x64xf32> -> vector<16x64xf32>
    %c0_4 = arith.constant 0 : index
    %c0_5 = arith.constant 0 : index
    %4 = vector.load %arg8[%c0_4, %c0_5] : memref<1x64xf32, #tpu.memory_space<vmem>>, vector<1x64xf32>
    %5 = vector.broadcast %4 : vector<1x64xf32> to vector<16x64xf32>
    %6 = arith.addf %3, %5 : vector<16x64xf32>
    %c16_i32 = arith.constant 16 : i32
    %7 = arith.muli %arg1, %c16_i32 : i32
    %8 = tpu.iota {dimensions = array<i32: 0>} : vector<16x1xi32>
    %9 = vector.broadcast %7 : i32 to vector<16x1xi32>
    %10 = arith.addi %9, %8 : vector<16x1xi32>
    %c0_i32 = arith.constant 0 : i32
    %11 = vector.broadcast %c0_i32 : i32 to vector<16x1xi32>
    %12 = arith.cmpi slt, %10, %11 : vector<16x1xi32>
    %c0_6 = arith.constant 0 : index
    %c0_7 = arith.constant 0 : index
    %c0_8 = arith.constant 0 : index
    %13 = vector.load %arg6[%c0_6, %c0_7, %c0_8] : memref<1x1x64xf32, #tpu.memory_space<vmem>>, vector<1x1x64xf32>
    %14 = vector.shape_cast %13 : vector<1x1x64xf32> to vector<1x64xf32>
    %c0_9 = arith.constant 0 : index
    %c0_10 = arith.constant 0 : index
    %c0_11 = arith.constant 0 : index
    %15 = vector.load %arg5[%c0_9, %c0_10, %c0_11] : memref<1x1x64xf32, #tpu.memory_space<vmem>>, vector<1x1x64xf32>
    %16 = vector.shape_cast %15 : vector<1x1x64xf32> to vector<1x64xf32>
    %17 = vector.shape_cast %12 : vector<16x1xi1> to vector<16x1xi1>
    %18 = vector.broadcast %17 : vector<16x1xi1> to vector<16x64xi1>
    %19 = vector.shape_cast %14 : vector<1x64xf32> to vector<1x64xf32>
    %20 = vector.broadcast %19 : vector<1x64xf32> to vector<16x64xf32>
    %21 = vector.shape_cast %16 : vector<1x64xf32> to vector<1x64xf32>
    %22 = vector.broadcast %21 : vector<1x64xf32> to vector<16x64xf32>
    %23 = arith.select %18, %20, %22 : vector<16x64xi1>, vector<16x64xf32>
    %c0_12 = arith.constant 0 : index
    %c0_13 = arith.constant 0 : index
    %c0_14 = arith.constant 0 : index
    %24 = vector.load %arg4[%c0_12, %c0_13, %c0_14] : memref<1x16x64xf32, #tpu.memory_space<vmem>>, vector<1x16x64xf32>
    %25 = vector.shape_cast %24 : vector<1x16x64xf32> to vector<16x64xf32>
    %26 = arith.mulf %23, %6 : vector<16x64xf32>
    %27 = arith.addf %25, %26 : vector<16x64xf32>
    %c0_15 = arith.constant 0 : index
    %c0_16 = arith.constant 0 : index
    %c0_17 = arith.constant 0 : index
    %28 = vector.load %arg9[%c0_15, %c0_16, %c0_17] : memref<1x16x64xf32, #tpu.memory_space<vmem>>, vector<1x16x64xf32>
    %29 = vector.shape_cast %28 : vector<1x16x64xf32> to vector<16x64xf32>
    %30 = vector.shape_cast %27 : vector<16x64xf32> to vector<1x16x64xf32>
    tpu.vector_store %arg9[%c0_15, %c0_16, %c0_17], %30 {strides = array<i32>} : memref<1x16x64xf32, #tpu.memory_space<vmem>>, vector<1x16x64xf32>,
    return
  }
  func.func @transform_0(%arg0: i32, %arg1: i32, %arg2: i32) -> (i32, i32, i32) {
    %c0_i32 = arith.constant 0 : i32
    %c0_i32_0 = arith.constant 0 : i32
    return %arg0, %arg1, %c0_i32 : i32, i32, i32
  }
  func.func @transform_1(%arg0: i32, %arg1: i32, %arg2: i32) -> (i32, i32, i32) {
    %c0_i32 = arith.constant 0 : i32
    return %arg0, %arg1, %arg2 : i32, i32, i32
  }
  func.func @transform_2(%arg0: i32, %arg1: i32, %arg2: i32) -> (i32, i32, i32) {
    %c0_i32 = arith.constant 0 : i32
    %c0_i32_0 = arith.constant 0 : i32
    return %arg0, %c0_i32, %arg2 : i32, i32, i32
  }
  func.func @transform_3(%arg0: i32, %arg1: i32, %arg2: i32) -> (i32, i32, i32) {
    %c0_i32 = arith.constant 0 : i32
    %c0_i32_0 = arith.constant 0 : i32
    return %arg0, %c0_i32, %arg2 : i32, i32, i32
  }
  func.func @transform_4(%arg0: i32, %arg1: i32, %arg2: i32) -> (i32, i32) {
    %c0_i32 = arith.constant 0 : i32
    %c0_i32_0 = arith.constant 0 : i32
    return %c0_i32, %arg2 : i32, i32
  }
  func.func @transform_5(%arg0: i32, %arg1: i32, %arg2: i32) -> (i32, i32) {
    %c0_i32 = arith.constant 0 : i32
    %c0_i32_0 = arith.constant 0 : i32
    return %c0_i32, %arg2 : i32, i32
  }
  func.func @transform_6(%arg0: i32, %arg1: i32, %arg2: i32) -> (i32, i32, i32) {
    %c0_i32 = arith.constant 0 : i32
    return %arg0, %arg1, %arg2 : i32, i32, i32
  }
}

module attributes {stable_mosaic.version = 11 : i64} {
  func.func @_ffn_fused_kernel(%arg0: i32, %arg1: i32, %arg2: i32, %arg3: memref<1x16x64xf32, #tpu.memory_space<vmem>>, %arg4: memref<1x1x64xf32, #tpu.memory_space<vmem>>, %arg5: memref<1x1x64xf32, #tpu.memory_space<vmem>>, %arg6: memref<1x1x64xf32, #tpu.memory_space<vmem>>, %arg7: memref<1x1x64xf32, #tpu.memory_space<vmem>>, %arg8: memref<1x1x64xf32, #tpu.memory_space<vmem>>, %arg9: memref<1x1x64xf32, #tpu.memory_space<vmem>>, %arg10: memref<64x256xbf16, #tpu.memory_space<vmem>>, %arg11: memref<1x256xf32, #tpu.memory_space<vmem>>, %arg12: memref<256x64xbf16, #tpu.memory_space<vmem>>, %arg13: memref<1x64xf32, #tpu.memory_space<vmem>>, %arg14: memref<1x16x64xf32, #tpu.memory_space<vmem>>, %arg15: memref<16x64xf32, #tpu.memory_space<vmem>>) attributes {dimension_semantics = [#tpu.dimension_semantics<parallel>, #tpu.dimension_semantics<parallel>, #tpu.dimension_semantics<arbitrary>], iteration_bounds = array<i64: 2, 1, 1>, scalar_prefetch = 0 : i64, scratch_operands = 1 : i64, tpu.core_type = #tpu.core_type<tc>, window_params = [{transform_indices = @transform_0, window_bounds = array<i64: 1, 16, 64>}, {transform_indices = @transform_1, window_bounds = array<i64: 1, 1, 64>}, {transform_indices = @transform_2, window_bounds = array<i64: 1, 1, 64>}, {transform_indices = @transform_3, window_bounds = array<i64: 1, 1, 64>}, {transform_indices = @transform_4, window_bounds = array<i64: 1, 1, 64>}, {transform_indices = @transform_5, window_bounds = array<i64: 1, 1, 64>}, {transform_indices = @transform_6, window_bounds = array<i64: 1, 1, 64>}, {transform_indices = @transform_7, window_bounds = array<i64: 64, 256>}, {transform_indices = @transform_8, window_bounds = array<i64: 1, 256>}, {transform_indices = @transform_9, window_bounds = array<i64: 256, 64>}, {pipeline_mode = #tpu.pipeline_mode<synchronous>, transform_indices = @transform_10, window_bounds = array<i64: 1, 64>}, {transform_indices = @transform_11, window_bounds = array<i64: 1, 16, 64>}]} {
    %c0_i32 = arith.constant 0 : i32
    %0 = arith.cmpi eq, %arg2, %c0_i32 : i32
    %1 = arith.extui %0 : i1 to i32
    %c0_i32_0 = arith.constant 0 : i32
    %2 = arith.cmpi ne, %1, %c0_i32_0 : i32
    scf.if %2 {
      %cst_39 = arith.constant 0.000000e+00 : f32
      %81 = vector.broadcast %cst_39 : f32 to vector<16x64xf32>
      %c0_40 = arith.constant 0 : index
      %c0_41 = arith.constant 0 : index
      %82 = vector.load %arg15[%c0_40, %c0_41] : memref<16x64xf32, #tpu.memory_space<vmem>>, vector<16x64xf32>
      tpu.vector_store %arg15[%c0_40, %c0_41], %81 {strides = array<i32>} : memref<16x64xf32, #tpu.memory_space<vmem>>, vector<16x64xf32>,
    } else {
    }
    %c0 = arith.constant 0 : index
    %c0_1 = arith.constant 0 : index
    %c0_2 = arith.constant 0 : index
    %3 = vector.load %arg3[%c0, %c0_1, %c0_2] : memref<1x16x64xf32, #tpu.memory_space<vmem>>, vector<1x16x64xf32>
    %4 = vector.shape_cast %3 : vector<1x16x64xf32> to vector<16x64xf32>
    %cst = arith.constant dense<0.000000e+00> : vector<16xf32>
    %5 = vector.multi_reduction <add>, %4, %cst [1] : vector<16x64xf32> to vector<16xf32>
    %6 = vector.shape_cast %5 : vector<16xf32> to vector<16x1xf32>
    %cst_3 = arith.constant 6.400000e+01 : f32
    %7 = vector.broadcast %cst_3 : f32 to vector<16x1xf32>
    %8 = arith.divf %6, %7 : vector<16x1xf32>
    %9 = vector.broadcast %8 : vector<16x1xf32> to vector<16x64xf32>
    %10 = arith.subf %4, %9 : vector<16x64xf32>
    %11 = arith.mulf %10, %10 : vector<16x64xf32>
    %cst_4 = arith.constant dense<0.000000e+00> : vector<16xf32>
    %12 = vector.multi_reduction <add>, %11, %cst_4 [1] : vector<16x64xf32> to vector<16xf32>
    %13 = vector.shape_cast %12 : vector<16xf32> to vector<16x1xf32>
    %cst_5 = arith.constant 6.400000e+01 : f32
    %14 = vector.broadcast %cst_5 : f32 to vector<16x1xf32>
    %15 = arith.divf %13, %14 : vector<16x1xf32>
    %cst_6 = arith.constant 9.99999997E-7 : f32
    %16 = vector.broadcast %cst_6 : f32 to vector<16x1xf32>
    %17 = arith.addf %15, %16 : vector<16x1xf32>
    %18 = math.rsqrt %17 : vector<16x1xf32>
    %19 = vector.broadcast %18 : vector<16x1xf32> to vector<16x64xf32>
    %20 = arith.mulf %10, %19 : vector<16x64xf32>
    %c16_i32 = arith.constant 16 : i32
    %21 = arith.muli %arg1, %c16_i32 : i32
    %22 = tpu.iota {dimensions = array<i32: 0>} : vector<16x1xi32>
    %23 = vector.broadcast %21 : i32 to vector<16x1xi32>
    %24 = arith.addi %23, %22 : vector<16x1xi32>
    %c0_i32_7 = arith.constant 0 : i32
    %25 = vector.broadcast %c0_i32_7 : i32 to vector<16x1xi32>
    %26 = arith.cmpi slt, %24, %25 : vector<16x1xi32>
    %c0_8 = arith.constant 0 : index
    %c0_9 = arith.constant 0 : index
    %c0_10 = arith.constant 0 : index
    %27 = vector.load %arg7[%c0_8, %c0_9, %c0_10] : memref<1x1x64xf32, #tpu.memory_space<vmem>>, vector<1x1x64xf32>
    %28 = vector.shape_cast %27 : vector<1x1x64xf32> to vector<1x64xf32>
    %c0_11 = arith.constant 0 : index
    %c0_12 = arith.constant 0 : index
    %c0_13 = arith.constant 0 : index
    %29 = vector.load %arg4[%c0_11, %c0_12, %c0_13] : memref<1x1x64xf32, #tpu.memory_space<vmem>>, vector<1x1x64xf32>
    %30 = vector.shape_cast %29 : vector<1x1x64xf32> to vector<1x64xf32>
    %31 = vector.shape_cast %26 : vector<16x1xi1> to vector<16x1xi1>
    %32 = vector.broadcast %31 : vector<16x1xi1> to vector<16x64xi1>
    %33 = vector.shape_cast %28 : vector<1x64xf32> to vector<1x64xf32>
    %34 = vector.broadcast %33 : vector<1x64xf32> to vector<16x64xf32>
    %35 = vector.shape_cast %30 : vector<1x64xf32> to vector<1x64xf32>
    %36 = vector.broadcast %35 : vector<1x64xf32> to vector<16x64xf32>
    %37 = arith.select %32, %34, %36 : vector<16x64xi1>, vector<16x64xf32>
    %c0_14 = arith.constant 0 : index
    %c0_15 = arith.constant 0 : index
    %c0_16 = arith.constant 0 : index
    %38 = vector.load %arg8[%c0_14, %c0_15, %c0_16] : memref<1x1x64xf32, #tpu.memory_space<vmem>>, vector<1x1x64xf32>
    %39 = vector.shape_cast %38 : vector<1x1x64xf32> to vector<1x64xf32>
    %c0_17 = arith.constant 0 : index
    %c0_18 = arith.constant 0 : index
    %c0_19 = arith.constant 0 : index
    %40 = vector.load %arg5[%c0_17, %c0_18, %c0_19] : memref<1x1x64xf32, #tpu.memory_space<vmem>>, vector<1x1x64xf32>
    %41 = vector.shape_cast %40 : vector<1x1x64xf32> to vector<1x64xf32>
    %42 = vector.shape_cast %26 : vector<16x1xi1> to vector<16x1xi1>
    %43 = vector.broadcast %42 : vector<16x1xi1> to vector<16x64xi1>
    %44 = vector.shape_cast %39 : vector<1x64xf32> to vector<1x64xf32>
    %45 = vector.broadcast %44 : vector<1x64xf32> to vector<16x64xf32>
    %46 = vector.shape_cast %41 : vector<1x64xf32> to vector<1x64xf32>
    %47 = vector.broadcast %46 : vector<1x64xf32> to vector<16x64xf32>
    %48 = arith.select %43, %45, %47 : vector<16x64xi1>, vector<16x64xf32>
    %cst_20 = arith.constant 1.000000e+00 : f32
    %49 = vector.broadcast %cst_20 : f32 to vector<16x64xf32>
    %50 = arith.addf %49, %37 : vector<16x64xf32>
    %51 = arith.mulf %20, %50 : vector<16x64xf32>
    %52 = arith.addf %51, %48 : vector<16x64xf32>
    %53 = arith.truncf %52 : vector<16x64xf32> to vector<16x64xbf16>
    %c0_21 = arith.constant 0 : index
    %c0_22 = arith.constant 0 : index
    %54 = vector.load %arg10[%c0_21, %c0_22] : memref<64x256xbf16, #tpu.memory_space<vmem>>, vector<64x256xbf16>
    %cst_23 = arith.constant dense<0.000000e+00> : vector<16x256xf32>
    %55 = tpu.matmul %53, %54, %cst_23 {dimension_numbers = #tpu.dot_dimension_numbers<[1], [0], [0], [1], [0, 0, 1, 1], [], []>} : vector<16x64xbf16>, vector<64x256xbf16>, vector<16x256xf32> -> vector<16x256xf32>
    %c0_24 = arith.constant 0 : index
    %c0_25 = arith.constant 0 : index
    %56 = vector.load %arg11[%c0_24, %c0_25] : memref<1x256xf32, #tpu.memory_space<vmem>>, vector<1x256xf32>
    %57 = vector.broadcast %56 : vector<1x256xf32> to vector<16x256xf32>
    %58 = arith.addf %55, %57 : vector<16x256xf32>
    %cst_26 = arith.constant 5.000000e-01 : f32
    %59 = vector.broadcast %cst_26 : f32 to vector<16x256xf32>
    %60 = arith.mulf %59, %58 : vector<16x256xf32>
    %cst_27 = arith.constant 4.471500e-02 : f32
    %61 = vector.broadcast %cst_27 : f32 to vector<16x256xf32>
    %62 = arith.mulf %61, %58 : vector<16x256xf32>
    %63 = arith.mulf %62, %58 : vector<16x256xf32>
    %64 = arith.mulf %63, %58 : vector<16x256xf32>
    %65 = arith.addf %58, %64 : vector<16x256xf32>
    %cst_28 = arith.constant 0.797884583 : f32
    %66 = vector.broadcast %cst_28 : f32 to vector<16x256xf32>
    %67 = arith.mulf %66, %65 : vector<16x256xf32>
    %68 = math.tanh %67 : vector<16x256xf32>
    %cst_29 = arith.constant 1.000000e+00 : f32
    %69 = vector.broadcast %cst_29 : f32 to vector<16x256xf32>
    %70 = arith.addf %69, %68 : vector<16x256xf32>
    %71 = arith.mulf %60, %70 : vector<16x256xf32>
    %c0_30 = arith.constant 0 : index
    %c0_31 = arith.constant 0 : index
    %72 = vector.load %arg15[%c0_30, %c0_31] : memref<16x64xf32, #tpu.memory_space<vmem>>, vector<16x64xf32>
    %73 = arith.truncf %71 : vector<16x256xf32> to vector<16x256xbf16>
    %c0_32 = arith.constant 0 : index
    %c0_33 = arith.constant 0 : index
    %74 = vector.load %arg12[%c0_32, %c0_33] : memref<256x64xbf16, #tpu.memory_space<vmem>>, vector<256x64xbf16>
    %cst_34 = arith.constant dense<0.000000e+00> : vector<16x64xf32>
    %75 = tpu.matmul %73, %74, %cst_34 {dimension_numbers = #tpu.dot_dimension_numbers<[1], [0], [0], [1], [0, 0, 1, 1], [], []>} : vector<16x256xbf16>, vector<256x64xbf16>, vector<16x64xf32> -> vector<16x64xf32>
    %76 = arith.addf %72, %75 : vector<16x64xf32>
    %c0_35 = arith.constant 0 : index
    %c0_36 = arith.constant 0 : index
    %77 = vector.load %arg15[%c0_35, %c0_36] : memref<16x64xf32, #tpu.memory_space<vmem>>, vector<16x64xf32>
    tpu.vector_store %arg15[%c0_35, %c0_36], %76 {strides = array<i32>} : memref<16x64xf32, #tpu.memory_space<vmem>>, vector<16x64xf32>,
    %c0_i32_37 = arith.constant 0 : i32
    %78 = arith.cmpi eq, %arg2, %c0_i32_37 : i32
    %79 = arith.extui %78 : i1 to i32
    %c0_i32_38 = arith.constant 0 : i32
    %80 = arith.cmpi ne, %79, %c0_i32_38 : i32
    scf.if %80 {
      %c0_39 = arith.constant 0 : index
      %c0_40 = arith.constant 0 : index
      %81 = vector.load %arg15[%c0_39, %c0_40] : memref<16x64xf32, #tpu.memory_space<vmem>>, vector<16x64xf32>
      %c0_41 = arith.constant 0 : index
      %c0_42 = arith.constant 0 : index
      %82 = vector.load %arg13[%c0_41, %c0_42] : memref<1x64xf32, #tpu.memory_space<vmem>>, vector<1x64xf32>
      %83 = vector.broadcast %82 : vector<1x64xf32> to vector<16x64xf32>
      %84 = arith.addf %81, %83 : vector<16x64xf32>
      %c0_43 = arith.constant 0 : index
      %c0_44 = arith.constant 0 : index
      %c0_45 = arith.constant 0 : index
      %85 = vector.load %arg9[%c0_43, %c0_44, %c0_45] : memref<1x1x64xf32, #tpu.memory_space<vmem>>, vector<1x1x64xf32>
      %86 = vector.shape_cast %85 : vector<1x1x64xf32> to vector<1x64xf32>
      %c0_46 = arith.constant 0 : index
      %c0_47 = arith.constant 0 : index
      %c0_48 = arith.constant 0 : index
      %87 = vector.load %arg6[%c0_46, %c0_47, %c0_48] : memref<1x1x64xf32, #tpu.memory_space<vmem>>, vector<1x1x64xf32>
      %88 = vector.shape_cast %87 : vector<1x1x64xf32> to vector<1x64xf32>
      %89 = vector.shape_cast %26 : vector<16x1xi1> to vector<16x1xi1>
      %90 = vector.broadcast %89 : vector<16x1xi1> to vector<16x64xi1>
      %91 = vector.shape_cast %86 : vector<1x64xf32> to vector<1x64xf32>
      %92 = vector.broadcast %91 : vector<1x64xf32> to vector<16x64xf32>
      %93 = vector.shape_cast %88 : vector<1x64xf32> to vector<1x64xf32>
      %94 = vector.broadcast %93 : vector<1x64xf32> to vector<16x64xf32>
      %95 = arith.select %90, %92, %94 : vector<16x64xi1>, vector<16x64xf32>
      %96 = arith.mulf %95, %84 : vector<16x64xf32>
      %97 = arith.addf %4, %96 : vector<16x64xf32>
      %c0_49 = arith.constant 0 : index
      %c0_50 = arith.constant 0 : index
      %c0_51 = arith.constant 0 : index
      %98 = vector.load %arg14[%c0_49, %c0_50, %c0_51] : memref<1x16x64xf32, #tpu.memory_space<vmem>>, vector<1x16x64xf32>
      %99 = vector.shape_cast %98 : vector<1x16x64xf32> to vector<16x64xf32>
      %100 = vector.shape_cast %97 : vector<16x64xf32> to vector<1x16x64xf32>
      tpu.vector_store %arg14[%c0_49, %c0_50, %c0_51], %100 {strides = array<i32>} : memref<1x16x64xf32, #tpu.memory_space<vmem>>, vector<1x16x64xf32>,
    } else {
    }
    return
  }
  func.func @transform_0(%arg0: i32, %arg1: i32, %arg2: i32) -> (i32, i32, i32) {
    %c0_i32 = arith.constant 0 : i32
    %c0_i32_0 = arith.constant 0 : i32
    return %arg0, %arg1, %c0_i32 : i32, i32, i32
  }
  func.func @transform_1(%arg0: i32, %arg1: i32, %arg2: i32) -> (i32, i32, i32) {
    %c0_i32 = arith.constant 0 : i32
    %c0_i32_0 = arith.constant 0 : i32
    %c0_i32_1 = arith.constant 0 : i32
    return %arg0, %c0_i32, %c0_i32_0 : i32, i32, i32
  }
  func.func @transform_2(%arg0: i32, %arg1: i32, %arg2: i32) -> (i32, i32, i32) {
    %c0_i32 = arith.constant 0 : i32
    %c0_i32_0 = arith.constant 0 : i32
    %c0_i32_1 = arith.constant 0 : i32
    return %arg0, %c0_i32, %c0_i32_0 : i32, i32, i32
  }
  func.func @transform_3(%arg0: i32, %arg1: i32, %arg2: i32) -> (i32, i32, i32) {
    %c0_i32 = arith.constant 0 : i32
    %c0_i32_0 = arith.constant 0 : i32
    %c0_i32_1 = arith.constant 0 : i32
    return %arg0, %c0_i32, %c0_i32_0 : i32, i32, i32
  }
  func.func @transform_4(%arg0: i32, %arg1: i32, %arg2: i32) -> (i32, i32, i32) {
    %c0_i32 = arith.constant 0 : i32
    %c0_i32_0 = arith.constant 0 : i32
    %c0_i32_1 = arith.constant 0 : i32
    return %arg0, %c0_i32, %c0_i32_0 : i32, i32, i32
  }
  func.func @transform_5(%arg0: i32, %arg1: i32, %arg2: i32) -> (i32, i32, i32) {
    %c0_i32 = arith.constant 0 : i32
    %c0_i32_0 = arith.constant 0 : i32
    %c0_i32_1 = arith.constant 0 : i32
    return %arg0, %c0_i32, %c0_i32_0 : i32, i32, i32
  }
  func.func @transform_6(%arg0: i32, %arg1: i32, %arg2: i32) -> (i32, i32, i32) {
    %c0_i32 = arith.constant 0 : i32
    %c0_i32_0 = arith.constant 0 : i32
    %c0_i32_1 = arith.constant 0 : i32
    return %arg0, %c0_i32, %c0_i32_0 : i32, i32, i32
  }
  func.func @transform_7(%arg0: i32, %arg1: i32, %arg2: i32) -> (i32, i32) {
    %c0_i32 = arith.constant 0 : i32
    %c0_i32_0 = arith.constant 0 : i32
    return %c0_i32, %arg2 : i32, i32
  }
  func.func @transform_8(%arg0: i32, %arg1: i32, %arg2: i32) -> (i32, i32) {
    %c0_i32 = arith.constant 0 : i32
    %c0_i32_0 = arith.constant 0 : i32
    return %c0_i32, %arg2 : i32, i32
  }
  func.func @transform_9(%arg0: i32, %arg1: i32, %arg2: i32) -> (i32, i32) {
    %c0_i32 = arith.constant 0 : i32
    %c0_i32_0 = arith.constant 0 : i32
    return %arg2, %c0_i32 : i32, i32
  }
  func.func @transform_10(%arg0: i32, %arg1: i32, %arg2: i32) -> (i32, i32) {
    %c0_i32 = arith.constant 0 : i32
    %c0_i32_0 = arith.constant 0 : i32
    %c0_i32_1 = arith.constant 0 : i32
    return %c0_i32, %c0_i32_0 : i32, i32
  }
  func.func @transform_11(%arg0: i32, %arg1: i32, %arg2: i32) -> (i32, i32, i32) {
    %c0_i32 = arith.constant 0 : i32
    %c0_i32_0 = arith.constant 0 : i32
    return %arg0, %arg1, %c0_i32 : i32, i32, i32
  }
}

module attributes {stable_mosaic.version = 11 : i64} {
  func.func @_proj_residual_kernel(%arg0: i32, %arg1: i32, %arg2: i32, %arg3: memref<1x32x64xbf16, #tpu.memory_space<vmem>>, %arg4: memref<1x32x64xf32, #tpu.memory_space<vmem>>, %arg5: memref<1x1x64xf32, #tpu.memory_space<vmem>>, %arg6: memref<1x1x64xf32, #tpu.memory_space<vmem>>, %arg7: memref<64x64xbf16, #tpu.memory_space<vmem>>, %arg8: memref<1x64xf32, #tpu.memory_space<vmem>>, %arg9: memref<1x32x64xf32, #tpu.memory_space<vmem>>) attributes {dimension_semantics = [#tpu.dimension_semantics<parallel>, #tpu.dimension_semantics<parallel>, #tpu.dimension_semantics<parallel>], iteration_bounds = array<i64: 2, 1, 1>, scalar_prefetch = 0 : i64, scratch_operands = 0 : i64, tpu.core_type = #tpu.core_type<tc>, window_params = [{transform_indices = @transform_0, window_bounds = array<i64: 1, 32, 64>}, {transform_indices = @transform_1, window_bounds = array<i64: 1, 32, 64>}, {transform_indices = @transform_2, window_bounds = array<i64: 1, 1, 64>}, {transform_indices = @transform_3, window_bounds = array<i64: 1, 1, 64>}, {transform_indices = @transform_4, window_bounds = array<i64: 64, 64>}, {transform_indices = @transform_5, window_bounds = array<i64: 1, 64>}, {transform_indices = @transform_6, window_bounds = array<i64: 1, 32, 64>}]} {
    %c0 = arith.constant 0 : index
    %c0_0 = arith.constant 0 : index
    %c0_1 = arith.constant 0 : index
    %0 = vector.load %arg3[%c0, %c0_0, %c0_1] : memref<1x32x64xbf16, #tpu.memory_space<vmem>>, vector<1x32x64xbf16>
    %1 = vector.shape_cast %0 : vector<1x32x64xbf16> to vector<32x64xbf16>
    %c0_2 = arith.constant 0 : index
    %c0_3 = arith.constant 0 : index
    %2 = vector.load %arg7[%c0_2, %c0_3] : memref<64x64xbf16, #tpu.memory_space<vmem>>, vector<64x64xbf16>
    %cst = arith.constant dense<0.000000e+00> : vector<32x64xf32>
    %3 = tpu.matmul %1, %2, %cst {dimension_numbers = #tpu.dot_dimension_numbers<[1], [0], [0], [1], [0, 0, 1, 1], [], []>} : vector<32x64xbf16>, vector<64x64xbf16>, vector<32x64xf32> -> vector<32x64xf32>
    %c0_4 = arith.constant 0 : index
    %c0_5 = arith.constant 0 : index
    %4 = vector.load %arg8[%c0_4, %c0_5] : memref<1x64xf32, #tpu.memory_space<vmem>>, vector<1x64xf32>
    %5 = vector.broadcast %4 : vector<1x64xf32> to vector<32x64xf32>
    %6 = arith.addf %3, %5 : vector<32x64xf32>
    %c32_i32 = arith.constant 32 : i32
    %7 = arith.muli %arg1, %c32_i32 : i32
    %8 = tpu.iota {dimensions = array<i32: 0>} : vector<32x1xi32>
    %9 = vector.broadcast %7 : i32 to vector<32x1xi32>
    %10 = arith.addi %9, %8 : vector<32x1xi32>
    %c8_i32 = arith.constant 8 : i32
    %11 = vector.broadcast %c8_i32 : i32 to vector<32x1xi32>
    %12 = arith.cmpi slt, %10, %11 : vector<32x1xi32>
    %c0_6 = arith.constant 0 : index
    %c0_7 = arith.constant 0 : index
    %c0_8 = arith.constant 0 : index
    %13 = vector.load %arg6[%c0_6, %c0_7, %c0_8] : memref<1x1x64xf32, #tpu.memory_space<vmem>>, vector<1x1x64xf32>
    %14 = vector.shape_cast %13 : vector<1x1x64xf32> to vector<1x64xf32>
    %c0_9 = arith.constant 0 : index
    %c0_10 = arith.constant 0 : index
    %c0_11 = arith.constant 0 : index
    %15 = vector.load %arg5[%c0_9, %c0_10, %c0_11] : memref<1x1x64xf32, #tpu.memory_space<vmem>>, vector<1x1x64xf32>
    %16 = vector.shape_cast %15 : vector<1x1x64xf32> to vector<1x64xf32>
    %17 = vector.shape_cast %12 : vector<32x1xi1> to vector<32x1xi1>
    %18 = vector.broadcast %17 : vector<32x1xi1> to vector<32x64xi1>
    %19 = vector.shape_cast %14 : vector<1x64xf32> to vector<1x64xf32>
    %20 = vector.broadcast %19 : vector<1x64xf32> to vector<32x64xf32>
    %21 = vector.shape_cast %16 : vector<1x64xf32> to vector<1x64xf32>
    %22 = vector.broadcast %21 : vector<1x64xf32> to vector<32x64xf32>
    %23 = arith.select %18, %20, %22 : vector<32x64xi1>, vector<32x64xf32>
    %c0_12 = arith.constant 0 : index
    %c0_13 = arith.constant 0 : index
    %c0_14 = arith.constant 0 : index
    %24 = vector.load %arg4[%c0_12, %c0_13, %c0_14] : memref<1x32x64xf32, #tpu.memory_space<vmem>>, vector<1x32x64xf32>
    %25 = vector.shape_cast %24 : vector<1x32x64xf32> to vector<32x64xf32>
    %26 = arith.mulf %23, %6 : vector<32x64xf32>
    %27 = arith.addf %25, %26 : vector<32x64xf32>
    %c0_15 = arith.constant 0 : index
    %c0_16 = arith.constant 0 : index
    %c0_17 = arith.constant 0 : index
    %28 = vector.load %arg9[%c0_15, %c0_16, %c0_17] : memref<1x32x64xf32, #tpu.memory_space<vmem>>, vector<1x32x64xf32>
    %29 = vector.shape_cast %28 : vector<1x32x64xf32> to vector<32x64xf32>
    %30 = vector.shape_cast %27 : vector<32x64xf32> to vector<1x32x64xf32>
    tpu.vector_store %arg9[%c0_15, %c0_16, %c0_17], %30 {strides = array<i32>} : memref<1x32x64xf32, #tpu.memory_space<vmem>>, vector<1x32x64xf32>,
    return
  }
  func.func @transform_0(%arg0: i32, %arg1: i32, %arg2: i32) -> (i32, i32, i32) {
    %c0_i32 = arith.constant 0 : i32
    %c0_i32_0 = arith.constant 0 : i32
    return %arg0, %arg1, %c0_i32 : i32, i32, i32
  }
  func.func @transform_1(%arg0: i32, %arg1: i32, %arg2: i32) -> (i32, i32, i32) {
    %c0_i32 = arith.constant 0 : i32
    return %arg0, %arg1, %arg2 : i32, i32, i32
  }
  func.func @transform_2(%arg0: i32, %arg1: i32, %arg2: i32) -> (i32, i32, i32) {
    %c0_i32 = arith.constant 0 : i32
    %c0_i32_0 = arith.constant 0 : i32
    return %arg0, %c0_i32, %arg2 : i32, i32, i32
  }
  func.func @transform_3(%arg0: i32, %arg1: i32, %arg2: i32) -> (i32, i32, i32) {
    %c0_i32 = arith.constant 0 : i32
    %c0_i32_0 = arith.constant 0 : i32
    return %arg0, %c0_i32, %arg2 : i32, i32, i32
  }
  func.func @transform_4(%arg0: i32, %arg1: i32, %arg2: i32) -> (i32, i32) {
    %c0_i32 = arith.constant 0 : i32
    %c0_i32_0 = arith.constant 0 : i32
    return %c0_i32, %arg2 : i32, i32
  }
  func.func @transform_5(%arg0: i32, %arg1: i32, %arg2: i32) -> (i32, i32) {
    %c0_i32 = arith.constant 0 : i32
    %c0_i32_0 = arith.constant 0 : i32
    return %c0_i32, %arg2 : i32, i32
  }
  func.func @transform_6(%arg0: i32, %arg1: i32, %arg2: i32) -> (i32, i32, i32) {
    %c0_i32 = arith.constant 0 : i32
    return %arg0, %arg1, %arg2 : i32, i32, i32
  }
}

module attributes {stable_mosaic.version = 11 : i64} {
  func.func @_ffn_fused_kernel(%arg0: i32, %arg1: i32, %arg2: i32, %arg3: memref<1x32x64xf32, #tpu.memory_space<vmem>>, %arg4: memref<1x1x64xf32, #tpu.memory_space<vmem>>, %arg5: memref<1x1x64xf32, #tpu.memory_space<vmem>>, %arg6: memref<1x1x64xf32, #tpu.memory_space<vmem>>, %arg7: memref<1x1x64xf32, #tpu.memory_space<vmem>>, %arg8: memref<1x1x64xf32, #tpu.memory_space<vmem>>, %arg9: memref<1x1x64xf32, #tpu.memory_space<vmem>>, %arg10: memref<64x256xbf16, #tpu.memory_space<vmem>>, %arg11: memref<1x256xf32, #tpu.memory_space<vmem>>, %arg12: memref<256x64xbf16, #tpu.memory_space<vmem>>, %arg13: memref<1x64xf32, #tpu.memory_space<vmem>>, %arg14: memref<1x32x64xf32, #tpu.memory_space<vmem>>, %arg15: memref<32x64xf32, #tpu.memory_space<vmem>>) attributes {dimension_semantics = [#tpu.dimension_semantics<parallel>, #tpu.dimension_semantics<parallel>, #tpu.dimension_semantics<arbitrary>], iteration_bounds = array<i64: 2, 1, 1>, scalar_prefetch = 0 : i64, scratch_operands = 1 : i64, tpu.core_type = #tpu.core_type<tc>, window_params = [{transform_indices = @transform_0, window_bounds = array<i64: 1, 32, 64>}, {transform_indices = @transform_1, window_bounds = array<i64: 1, 1, 64>}, {transform_indices = @transform_2, window_bounds = array<i64: 1, 1, 64>}, {transform_indices = @transform_3, window_bounds = array<i64: 1, 1, 64>}, {transform_indices = @transform_4, window_bounds = array<i64: 1, 1, 64>}, {transform_indices = @transform_5, window_bounds = array<i64: 1, 1, 64>}, {transform_indices = @transform_6, window_bounds = array<i64: 1, 1, 64>}, {transform_indices = @transform_7, window_bounds = array<i64: 64, 256>}, {transform_indices = @transform_8, window_bounds = array<i64: 1, 256>}, {transform_indices = @transform_9, window_bounds = array<i64: 256, 64>}, {pipeline_mode = #tpu.pipeline_mode<synchronous>, transform_indices = @transform_10, window_bounds = array<i64: 1, 64>}, {transform_indices = @transform_11, window_bounds = array<i64: 1, 32, 64>}]} {
    %c0_i32 = arith.constant 0 : i32
    %0 = arith.cmpi eq, %arg2, %c0_i32 : i32
    %1 = arith.extui %0 : i1 to i32
    %c0_i32_0 = arith.constant 0 : i32
    %2 = arith.cmpi ne, %1, %c0_i32_0 : i32
    scf.if %2 {
      %cst_38 = arith.constant 0.000000e+00 : f32
      %81 = vector.broadcast %cst_38 : f32 to vector<32x64xf32>
      %c0_39 = arith.constant 0 : index
      %c0_40 = arith.constant 0 : index
      %82 = vector.load %arg15[%c0_39, %c0_40] : memref<32x64xf32, #tpu.memory_space<vmem>>, vector<32x64xf32>
      tpu.vector_store %arg15[%c0_39, %c0_40], %81 {strides = array<i32>} : memref<32x64xf32, #tpu.memory_space<vmem>>, vector<32x64xf32>,
    } else {
    }
    %c0 = arith.constant 0 : index
    %c0_1 = arith.constant 0 : index
    %c0_2 = arith.constant 0 : index
    %3 = vector.load %arg3[%c0, %c0_1, %c0_2] : memref<1x32x64xf32, #tpu.memory_space<vmem>>, vector<1x32x64xf32>
    %4 = vector.shape_cast %3 : vector<1x32x64xf32> to vector<32x64xf32>
    %cst = arith.constant dense<0.000000e+00> : vector<32xf32>
    %5 = vector.multi_reduction <add>, %4, %cst [1] : vector<32x64xf32> to vector<32xf32>
    %6 = vector.shape_cast %5 : vector<32xf32> to vector<32x1xf32>
    %cst_3 = arith.constant 6.400000e+01 : f32
    %7 = vector.broadcast %cst_3 : f32 to vector<32x1xf32>
    %8 = arith.divf %6, %7 : vector<32x1xf32>
    %9 = vector.broadcast %8 : vector<32x1xf32> to vector<32x64xf32>
    %10 = arith.subf %4, %9 : vector<32x64xf32>
    %11 = arith.mulf %10, %10 : vector<32x64xf32>
    %cst_4 = arith.constant dense<0.000000e+00> : vector<32xf32>
    %12 = vector.multi_reduction <add>, %11, %cst_4 [1] : vector<32x64xf32> to vector<32xf32>
    %13 = vector.shape_cast %12 : vector<32xf32> to vector<32x1xf32>
    %cst_5 = arith.constant 6.400000e+01 : f32
    %14 = vector.broadcast %cst_5 : f32 to vector<32x1xf32>
    %15 = arith.divf %13, %14 : vector<32x1xf32>
    %cst_6 = arith.constant 9.99999997E-7 : f32
    %16 = vector.broadcast %cst_6 : f32 to vector<32x1xf32>
    %17 = arith.addf %15, %16 : vector<32x1xf32>
    %18 = math.rsqrt %17 : vector<32x1xf32>
    %19 = vector.broadcast %18 : vector<32x1xf32> to vector<32x64xf32>
    %20 = arith.mulf %10, %19 : vector<32x64xf32>
    %c32_i32 = arith.constant 32 : i32
    %21 = arith.muli %arg1, %c32_i32 : i32
    %22 = tpu.iota {dimensions = array<i32: 0>} : vector<32x1xi32>
    %23 = vector.broadcast %21 : i32 to vector<32x1xi32>
    %24 = arith.addi %23, %22 : vector<32x1xi32>
    %c8_i32 = arith.constant 8 : i32
    %25 = vector.broadcast %c8_i32 : i32 to vector<32x1xi32>
    %26 = arith.cmpi slt, %24, %25 : vector<32x1xi32>
    %c0_7 = arith.constant 0 : index
    %c0_8 = arith.constant 0 : index
    %c0_9 = arith.constant 0 : index
    %27 = vector.load %arg7[%c0_7, %c0_8, %c0_9] : memref<1x1x64xf32, #tpu.memory_space<vmem>>, vector<1x1x64xf32>
    %28 = vector.shape_cast %27 : vector<1x1x64xf32> to vector<1x64xf32>
    %c0_10 = arith.constant 0 : index
    %c0_11 = arith.constant 0 : index
    %c0_12 = arith.constant 0 : index
    %29 = vector.load %arg4[%c0_10, %c0_11, %c0_12] : memref<1x1x64xf32, #tpu.memory_space<vmem>>, vector<1x1x64xf32>
    %30 = vector.shape_cast %29 : vector<1x1x64xf32> to vector<1x64xf32>
    %31 = vector.shape_cast %26 : vector<32x1xi1> to vector<32x1xi1>
    %32 = vector.broadcast %31 : vector<32x1xi1> to vector<32x64xi1>
    %33 = vector.shape_cast %28 : vector<1x64xf32> to vector<1x64xf32>
    %34 = vector.broadcast %33 : vector<1x64xf32> to vector<32x64xf32>
    %35 = vector.shape_cast %30 : vector<1x64xf32> to vector<1x64xf32>
    %36 = vector.broadcast %35 : vector<1x64xf32> to vector<32x64xf32>
    %37 = arith.select %32, %34, %36 : vector<32x64xi1>, vector<32x64xf32>
    %c0_13 = arith.constant 0 : index
    %c0_14 = arith.constant 0 : index
    %c0_15 = arith.constant 0 : index
    %38 = vector.load %arg8[%c0_13, %c0_14, %c0_15] : memref<1x1x64xf32, #tpu.memory_space<vmem>>, vector<1x1x64xf32>
    %39 = vector.shape_cast %38 : vector<1x1x64xf32> to vector<1x64xf32>
    %c0_16 = arith.constant 0 : index
    %c0_17 = arith.constant 0 : index
    %c0_18 = arith.constant 0 : index
    %40 = vector.load %arg5[%c0_16, %c0_17, %c0_18] : memref<1x1x64xf32, #tpu.memory_space<vmem>>, vector<1x1x64xf32>
    %41 = vector.shape_cast %40 : vector<1x1x64xf32> to vector<1x64xf32>
    %42 = vector.shape_cast %26 : vector<32x1xi1> to vector<32x1xi1>
    %43 = vector.broadcast %42 : vector<32x1xi1> to vector<32x64xi1>
    %44 = vector.shape_cast %39 : vector<1x64xf32> to vector<1x64xf32>
    %45 = vector.broadcast %44 : vector<1x64xf32> to vector<32x64xf32>
    %46 = vector.shape_cast %41 : vector<1x64xf32> to vector<1x64xf32>
    %47 = vector.broadcast %46 : vector<1x64xf32> to vector<32x64xf32>
    %48 = arith.select %43, %45, %47 : vector<32x64xi1>, vector<32x64xf32>
    %cst_19 = arith.constant 1.000000e+00 : f32
    %49 = vector.broadcast %cst_19 : f32 to vector<32x64xf32>
    %50 = arith.addf %49, %37 : vector<32x64xf32>
    %51 = arith.mulf %20, %50 : vector<32x64xf32>
    %52 = arith.addf %51, %48 : vector<32x64xf32>
    %53 = arith.truncf %52 : vector<32x64xf32> to vector<32x64xbf16>
    %c0_20 = arith.constant 0 : index
    %c0_21 = arith.constant 0 : index
    %54 = vector.load %arg10[%c0_20, %c0_21] : memref<64x256xbf16, #tpu.memory_space<vmem>>, vector<64x256xbf16>
    %cst_22 = arith.constant dense<0.000000e+00> : vector<32x256xf32>
    %55 = tpu.matmul %53, %54, %cst_22 {dimension_numbers = #tpu.dot_dimension_numbers<[1], [0], [0], [1], [0, 0, 1, 1], [], []>} : vector<32x64xbf16>, vector<64x256xbf16>, vector<32x256xf32> -> vector<32x256xf32>
    %c0_23 = arith.constant 0 : index
    %c0_24 = arith.constant 0 : index
    %56 = vector.load %arg11[%c0_23, %c0_24] : memref<1x256xf32, #tpu.memory_space<vmem>>, vector<1x256xf32>
    %57 = vector.broadcast %56 : vector<1x256xf32> to vector<32x256xf32>
    %58 = arith.addf %55, %57 : vector<32x256xf32>
    %cst_25 = arith.constant 5.000000e-01 : f32
    %59 = vector.broadcast %cst_25 : f32 to vector<32x256xf32>
    %60 = arith.mulf %59, %58 : vector<32x256xf32>
    %cst_26 = arith.constant 4.471500e-02 : f32
    %61 = vector.broadcast %cst_26 : f32 to vector<32x256xf32>
    %62 = arith.mulf %61, %58 : vector<32x256xf32>
    %63 = arith.mulf %62, %58 : vector<32x256xf32>
    %64 = arith.mulf %63, %58 : vector<32x256xf32>
    %65 = arith.addf %58, %64 : vector<32x256xf32>
    %cst_27 = arith.constant 0.797884583 : f32
    %66 = vector.broadcast %cst_27 : f32 to vector<32x256xf32>
    %67 = arith.mulf %66, %65 : vector<32x256xf32>
    %68 = math.tanh %67 : vector<32x256xf32>
    %cst_28 = arith.constant 1.000000e+00 : f32
    %69 = vector.broadcast %cst_28 : f32 to vector<32x256xf32>
    %70 = arith.addf %69, %68 : vector<32x256xf32>
    %71 = arith.mulf %60, %70 : vector<32x256xf32>
    %c0_29 = arith.constant 0 : index
    %c0_30 = arith.constant 0 : index
    %72 = vector.load %arg15[%c0_29, %c0_30] : memref<32x64xf32, #tpu.memory_space<vmem>>, vector<32x64xf32>
    %73 = arith.truncf %71 : vector<32x256xf32> to vector<32x256xbf16>
    %c0_31 = arith.constant 0 : index
    %c0_32 = arith.constant 0 : index
    %74 = vector.load %arg12[%c0_31, %c0_32] : memref<256x64xbf16, #tpu.memory_space<vmem>>, vector<256x64xbf16>
    %cst_33 = arith.constant dense<0.000000e+00> : vector<32x64xf32>
    %75 = tpu.matmul %73, %74, %cst_33 {dimension_numbers = #tpu.dot_dimension_numbers<[1], [0], [0], [1], [0, 0, 1, 1], [], []>} : vector<32x256xbf16>, vector<256x64xbf16>, vector<32x64xf32> -> vector<32x64xf32>
    %76 = arith.addf %72, %75 : vector<32x64xf32>
    %c0_34 = arith.constant 0 : index
    %c0_35 = arith.constant 0 : index
    %77 = vector.load %arg15[%c0_34, %c0_35] : memref<32x64xf32, #tpu.memory_space<vmem>>, vector<32x64xf32>
    tpu.vector_store %arg15[%c0_34, %c0_35], %76 {strides = array<i32>} : memref<32x64xf32, #tpu.memory_space<vmem>>, vector<32x64xf32>,
    %c0_i32_36 = arith.constant 0 : i32
    %78 = arith.cmpi eq, %arg2, %c0_i32_36 : i32
    %79 = arith.extui %78 : i1 to i32
    %c0_i32_37 = arith.constant 0 : i32
    %80 = arith.cmpi ne, %79, %c0_i32_37 : i32
    scf.if %80 {
      %c0_38 = arith.constant 0 : index
      %c0_39 = arith.constant 0 : index
      %81 = vector.load %arg15[%c0_38, %c0_39] : memref<32x64xf32, #tpu.memory_space<vmem>>, vector<32x64xf32>
      %c0_40 = arith.constant 0 : index
      %c0_41 = arith.constant 0 : index
      %82 = vector.load %arg13[%c0_40, %c0_41] : memref<1x64xf32, #tpu.memory_space<vmem>>, vector<1x64xf32>
      %83 = vector.broadcast %82 : vector<1x64xf32> to vector<32x64xf32>
      %84 = arith.addf %81, %83 : vector<32x64xf32>
      %c0_42 = arith.constant 0 : index
      %c0_43 = arith.constant 0 : index
      %c0_44 = arith.constant 0 : index
      %85 = vector.load %arg9[%c0_42, %c0_43, %c0_44] : memref<1x1x64xf32, #tpu.memory_space<vmem>>, vector<1x1x64xf32>
      %86 = vector.shape_cast %85 : vector<1x1x64xf32> to vector<1x64xf32>
      %c0_45 = arith.constant 0 : index
      %c0_46 = arith.constant 0 : index
      %c0_47 = arith.constant 0 : index
      %87 = vector.load %arg6[%c0_45, %c0_46, %c0_47] : memref<1x1x64xf32, #tpu.memory_space<vmem>>, vector<1x1x64xf32>
      %88 = vector.shape_cast %87 : vector<1x1x64xf32> to vector<1x64xf32>
      %89 = vector.shape_cast %26 : vector<32x1xi1> to vector<32x1xi1>
      %90 = vector.broadcast %89 : vector<32x1xi1> to vector<32x64xi1>
      %91 = vector.shape_cast %86 : vector<1x64xf32> to vector<1x64xf32>
      %92 = vector.broadcast %91 : vector<1x64xf32> to vector<32x64xf32>
      %93 = vector.shape_cast %88 : vector<1x64xf32> to vector<1x64xf32>
      %94 = vector.broadcast %93 : vector<1x64xf32> to vector<32x64xf32>
      %95 = arith.select %90, %92, %94 : vector<32x64xi1>, vector<32x64xf32>
      %96 = arith.mulf %95, %84 : vector<32x64xf32>
      %97 = arith.addf %4, %96 : vector<32x64xf32>
      %c0_48 = arith.constant 0 : index
      %c0_49 = arith.constant 0 : index
      %c0_50 = arith.constant 0 : index
      %98 = vector.load %arg14[%c0_48, %c0_49, %c0_50] : memref<1x32x64xf32, #tpu.memory_space<vmem>>, vector<1x32x64xf32>
      %99 = vector.shape_cast %98 : vector<1x32x64xf32> to vector<32x64xf32>
      %100 = vector.shape_cast %97 : vector<32x64xf32> to vector<1x32x64xf32>
      tpu.vector_store %arg14[%c0_48, %c0_49, %c0_50], %100 {strides = array<i32>} : memref<1x32x64xf32, #tpu.memory_space<vmem>>, vector<1x32x64xf32>,
    } else {
    }
    return
  }
  func.func @transform_0(%arg0: i32, %arg1: i32, %arg2: i32) -> (i32, i32, i32) {
    %c0_i32 = arith.constant 0 : i32
    %c0_i32_0 = arith.constant 0 : i32
    return %arg0, %arg1, %c0_i32 : i32, i32, i32
  }
  func.func @transform_1(%arg0: i32, %arg1: i32, %arg2: i32) -> (i32, i32, i32) {
    %c0_i32 = arith.constant 0 : i32
    %c0_i32_0 = arith.constant 0 : i32
    %c0_i32_1 = arith.constant 0 : i32
    return %arg0, %c0_i32, %c0_i32_0 : i32, i32, i32
  }
  func.func @transform_2(%arg0: i32, %arg1: i32, %arg2: i32) -> (i32, i32, i32) {
    %c0_i32 = arith.constant 0 : i32
    %c0_i32_0 = arith.constant 0 : i32
    %c0_i32_1 = arith.constant 0 : i32
    return %arg0, %c0_i32, %c0_i32_0 : i32, i32, i32
  }
  func.func @transform_3(%arg0: i32, %arg1: i32, %arg2: i32) -> (i32, i32, i32) {
    %c0_i32 = arith.constant 0 : i32
    %c0_i32_0 = arith.constant 0 : i32
    %c0_i32_1 = arith.constant 0 : i32
    return %arg0, %c0_i32, %c0_i32_0 : i32, i32, i32
  }
  func.func @transform_4(%arg0: i32, %arg1: i32, %arg2: i32) -> (i32, i32, i32) {
    %c0_i32 = arith.constant 0 : i32
    %c0_i32_0 = arith.constant 0 : i32
    %c0_i32_1 = arith.constant 0 : i32
    return %arg0, %c0_i32, %c0_i32_0 : i32, i32, i32
  }
  func.func @transform_5(%arg0: i32, %arg1: i32, %arg2: i32) -> (i32, i32, i32) {
    %c0_i32 = arith.constant 0 : i32
    %c0_i32_0 = arith.constant 0 : i32
    %c0_i32_1 = arith.constant 0 : i32
    return %arg0, %c0_i32, %c0_i32_0 : i32, i32, i32
  }
  func.func @transform_6(%arg0: i32, %arg1: i32, %arg2: i32) -> (i32, i32, i32) {
    %c0_i32 = arith.constant 0 : i32
    %c0_i32_0 = arith.constant 0 : i32
    %c0_i32_1 = arith.constant 0 : i32
    return %arg0, %c0_i32, %c0_i32_0 : i32, i32, i32
  }
  func.func @transform_7(%arg0: i32, %arg1: i32, %arg2: i32) -> (i32, i32) {
    %c0_i32 = arith.constant 0 : i32
    %c0_i32_0 = arith.constant 0 : i32
    return %c0_i32, %arg2 : i32, i32
  }
  func.func @transform_8(%arg0: i32, %arg1: i32, %arg2: i32) -> (i32, i32) {
    %c0_i32 = arith.constant 0 : i32
    %c0_i32_0 = arith.constant 0 : i32
    return %c0_i32, %arg2 : i32, i32
  }
  func.func @transform_9(%arg0: i32, %arg1: i32, %arg2: i32) -> (i32, i32) {
    %c0_i32 = arith.constant 0 : i32
    %c0_i32_0 = arith.constant 0 : i32
    return %arg2, %c0_i32 : i32, i32
  }
  func.func @transform_10(%arg0: i32, %arg1: i32, %arg2: i32) -> (i32, i32) {
    %c0_i32 = arith.constant 0 : i32
    %c0_i32_0 = arith.constant 0 : i32
    %c0_i32_1 = arith.constant 0 : i32
    return %c0_i32, %c0_i32_0 : i32, i32
  }
  func.func @transform_11(%arg0: i32, %arg1: i32, %arg2: i32) -> (i32, i32, i32) {
    %c0_i32 = arith.constant 0 : i32
    %c0_i32_0 = arith.constant 0 : i32
    return %arg0, %arg1, %c0_i32 : i32, i32, i32
  }
}

</mosaic_0001>

<bundles_post_ra>
// kernel: transformer_block_forward.13
= control target key start
LH: loop header
LB: loop body
LE: loop exit
PB: predicated region body
PF: predicated region fallthrough
CT: control target
= control target key end

     0   :  { %8 = vsyncpa [#allocation3], 0  ;;  %s485_s0 = inlined_call_operand.hbm [shape: bf16[4,64], index: 0, kind: input, shape index: {}]   ;;  %s486_s1 = inlined_call_operand.hbm [shape: bf16[64,384], index: 1, kind: input, shape index: {}]   ;;  %s487_s2 = inlined_call_operand.hbm [shape: f32[1,384], index: 2, kind: input, shape index: {}]   ;;  %s488_s3 = inlined_call_operand.hbm [shape: f32[4,384], index: 3, kind: output, shape index: {}]  }
   0x1   :  { %9 = vsyncpa [#allocation6], 0 }
   0x2   :  { %10 = vsyncpa [#allocation4], 0  ;;  %s408_s12 = smov [#allocation5]   ;;  %s314_s16 = scalar_lea.hbm %s486_s1, 1536 }
   0x3   :  { %s26_s13 = sshll.u32 %s408_s12, 4  ;;  %p315_p0 = scmp.ne.s32.totalorder %s486_s1, %s314_s16  ;;  %s27_s13 = int_to_ptr.vmem [resolvable:$true] %s26_s13 }
   0x4   :  { %p318_p1 = scmp.lt.u32.totalorder %s314_s16, %s486_s1 }
   0x6   :  { %p320_p2 = pnand %p318_p1, %p315_p0 }
   0x8   :  { %323 = shalt.err (!%p320_p2)
}
   0x9   :  { %s324_s21 = scalar_lea.vmem %s27_s13, 1536  ;;  %p329_p4 = scmp.lt.s32.totalorder %s27_s13, %s27_s13 }
   0xa   :  { %p325_p3 = scmp.ne.s32.totalorder %s27_s13, %s324_s21  ;;  %p330_p5 = scmp.lt.s32.totalorder %s324_s21, %s324_s21 }
   0xc   :  { %p331_p6 = por %p330_p5, %p329_p4 }
   0xe   :  { %p332_p7 = pnand %p331_p6, %p325_p3 }
  0x10   :  { %335 = shalt.err (!%p332_p7)
}
  0x11   :  { %s409_s22 = smov 192   ;;  %s410_s23 = smov 12  }
  0x12   :  { %32 = dma.hbm_to_vmem [thread:$0]  %s486_s1, 1536, %s27_s13, [#allocation6], %s409_s22, %s409_s22, %s410_s23  }
  0x13   :  { %s411_s26 = smov [#allocation2]   ;;  %s412_s28 = smov [#allocation7]  }
  0x14   :  { %s17_s27 = sshll.u32 %s411_s26, 4  ;;  %s39_s29 = sshll.u32 %s412_s28, 4  ;;  %s18_s27 = int_to_ptr.vmem [resolvable:$true] %s17_s27  ;;  %s40_s29 = int_to_ptr.vmem [resolvable:$true] %s39_s29 }
  0x15   :  { %s336_s5 = scalar_lea.hbm %s485_s0, 32 }
  0x16   :  { %p337_p8 = scmp.ne.s32.totalorder %s485_s0, %s336_s5  ;;  %p340_p9 = scmp.lt.u32.totalorder %s336_s5, %s485_s0 }
  0x18   :  { %p342_p10 = pnand %p340_p9, %p337_p8 }
  0x1a   :  { %345 = shalt.err (!%p342_p10)
}
  0x1b   :  { %s346_s1 = scalar_lea.vmem %s18_s27, 32  ;;  %p351_p12 = scmp.lt.s32.totalorder %s18_s27, %s18_s27 }
  0x1c   :  { %p347_p11 = scmp.ne.s32.totalorder %s18_s27, %s346_s1  ;;  %p352_p13 = scmp.lt.s32.totalorder %s346_s1, %s346_s1 }
  0x1e   :  { %p353_p0 = por %p352_p13, %p351_p12 }
  0x20   :  { %p354_p1 = pnand %p353_p0, %p347_p11 }
  0x22   :  { %357 = shalt.err (!%p354_p1)
}
  0x23   :  { %20 = dma.hbm_to_vmem [thread:$0]  %s485_s0, 32, %s18_s27, [#allocation3]  }
  0x24   :  { %s358_s14 = scalar_lea.hbm %s487_s2, 48 }
  0x25   :  { %p359_p2 = scmp.ne.s32.totalorder %s487_s2, %s358_s14  ;;  %p362_p3 = scmp.lt.u32.totalorder %s358_s14, %s487_s2 }
  0x27   :  { %p364_p4 = pnand %p362_p3, %p359_p2 }
  0x29   :  { %367 = shalt.err (!%p364_p4)
}
  0x2a   :  { %s368_s19 = scalar_lea.vmem %s40_s29, 48  ;;  %s372_s20 = scalar_lea.vmem %s40_s29, 64 }
  0x2b   :  { %p369_p5 = scmp.ne.s32.totalorder %s40_s29, %s368_s19  ;;  %p373_p6 = scmp.lt.s32.totalorder %s40_s29, %s40_s29 }
  0x2c   :  { %p374_p7 = scmp.lt.s32.totalorder %s372_s20, %s368_s19 }
  0x2e   :  { %p375_p8 = por %p374_p7, %p373_p6 }
  0x30   :  { %p376_p9 = pnand %p375_p8, %p369_p5 }
  0x32   :  { %379 = shalt.err (!%p376_p9)
}
  0x33   :  { %42 = dma.hbm_to_vmem [thread:$0]  %s487_s2, 48, %s40_s29, [#allocation6]  }
  0x34   :  { %402 = dma.done.wait [#allocation3], 32  }
  0x35   :  { %403 = vsyncadd [#allocation3], 4294967264 }
  0x36   :  { %404 = dma.done.wait [#allocation6], 1584  }
  0x37   :  { %405 = vsyncadd [#allocation6], 4294965712  ;;  %v413_v0 = vmov 0.0   ;;  %v414_v1 = vmov 0   ;;  %vm415_vm0 = vmmov 0   ;;  %vm151_vm1 = vcmask 523264  }
  0x38   :  { %277 = vmatprep.subr.bf16.mxu1 %v413_v0  ;;  %187 = vmatprep.mubr.bf16.mxu0 %v414_v1  ;;  %v298_v2 = vld [vmem:[#allocation5 + $0x4] ss:$12 sps:$4 sm:$0xff]   ;;  %v300_v3 = vld [vmem:[#allocation5] ss:$12 sps:$4 sm:$0xff]   ;;  %v301_v4 = vld [vmem:[#allocation5 + $0x8] ss:$12 sps:$4 sm:$0xff]   ;;  %v72_v15 = vlaneseq }
  0x39   :  { %285 = vmatprep.mubr.msk.bf16.mxu1 %vm415_vm0, %v413_v0  ;;  %155 = vmatprep.subr.bf16.mxu0 %v298_v2  ;;  %v302_v5 = vld [vmem:[#allocation5 + $0x1c] ss:$12 sps:$4 sm:$0xff]   ;;  %v304_v6 = vld [vmem:[#allocation5 + $0x18] ss:$12 sps:$4 sm:$0xff]   ;;  %v305_v7 = vld [vmem:[#allocation5 + $0x20] ss:$12 sps:$4 sm:$0xff]  }
  0x3a   :  { %156 = vmatpush1.bf16.msra.mxu0 %v300_v3  ;;  %278 = vmatpush3.bf16.msra.mxu1 %v301_v4  ;;  %v306_v8 = vld [vmem:[#allocation5 + $0x34] ss:$12 sps:$4 sm:$0xff]   ;;  %v308_v9 = vld [vmem:[#allocation5 + $0x30] ss:$12 sps:$4 sm:$0xff]   ;;  %v309_v10 = vld [vmem:[#allocation5 + $0x38] ss:$12 sps:$4 sm:$0xff]  }
  0x3b   :  { %157 = vmatprep.subr.bf16.mxu0 %v302_v5  ;;  %279 = vmatprep.subr.bf16.mxu1 %v413_v0  ;;  %v310_v11 = vld [vmem:[#allocation5 + $0x4c] ss:$12 sps:$4 sm:$0xff]   ;;  %v312_v12 = vld [vmem:[#allocation5 + $0x48] ss:$12 sps:$4 sm:$0xff]   ;;  %v313_v13 = vld [vmem:[#allocation5 + $0x50] ss:$12 sps:$4 sm:$0xff]  }
  0x3c   :  { %v53_v14 = vld [vmem:[#allocation2] sm:$0x3]  ;;  %v73_v16 = vshrl.u32 %v72_v15, 7  ;;  %v70_v18 = vld [vmem:[#allocation7] sm:$0x7]  ;;  %s416_s2 = smov [#allocation8]  }
  0x3d   :  { %s248_s22 = sshll.u32 %s416_s2, 4  ;;  %s249_s22 = int_to_ptr.vmem [resolvable:$true] %s248_s22 }
  0x3e   :  { %158 = vmatpush1.bf16.msra.mxu0 %v304_v6  ;;  %280 = vmatpush3.bf16.msra.mxu1 %v305_v7  ;;  %v74_v17 = vsub.s32 0, %v73_v16  ;;  %v82_v19 = vsub.s32 2, %v73_v16  ;;  %v78_v20 = vsub.s32 1, %v73_v16  ;;  %s380_s23 = scalar_lea.vmem %s249_s22, 192  ;;  %p385_p11 = scmp.lt.s32.totalorder %s249_s22, %s249_s22 }
  0x3f   :  { %159 = vmatprep.subr.bf16.mxu0 %v306_v8  ;;  %281 = vmatprep.subr.bf16.mxu1 %v413_v0  ;;  %p381_p10 = scmp.ne.s32.totalorder %s249_s22, %s380_s23  ;;  %p386_p12 = scmp.lt.s32.totalorder %s380_s23, %s380_s23 }
  0x40   :  { %v75_v21 = vrot.slane %v70_v18, %v74_v17  ;;  %v83_v22 = vrot.slane %v70_v18, %v82_v19  ;;  %v79_v23 = vrot.slane %v70_v18, %v78_v20 }
  0x41   :  { %p387_p13 = por %p386_p12, %p385_p11 }
  0x42   :  { %160 = vmatpush1.bf16.msra.mxu0 %v308_v9  ;;  %282 = vmatpush3.bf16.msra.mxu1 %v309_v10 }
  0x43   :  { %161 = vmatprep.subr.bf16.mxu0 %v310_v11  ;;  %283 = vmatprep.subr.bf16.mxu1 %v413_v0  ;;  %p388_p0 = pnand %p387_p13, %p381_p10 }
  0x46   :  { %162 = vmatpush1.bf16.msra.mxu0 %v312_v12  ;;  %284 = vmatpush3.bf16.msra.mxu1 %v313_v13 }
  0x49   :  { %270 = vmatmul.mubr.msk.bf16.vlgmr.msra.gmra.mrb[0].mxu0 %vm151_vm1, %v53_v14  ;;  %286 = vmatmul.mubr.msk.bf16.vlgmr.msra.gmra.mrb[0].mxu1 %vm151_vm1, %v53_v14 }
 0x11c   :  { %v189_v24 = vpop.f32.mrb[0].mxu0  ;;  %v230_v26 = vpop.f32.mrb[0].mxu1 }
 0x11d   :  { %v190_v25 = vadd.f32 %v189_v24, %v75_v21  ;;  %v191_v27 = vpop.f32.mrb[1].mxu0  ;;  %v231_v28 = vadd.f32 %v230_v26, %v83_v22  ;;  %v287_v30 = vpop.f32.mrb[1].mxu1 }
 0x11e   :  { %v192_v29 = vadd.f32 %v191_v27, %v79_v23  ;;  %v193_v31 = vpop.f32.mrb[2].mxu0  ;;  %v233_v32 = vpop.f32.mrb[2].mxu1 }
 0x11f   :  { %v194_v33 = vpop.f32.mrb[3].mxu0  ;;  %241 = vst [vmem:[#allocation8 + $0x8] sm:$0xf] %v231_v28  ;;  %v288_v35 = vpop.f32.mrb[3].mxu1 }
 0x120   :  { %v238_v34 = vcombine.low %v190_v25, %v192_v29 }
 0x122   :  { %240 = vst [vmem:[#allocation8] sm:$0xff] %v238_v34 }
 0x123   :  { %391 = shalt.err (!%p388_p0)
}
 0x124   :  { %s392_s26 = scalar_lea.hbm %s488_s3, 192 }
 0x125   :  { %p393_p1 = scmp.ne.s32.totalorder %s488_s3, %s392_s26  ;;  %p396_p2 = scmp.lt.u32.totalorder %s392_s26, %s488_s3 }
 0x127   :  { %p398_p3 = pnand %p396_p2, %p393_p1 }
 0x129   :  { %401 = shalt.err (!%p398_p3)
}
 0x12a   :  { %251 = dma.vmem_to_hbm [thread:$0]  %s249_s22, 192, %s488_s3, [#allocation4]  }
 0x12b   :  { %406 = dma.done.wait [#allocation4], 192  }
 0x12c   :  { %407 = vsyncadd [#allocation4], 4294967104 }
 0x12d   :  { %255 = vsyncpa [#allocation3], 1 }
 0x12e   :  { %256 = vsyncpa [#allocation6], 1 }
 0x12f   :  { %257 = vsyncpa [#allocation4], 1 }

// kernel: transformer_block_forward.15
= control target key start
LH: loop header
LB: loop body
LE: loop exit
PB: predicated region body
PF: predicated region fallthrough
CT: control target
= control target key end

     0   :  { %s1989_s0 = inlined_call_operand.hbm [shape: f32[2,32,64], index: 0, kind: input, shape index: {}]   ;;  %s1990_s1 = inlined_call_operand.hbm [shape: f32[2,1,64], index: 1, kind: input, shape index: {}]   ;;  %s1991_s2 = inlined_call_operand.hbm [shape: f32[2,1,64], index: 2, kind: input, shape index: {}]   ;;  %s1992_s3 = inlined_call_operand.hbm [shape: f32[2,1,64], index: 3, kind: input, shape index: {}]   ;;  %s1993_s4 = inlined_call_operand.hbm [shape: f32[2,1,64], index: 4, kind: input, shape index: {}]   ;;  %s1994_s5 = inlined_call_operand.hbm [shape: bf16[64,192], index: 5, kind: input, shape index: {}]   ;;  %s1995_s6 = inlined_call_operand.hbm [shape: f32[1,192], index: 6, kind: input, shape index: {}]   ;;  %s1996_s7 = inlined_call_operand.hbm [shape: bf16[2,32,192], index: 7, kind: output, shape index: {}]  }
   0x1   :  { %2019 = sst [smem:[#allocation27_spill]] %s1989_s0 }
   0x2   :  { %2020 = sst [smem:[#allocation28_spill]] %s1990_s1 }
   0x3   :  { %2021 = sst [smem:[#allocation29_spill]] %s1992_s3 }
   0x4   :  { %2022 = sst [smem:[#allocation30_spill]] %s1994_s5 }
   0x5   :  { %2023 = sst [smem:[#allocation31_spill]] %s1995_s6 }
   0x6   :  { %2024 = sst [smem:[#allocation32_spill]] %s1996_s7 }
   0x7   :  { %12 = vsyncpa [#allocation3], 0 }
   0x8   :  { %14 = vsyncpa [#allocation3 + $0x1], 0 }
   0x9   :  { %15 = vsyncpa [#allocation6], 0 }
   0xa   :  { %17 = vsyncpa [#allocation6 + $0x1], 0 }
   0xb   :  { %18 = vsyncpa [#allocation9], 0 }
   0xc   :  { %20 = vsyncpa [#allocation9 + $0x1], 0 }
   0xd   :  { %21 = vsyncpa [#allocation12], 0 }
   0xe   :  { %22 = vsyncpa [#allocation4], 0 }
   0xf   :  { %24 = vsyncpa [#allocation4 + $0x1], 0  ;;  %s1530_s24 = smov 0   ;;  %s1532_s25 = smov 0  }
  0x10   :  { %s1534_s26 = smov 0   ;;  %s1536_s27 = smov 0  }
  0x11   :  { %s1538_s28 = smov 0   ;;  %s1540_s29 = smov 0  }
  0x12 LB: > { %2025 = sst [smem:[#allocation20_spill]] %s1455_s24  ;;  %s1561_s30 = sadd.s32 4294967295, %s1475_s29   ;;  %s1475_s29 = sphi %s1540_s29, %s30_s29   ;;  %s1471_s28 = sphi %s1538_s28, %s2073_s28   ;;  %s1467_s27 = sphi %s1536_s27, %s2072_s27   ;;  %s1463_s26 = sphi %s1534_s26, %s2071_s26   ;;  %s1459_s25 = sphi %s1532_s25, %s2075_s25   ;;  %s1455_s24 = sphi %s1530_s24, %s2074_s24  }
  0x13   : > { %2026 = sst [smem:[#allocation21_spill]] %s1463_s26  ;;  %s993_s8 = sadd.s32 4294967294, %s1475_s29  }
  0x14   : > { %2027 = sst [smem:[#allocation22_spill]] %s1471_s28  ;;  %p65_p0 = scmp.ne.s32.totalorder %s1463_s26, %s1459_s25 }
  0x15   : > { %p66_p1 = scmp.eq.s32.totalorder %s1475_s29, 0  ;;  %p71_p2 = scmp.ne.s32.totalorder %s1459_s25, %s1455_s24 }
  0x16   : > { %p1997_p3 = scmp.eq.s32.totalorder %s1561_s30, 0  ;;  %p255_p5 = scmp.eq.s32.totalorder %s1561_s30, 1 }
  0x17   : > { %p1570_p4 = por %p66_p1, %p65_p0  ;;  %p261_p7 = scmp.eq.s32.totalorder %s993_s8, 1 }
  0x18   : > { %p1577_p6 = por %p1997_p3, %p71_p2  ;;  %p1581_p8 = por %p255_p5, %p65_p0 }
  0x19   : > { %p994_p9 = scmp.ge.s32.totalorder %s1475_s29, 1  ;;  %p1586_p10 = por %p261_p7, %p71_p2 }
  0x1a   : > { %s2029_s10 = scalar_select %p1577_p6, 1, 0 }
  0x1b   : > { %s2030_s11 = scalar_select %p1581_p8, 1, 0 }
  0x1c   : > { %s2032_s12 = scalar_select %p1586_p10, 1, 0 }
  0x1d   : > { %2031 = sst [smem:[#allocation23_spill]] %s2030_s11  ;;  %p268_p11 = scmp.lt.s32.totalorder %s1475_s29, 3 }
  0x1e   : > { %2033 = sst [smem:[#allocation24_spill]] %s2032_s12  ;;  %s1477_s14 = smov [#allocation11]  }
  0x1f   : > { %p1591_p12 = pnand %p994_p9, %p268_p11  ;;  %s283_s15 = sshll.u32 %s1477_s14, 4  ;;  %s1595_s15 = int_to_ptr.vmem [resolvable:$true] %s283_s15 }
  0x20   : > { %s49_s17 = sadd.s32 1, %s1471_s28  ;;  %s2037_s5 = sld [smem:[#allocation30_spill]] }
  0x21   : > { %s2034_s13 = scalar_select %p1591_p12, 1, 0 }
  0x22   : > { %p1067_p13 = pneg %p1591_p12  ;;  %p1608_p2 = scmp.ge.s32.totalorder %s49_s17, 2 }
  0x24   : > { %p1602_p1 = pnand %p1067_p13, %p1997_p3 }
  0x26   : > { %s2035_s16 = scalar_select %p1602_p1, 1, 0 }
  0x27   : > { %s1175_s22 = scalar_lea.hbm %s2037_s5, 1024  ;;  %p2007_p7 = pneg %p1602_p1 }
  0x28   : > { %p1176_p5 = scmp.ne.s32.totalorder %s2037_s5, %s1175_s22  ;;  %p1182_p13 = scmp.lt.u32.totalorder %s1175_s22, %s2037_s5 }
  0x2a   : > { %p1178_p9 = pnand %p2007_p7, %p1176_p5 }
  0x2c   : > { %p1179_p11 = pneg %p1178_p9 }
  0x2e   : > { %p1184_p0 = pnand %p1182_p13, %p1179_p11 }
  0x30   : > { %1187 = shalt.err (!%p1184_p0)
}
  0x31   : > { %s1188_s20 = scalar_lea.vmem %s1595_s15, 1024  ;;  %p1196_p6 = scmp.lt.s32.totalorder %s1595_s15, %s1595_s15 }
  0x32   : > { %p1189_p3 = scmp.ne.s32.totalorder %s1595_s15, %s1188_s20  ;;  %p1197_p5 = scmp.lt.s32.totalorder %s1188_s20, %s1188_s20 }
  0x34   : > { %p1191_p10 = pnand %p1189_p3, %p2007_p7  ;;  %p1198_p9 = por %p1197_p5, %p1196_p6 }
  0x36   : > { %p1192_p8 = pneg %p1191_p10 }
  0x38   : > { %p1199_p12 = pnand %p1198_p9, %p1192_p8 }
  0x3a   : > { %1202 = shalt.err (!%p1199_p12)
}
  0x3b   : > { %s2003_s18 = smov 128   ;;  %s2004_s21 = smov 8  }
  0x3c   : > { %1070 = dma.hbm_to_vmem [thread:$0]  (!%p1602_p1), %s2037_s5, 1024, %s1595_s15, [#allocation12], %s2003_s18, %s2003_s18, %s2004_s21  }
  0x3d   : > { %s2077_s17 = smov (%p1608_p2, %s49_s17), 0  ;;  %p1096_p3 = scmp.lt.s32.totalorder %s1475_s29, 2 }
  0x3e   : > { %2038 = sst [smem:[#allocation25_spill]] %s2077_s17  ;;  %s1648_s8 = sand.u32 1, %s1463_s26  }
  0x3f   : > { %s53_s14 = ssub.s32 %s1471_s28, %s2077_s17  ;;  %s2006_s20 = sand.u32 1, %s1475_s29  }
  0x40   : > { %p56_p6 = scmp.eq.s32.totalorder %s53_s14, 0  ;;  %p1655_p8 = pnand %p1096_p3, %p1570_p4 }
  0x41   : > { %s2040_s24 = sadd.s32 1, %s1463_s26  ;;  %s1665_s15 = sshll.u32 %s1471_s28, 4 }
  0x42   : > { %s2039_s12 = scalar_select %p1655_p8, 1, 0 }
  0x43   : > { %s1662_s22 = scalar_select %p56_p6, %s1463_s26, %s2040_s24  }
  0x44   : > { %s2042_s1 = sld [smem:[#allocation28_spill]]  ;;  %s337_s9 = scalar_lea.vmem [#allocation5], %s1648_s8 }
  0x45   : > { %2041 = sst [smem:[#allocation26_spill]] %s1662_s22  ;;  %s344_s14 = sshll.u32 %s337_s9, 4  ;;  %s1674_s14 = int_to_ptr.vmem [resolvable:$true] %s344_s14 }
  0x46   : > { %s1678_s21 = scalar_lea.sflag [#allocation6], %s2006_s20  ;;  %p1684_p10 = pneg %p1655_p8 }
  0x48   : > { %s2043_s5 = scalar_select %p1684_p10, 1, 0 }
  0x4a   : > { %s1671_s18 = scalar_lea.hbm %s2042_s1, %s1665_s15  ;;  %s1208_s9 = scalar_lea.hbm %s2042_s1, 32 }
  0x4b   : > { %s1203_s24 = scalar_lea.hbm %s1671_s18, 16  ;;  %p1209_p2 = scmp.lt.u32.totalorder %s1671_s18, %s2042_s1 }
  0x4c   : > { %p1204_p4 = scmp.ne.s32.totalorder %s1671_s18, %s1203_s24  ;;  %p1210_p11 = scmp.lt.u32.totalorder %s1208_s9, %s1203_s24 }
  0x4d   : > { %p1212_p5 = scmp.lt.u32.totalorder %s1203_s24, %s1671_s18 }
  0x4e   : > { %p1206_p12 = pnand %p1684_p10, %p1204_p4  ;;  %p1211_p13 = por %p1210_p11, %p1209_p2 }
  0x50   : > { %p1207_p0 = pneg %p1206_p12  ;;  %p1213_p9 = por %p1212_p5, %p1211_p13 }
  0x52   : > { %p1214_p3 = pnand %p1213_p9, %p1207_p0 }
  0x54   : > { %1217 = shalt.err (!%p1214_p3)
}
  0x55   : > { %s1218_s20 = scalar_lea.vmem %s1674_s14, 16  ;;  %s1480_s19 = smov [#allocation5]  }
  0x56   : > { %p1219_p6 = scmp.ne.s32.totalorder %s1674_s14, %s1218_s20  ;;  %s1223_s23 = sshll.u32 %s1480_s19, 4  ;;  %s1224_s23 = int_to_ptr.vmem [resolvable:$false] %s1223_s23 }
  0x57   : > { %s1225_s17 = scalar_lea.vmem %s1224_s23, 32  ;;  %p1226_p7 = scmp.lt.s32.totalorder %s1674_s14, %s1224_s23 }
  0x58   : > { %p1221_p4 = pnand %p1219_p6, %p1684_p10  ;;  %p1227_p1 = scmp.lt.s32.totalorder %s1225_s17, %s1218_s20 }
  0x5a   : > { %p1222_p12 = pneg %p1221_p4  ;;  %p1228_p2 = por %p1227_p1, %p1226_p7 }
  0x5c   : > { %p1229_p11 = pnand %p1228_p2, %p1222_p12 }
  0x5e   : > { %1232 = shalt.err (!%p1229_p11)
}
  0x5f   : > { %1080 = dma.hbm_to_vmem [thread:$0]  (!%p1655_p8), %s1671_s18, 16, %s1674_s14, %s1678_s21  }
  0x60   : > { %s2044_s3 = sld [smem:[#allocation29_spill]]  ;;  %s371_s20 = scalar_lea.vmem [#allocation8], %s1648_s8 }
  0x61   : > { %s378_s19 = sshll.u32 %s371_s20, 4  ;;  %s1481_s23 = smov [#allocation13]   ;;  %s1715_s19 = int_to_ptr.vmem [resolvable:$true] %s378_s19 }
  0x62   : > { %s1717_s17 = sshll.u32 %s1481_s23, 4  ;;  %s2045_s1 = sand.u32 1, %s1475_s29   ;;  %s301_s17 = int_to_ptr.vmem [resolvable:$true] %s1717_s17 }
  0x63   : > { %s1721_s26 = scalar_lea.sflag [#allocation9], %s2045_s1 }
  0x66   : > { %s1712_s9 = scalar_lea.hbm %s2044_s3, %s1665_s15  ;;  %s1238_s24 = scalar_lea.hbm %s2044_s3, 32 }
  0x67   : > { %s1233_s18 = scalar_lea.hbm %s1712_s9, 16  ;;  %p1239_p13 = scmp.lt.u32.totalorder %s1712_s9, %s2044_s3 }
  0x68   : > { %p1234_p1 = scmp.ne.s32.totalorder %s1712_s9, %s1233_s18  ;;  %p1240_p5 = scmp.lt.u32.totalorder %s1238_s24, %s1233_s18 }
  0x69   : > { %p1242_p3 = scmp.lt.u32.totalorder %s1233_s18, %s1712_s9 }
  0x6a   : > { %p1236_p7 = pnand %p1234_p1, %p1684_p10  ;;  %p1241_p9 = por %p1240_p5, %p1239_p13 }
  0x6c   : > { %p1237_p0 = pneg %p1236_p7  ;;  %p1243_p6 = por %p1242_p3, %p1241_p9 }
  0x6e   : > { %p1244_p4 = pnand %p1243_p6, %p1237_p0 }
  0x70   : > { %1247 = shalt.err (!%p1244_p4)
}
  0x71   : > { %s1248_s1 = scalar_lea.vmem %s1715_s19, 16  ;;  %s1482_s20 = smov [#allocation8]  }
  0x72   : > { %p1249_p12 = scmp.ne.s32.totalorder %s1715_s19, %s1248_s1  ;;  %s1253_s23 = sshll.u32 %s1482_s20, 4  ;;  %s1254_s23 = int_to_ptr.vmem [resolvable:$false] %s1253_s23 }
  0x73   : > { %s1255_s7 = scalar_lea.vmem %s1254_s23, 32  ;;  %p1256_p1 = scmp.lt.s32.totalorder %s1715_s19, %s1254_s23 }
  0x74   : > { %p1251_p2 = pnand %p1249_p12, %p1684_p10  ;;  %p1257_p7 = scmp.lt.s32.totalorder %s1255_s7, %s1248_s1 }
  0x76   : > { %p1252_p11 = pneg %p1251_p2  ;;  %p1258_p13 = por %p1257_p7, %p1256_p1 }
  0x78   : > { %p1259_p5 = pnand %p1258_p13, %p1252_p11 }
  0x7a   : > { %1262 = shalt.err (!%p1259_p5)
}
  0x7b   : > { %1086 = dma.hbm_to_vmem [thread:$0]  (!%p1655_p8), %s1712_s9, 16, %s1715_s19, %s1721_s26  }
  0x7c   : > { %s2046_s6 = sld [smem:[#allocation31_spill]]  ;;  %p2047_p9 = scmp.ne.s32.totalorder %s2035_s16, 0 }
  0x7e   : > { %p2048_p3 = pneg %p2047_p9 }
  0x82   : > { %s1263_s14 = scalar_lea.hbm %s2046_s6, 32 }
  0x83   : > { %p1264_p0 = scmp.ne.s32.totalorder %s2046_s6, %s1263_s14  ;;  %p1270_p12 = scmp.lt.u32.totalorder %s1263_s14, %s2046_s6 }
  0x85   : > { %p1266_p6 = pnand %p1264_p0, %p2048_p3 }
  0x87   : > { %p1267_p4 = pneg %p1266_p6 }
  0x89   : > { %p1272_p2 = pnand %p1270_p12, %p1267_p4 }
  0x8b   : > { %1275 = shalt.err (!%p1272_p2)
}
  0x8c   : > { %s1276_s9 = scalar_lea.vmem %s301_s17, 32  ;;  %p2049_p1 = pmov %p2048_p3 }
  0x8d   : > { %p1277_p11 = scmp.ne.s32.totalorder %s301_s17, %s1276_s9  ;;  %p1284_p5 = scmp.lt.s32.totalorder %s301_s17, %s301_s17 }
  0x8e   : > { %p1285_p8 = scmp.lt.s32.totalorder %s1276_s9, %s1276_s9 }
  0x8f   : > { %p1279_p7 = pnand %p1277_p11, %p2049_p1 }
  0x90   : > { %p1286_p10 = por %p1285_p8, %p1284_p5 }
  0x91   : > { %p1280_p13 = pneg %p1279_p7 }
  0x93   : > { %p1287_p0 = pnand %p1286_p10, %p1280_p13 }
  0x95   : > { %1290 = shalt.err (!%p1287_p0)
}
  0x96   : > { %1073 = dma.hbm_to_vmem [thread:$0]  (!%p2047_p9), %s2046_s6, 32, %s301_s17, [#allocation12]  }
  0x97   : > { %s998_s7 = sshll.u32 %s1648_s8, 5  ;;  %s1033_s11 = sshll.u32 %s1471_s28, 9 }
  0x98   : > { %s2050_s0 = sld [smem:[#allocation27_spill]]  ;;  %s315_s16 = scalar_lea.vmem [#allocation2], %s998_s7 }
  0x99   : > { %s324_s24 = sshll.u32 %s315_s16, 4  ;;  %s1779_s9 = scalar_lea.hbm %s1991_s2, %s1665_s15  ;;  %s1773_s24 = int_to_ptr.vmem [resolvable:$true] %s324_s24 }
  0x9a   : > { %s312_s17 = scalar_lea.sflag [#allocation3], %s1648_s8  ;;  %p2051_p10 = scmp.ne.s32.totalorder %s2043_s5, 0 }
  0x9e   : > { %s1771_s22 = scalar_lea.hbm %s2050_s0, %s1033_s11  ;;  %s1296_s18 = scalar_lea.hbm %s2050_s0, 1024 }
  0x9f   : > { %s1291_s19 = scalar_lea.hbm %s1771_s22, 512  ;;  %p1297_p6 = scmp.lt.u32.totalorder %s1771_s22, %s2050_s0 }
  0xa0   : > { %p1292_p8 = scmp.ne.s32.totalorder %s1771_s22, %s1291_s19  ;;  %p1298_p4 = scmp.lt.u32.totalorder %s1296_s18, %s1291_s19 }
  0xa1   : > { %p1300_p2 = scmp.lt.u32.totalorder %s1291_s19, %s1771_s22 }
  0xa2   : > { %p1294_p9 = pnand %p1292_p8, %p2051_p10  ;;  %p1299_p12 = por %p1298_p4, %p1297_p6 }
  0xa4   : > { %p1295_p3 = pneg %p1294_p9  ;;  %p1301_p11 = por %p1300_p2, %p1299_p12 }
  0xa6   : > { %p1302_p1 = pnand %p1301_p11, %p1295_p3 }
  0xa8   : > { %1305 = shalt.err (!%p1302_p1)
}
  0xa9   : > { %s1306_s16 = scalar_lea.vmem %s1773_s24, 512  ;;  %s1483_s1 = smov [#allocation2]  }
  0xaa   : > { %p1307_p7 = scmp.ne.s32.totalorder %s1773_s24, %s1306_s16  ;;  %s1311_s20 = sshll.u32 %s1483_s1, 4  ;;  %s1312_s20 = int_to_ptr.vmem [resolvable:$false] %s1311_s20 }
  0xab   : > { %s1313_s23 = scalar_lea.vmem %s1312_s20, 1024  ;;  %p1314_p0 = scmp.lt.s32.totalorder %s1773_s24, %s1312_s20 }
  0xac   : > { %p1309_p13 = pnand %p1307_p7, %p2051_p10  ;;  %p1315_p8 = scmp.lt.s32.totalorder %s1313_s23, %s1306_s16 }
  0xae   : > { %p1310_p5 = pneg %p1309_p13  ;;  %p1316_p9 = por %p1315_p8, %p1314_p0 }
  0xb0   : > { %p1317_p6 = pnand %p1316_p9, %p1310_p5 }
  0xb2   : > { %1320 = shalt.err (!%p1317_p6)
}
  0xb3   : > { %p2052_p3 = scmp.ne.s32.totalorder %s2039_s12, 0  ;;  %s2053_s19 = smov 8  }
  0xb4   : > { %s2054_s11 = smov 128   ;;  %s354_s18 = scalar_lea.vmem [#allocation7], %s1648_s8 }
  0xb5   : > { %1077 = dma.hbm_to_vmem [thread:$0]  (!%p2052_p3), %s1771_s22, 512, %s1773_s24, %s312_s17, %s2054_s11, %s2054_s11, %s2053_s19  }
  0xb6   : > { %s361_s14 = sshll.u32 %s354_s18, 4  ;;  %s1813_s1 = scalar_lea.hbm %s1993_s4, %s1665_s15  ;;  %s362_s14 = int_to_ptr.vmem [resolvable:$true] %s361_s14 }
  0xb7   : > { %s1321_s20 = scalar_lea.hbm %s1779_s9, 16  ;;  %s1326_s3 = scalar_lea.hbm %s1991_s2, 32 }
  0xb8   : > { %p1322_p4 = scmp.ne.s32.totalorder %s1779_s9, %s1321_s20  ;;  %p1327_p11 = scmp.lt.u32.totalorder %s1779_s9, %s1991_s2 }
  0xb9   : > { %p1328_p1 = scmp.lt.u32.totalorder %s1326_s3, %s1321_s20  ;;  %p1330_p13 = scmp.lt.u32.totalorder %s1321_s20, %s1779_s9 }
  0xba   : > { %p1324_p12 = pnand %p1322_p4, %p2051_p10 }
  0xbb   : > { %p1329_p7 = por %p1328_p1, %p1327_p11 }
  0xbc   : > { %p1325_p2 = pneg %p1324_p12 }
  0xbd   : > { %p1331_p5 = por %p1330_p13, %p1329_p7 }
  0xbf   : > { %p1332_p0 = pnand %p1331_p5, %p1325_p2 }
  0xc1   : > { %1335 = shalt.err (!%p1332_p0)
}
  0xc2   : > { %s1336_s15 = scalar_lea.vmem %s362_s14, 16  ;;  %s1484_s22 = smov [#allocation7]  }
  0xc3   : > { %p1337_p8 = scmp.ne.s32.totalorder %s362_s14, %s1336_s15  ;;  %s1341_s24 = sshll.u32 %s1484_s22, 4  ;;  %s1342_s24 = int_to_ptr.vmem [resolvable:$false] %s1341_s24 }
  0xc4   : > { %s1343_s0 = scalar_lea.vmem %s1342_s24, 32  ;;  %p1344_p4 = scmp.lt.s32.totalorder %s362_s14, %s1342_s24 }
  0xc5   : > { %p1339_p9 = pnand %p1337_p8, %p2051_p10  ;;  %p1345_p12 = scmp.lt.s32.totalorder %s1343_s0, %s1336_s15 }
  0xc7   : > { %p1340_p6 = pneg %p1339_p9  ;;  %p1346_p3 = por %p1345_p12, %p1344_p4 }
  0xc9   : > { %p1347_p1 = pnand %p1346_p3, %p1340_p6 }
  0xcb   : > { %1350 = shalt.err (!%p1347_p1)
}
  0xcc   : > { %p2055_p11 = scmp.ne.s32.totalorder %s2039_s12, 0  ;;  %s388_s3 = scalar_lea.vmem [#allocation10], %s1648_s8 }
  0xcd   : > { %s395_s6 = sshll.u32 %s388_s3, 4  ;;  %s1351_s28 = scalar_lea.hbm %s1813_s1, 16  ;;  %s396_s6 = int_to_ptr.vmem [resolvable:$true] %s395_s6 }
  0xce   : > { %1083 = dma.hbm_to_vmem [thread:$0]  (!%p2055_p11), %s1779_s9, 16, %s362_s14, %s1678_s21  }
  0xcf   : > { %p1352_p2 = scmp.ne.s32.totalorder %s1813_s1, %s1351_s28  ;;  %s1356_s11 = scalar_lea.hbm %s1993_s4, 32 }
  0xd0   : > { %p1357_p13 = scmp.lt.u32.totalorder %s1813_s1, %s1993_s4  ;;  %p1358_p5 = scmp.lt.u32.totalorder %s1356_s11, %s1351_s28 }
  0xd1   : > { %p1354_p7 = pnand %p1352_p2, %p2051_p10  ;;  %p1360_p8 = scmp.lt.u32.totalorder %s1351_s28, %s1813_s1 }
  0xd2   : > { %p1359_p0 = por %p1358_p5, %p1357_p13 }
  0xd3   : > { %p1355_p3 = pneg %p1354_p7 }
  0xd4   : > { %p1361_p9 = por %p1360_p8, %p1359_p0 }
  0xd6   : > { %p1362_p6 = pnand %p1361_p9, %p1355_p3 }
  0xd8   : > { %1365 = shalt.err (!%p1362_p6)
}
  0xd9   : > { %s1366_s21 = scalar_lea.vmem %s396_s6, 16  ;;  %s1485_s8 = smov [#allocation10]  }
  0xda   : > { %p1367_p4 = scmp.ne.s32.totalorder %s396_s6, %s1366_s21  ;;  %s1371_s9 = sshll.u32 %s1485_s8, 4  ;;  %s1372_s9 = int_to_ptr.vmem [resolvable:$false] %s1371_s9 }
  0xdb   : > { %s1373_s14 = scalar_lea.vmem %s1372_s9, 32  ;;  %p1374_p2 = scmp.lt.s32.totalorder %s396_s6, %s1372_s9 }
  0xdc   : > { %p1369_p12 = pnand %p1367_p4, %p2051_p10  ;;  %p1375_p7 = scmp.lt.s32.totalorder %s1373_s14, %s1366_s21 }
  0xde   : > { %p1370_p1 = pneg %p1369_p12  ;;  %p1376_p11 = por %p1375_p7, %p1374_p2 }
  0xe0   : > { %p1377_p5 = pnand %p1376_p11, %p1370_p1 }
  0xe2   : > { %1380 = shalt.err (!%p1377_p5)
}
  0xe3   : > { %p2056_p13 = scmp.ne.s32.totalorder %s2039_s12, 0  ;;  %p2057_p3 = scmp.ne.s32.totalorder %s2034_s13, 0 }
  0xe4   : > { %s1855_s5 = sand.u32 (!%p2057_p3), 1, %s1459_s25   ;;  %p2058_p10 = scmp.ne.s32.totalorder (!%p2057_p3), %s2029_s10, 0 }
  0xe5   : > { %1089 = dma.hbm_to_vmem [thread:$0]  (!%p2056_p13), %s1813_s1, 16, %s396_s6, %s1721_s26  }
  0xe6   : > { %404 = sbr.rel (%p2057_p3) target bundleno = 805 (0x325), region = 48  ;;  %s1006_s16 = sshll.u32 (!%p2057_p3), %s1855_s5, 5 }
  0xe7   : > { %s407_s20 = scalar_lea.sflag (!%p2057_p3), [#allocation3], %s1855_s5  ;;  %s410_s23 = scalar_lea.vmem (!%p2057_p3), [#allocation2], %s1006_s16 }
  0xed   : > { %1434 = dma.done.wait (%p2058_p10), %s407_s20, 512  }
  0xee   : > { %1436 = vsyncadd (%p2058_p10), %s407_s20, 4294966784  ;;  %s415_s26 = sand.u32 1, %s1561_s30   ;;  %s418_s13 = scalar_lea.vmem [#allocation5], %s1855_s5 }
  0xef   : > { %s416_s12 = scalar_lea.sflag [#allocation6], %s415_s26 }
  0xf0   : > { %1438 = dma.done.wait (%p2058_p10), %s416_s12, 32  }
  0xf1   : > { %1440 = vsyncadd (%p2058_p10), %s416_s12, 4294967264  ;;  %s426_s1 = scalar_lea.vmem [#allocation7], %s1855_s5  ;;  %s432_s15 = scalar_lea.sflag [#allocation9], %s415_s26 }
  0xf2   : > { %s434_s22 = scalar_lea.vmem [#allocation8], %s1855_s5 }
  0xf3   : > { %1442 = dma.done.wait (%p2058_p10), %s432_s15, 32  }
  0xf4   : > { %1444 = vsyncadd (%p2058_p10), %s432_s15, 4294967264  ;;  %s442_s24 = scalar_lea.vmem [#allocation10], %s1855_s5  ;;  %p2059_p11 = scmp.eq.s32.totalorder %s1561_s30, 0 }
  0xf6   : > { %1446 = dma.done.wait (%p2059_p11), [#allocation12], 1056   ;;  %p2060_p0 = pmov %p2059_p11 }
  0xf7   : > { %vm507_vm0 = vcmask 523264   ;;  %v503_v0 = vld [vmem:[%s410_s23] sm:$0xff]  ;;  %v505_v1 = vld [vmem:[%s410_s23 + $0x10] sm:$0xff]  ;;  %v504_v2 = vld [vmem:[%s410_s23 + $0x8] sm:$0xff]  ;;  %v1486_v36 = vmov 0   ;;  %vm777_vm1 = vcmask 1043456  }
  0xf8   : > { %1448 = vsyncadd (%p2060_p0), [#allocation12], 4294966240  ;;  %v508_v3 = vsel %vm507_vm0, %v503_v0, 0.0  ;;  %v514_v4 = vsel %vm507_vm0, %v505_v1, 0.0  ;;  %v506_v5 = vld [vmem:[%s410_s23 + $0x18] sm:$0xff]  ;;  %v511_v6 = vsel %vm507_vm0, %v504_v2, 0.0  ;;  %732 = vmatprep.mubr.bf16.mxu0 %v1486_v36  ;;  %742 = vmatprep.mubr.bf16.mxu1 %v1486_v36 }
  0xf9   : > { %509 = vadd.xlane.f32.xlu0 %v508_v3  ;;  %515 = vadd.xlane.f32.xlu1 %v514_v4  ;;  %v517_v7 = vsel %vm507_vm0, %v506_v5, 0.0  ;;  %v1155_v28 = vld [vmem:[#allocation11 + $0x4] ss:$8 sps:$4 sm:$0xff]   ;;  %v1157_v29 = vld [vmem:[#allocation11] ss:$8 sps:$4 sm:$0xff]   ;;  %vm778_vm2 = vcmask 523268  }
  0xfa   : > { %700 = vmatprep.subr.bf16.mxu0 %v1155_v28  ;;  %1039 = vmatprep.subr.bf16.mxu1 %v1155_v28  ;;  %v1158_v30 = vld [vmem:[#allocation11 + $0x14] ss:$8 sps:$4 sm:$0xff]   ;;  %v1160_v31 = vld [vmem:[#allocation11 + $0x10] ss:$8 sps:$4 sm:$0xff]   ;;  %v1161_v32 = vld [vmem:[#allocation11 + $0x24] ss:$8 sps:$4 sm:$0xff]  }
  0xfb   : > { %701 = vmatpush1.bf16.msra.mxu0 %v1157_v29  ;;  %1043 = vmatpush1.bf16.msra.mxu1 %v1157_v29  ;;  %v1163_v33 = vld [vmem:[#allocation11 + $0x20] ss:$8 sps:$4 sm:$0xff]   ;;  %v1164_v34 = vld [vmem:[#allocation11 + $0x34] ss:$8 sps:$4 sm:$0xff]   ;;  %v1166_v35 = vld [vmem:[#allocation11 + $0x30] ss:$8 sps:$4 sm:$0xff]  }
  0xfc   : > { %702 = vmatprep.subr.bf16.mxu0 %v1158_v30  ;;  %1040 = vmatprep.subr.bf16.mxu1 %v1158_v30  ;;  %v1010_v49 = vld [vmem:[%s434_s22] ss:$0 sm:$0xff]  ;;  %vm1920_vm3 = vmor %vm778_vm2, %vm777_vm1  ;;  %s496_s30 = scalar_lea.vmem [#allocation14], %s1006_s16  ;;  %s2063_s0 = sld [smem:[#allocation23_spill]] }
  0xfd   : > { %512 = vadd.xlane.f32.xlu0 %v511_v6  ;;  %518 = vadd.xlane.f32.xlu1 %v517_v7  ;;  %v1011_v51 = vld [vmem:[%s418_s13] ss:$0 sm:$0xff]  ;;  %v620_v53 = vadd.f32 1.0, %v1010_v49  ;;  %s803_s10 = sshll.u32 %s496_s30, 4  ;;  %s1038_s3 = sshll.u32 %s1467_s27, 9  ;;  %s1929_s10 = int_to_ptr.vmem [resolvable:$true] %s803_s10 }
  0xfe   : > { %v621_v54 = vadd.f32 1.0, %v1011_v51  ;;  %v1012_v60 = vld [vmem:[%s442_s24] ss:$0 sm:$0xff]  ;;  %s2064_s17 = sld [smem:[#allocation32_spill]]  ;;  %s785_s27 = scalar_lea.sflag [#allocation4], %s1855_s5 }
  0xff   : > { %703 = vmatpush1.bf16.msra.mxu0 %v1160_v31  ;;  %1044 = vmatpush1.bf16.msra.mxu1 %v1160_v31  ;;  %v1013_v61 = vld [vmem:[%s426_s1] ss:$0 sm:$0xff]  ;;  %s1381_s11 = scalar_lea.vmem %s1929_s10, 512  ;;  %s1487_s18 = smov [#allocation14]  }
 0x100   : > { %704 = vmatprep.subr.bf16.mxu0 %v1161_v32  ;;  %1041 = vmatprep.subr.bf16.mxu1 %v1161_v32  ;;  %p1382_p8 = scmp.ne.s32.totalorder %s1929_s10, %s1381_s11  ;;  %s1385_s7 = sshll.u32 %s1487_s18, 4  ;;  %s1386_s7 = int_to_ptr.vmem [resolvable:$false] %s1385_s7 }
 0x101   : > { %s1387_s21 = scalar_lea.vmem %s1386_s7, 1024  ;;  %p1388_p12 = scmp.lt.s32.totalorder %s1929_s10, %s1386_s7 }
 0x102   : > { %p2065_p9 = scmp.ne.s32.totalorder %s2063_s0, 0  ;;  %p1389_p1 = scmp.lt.s32.totalorder %s1387_s21, %s1381_s11 }
 0x103   : > { %705 = vmatpush1.bf16.msra.mxu0 %v1163_v33  ;;  %1045 = vmatpush1.bf16.msra.mxu1 %v1163_v33 }
 0x104   : > { %706 = vmatprep.subr.bf16.mxu0 %v1164_v34  ;;  %1042 = vmatprep.subr.bf16.mxu1 %v1164_v34  ;;  %s1936_s19 = scalar_lea.hbm %s2064_s17, %s1038_s3  ;;  %p1383_p6 = pnand %p1382_p8, %p2065_p9 }
 0x105   : > { %p1390_p2 = por %p1389_p1, %p1388_p12 }
 0x106   : > { %p1384_p4 = pneg %p1383_p6 }
 0x107   : > { %707 = vmatpush1.bf16.msra.mxu0 %v1166_v35  ;;  %1046 = vmatpush1.bf16.msra.mxu1 %v1166_v35 }
 0x108   : > { %p1391_p7 = pnand %p1390_p2, %p1384_p4 }
 0x186   : > { %v510_v8 = vpop.xlane.xlu0 %509  ;;  %v516_v9 = vpop.xlane.xlu1 %515 }
 0x187   : > { %v521_v10 = vmul.f32 0.015625, %v510_v8  ;;  %v523_v11 = vmul.f32 0.015625, %v516_v9  ;;  %v644_v9 = vlaneseq }
 0x189   : > { %v1886_v12 = vsub.f32 %v503_v0, %v521_v10  ;;  %v1888_v13 = vsub.f32 %v505_v1, %v523_v11  ;;  %v645_v10 = vshrl.u32 %v644_v9, 7 }
 0x18a   : > { %v513_v14 = vpop.xlane.xlu0 %512  ;;  %v519_v15 = vpop.xlane.xlu1 %518 }
 0x18b   : > { %v522_v16 = vmul.f32 0.015625, %v513_v14  ;;  %v524_v17 = vmul.f32 0.015625, %v519_v15  ;;  %v529_v18 = vmul.f32 %v1886_v12, %v1886_v12  ;;  %v531_v19 = vmul.f32 %v1888_v13, %v1888_v13 }
 0x18c   : > { %v646_v11 = vsub.s32 0, %v645_v10 }
 0x18d   : > { %v1894_v20 = vsub.f32 %v504_v2, %v522_v16  ;;  %v1896_v21 = vsub.f32 %v506_v5, %v524_v17  ;;  %v533_v22 = vsel %vm507_vm0, %v529_v18, 0.0  ;;  %v539_v23 = vsel %vm507_vm0, %v531_v19, 0.0 }
 0x18e   : > { %534 = vadd.xlane.f32.xlu0 %v533_v22 }
 0x18f   : > { %v530_v24 = vmul.f32 %v1894_v20, %v1894_v20  ;;  %v532_v25 = vmul.f32 %v1896_v21, %v1896_v21 }
 0x191   : > { %v536_v26 = vsel %vm507_vm0, %v530_v24, 0.0  ;;  %v542_v27 = vsel %vm507_vm0, %v532_v25, 0.0 }
 0x192   : > { %540 = vadd.xlane.f32.xlu0 %v539_v23  ;;  %537 = vadd.xlane.f32.xlu1 %v536_v26 }
 0x196   : > { %543 = vadd.xlane.f32.xlu1 %v542_v27 }
 0x21b   : > { %v535_v37 = vpop.xlane.xlu0 %534 }
 0x21c   : > { %v545_v38 = vmul.f32 0.015625, %v535_v37 }
 0x21e   : > { %v549_v39 = vadd.f32 1e-06, %v545_v38 }
 0x21f   : > { %v538_v40 = vpop.xlane.xlu1 %537  ;;  %v541_v41 = vpop.xlane.xlu0 %540 }
 0x220   : > { %1167 = vrsqrt.f32 %v549_v39  ;;  %v546_v42 = vmul.f32 0.015625, %v538_v40  ;;  %v547_v43 = vmul.f32 0.015625, %v541_v41 }
 0x222   : > { %v550_v44 = vadd.f32 1e-06, %v546_v42  ;;  %v551_v45 = vadd.f32 1e-06, %v547_v43 }
 0x223   : > { %v544_v46 = vpop.xlane.xlu1 %543 }
 0x224   : > { %1169 = vrsqrt.f32 %v550_v44  ;;  %v548_v47 = vmul.f32 0.015625, %v544_v46 }
 0x225   : > { %1171 = vrsqrt.f32 %v551_v45 }
 0x226   : > { %v552_v48 = vadd.f32 1e-06, %v548_v47 }
 0x228   : > { %1173 = vrsqrt.f32 %v552_v48 }
 0x22a   : > { %v1168_v50 = vpop.eup %1167 }
 0x22b   : > { %v557_v52 = vmul.f32 %v1168_v50, %v1886_v12  ;;  %v642_v12 = vld [vmem:[#allocation13] sm:$0x3] }
 0x22c   : > { %v647_v14 = vrot.slane %v642_v12, %v646_v11 }
 0x22d   : > { %v624_v58 = vmul.f32 %v620_v53, %v557_v52 }
 0x22e   : > { %v1170_v55 = vpop.eup %1169 }
 0x22f   : > { %v1172_v56 = vpop.eup %1171  ;;  %v558_v57 = vmul.f32 %v1170_v55, %v1894_v20  ;;  %v628_v1 = vadd.f32 %v1012_v60, %v624_v58 }
 0x230   : > { %v559_v59 = vmul.f32 %v1172_v56, %v1888_v13  ;;  %v650_v13 = vsub.s32 1, %v645_v10 }
 0x231   : > { %v625_v62 = vmul.f32 %v621_v54, %v558_v57 }
 0x232   : > { %v1174_v63 = vpop.eup %1173  ;;  %v626_v3 = vmul.f32 %v621_v54, %v559_v59  ;;  %v651_v15 = vrot.slane %v642_v12, %v650_v13 }
 0x233   : > { %v560_v0 = vmul.f32 %v1174_v63, %v1896_v21  ;;  %v629_v2 = vadd.f32 %v1013_v61, %v625_v62 }
 0x234   : > { %v630_v6 = vadd.f32 %v1013_v61, %v626_v3 }
 0x235   : > { %v632_v4 = vpack.c.bf16 %v629_v2, %v628_v1  ;;  %v627_v5 = vmul.f32 %v621_v54, %v560_v0 }
 0x237   : > { %1022 = vmatmul.mubr.msk.bf16.vlgmr.msra.gmra.mrb[0].mxu0 %vm507_vm0, %v632_v4  ;;  %v631_v7 = vadd.f32 %v1013_v61, %v627_v5 }
 0x239   : > { %v633_v8 = vpack.c.bf16 %v631_v7, %v630_v6 }
 0x23b   : > { %1023 = vmatmul.mubr.msk.bf16.vlgmr.msra.gmra.mrb[0].mxu1 %vm507_vm0, %v633_v8 }
 0x30a   : > { %v734_v16 = vpop.f32.mrb[0].mxu0 }
 0x30b   : > { %v735_v17 = vadd.f32 %v734_v16, %v647_v14  ;;  %v736_v18 = vpop.f32.mrb[1].mxu0 }
 0x30c   : > { %v737_v19 = vadd.f32 %v736_v18, %v651_v15  ;;  %v738_v20 = vpop.f32.mrb[2].mxu0 }
 0x30d   : > { %v739_v22 = vadd.f32 %v738_v20, %v647_v14  ;;  %v740_v23 = vpop.f32.mrb[3].mxu0 }
 0x30e   : > { %v1034_v24 = vpack.c.bf16 %v737_v19, %v735_v17  ;;  %v741_v25 = vadd.f32 %v740_v23, %v651_v15  ;;  %v744_v26 = vpop.f32.mrb[0].mxu1 }
 0x30f   : > { %v745_v27 = vadd.f32 %v744_v26, %v647_v14  ;;  %v746_v28 = vpop.f32.mrb[1].mxu1 }
 0x310   : > { %780 = vst.msk [vmem:[%s496_s30] sm:$0xff] %vm1920_vm3, %v1034_v24  ;;  %v1035_v29 = vpack.c.bf16 %v741_v25, %v739_v22  ;;  %v747_v30 = vadd.f32 %v746_v28, %v651_v15  ;;  %v748_v31 = vpop.f32.mrb[2].mxu1 }
 0x311   : > { %v749_v32 = vadd.f32 %v748_v31, %v647_v14  ;;  %v750_v33 = vpop.f32.mrb[3].mxu1 }
 0x312   : > { %781 = vst.msk [vmem:[%s496_s30 + $0x8] sm:$0xff] %vm1920_vm3, %v1035_v29  ;;  %v1036_v34 = vpack.c.bf16 %v747_v30, %v745_v27  ;;  %v751_v35 = vadd.f32 %v750_v33, %v651_v15 }
 0x314   : > { %782 = vst.msk [vmem:[%s496_s30 + $0x10] sm:$0xff] %vm1920_vm3, %v1036_v34  ;;  %v1037_v36 = vpack.c.bf16 %v751_v35, %v749_v32 }
 0x316   : > { %783 = vst.msk [vmem:[%s496_s30 + $0x18] sm:$0xff] %vm1920_vm3, %v1037_v36 }
 0x317   : > { %1394 = shalt.err (!%p1391_p7)
}
 0x318   : > { %s1395_s8 = scalar_lea.hbm %s1936_s19, 512  ;;  %s1399_s16 = scalar_lea.hbm %s2064_s17, 1024 }
 0x319   : > { %p1396_p5 = scmp.ne.s32.totalorder %s1936_s19, %s1395_s8  ;;  %p1400_p10 = scmp.lt.u32.totalorder %s1936_s19, %s2064_s17 }
 0x31a   : > { %p1401_p11 = scmp.lt.u32.totalorder %s1399_s16, %s1395_s8  ;;  %p1403_p8 = scmp.lt.u32.totalorder %s1395_s8, %s1936_s19 }
 0x31b   : > { %p1397_p13 = pnand %p1396_p5, %p2065_p9 }
 0x31c   : > { %p1402_p0 = por %p1401_p11, %p1400_p10 }
 0x31d   : > { %p1398_p3 = pneg %p1397_p13 }
 0x31e   : > { %p1404_p6 = por %p1403_p8, %p1402_p0 }
 0x320   : > { %p1405_p4 = pnand %p1404_p6, %p1398_p3 }
 0x322   : > { %1408 = shalt.err (!%p1405_p4)
}
 0x323   : > { %s1488_s26 = smov 128   ;;  %s1489_s12 = smov 8  }
 0x324   : > { %1065 = dma.vmem_to_hbm [thread:$0]  (%p2065_p9), %s1929_s10, 512, %s1936_s19, %s785_s27, %s1488_s26, %s1488_s26, %s1489_s12  }
 0x325 PF: > { %s2066_s13 = sld [smem:[#allocation20_spill]]  ;;  %s2067_s1 = sld [smem:[#allocation24_spill]] }
 0x326   : > { %p2069_p1 = scmp.ge.s32.totalorder %s1475_s29, 2 }
 0x32b   : > { %s818_s15 = sand.u32 1, %s2066_s13   ;;  %p2068_p12 = scmp.ne.s32.totalorder %s2067_s1, 0 }
 0x32c   : > { %s819_s22 = scalar_lea.sflag [#allocation4], %s818_s15 }
 0x32d   : > { %p1091_p2 = pnand %p2069_p1, %p2068_p12 }
 0x32f   : > { %1450 = dma.done.wait (!%p1091_p2), %s819_s22, 512  }
 0x330   : > { %1452 = vsyncadd (!%p1091_p2), %s819_s22, 4294966784  ;;  %s30_s29 = sadd.s32 1, %s1475_s29   ;;  %s2070_s30 = sld [smem:[#allocation21_spill]] }
 0x331   : > { %p27_p7 = scmp.ge.s32.totalorder %s30_s29, 4   ;;  %s2071_s26 = sld [smem:[#allocation26_spill]] }
 0x332   : > { %s2072_s27 = sld [smem:[#allocation22_spill]]  ;;  %s2073_s28 = sld [smem:[#allocation25_spill]] }
 0x333   : > { %s2074_s24 = smov %s1459_s25  ;;  %29 = sbr.rel (!%p27_p7) target bundleno = 18 (0x12), region = 151 }
 0x336   : > { %s2075_s25 = smov %s2070_s30 }
 0x33a   :  { %824 = vsyncpa [#allocation3], 1 }
 0x33b   :  { %826 = vsyncpa [#allocation3 + $0x1], 1 }
 0x33c   :  { %827 = vsyncpa [#allocation6], 1 }
 0x33d   :  { %829 = vsyncpa [#allocation6 + $0x1], 1 }
 0x33e   :  { %830 = vsyncpa [#allocation9], 1 }
 0x33f   :  { %832 = vsyncpa [#allocation9 + $0x1], 1 }
 0x340   :  { %833 = vsyncpa [#allocation12], 1 }
 0x341   :  { %834 = vsyncpa [#allocation4], 1 }
 0x342   :  { %836 = vsyncpa [#allocation4 + $0x1], 1 }

// kernel: transformer_block_forward.17
= control target key start
LH: loop header
LB: loop body
LE: loop exit
PB: predicated region body
PF: predicated region fallthrough
CT: control target
= control target key end

     0   :  { %vm107_vm0 = vcmask 130048   ;;  %vm500_vm1 = vcmask 125952   ;;  %s1165_s0 = inlined_call_operand.vmem [shape: bf16[256,16], index: 0, kind: input, shape index: {}]   ;;  %s1166_s1 = inlined_call_operand.vmem [shape: f32[1,16], index: 1, kind: input, shape index: {}]   ;;  %s1167_s2 = inlined_call_operand.vmem [shape: bf16[256,16], index: 2, kind: output, shape index: {}]  }
   0x1   :  { %v666_v0 = vld [vmem:[%s1165_s0 + $0x8] sm:$0xff]   ;;  %v603_v1 = vld [vmem:[%s1165_s0] sm:$0xff]   ;;  %v667_v2 = vld [vmem:[%s1165_s0 + $0x10] sm:$0xff]  }
   0x2   :  { %v769_v3 = vunpack.c.l.bf16 %v666_v0  ;;  %v771_v4 = vunpack.c.l.bf16 %v603_v1  ;;  %v773_v5 = vunpack.c.h.bf16 %v666_v0  ;;  %v775_v6 = vunpack.c.h.bf16 %v603_v1  ;;  %v668_v13 = vld [vmem:[%s1165_s0 + $0x18] sm:$0xff]   ;;  %v669_v22 = vld [vmem:[%s1165_s0 + $0x20] sm:$0xff]   ;;  %v670_v29 = vld [vmem:[%s1165_s0 + $0x28] sm:$0xff]  }
   0x3   :  { %v777_v7 = vunpack.c.h.bf16 %v667_v2  ;;  %v779_v8 = vunpack.c.l.bf16 %v667_v2  ;;  %v794_v16 = vunpack.c.h.bf16 %v668_v13  ;;  %v796_v17 = vunpack.c.l.bf16 %v668_v13  ;;  %v671_v36 = vld [vmem:[%s1165_s0 + $0x30] sm:$0xff]   ;;  %v672_v43 = vld [vmem:[%s1165_s0 + $0x38] sm:$0xff]   ;;  %v673_v50 = vld [vmem:[%s1165_s0 + $0x40] sm:$0xff]  }
   0x4   :  { %v77_v9 = vmul.f32 %v769_v3, %v769_v3  ;;  %v75_v10 = vmul.f32 %v771_v4, %v771_v4  ;;  %v78_v11 = vmul.f32 %v773_v5, %v773_v5  ;;  %v76_v12 = vmul.f32 %v775_v6, %v775_v6  ;;  %v674_v57 = vld [vmem:[%s1165_s0 + $0x48] sm:$0xff]   ;;  %v675_v0 = vld [vmem:[%s1165_s0 + $0x50] sm:$0xff]   ;;  %v676_v13 = vld [vmem:[%s1165_s0 + $0x58] sm:$0xff]  }
   0x5   :  { %v80_v20 = vmul.f32 %v777_v7, %v777_v7  ;;  %v79_v21 = vmul.f32 %v779_v8, %v779_v8  ;;  %v82_v23 = vmul.f32 %v794_v16, %v794_v16  ;;  %v81_v24 = vmul.f32 %v796_v17, %v796_v17 }
   0x6   :  { %v114_v14 = vsel %vm107_vm0, %v77_v9, 0.0  ;;  %v108_v15 = vsel %vm107_vm0, %v75_v10, 0.0  ;;  %v117_v18 = vsel %vm107_vm0, %v78_v11, 0.0  ;;  %v111_v19 = vsel %vm107_vm0, %v76_v12, 0.0 }
   0x7   :  { %115 = vadd.xlane.f32.xlu1 %v114_v14  ;;  %109 = vadd.xlane.f32.xlu0 %v108_v15  ;;  %v123_v25 = vsel %vm107_vm0, %v80_v20, 0.0  ;;  %v120_v26 = vsel %vm107_vm0, %v79_v21, 0.0  ;;  %v813_v27 = vunpack.c.h.bf16 %v669_v22  ;;  %v815_v28 = vunpack.c.l.bf16 %v669_v22  ;;  %v677_v22 = vld [vmem:[%s1165_s0 + $0x60] sm:$0xff]  }
   0x8   :  { %v129_v30 = vsel %vm107_vm0, %v82_v23, 0.0  ;;  %v126_v31 = vsel %vm107_vm0, %v81_v24, 0.0  ;;  %v826_v34 = vunpack.c.h.bf16 %v670_v29  ;;  %v828_v35 = vunpack.c.l.bf16 %v670_v29 }
   0x9   :  { %v84_v32 = vmul.f32 %v813_v27, %v813_v27  ;;  %v83_v33 = vmul.f32 %v815_v28, %v815_v28  ;;  %v833_v37 = vunpack.c.h.bf16 %v671_v36  ;;  %v835_v38 = vunpack.c.l.bf16 %v671_v36 }
   0xa   :  { %v86_v41 = vmul.f32 %v826_v34, %v826_v34  ;;  %v85_v42 = vmul.f32 %v828_v35, %v828_v35  ;;  %v846_v44 = vunpack.c.h.bf16 %v672_v43  ;;  %v848_v45 = vunpack.c.l.bf16 %v672_v43 }
   0xb   :  { %118 = vadd.xlane.f32.xlu1 %v117_v18  ;;  %112 = vadd.xlane.f32.xlu0 %v111_v19  ;;  %v135_v39 = vsel %vm107_vm0, %v84_v32, 0.0  ;;  %v132_v40 = vsel %vm107_vm0, %v83_v33, 0.0  ;;  %v88_v48 = vmul.f32 %v833_v37, %v833_v37  ;;  %v87_v49 = vmul.f32 %v835_v38, %v835_v38 }
   0xc   :  { %v141_v46 = vsel %vm107_vm0, %v86_v41, 0.0  ;;  %v138_v47 = vsel %vm107_vm0, %v85_v42, 0.0  ;;  %v90_v51 = vmul.f32 %v846_v44, %v846_v44  ;;  %v861_v52 = vunpack.c.h.bf16 %v673_v50  ;;  %v679_v42 = vld [vmem:[%s1165_s0 + $0x70] sm:$0xff]  }
   0xd   :  { %v147_v53 = vsel %vm107_vm0, %v88_v48, 0.0  ;;  %v144_v54 = vsel %vm107_vm0, %v87_v49, 0.0  ;;  %v89_v55 = vmul.f32 %v848_v45, %v848_v45  ;;  %v867_v56 = vunpack.c.l.bf16 %v673_v50 }
   0xe   :  { %v153_v58 = vsel %vm107_vm0, %v90_v51, 0.0  ;;  %v92_v59 = vmul.f32 %v861_v52, %v861_v52  ;;  %v878_v62 = vunpack.c.h.bf16 %v674_v57  ;;  %v880_v63 = vunpack.c.l.bf16 %v674_v57  ;;  %v680_v51 = vld [vmem:[%s1165_s0 + $0x78] sm:$0xff]  }
   0xf   :  { %124 = vadd.xlane.f32.xlu1 %v123_v25  ;;  %121 = vadd.xlane.f32.xlu0 %v120_v26  ;;  %v150_v60 = vsel %vm107_vm0, %v89_v55, 0.0  ;;  %v91_v61 = vmul.f32 %v867_v56, %v867_v56  ;;  %v885_v1 = vunpack.c.h.bf16 %v675_v0  ;;  %v887_v2 = vunpack.c.l.bf16 %v675_v0 }
  0x10   :  { %v159_v9 = vsel %vm107_vm0, %v92_v59, 0.0  ;;  %v94_v11 = vmul.f32 %v878_v62, %v878_v62  ;;  %v93_v12 = vmul.f32 %v880_v63, %v880_v63  ;;  %v900_v15 = vunpack.c.h.bf16 %v676_v13 }
  0x11   :  { %v156_v10 = vsel %vm107_vm0, %v91_v61, 0.0  ;;  %v96_v14 = vmul.f32 %v885_v1, %v885_v1  ;;  %v95_v20 = vmul.f32 %v887_v2, %v887_v2  ;;  %v906_v21 = vunpack.c.l.bf16 %v676_v13 }
  0x12   :  { %v165_v18 = vsel %vm107_vm0, %v94_v11, 0.0  ;;  %v162_v19 = vsel %vm107_vm0, %v93_v12, 0.0  ;;  %v98_v23 = vmul.f32 %v900_v15, %v900_v15  ;;  %v913_v24 = vunpack.c.h.bf16 %v677_v22 }
  0x13   :  { %130 = vadd.xlane.f32.xlu1 %v129_v30  ;;  %127 = vadd.xlane.f32.xlu0 %v126_v31  ;;  %v171_v25 = vsel %vm107_vm0, %v96_v14, 0.0  ;;  %v168_v26 = vsel %vm107_vm0, %v95_v20, 0.0  ;;  %v97_v29 = vmul.f32 %v906_v21, %v906_v21  ;;  %v919_v30 = vunpack.c.l.bf16 %v677_v22  ;;  %v678_v31 = vld [vmem:[%s1165_s0 + $0x68] sm:$0xff]  }
  0x14   :  { %v177_v32 = vsel %vm107_vm0, %v98_v23, 0.0  ;;  %v100_v33 = vmul.f32 %v913_v24, %v913_v24  ;;  %v932_v41 = vunpack.c.l.bf16 %v678_v31  ;;  %v937_v43 = vunpack.c.h.bf16 %v679_v42 }
  0x15   :  { %v174_v36 = vsel %vm107_vm0, %v97_v29, 0.0  ;;  %v958_v59 = vunpack.c.l.bf16 %v680_v51 }
  0x16   :  { %v101_v50 = vmul.f32 %v932_v41, %v932_v41 }
  0x17   :  { %136 = vadd.xlane.f32.xlu1 %v135_v39  ;;  %133 = vadd.xlane.f32.xlu0 %v132_v40  ;;  %v99_v39 = vmul.f32 %v919_v30, %v919_v30  ;;  %v930_v40 = vunpack.c.h.bf16 %v678_v31 }
  0x18   :  { %v186_v57 = vsel %vm107_vm0, %v101_v50, 0.0 }
  0x19   :  { %v180_v48 = vsel %vm107_vm0, %v99_v39, 0.0  ;;  %v102_v49 = vmul.f32 %v930_v40, %v930_v40 }
  0x1b   :  { %142 = vadd.xlane.f32.xlu1 %v141_v46  ;;  %139 = vadd.xlane.f32.xlu0 %v138_v47  ;;  %v939_v46 = vunpack.c.l.bf16 %v679_v42  ;;  %v183_v47 = vsel %vm107_vm0, %v100_v33, 0.0  ;;  %v189_v55 = vsel %vm107_vm0, %v102_v49, 0.0 }
  0x1f   :  { %148 = vadd.xlane.f32.xlu1 %v147_v53  ;;  %145 = vadd.xlane.f32.xlu0 %v144_v54  ;;  %v104_v53 = vmul.f32 %v937_v43, %v937_v43  ;;  %v952_v54 = vunpack.c.h.bf16 %v680_v51 }
  0x21   :  { %v106_v0 = vmul.f32 %v952_v54, %v952_v54 }
  0x23   :  { %154 = vadd.xlane.f32.xlu1 %v153_v58  ;;  %151 = vadd.xlane.f32.xlu0 %v150_v60  ;;  %v103_v58 = vmul.f32 %v939_v46, %v939_v46  ;;  %v195_v60 = vsel %vm107_vm0, %v104_v53, 0.0 }
  0x25   :  { %v192_v61 = vsel %vm107_vm0, %v103_v58, 0.0 }
  0x27   :  { %160 = vadd.xlane.f32.xlu1 %v159_v9  ;;  %157 = vadd.xlane.f32.xlu0 %v156_v10  ;;  %v105_v9 = vmul.f32 %v958_v59, %v958_v59  ;;  %v201_v10 = vsel %vm107_vm0, %v106_v0, 0.0 }
  0x29   :  { %v198_v11 = vsel %vm107_vm0, %v105_v9, 0.0 }
  0x2b   :  { %166 = vadd.xlane.f32.xlu1 %v165_v18  ;;  %163 = vadd.xlane.f32.xlu0 %v162_v19 }
  0x2f   :  { %172 = vadd.xlane.f32.xlu1 %v171_v25  ;;  %169 = vadd.xlane.f32.xlu0 %v168_v26 }
  0x33   :  { %178 = vadd.xlane.f32.xlu1 %v177_v32  ;;  %175 = vadd.xlane.f32.xlu0 %v174_v36 }
  0x37   :  { %184 = vadd.xlane.f32.xlu1 %v183_v47  ;;  %181 = vadd.xlane.f32.xlu0 %v180_v48 }
  0x3b   :  { %190 = vadd.xlane.f32.xlu1 %v189_v55  ;;  %187 = vadd.xlane.f32.xlu0 %v186_v57  ;;  %v971_v55 = vld [vmem:[%s1166_s1] ss:$0 sm:$0xff] }
  0x3f   :  { %196 = vadd.xlane.f32.xlu1 %v195_v60  ;;  %193 = vadd.xlane.f32.xlu0 %v192_v61 }
  0x43   :  { %202 = vadd.xlane.f32.xlu1 %v201_v10  ;;  %199 = vadd.xlane.f32.xlu0 %v198_v11 }
  0x94   :  { %v116_v12 = vpop.xlane.xlu1 %115  ;;  %v110_v13 = vpop.xlane.xlu0 %109 }
  0x95   :  { %v207_v14 = vmul.f32 0.0625, %v116_v12  ;;  %v205_v18 = vmul.f32 0.0625, %v110_v13 }
  0x97   :  { %v239_v19 = vadd.f32 1e-06, %v207_v14  ;;  %v237_v20 = vadd.f32 1e-06, %v205_v18 }
  0x98   :  { %v119_v22 = vpop.xlane.xlu1 %118  ;;  %v113_v23 = vpop.xlane.xlu0 %112 }
  0x99   :  { %681 = vrsqrt.f32 %v239_v19  ;;  %v208_v25 = vmul.f32 0.0625, %v119_v22  ;;  %v206_v26 = vmul.f32 0.0625, %v113_v23 }
  0x9a   :  { %683 = vrsqrt.f32 %v237_v20 }
  0x9b   :  { %v240_v29 = vadd.f32 1e-06, %v208_v25  ;;  %v238_v31 = vadd.f32 1e-06, %v206_v26 }
  0x9c   :  { %v125_v32 = vpop.xlane.xlu1 %124  ;;  %v122_v33 = vpop.xlane.xlu0 %121 }
  0x9d   :  { %685 = vrsqrt.f32 %v240_v29  ;;  %v210_v36 = vmul.f32 0.0625, %v125_v32  ;;  %v209_v39 = vmul.f32 0.0625, %v122_v33 }
  0x9e   :  { %687 = vrsqrt.f32 %v238_v31 }
  0x9f   :  { %v242_v42 = vadd.f32 1e-06, %v210_v36  ;;  %v241_v47 = vadd.f32 1e-06, %v209_v39 }
  0xa0   :  { %v131_v48 = vpop.xlane.xlu1 %130  ;;  %v128_v49 = vpop.xlane.xlu0 %127 }
  0xa1   :  { %689 = vrsqrt.f32 %v242_v42  ;;  %v212_v50 = vmul.f32 0.0625, %v131_v48  ;;  %v211_v51 = vmul.f32 0.0625, %v128_v49 }
  0xa2   :  { %691 = vrsqrt.f32 %v241_v47 }
  0xa3   :  { %v682_v53 = vpop.eup %681  ;;  %v244_v57 = vadd.f32 1e-06, %v212_v50  ;;  %v243_v58 = vadd.f32 1e-06, %v211_v51 }
  0xa4   :  { %v684_v60 = vpop.eup %683  ;;  %v303_v61 = vmul.f32 %v682_v53, %v769_v3  ;;  %v137_v0 = vpop.xlane.xlu1 %136 }
  0xa5   :  { %v134_v9 = vpop.xlane.xlu0 %133  ;;  %v301_v10 = vmul.f32 %v684_v60, %v771_v4  ;;  %693 = vrsqrt.f32 %v244_v57  ;;  %v214_v11 = vmul.f32 0.0625, %v137_v0 }
  0xa6   :  { %v213_v12 = vmul.f32 0.0625, %v134_v9  ;;  %v342_v13 = vmul.f32 %v971_v55, %v303_v61  ;;  %695 = vrsqrt.f32 %v243_v58 }
  0xa7   :  { %v686_v14 = vpop.eup %685  ;;  %v340_v18 = vmul.f32 %v971_v55, %v301_v10  ;;  %v246_v19 = vadd.f32 1e-06, %v214_v11 }
  0xa8   :  { %v245_v20 = vadd.f32 1e-06, %v213_v12  ;;  %v688_v22 = vpop.eup %687  ;;  %v572_v23 = vpack.c.bf16 %v342_v13, %v342_v13  ;;  %v304_v3 = vmul.f32 %v686_v14, %v773_v5  ;;  %v143_v25 = vpop.xlane.xlu1 %142 }
  0xa9   :  { %v140_v26 = vpop.xlane.xlu0 %139  ;;  %v570_v29 = vpack.c.bf16 %v340_v18, %v340_v18  ;;  %v302_v4 = vmul.f32 %v688_v22, %v775_v6  ;;  %697 = vrsqrt.f32 %v246_v19  ;;  %v216_v31 = vmul.f32 0.0625, %v143_v25 }
  0xaa   :  { %503 = vst.msk [vmem:[%s1167_s2 + $0x8] sm:$0xf] %vm500_vm1, %v572_v23  ;;  %v343_v32 = vmul.f32 %v971_v55, %v304_v3  ;;  %699 = vrsqrt.f32 %v245_v20  ;;  %v215_v33 = vmul.f32 0.0625, %v140_v26 }
  0xab   :  { %v690_v36 = vpop.eup %689  ;;  %501 = vst.msk [vmem:[%s1167_s2] sm:$0xf] %vm500_vm1, %v570_v29  ;;  %v341_v5 = vmul.f32 %v971_v55, %v302_v4  ;;  %v248_v6 = vadd.f32 1e-06, %v216_v31 }
  0xac   :  { %v692_v39 = vpop.eup %691  ;;  %v573_v42 = vpack.c.bf16 %v343_v32, %v343_v32  ;;  %v306_v47 = vmul.f32 %v690_v36, %v777_v7  ;;  %v247_v48 = vadd.f32 1e-06, %v215_v33  ;;  %v149_v49 = vpop.xlane.xlu1 %148 }
  0xad   :  { %v146_v50 = vpop.xlane.xlu0 %145  ;;  %v571_v51 = vpack.c.bf16 %v341_v5, %v341_v5  ;;  %v305_v53 = vmul.f32 %v692_v39, %v779_v8  ;;  %701 = vrsqrt.f32 %v248_v6  ;;  %v218_v57 = vmul.f32 0.0625, %v149_v49 }
  0xae   :  { %504 = vst.msk [vmem:[%s1167_s2 + $0xc] sm:$0xf] %vm500_vm1, %v573_v42  ;;  %v345_v58 = vmul.f32 %v971_v55, %v306_v47  ;;  %703 = vrsqrt.f32 %v247_v48  ;;  %v217_v60 = vmul.f32 0.0625, %v146_v50 }
  0xaf   :  { %v694_v61 = vpop.eup %693  ;;  %502 = vst.msk [vmem:[%s1167_s2 + $0x4] sm:$0xf] %vm500_vm1, %v571_v51  ;;  %v344_v7 = vmul.f32 %v971_v55, %v305_v53  ;;  %v250_v8 = vadd.f32 1e-06, %v218_v57 }
  0xb0   :  { %v696_v0 = vpop.eup %695  ;;  %v575_v9 = vpack.c.bf16 %v345_v58, %v345_v58  ;;  %v308_v10 = vmul.f32 %v694_v61, %v794_v16  ;;  %v249_v11 = vadd.f32 1e-06, %v217_v60  ;;  %v155_v12 = vpop.xlane.xlu1 %154 }
  0xb1   :  { %v152_v13 = vpop.xlane.xlu0 %151  ;;  %v574_v14 = vpack.c.bf16 %v344_v7, %v344_v7  ;;  %v307_v18 = vmul.f32 %v696_v0, %v796_v17  ;;  %705 = vrsqrt.f32 %v250_v8  ;;  %v220_v19 = vmul.f32 0.0625, %v155_v12 }
  0xb2   :  { %506 = vst.msk [vmem:[%s1167_s2 + $0x14] sm:$0xf] %vm500_vm1, %v575_v9  ;;  %v347_v20 = vmul.f32 %v971_v55, %v308_v10  ;;  %707 = vrsqrt.f32 %v249_v11  ;;  %v219_v22 = vmul.f32 0.0625, %v152_v13 }
  0xb3   :  { %v698_v23 = vpop.eup %697  ;;  %505 = vst.msk [vmem:[%s1167_s2 + $0x10] sm:$0xf] %vm500_vm1, %v574_v14  ;;  %v346_v16 = vmul.f32 %v971_v55, %v307_v18  ;;  %v252_v17 = vadd.f32 1e-06, %v220_v19 }
  0xb4   :  { %v700_v3 = vpop.eup %699  ;;  %v577_v25 = vpack.c.bf16 %v347_v20, %v347_v20  ;;  %v310_v26 = vmul.f32 %v698_v23, %v813_v27  ;;  %v251_v29 = vadd.f32 1e-06, %v219_v22  ;;  %v161_v4 = vpop.xlane.xlu1 %160 }
  0xb5   :  { %v158_v31 = vpop.xlane.xlu0 %157  ;;  %v576_v32 = vpack.c.bf16 %v346_v16, %v346_v16  ;;  %v309_v33 = vmul.f32 %v700_v3, %v815_v28  ;;  %709 = vrsqrt.f32 %v252_v17  ;;  %v222_v36 = vmul.f32 0.0625, %v161_v4 }
  0xb6   :  { %508 = vst.msk [vmem:[%s1167_s2 + $0x1c] sm:$0xf] %vm500_vm1, %v577_v25  ;;  %v349_v5 = vmul.f32 %v971_v55, %v310_v26  ;;  %711 = vrsqrt.f32 %v251_v29  ;;  %v221_v6 = vmul.f32 0.0625, %v158_v31 }
  0xb7   :  { %v702_v39 = vpop.eup %701  ;;  %507 = vst.msk [vmem:[%s1167_s2 + $0x18] sm:$0xf] %vm500_vm1, %v576_v32  ;;  %v348_v27 = vmul.f32 %v971_v55, %v309_v33  ;;  %v254_v28 = vadd.f32 1e-06, %v222_v36 }
  0xb8   :  { %v704_v42 = vpop.eup %703  ;;  %v579_v47 = vpack.c.bf16 %v349_v5, %v349_v5  ;;  %v312_v48 = vmul.f32 %v702_v39, %v826_v34  ;;  %v253_v49 = vadd.f32 1e-06, %v221_v6  ;;  %v167_v50 = vpop.xlane.xlu1 %166 }
  0xb9   :  { %v164_v51 = vpop.xlane.xlu0 %163  ;;  %v578_v53 = vpack.c.bf16 %v348_v27, %v348_v27  ;;  %v311_v57 = vmul.f32 %v704_v42, %v828_v35  ;;  %713 = vrsqrt.f32 %v254_v28  ;;  %v224_v58 = vmul.f32 0.0625, %v167_v50 }
  0xba   :  { %510 = vst.msk [vmem:[%s1167_s2 + $0x24] sm:$0xf] %vm500_vm1, %v579_v47  ;;  %v351_v60 = vmul.f32 %v971_v55, %v312_v48  ;;  %715 = vrsqrt.f32 %v253_v49  ;;  %v223_v61 = vmul.f32 0.0625, %v164_v51 }
  0xbb   :  { %v706_v7 = vpop.eup %705  ;;  %509 = vst.msk [vmem:[%s1167_s2 + $0x20] sm:$0xf] %vm500_vm1, %v578_v53  ;;  %v350_v34 = vmul.f32 %v971_v55, %v311_v57  ;;  %v256_v35 = vadd.f32 1e-06, %v224_v58 }
  0xbc   :  { %v708_v8 = vpop.eup %707  ;;  %v581_v0 = vpack.c.bf16 %v351_v60, %v351_v60  ;;  %v314_v9 = vmul.f32 %v706_v7, %v833_v37  ;;  %v255_v10 = vadd.f32 1e-06, %v223_v61  ;;  %v173_v11 = vpop.xlane.xlu1 %172 }
  0xbd   :  { %v170_v12 = vpop.xlane.xlu0 %169  ;;  %v580_v13 = vpack.c.bf16 %v350_v34, %v350_v34  ;;  %v313_v14 = vmul.f32 %v708_v8, %v835_v38  ;;  %717 = vrsqrt.f32 %v256_v35  ;;  %v226_v18 = vmul.f32 0.0625, %v173_v11 }
  0xbe   :  { %512 = vst.msk [vmem:[%s1167_s2 + $0x2c] sm:$0xf] %vm500_vm1, %v581_v0  ;;  %v353_v19 = vmul.f32 %v971_v55, %v314_v9  ;;  %719 = vrsqrt.f32 %v255_v10  ;;  %v225_v20 = vmul.f32 0.0625, %v170_v12 }
  0xbf   :  { %v710_v22 = vpop.eup %709  ;;  %511 = vst.msk [vmem:[%s1167_s2 + $0x28] sm:$0xf] %vm500_vm1, %v580_v13  ;;  %v352_v37 = vmul.f32 %v971_v55, %v313_v14  ;;  %v258_v38 = vadd.f32 1e-06, %v226_v18 }
  0xc0   :  { %v712_v23 = vpop.eup %711  ;;  %v583_v16 = vpack.c.bf16 %v353_v19, %v353_v19  ;;  %v316_v17 = vmul.f32 %v710_v22, %v846_v44  ;;  %v257_v3 = vadd.f32 1e-06, %v225_v20  ;;  %v179_v25 = vpop.xlane.xlu1 %178 }
  0xc1   :  { %v176_v26 = vpop.xlane.xlu0 %175  ;;  %v582_v29 = vpack.c.bf16 %v352_v37, %v352_v37  ;;  %v315_v4 = vmul.f32 %v712_v23, %v848_v45  ;;  %721 = vrsqrt.f32 %v258_v38  ;;  %v228_v31 = vmul.f32 0.0625, %v179_v25 }
  0xc2   :  { %514 = vst.msk [vmem:[%s1167_s2 + $0x34] sm:$0xf] %vm500_vm1, %v583_v16  ;;  %v355_v32 = vmul.f32 %v971_v55, %v316_v17  ;;  %723 = vrsqrt.f32 %v257_v3  ;;  %v227_v33 = vmul.f32 0.0625, %v176_v26 }
  0xc3   :  { %v714_v36 = vpop.eup %713  ;;  %513 = vst.msk [vmem:[%s1167_s2 + $0x30] sm:$0xf] %vm500_vm1, %v582_v29  ;;  %v354_v44 = vmul.f32 %v971_v55, %v315_v4  ;;  %v260_v45 = vadd.f32 1e-06, %v228_v31 }
  0xc4   :  { %v716_v5 = vpop.eup %715  ;;  %v585_v6 = vpack.c.bf16 %v355_v32, %v355_v32  ;;  %v318_v39 = vmul.f32 %v714_v36, %v861_v52  ;;  %v259_v27 = vadd.f32 1e-06, %v227_v33  ;;  %v185_v28 = vpop.xlane.xlu1 %184 }
  0xc5   :  { %v182_v42 = vpop.xlane.xlu0 %181  ;;  %v584_v47 = vpack.c.bf16 %v354_v44, %v354_v44  ;;  %v317_v48 = vmul.f32 %v716_v5, %v867_v56  ;;  %725 = vrsqrt.f32 %v260_v45  ;;  %v230_v49 = vmul.f32 0.0625, %v185_v28 }
  0xc6   :  { %516 = vst.msk [vmem:[%s1167_s2 + $0x3c] sm:$0xf] %vm500_vm1, %v585_v6  ;;  %v357_v50 = vmul.f32 %v971_v55, %v318_v39  ;;  %727 = vrsqrt.f32 %v259_v27  ;;  %v229_v51 = vmul.f32 0.0625, %v182_v42 }
  0xc7   :  { %v718_v53 = vpop.eup %717  ;;  %515 = vst.msk [vmem:[%s1167_s2 + $0x38] sm:$0xf] %vm500_vm1, %v584_v47  ;;  %v356_v52 = vmul.f32 %v971_v55, %v317_v48  ;;  %v262_v56 = vadd.f32 1e-06, %v230_v49 }
  0xc8   :  { %v720_v57 = vpop.eup %719  ;;  %v587_v58 = vpack.c.bf16 %v357_v50, %v357_v50  ;;  %v320_v60 = vmul.f32 %v718_v53, %v878_v62  ;;  %v261_v61 = vadd.f32 1e-06, %v229_v51  ;;  %v191_v7 = vpop.xlane.xlu1 %190 }
  0xc9   :  { %v188_v34 = vpop.xlane.xlu0 %187  ;;  %v586_v35 = vpack.c.bf16 %v356_v52, %v356_v52  ;;  %v319_v8 = vmul.f32 %v720_v57, %v880_v63  ;;  %729 = vrsqrt.f32 %v262_v56  ;;  %v232_v0 = vmul.f32 0.0625, %v191_v7 }
  0xca   :  { %518 = vst.msk [vmem:[%s1167_s2 + $0x44] sm:$0xf] %vm500_vm1, %v587_v58  ;;  %v359_v9 = vmul.f32 %v971_v55, %v320_v60  ;;  %731 = vrsqrt.f32 %v261_v61  ;;  %v231_v10 = vmul.f32 0.0625, %v188_v34 }
  0xcb   :  { %v722_v11 = vpop.eup %721  ;;  %517 = vst.msk [vmem:[%s1167_s2 + $0x40] sm:$0xf] %vm500_vm1, %v586_v35  ;;  %v358_v62 = vmul.f32 %v971_v55, %v319_v8  ;;  %v264_v63 = vadd.f32 1e-06, %v232_v0 }
  0xcc   :  { %v724_v12 = vpop.eup %723  ;;  %v589_v13 = vpack.c.bf16 %v359_v9, %v359_v9  ;;  %v322_v14 = vmul.f32 %v722_v11, %v885_v1  ;;  %v263_v18 = vadd.f32 1e-06, %v231_v10  ;;  %v197_v19 = vpop.xlane.xlu1 %196 }
  0xcd   :  { %v194_v20 = vpop.xlane.xlu0 %193  ;;  %v588_v22 = vpack.c.bf16 %v358_v62, %v358_v62  ;;  %v321_v37 = vmul.f32 %v724_v12, %v887_v2  ;;  %733 = vrsqrt.f32 %v264_v63  ;;  %v234_v38 = vmul.f32 0.0625, %v197_v19 }
  0xce   :  { %520 = vst.msk [vmem:[%s1167_s2 + $0x4c] sm:$0xf] %vm500_vm1, %v589_v13  ;;  %v361_v23 = vmul.f32 %v971_v55, %v322_v14  ;;  %735 = vrsqrt.f32 %v263_v18  ;;  %v233_v16 = vmul.f32 0.0625, %v194_v20 }
  0xcf   :  { %v726_v17 = vpop.eup %725  ;;  %519 = vst.msk [vmem:[%s1167_s2 + $0x48] sm:$0xf] %vm500_vm1, %v588_v22  ;;  %v360_v1 = vmul.f32 %v971_v55, %v321_v37  ;;  %v266_v2 = vadd.f32 1e-06, %v234_v38 }
  0xd0   :  { %v728_v3 = vpop.eup %727  ;;  %v591_v25 = vpack.c.bf16 %v361_v23, %v361_v23  ;;  %v324_v26 = vmul.f32 %v726_v17, %v900_v15  ;;  %v265_v29 = vadd.f32 1e-06, %v233_v16  ;;  %v203_v4 = vpop.xlane.xlu1 %202 }
  0xd1   :  { %v200_v31 = vpop.xlane.xlu0 %199  ;;  %v590_v32 = vpack.c.bf16 %v360_v1, %v360_v1  ;;  %v323_v33 = vmul.f32 %v728_v3, %v906_v21  ;;  %737 = vrsqrt.f32 %v266_v2  ;;  %v236_v36 = vmul.f32 0.0625, %v203_v4 }
  0xd2   :  { %522 = vst.msk [vmem:[%s1167_s2 + $0x54] sm:$0xf] %vm500_vm1, %v591_v25  ;;  %v363_v44 = vmul.f32 %v971_v55, %v324_v26  ;;  %739 = vrsqrt.f32 %v265_v29  ;;  %v235_v45 = vmul.f32 0.0625, %v200_v31 }
  0xd3   :  { %v730_v5 = vpop.eup %729  ;;  %521 = vst.msk [vmem:[%s1167_s2 + $0x50] sm:$0xf] %vm500_vm1, %v590_v32  ;;  %v362_v15 = vmul.f32 %v971_v55, %v323_v33  ;;  %v268_v21 = vadd.f32 1e-06, %v236_v36 }
  0xd4   :  { %v732_v6 = vpop.eup %731  ;;  %v593_v39 = vpack.c.bf16 %v363_v44, %v363_v44  ;;  %v326_v27 = vmul.f32 %v730_v5, %v913_v24  ;;  %v267_v28 = vadd.f32 1e-06, %v235_v45 }
  0xd5   :  { %v592_v42 = vpack.c.bf16 %v362_v15, %v362_v15  ;;  %v325_v47 = vmul.f32 %v732_v6, %v919_v30  ;;  %741 = vrsqrt.f32 %v268_v21 }
  0xd6   :  { %524 = vst.msk [vmem:[%s1167_s2 + $0x5c] sm:$0xf] %vm500_vm1, %v593_v39  ;;  %v365_v48 = vmul.f32 %v971_v55, %v326_v27  ;;  %743 = vrsqrt.f32 %v267_v28 }
  0xd7   :  { %v734_v49 = vpop.eup %733  ;;  %523 = vst.msk [vmem:[%s1167_s2 + $0x58] sm:$0xf] %vm500_vm1, %v592_v42  ;;  %v364_v24 = vmul.f32 %v971_v55, %v325_v47 }
  0xd8   :  { %v736_v50 = vpop.eup %735  ;;  %v595_v51 = vpack.c.bf16 %v365_v48, %v365_v48  ;;  %v328_v30 = vmul.f32 %v734_v49, %v930_v40 }
  0xd9   :  { %v594_v53 = vpack.c.bf16 %v364_v24, %v364_v24  ;;  %v327_v52 = vmul.f32 %v736_v50, %v932_v41 }
  0xda   :  { %526 = vst.msk [vmem:[%s1167_s2 + $0x64] sm:$0xf] %vm500_vm1, %v595_v51  ;;  %v367_v56 = vmul.f32 %v971_v55, %v328_v30 }
  0xdb   :  { %v738_v57 = vpop.eup %737  ;;  %525 = vst.msk [vmem:[%s1167_s2 + $0x60] sm:$0xf] %vm500_vm1, %v594_v53  ;;  %v366_v58 = vmul.f32 %v971_v55, %v327_v52 }
  0xdc   :  { %v740_v60 = vpop.eup %739  ;;  %v597_v40 = vpack.c.bf16 %v367_v56, %v367_v56  ;;  %v330_v61 = vmul.f32 %v738_v57, %v937_v43 }
  0xdd   :  { %v596_v41 = vpack.c.bf16 %v366_v58, %v366_v58  ;;  %v329_v7 = vmul.f32 %v740_v60, %v939_v46 }
  0xde   :  { %528 = vst.msk [vmem:[%s1167_s2 + $0x6c] sm:$0xf] %vm500_vm1, %v597_v40  ;;  %v369_v34 = vmul.f32 %v971_v55, %v330_v61 }
  0xdf   :  { %v742_v35 = vpop.eup %741  ;;  %527 = vst.msk [vmem:[%s1167_s2 + $0x68] sm:$0xf] %vm500_vm1, %v596_v41  ;;  %v368_v8 = vmul.f32 %v971_v55, %v329_v7 }
  0xe0   :  { %v744_v0 = vpop.eup %743  ;;  %v599_v43 = vpack.c.bf16 %v369_v34, %v369_v34  ;;  %v332_v9 = vmul.f32 %v742_v35, %v952_v54 }
  0xe1   :  { %v598_v46 = vpack.c.bf16 %v368_v8, %v368_v8  ;;  %v331_v10 = vmul.f32 %v744_v0, %v958_v59 }
  0xe2   :  { %530 = vst.msk [vmem:[%s1167_s2 + $0x74] sm:$0xf] %vm500_vm1, %v599_v43  ;;  %v371_v11 = vmul.f32 %v971_v55, %v332_v9 }
  0xe3   :  { %529 = vst.msk [vmem:[%s1167_s2 + $0x70] sm:$0xf] %vm500_vm1, %v598_v46  ;;  %v370_v62 = vmul.f32 %v971_v55, %v331_v10 }
  0xe4   :  { %v601_v63 = vpack.c.bf16 %v371_v11, %v371_v11 }
  0xe5   :  { %v600_v12 = vpack.c.bf16 %v370_v62, %v370_v62 }
  0xe6   :  { %532 = vst.msk [vmem:[%s1167_s2 + $0x7c] sm:$0xf] %vm500_vm1, %v601_v63 }
  0xe7   :  { %531 = vst.msk [vmem:[%s1167_s2 + $0x78] sm:$0xf] %vm500_vm1, %v600_v12 }

// kernel: transformer_block_forward.14
= control target key start
LH: loop header
LB: loop body
LE: loop exit
PB: predicated region body
PF: predicated region fallthrough
CT: control target
= control target key end

     0   :  { %8 = vsyncpa [#allocation3], 0  ;;  %s502_s0 = inlined_call_operand.hbm [shape: bf16[2,64], index: 0, kind: input, shape index: {}]   ;;  %s503_s1 = inlined_call_operand.hbm [shape: bf16[64,384], index: 1, kind: input, shape index: {}]   ;;  %s504_s2 = inlined_call_operand.hbm [shape: f32[1,384], index: 2, kind: input, shape index: {}]   ;;  %s505_s3 = inlined_call_operand.hbm [shape: f32[2,384], index: 3, kind: output, shape index: {}]  }
   0x1   :  { %9 = vsyncpa [#allocation6], 0 }
   0x2   :  { %10 = vsyncpa [#allocation4], 0  ;;  %s424_s12 = smov [#allocation5]   ;;  %s330_s16 = scalar_lea.hbm %s503_s1, 1536 }
   0x3   :  { %s26_s13 = sshll.u32 %s424_s12, 4  ;;  %p331_p0 = scmp.ne.s32.totalorder %s503_s1, %s330_s16  ;;  %s27_s13 = int_to_ptr.vmem [resolvable:$true] %s26_s13 }
   0x4   :  { %p334_p1 = scmp.lt.u32.totalorder %s330_s16, %s503_s1 }
   0x6   :  { %p336_p2 = pnand %p334_p1, %p331_p0 }
   0x8   :  { %339 = shalt.err (!%p336_p2)
}
   0x9   :  { %s340_s21 = scalar_lea.vmem %s27_s13, 1536  ;;  %p345_p4 = scmp.lt.s32.totalorder %s27_s13, %s27_s13 }
   0xa   :  { %p341_p3 = scmp.ne.s32.totalorder %s27_s13, %s340_s21  ;;  %p346_p5 = scmp.lt.s32.totalorder %s340_s21, %s340_s21 }
   0xc   :  { %p347_p6 = por %p346_p5, %p345_p4 }
   0xe   :  { %p348_p7 = pnand %p347_p6, %p341_p3 }
  0x10   :  { %351 = shalt.err (!%p348_p7)
}
  0x11   :  { %s425_s22 = smov 192   ;;  %s426_s23 = smov 12  }
  0x12   :  { %32 = dma.hbm_to_vmem [thread:$0]  %s503_s1, 1536, %s27_s13, [#allocation6], %s425_s22, %s425_s22, %s426_s23  }
  0x13   :  { %s427_s26 = smov [#allocation2]   ;;  %s428_s28 = smov [#allocation7]  }
  0x14   :  { %s17_s27 = sshll.u32 %s427_s26, 4  ;;  %s39_s29 = sshll.u32 %s428_s28, 4  ;;  %s18_s27 = int_to_ptr.vmem [resolvable:$true] %s17_s27  ;;  %s40_s29 = int_to_ptr.vmem [resolvable:$true] %s39_s29 }
  0x15   :  { %s352_s5 = scalar_lea.hbm %s502_s0, 16 }
  0x16   :  { %p353_p8 = scmp.ne.s32.totalorder %s502_s0, %s352_s5  ;;  %p356_p9 = scmp.lt.u32.totalorder %s352_s5, %s502_s0 }
  0x18   :  { %p358_p10 = pnand %p356_p9, %p353_p8 }
  0x1a   :  { %361 = shalt.err (!%p358_p10)
}
  0x1b   :  { %s362_s1 = scalar_lea.vmem %s18_s27, 16  ;;  %s366_s10 = scalar_lea.vmem %s18_s27, 32 }
  0x1c   :  { %p363_p11 = scmp.ne.s32.totalorder %s18_s27, %s362_s1  ;;  %p367_p12 = scmp.lt.s32.totalorder %s18_s27, %s18_s27 }
  0x1d   :  { %p368_p13 = scmp.lt.s32.totalorder %s366_s10, %s362_s1 }
  0x1f   :  { %p369_p0 = por %p368_p13, %p367_p12 }
  0x21   :  { %p370_p1 = pnand %p369_p0, %p363_p11 }
  0x23   :  { %373 = shalt.err (!%p370_p1)
}
  0x24   :  { %20 = dma.hbm_to_vmem [thread:$0]  %s502_s0, 16, %s18_s27, [#allocation3]  }
  0x25   :  { %s374_s15 = scalar_lea.hbm %s504_s2, 48 }
  0x26   :  { %p375_p2 = scmp.ne.s32.totalorder %s504_s2, %s374_s15  ;;  %p378_p3 = scmp.lt.u32.totalorder %s374_s15, %s504_s2 }
  0x28   :  { %p380_p4 = pnand %p378_p3, %p375_p2 }
  0x2a   :  { %383 = shalt.err (!%p380_p4)
}
  0x2b   :  { %s384_s20 = scalar_lea.vmem %s40_s29, 48  ;;  %s388_s21 = scalar_lea.vmem %s40_s29, 64 }
  0x2c   :  { %p385_p5 = scmp.ne.s32.totalorder %s40_s29, %s384_s20  ;;  %p389_p6 = scmp.lt.s32.totalorder %s40_s29, %s40_s29 }
  0x2d   :  { %p390_p7 = scmp.lt.s32.totalorder %s388_s21, %s384_s20 }
  0x2f   :  { %p391_p8 = por %p390_p7, %p389_p6 }
  0x31   :  { %p392_p9 = pnand %p391_p8, %p385_p5 }
  0x33   :  { %395 = shalt.err (!%p392_p9)
}
  0x34   :  { %42 = dma.hbm_to_vmem [thread:$0]  %s504_s2, 48, %s40_s29, [#allocation6]  }
  0x35   :  { %418 = dma.done.wait [#allocation3], 16  }
  0x36   :  { %419 = vsyncadd [#allocation3], 4294967280 }
  0x37   :  { %420 = dma.done.wait [#allocation6], 1584  }
  0x38   :  { %421 = vsyncadd [#allocation6], 4294965712  ;;  %v429_v0 = vmov 0.0   ;;  %v430_v1 = vmov 0   ;;  %vm431_vm0 = vmmov 0   ;;  %vm151_vm1 = vcmask 523264  }
  0x39   :  { %292 = vmatprep.subr.bf16.mxu1 %v429_v0  ;;  %187 = vmatprep.mubr.bf16.mxu0 %v430_v1  ;;  %v314_v2 = vld [vmem:[#allocation5 + $0x4] ss:$12 sps:$4 sm:$0xff]   ;;  %v316_v3 = vld [vmem:[#allocation5] ss:$12 sps:$4 sm:$0xff]   ;;  %v317_v4 = vld [vmem:[#allocation5 + $0x8] ss:$12 sps:$4 sm:$0xff]   ;;  %v72_v15 = vlaneseq }
  0x3a   :  { %300 = vmatprep.mubr.msk.bf16.mxu1 %vm431_vm0, %v429_v0  ;;  %155 = vmatprep.subr.bf16.mxu0 %v314_v2  ;;  %v318_v5 = vld [vmem:[#allocation5 + $0x1c] ss:$12 sps:$4 sm:$0xff]   ;;  %v320_v6 = vld [vmem:[#allocation5 + $0x18] ss:$12 sps:$4 sm:$0xff]   ;;  %v321_v7 = vld [vmem:[#allocation5 + $0x20] ss:$12 sps:$4 sm:$0xff]  }
  0x3b   :  { %156 = vmatpush1.bf16.msra.mxu0 %v316_v3  ;;  %293 = vmatpush3.bf16.msra.mxu1 %v317_v4  ;;  %v322_v8 = vld [vmem:[#allocation5 + $0x34] ss:$12 sps:$4 sm:$0xff]   ;;  %v324_v9 = vld [vmem:[#allocation5 + $0x30] ss:$12 sps:$4 sm:$0xff]   ;;  %v325_v10 = vld [vmem:[#allocation5 + $0x38] ss:$12 sps:$4 sm:$0xff]  }
  0x3c   :  { %157 = vmatprep.subr.bf16.mxu0 %v318_v5  ;;  %294 = vmatprep.subr.bf16.mxu1 %v429_v0  ;;  %v326_v11 = vld [vmem:[#allocation5 + $0x4c] ss:$12 sps:$4 sm:$0xff]   ;;  %v328_v12 = vld [vmem:[#allocation5 + $0x48] ss:$12 sps:$4 sm:$0xff]   ;;  %v329_v13 = vld [vmem:[#allocation5 + $0x50] ss:$12 sps:$4 sm:$0xff]  }
  0x3d   :  { %v53_v14 = vld [vmem:[#allocation2] sm:$0x1]  ;;  %v73_v16 = vshrl.u32 %v72_v15, 7  ;;  %v432_v17 = vmov 1983009808   ;;  %s433_s2 = smov [#allocation8]  }
  0x3e   :  { %v241_v18 = vunpack.c.l.s4 %v432_v17  ;;  %v70_v20 = vld [vmem:[#allocation7] sm:$0x7]  ;;  %s263_s23 = sshll.u32 %s433_s2, 4  ;;  %s264_s23 = int_to_ptr.vmem [resolvable:$true] %s263_s23 }
  0x3f   :  { %158 = vmatpush1.bf16.msra.mxu0 %v320_v6  ;;  %295 = vmatpush3.bf16.msra.mxu1 %v321_v7  ;;  %v74_v19 = vsub.s32 0, %v73_v16  ;;  %v82_v21 = vsub.s32 2, %v73_v16  ;;  %v78_v22 = vsub.s32 1, %v73_v16  ;;  %s396_s24 = scalar_lea.vmem %s264_s23, 96  ;;  %p401_p11 = scmp.lt.s32.totalorder %s264_s23, %s264_s23 }
  0x40   :  { %159 = vmatprep.subr.bf16.mxu0 %v322_v8  ;;  %296 = vmatprep.subr.bf16.mxu1 %v429_v0  ;;  %v242_v23 = vunpack.c.0.s8 %v241_v18  ;;  %p397_p10 = scmp.ne.s32.totalorder %s264_s23, %s396_s24  ;;  %p402_p12 = scmp.lt.s32.totalorder %s396_s24, %s396_s24 }
  0x41   :  { %v75_v24 = vrot.slane %v70_v20, %v74_v19  ;;  %v83_v25 = vrot.slane %v70_v20, %v82_v21  ;;  %v79_v26 = vrot.slane %v70_v20, %v78_v22 }
  0x42   :  { %v245_v28 = vsub.s32 %v242_v23, %v73_v16  ;;  %p403_p13 = por %p402_p12, %p401_p11 }
  0x43   :  { %160 = vmatpush1.bf16.msra.mxu0 %v324_v9  ;;  %297 = vmatpush3.bf16.msra.mxu1 %v325_v10 }
  0x44   :  { %161 = vmatprep.subr.bf16.mxu0 %v326_v11  ;;  %298 = vmatprep.subr.bf16.mxu1 %v429_v0  ;;  %p404_p0 = pnand %p403_p13, %p397_p10 }
  0x47   :  { %162 = vmatpush1.bf16.msra.mxu0 %v328_v12  ;;  %299 = vmatpush3.bf16.msra.mxu1 %v329_v13 }
  0x4a   :  { %285 = vmatmul.mubr.msk.bf16.vlgmr.msra.gmra.mrb[0].mxu0 %vm151_vm1, %v53_v14  ;;  %301 = vmatmul.mubr.msk.bf16.vlgmr.msra.gmra.mrb[0].mxu1 %vm151_vm1, %v53_v14 }
 0x11d   :  { %v189_v27 = vpop.f32.mrb[0].mxu0  ;;  %v230_v30 = vpop.f32.mrb[0].mxu1 }
 0x11e   :  { %v190_v29 = vadd.f32 %v189_v27, %v75_v24  ;;  %v191_v31 = vpop.f32.mrb[1].mxu0  ;;  %v231_v32 = vadd.f32 %v230_v30, %v83_v25  ;;  %v302_v34 = vpop.f32.mrb[1].mxu1 }
 0x11f   :  { %v192_v33 = vadd.f32 %v191_v31, %v79_v26  ;;  %v193_v35 = vpop.f32.mrb[2].mxu0  ;;  %v233_v36 = vpop.f32.mrb[2].mxu1 }
 0x120   :  { %v194_v37 = vpop.f32.mrb[3].mxu0  ;;  %v253_v38 = vrot.slane %v231_v32, %v245_v28  ;;  %v303_v40 = vpop.f32.mrb[3].mxu1 }
 0x121   :  { %v239_v39 = vcombine.low %v190_v29, %v192_v33 }
 0x123   :  { %v246_v41 = vrot.slane %v239_v39, %v245_v28 }
 0x125   :  { %v254_v42 = vcombine.low %v246_v41, %v253_v38 }
 0x127   :  { %256 = vst [vmem:[#allocation8] sm:$0x3f] %v254_v42 }
 0x128   :  { %407 = shalt.err (!%p404_p0)
}
 0x129   :  { %s408_s27 = scalar_lea.hbm %s505_s3, 96 }
 0x12a   :  { %p409_p1 = scmp.ne.s32.totalorder %s505_s3, %s408_s27  ;;  %p412_p2 = scmp.lt.u32.totalorder %s408_s27, %s505_s3 }
 0x12c   :  { %p414_p3 = pnand %p412_p2, %p409_p1 }
 0x12e   :  { %417 = shalt.err (!%p414_p3)
}
 0x12f   :  { %266 = dma.vmem_to_hbm [thread:$0]  %s264_s23, 96, %s505_s3, [#allocation4]  }
 0x130   :  { %422 = dma.done.wait [#allocation4], 96  }
 0x131   :  { %423 = vsyncadd [#allocation4], 4294967200 }
 0x132   :  { %270 = vsyncpa [#allocation3], 1 }
 0x133   :  { %271 = vsyncpa [#allocation6], 1 }
 0x134   :  { %272 = vsyncpa [#allocation4], 1 }

// kernel: transformer_block_forward.16
= control target key start
LH: loop header
LB: loop body
LE: loop exit
PB: predicated region body
PF: predicated region fallthrough
CT: control target
= control target key end

     0   :  { %s1853_s0 = inlined_call_operand.hbm [shape: f32[2,16,64], index: 0, kind: input, shape index: {}]   ;;  %s1854_s1 = inlined_call_operand.hbm [shape: f32[2,1,64], index: 1, kind: input, shape index: {}, may-alias: {1,3}]   ;;  %s1855_s2 = inlined_call_operand.hbm [shape: f32[2,1,64], index: 2, kind: input, shape index: {}, may-alias: {2,4}]   ;;  %s1856_s3 = inlined_call_operand.hbm [shape: f32[2,1,64], index: 3, kind: input, shape index: {}, may-alias: {1,3}]   ;;  %s1857_s4 = inlined_call_operand.hbm [shape: f32[2,1,64], index: 4, kind: input, shape index: {}, may-alias: {2,4}]   ;;  %s1858_s5 = inlined_call_operand.hbm [shape: bf16[64,192], index: 5, kind: input, shape index: {}]   ;;  %s1859_s6 = inlined_call_operand.hbm [shape: f32[1,192], index: 6, kind: input, shape index: {}]   ;;  %s1860_s7 = inlined_call_operand.hbm [shape: bf16[2,16,192], index: 7, kind: output, shape index: {}]  }
   0x1   :  { %1883 = sst [smem:[#allocation27_spill]] %s1853_s0 }
   0x2   :  { %1884 = sst [smem:[#allocation28_spill]] %s1854_s1 }
   0x3   :  { %1885 = sst [smem:[#allocation29_spill]] %s1856_s3 }
   0x4   :  { %1886 = sst [smem:[#allocation30_spill]] %s1858_s5 }
   0x5   :  { %1887 = sst [smem:[#allocation31_spill]] %s1859_s6 }
   0x6   :  { %1888 = sst [smem:[#allocation32_spill]] %s1860_s7 }
   0x7   :  { %12 = vsyncpa [#allocation3], 0 }
   0x8   :  { %14 = vsyncpa [#allocation3 + $0x1], 0 }
   0x9   :  { %15 = vsyncpa [#allocation6], 0 }
   0xa   :  { %17 = vsyncpa [#allocation6 + $0x1], 0 }
   0xb   :  { %18 = vsyncpa [#allocation9], 0 }
   0xc   :  { %20 = vsyncpa [#allocation9 + $0x1], 0 }
   0xd   :  { %21 = vsyncpa [#allocation12], 0 }
   0xe   :  { %22 = vsyncpa [#allocation4], 0 }
   0xf   :  { %24 = vsyncpa [#allocation4 + $0x1], 0  ;;  %s1437_s24 = smov 0   ;;  %s1439_s25 = smov 0  }
  0x10   :  { %s1441_s26 = smov 0   ;;  %s1443_s27 = smov 0  }
  0x11   :  { %s1445_s28 = smov 0   ;;  %s1447_s29 = smov 0  }
  0x12 LB: > { %1889 = sst [smem:[#allocation20_spill]] %s1362_s24  ;;  %s1468_s30 = sadd.s32 4294967295, %s1382_s29   ;;  %s1382_s29 = sphi %s1447_s29, %s30_s29   ;;  %s1378_s28 = sphi %s1445_s28, %s1935_s28   ;;  %s1374_s27 = sphi %s1443_s27, %s1934_s27   ;;  %s1370_s26 = sphi %s1441_s26, %s1933_s26   ;;  %s1366_s25 = sphi %s1439_s25, %s1937_s25   ;;  %s1362_s24 = sphi %s1437_s24, %s1936_s24  }
  0x13   : > { %1890 = sst [smem:[#allocation21_spill]] %s1370_s26  ;;  %s917_s8 = sadd.s32 4294967294, %s1382_s29  }
  0x14   : > { %1891 = sst [smem:[#allocation22_spill]] %s1378_s28  ;;  %p65_p0 = scmp.ne.s32.totalorder %s1370_s26, %s1366_s25 }
  0x15   : > { %p66_p1 = scmp.eq.s32.totalorder %s1382_s29, 0  ;;  %p71_p2 = scmp.ne.s32.totalorder %s1366_s25, %s1362_s24 }
  0x16   : > { %p1861_p3 = scmp.eq.s32.totalorder %s1468_s30, 0  ;;  %p255_p5 = scmp.eq.s32.totalorder %s1468_s30, 1 }
  0x17   : > { %p1477_p4 = por %p66_p1, %p65_p0  ;;  %p261_p7 = scmp.eq.s32.totalorder %s917_s8, 1 }
  0x18   : > { %p1484_p6 = por %p1861_p3, %p71_p2  ;;  %p1488_p8 = por %p255_p5, %p65_p0 }
  0x19   : > { %p918_p9 = scmp.ge.s32.totalorder %s1382_s29, 1  ;;  %p1493_p10 = por %p261_p7, %p71_p2 }
  0x1a   : > { %s1893_s10 = scalar_select %p1484_p6, 1, 0 }
  0x1b   : > { %s1894_s11 = scalar_select %p1488_p8, 1, 0 }
  0x1c   : > { %s1896_s12 = scalar_select %p1493_p10, 1, 0 }
  0x1d   : > { %1895 = sst [smem:[#allocation23_spill]] %s1894_s11  ;;  %p268_p11 = scmp.lt.s32.totalorder %s1382_s29, 3 }
  0x1e   : > { %1897 = sst [smem:[#allocation24_spill]] %s1896_s12  ;;  %s1384_s14 = smov [#allocation11]  }
  0x1f   : > { %p1498_p12 = pnand %p918_p9, %p268_p11  ;;  %s283_s15 = sshll.u32 %s1384_s14, 4  ;;  %s1502_s15 = int_to_ptr.vmem [resolvable:$true] %s283_s15 }
  0x20   : > { %s49_s17 = sadd.s32 1, %s1378_s28  ;;  %s1901_s5 = sld [smem:[#allocation30_spill]] }
  0x21   : > { %s1898_s13 = scalar_select %p1498_p12, 1, 0 }
  0x22   : > { %p978_p13 = pneg %p1498_p12  ;;  %p1515_p2 = scmp.ge.s32.totalorder %s49_s17, 2 }
  0x24   : > { %p1509_p1 = pnand %p978_p13, %p1861_p3 }
  0x26   : > { %s1899_s16 = scalar_select %p1509_p1, 1, 0 }
  0x27   : > { %s1082_s22 = scalar_lea.hbm %s1901_s5, 1024  ;;  %p1871_p7 = pneg %p1509_p1 }
  0x28   : > { %p1083_p5 = scmp.ne.s32.totalorder %s1901_s5, %s1082_s22  ;;  %p1089_p13 = scmp.lt.u32.totalorder %s1082_s22, %s1901_s5 }
  0x2a   : > { %p1085_p9 = pnand %p1871_p7, %p1083_p5 }
  0x2c   : > { %p1086_p11 = pneg %p1085_p9 }
  0x2e   : > { %p1091_p0 = pnand %p1089_p13, %p1086_p11 }
  0x30   : > { %1094 = shalt.err (!%p1091_p0)
}
  0x31   : > { %s1095_s20 = scalar_lea.vmem %s1502_s15, 1024  ;;  %p1103_p6 = scmp.lt.s32.totalorder %s1502_s15, %s1502_s15 }
  0x32   : > { %p1096_p3 = scmp.ne.s32.totalorder %s1502_s15, %s1095_s20  ;;  %p1104_p5 = scmp.lt.s32.totalorder %s1095_s20, %s1095_s20 }
  0x34   : > { %p1098_p10 = pnand %p1096_p3, %p1871_p7  ;;  %p1105_p9 = por %p1104_p5, %p1103_p6 }
  0x36   : > { %p1099_p8 = pneg %p1098_p10 }
  0x38   : > { %p1106_p12 = pnand %p1105_p9, %p1099_p8 }
  0x3a   : > { %1109 = shalt.err (!%p1106_p12)
}
  0x3b   : > { %s1867_s18 = smov 128   ;;  %s1868_s21 = smov 8  }
  0x3c   : > { %981 = dma.hbm_to_vmem [thread:$0]  (!%p1509_p1), %s1901_s5, 1024, %s1502_s15, [#allocation12], %s1867_s18, %s1867_s18, %s1868_s21  }
  0x3d   : > { %s1939_s17 = smov (%p1515_p2, %s49_s17), 0  ;;  %p1007_p3 = scmp.lt.s32.totalorder %s1382_s29, 2 }
  0x3e   : > { %1902 = sst [smem:[#allocation25_spill]] %s1939_s17  ;;  %s1555_s8 = sand.u32 1, %s1370_s26  }
  0x3f   : > { %s53_s14 = ssub.s32 %s1378_s28, %s1939_s17  ;;  %s1870_s20 = sand.u32 1, %s1382_s29  }
  0x40   : > { %p56_p6 = scmp.eq.s32.totalorder %s53_s14, 0  ;;  %p1562_p8 = pnand %p1007_p3, %p1477_p4 }
  0x41   : > { %s1904_s24 = sadd.s32 1, %s1370_s26  ;;  %s1572_s15 = sshll.u32 %s1378_s28, 4 }
  0x42   : > { %s1903_s12 = scalar_select %p1562_p8, 1, 0 }
  0x43   : > { %s1569_s22 = scalar_select %p56_p6, %s1370_s26, %s1904_s24  }
  0x44   : > { %s1906_s1 = sld [smem:[#allocation28_spill]]  ;;  %s337_s9 = scalar_lea.vmem [#allocation5], %s1555_s8 }
  0x45   : > { %1905 = sst [smem:[#allocation26_spill]] %s1569_s22  ;;  %s344_s14 = sshll.u32 %s337_s9, 4  ;;  %s1581_s14 = int_to_ptr.vmem [resolvable:$true] %s344_s14 }
  0x46   : > { %s1585_s21 = scalar_lea.sflag [#allocation6], %s1870_s20  ;;  %p1591_p10 = pneg %p1562_p8 }
  0x48   : > { %s1907_s5 = scalar_select %p1591_p10, 1, 0 }
  0x4a   : > { %s1578_s18 = scalar_lea.hbm %s1906_s1, %s1572_s15  ;;  %s1115_s9 = scalar_lea.hbm %s1906_s1, 32 }
  0x4b   : > { %s1110_s24 = scalar_lea.hbm %s1578_s18, 16  ;;  %p1116_p2 = scmp.lt.u32.totalorder %s1578_s18, %s1906_s1 }
  0x4c   : > { %p1111_p4 = scmp.ne.s32.totalorder %s1578_s18, %s1110_s24  ;;  %p1117_p11 = scmp.lt.u32.totalorder %s1115_s9, %s1110_s24 }
  0x4d   : > { %p1119_p5 = scmp.lt.u32.totalorder %s1110_s24, %s1578_s18 }
  0x4e   : > { %p1113_p12 = pnand %p1591_p10, %p1111_p4  ;;  %p1118_p13 = por %p1117_p11, %p1116_p2 }
  0x50   : > { %p1114_p0 = pneg %p1113_p12  ;;  %p1120_p9 = por %p1119_p5, %p1118_p13 }
  0x52   : > { %p1121_p3 = pnand %p1120_p9, %p1114_p0 }
  0x54   : > { %1124 = shalt.err (!%p1121_p3)
}
  0x55   : > { %s1125_s20 = scalar_lea.vmem %s1581_s14, 16  ;;  %s1387_s19 = smov [#allocation5]  }
  0x56   : > { %p1126_p6 = scmp.ne.s32.totalorder %s1581_s14, %s1125_s20  ;;  %s1130_s23 = sshll.u32 %s1387_s19, 4  ;;  %s1131_s23 = int_to_ptr.vmem [resolvable:$false] %s1130_s23 }
  0x57   : > { %s1132_s17 = scalar_lea.vmem %s1131_s23, 32  ;;  %p1133_p7 = scmp.lt.s32.totalorder %s1581_s14, %s1131_s23 }
  0x58   : > { %p1128_p4 = pnand %p1126_p6, %p1591_p10  ;;  %p1134_p1 = scmp.lt.s32.totalorder %s1132_s17, %s1125_s20 }
  0x5a   : > { %p1129_p12 = pneg %p1128_p4  ;;  %p1135_p2 = por %p1134_p1, %p1133_p7 }
  0x5c   : > { %p1136_p11 = pnand %p1135_p2, %p1129_p12 }
  0x5e   : > { %1139 = shalt.err (!%p1136_p11)
}
  0x5f   : > { %991 = dma.hbm_to_vmem [thread:$0]  (!%p1562_p8), %s1578_s18, 16, %s1581_s14, %s1585_s21  }
  0x60   : > { %s1908_s3 = sld [smem:[#allocation29_spill]]  ;;  %s371_s20 = scalar_lea.vmem [#allocation8], %s1555_s8 }
  0x61   : > { %s378_s19 = sshll.u32 %s371_s20, 4  ;;  %s1388_s23 = smov [#allocation13]   ;;  %s1622_s19 = int_to_ptr.vmem [resolvable:$true] %s378_s19 }
  0x62   : > { %s1624_s17 = sshll.u32 %s1388_s23, 4  ;;  %s1909_s1 = sand.u32 1, %s1382_s29   ;;  %s301_s17 = int_to_ptr.vmem [resolvable:$true] %s1624_s17 }
  0x63   : > { %s1628_s26 = scalar_lea.sflag [#allocation9], %s1909_s1 }
  0x66   : > { %s1619_s9 = scalar_lea.hbm %s1908_s3, %s1572_s15  ;;  %s1145_s24 = scalar_lea.hbm %s1908_s3, 32 }
  0x67   : > { %s1140_s18 = scalar_lea.hbm %s1619_s9, 16  ;;  %p1146_p13 = scmp.lt.u32.totalorder %s1619_s9, %s1908_s3 }
  0x68   : > { %p1141_p1 = scmp.ne.s32.totalorder %s1619_s9, %s1140_s18  ;;  %p1147_p5 = scmp.lt.u32.totalorder %s1145_s24, %s1140_s18 }
  0x69   : > { %p1149_p3 = scmp.lt.u32.totalorder %s1140_s18, %s1619_s9 }
  0x6a   : > { %p1143_p7 = pnand %p1141_p1, %p1591_p10  ;;  %p1148_p9 = por %p1147_p5, %p1146_p13 }
  0x6c   : > { %p1144_p0 = pneg %p1143_p7  ;;  %p1150_p6 = por %p1149_p3, %p1148_p9 }
  0x6e   : > { %p1151_p4 = pnand %p1150_p6, %p1144_p0 }
  0x70   : > { %1154 = shalt.err (!%p1151_p4)
}
  0x71   : > { %s1155_s1 = scalar_lea.vmem %s1622_s19, 16  ;;  %s1389_s20 = smov [#allocation8]  }
  0x72   : > { %p1156_p12 = scmp.ne.s32.totalorder %s1622_s19, %s1155_s1  ;;  %s1160_s23 = sshll.u32 %s1389_s20, 4  ;;  %s1161_s23 = int_to_ptr.vmem [resolvable:$false] %s1160_s23 }
  0x73   : > { %s1162_s7 = scalar_lea.vmem %s1161_s23, 32  ;;  %p1163_p1 = scmp.lt.s32.totalorder %s1622_s19, %s1161_s23 }
  0x74   : > { %p1158_p2 = pnand %p1156_p12, %p1591_p10  ;;  %p1164_p7 = scmp.lt.s32.totalorder %s1162_s7, %s1155_s1 }
  0x76   : > { %p1159_p11 = pneg %p1158_p2  ;;  %p1165_p13 = por %p1164_p7, %p1163_p1 }
  0x78   : > { %p1166_p5 = pnand %p1165_p13, %p1159_p11 }
  0x7a   : > { %1169 = shalt.err (!%p1166_p5)
}
  0x7b   : > { %997 = dma.hbm_to_vmem [thread:$0]  (!%p1562_p8), %s1619_s9, 16, %s1622_s19, %s1628_s26  }
  0x7c   : > { %s1910_s6 = sld [smem:[#allocation31_spill]]  ;;  %p1911_p9 = scmp.ne.s32.totalorder %s1899_s16, 0 }
  0x7e   : > { %p1912_p3 = pneg %p1911_p9 }
  0x82   : > { %s1170_s14 = scalar_lea.hbm %s1910_s6, 32 }
  0x83   : > { %p1171_p0 = scmp.ne.s32.totalorder %s1910_s6, %s1170_s14  ;;  %p1177_p12 = scmp.lt.u32.totalorder %s1170_s14, %s1910_s6 }
  0x85   : > { %p1173_p6 = pnand %p1171_p0, %p1912_p3 }
  0x87   : > { %p1174_p4 = pneg %p1173_p6 }
  0x89   : > { %p1179_p2 = pnand %p1177_p12, %p1174_p4 }
  0x8b   : > { %1182 = shalt.err (!%p1179_p2)
}
  0x8c   : > { %s1183_s9 = scalar_lea.vmem %s301_s17, 32  ;;  %p1913_p1 = pmov %p1912_p3 }
  0x8d   : > { %p1184_p11 = scmp.ne.s32.totalorder %s301_s17, %s1183_s9  ;;  %p1191_p5 = scmp.lt.s32.totalorder %s301_s17, %s301_s17 }
  0x8e   : > { %p1192_p8 = scmp.lt.s32.totalorder %s1183_s9, %s1183_s9 }
  0x8f   : > { %p1186_p7 = pnand %p1184_p11, %p1913_p1 }
  0x90   : > { %p1193_p10 = por %p1192_p8, %p1191_p5 }
  0x91   : > { %p1187_p13 = pneg %p1186_p7 }
  0x93   : > { %p1194_p0 = pnand %p1193_p10, %p1187_p13 }
  0x95   : > { %1197 = shalt.err (!%p1194_p0)
}
  0x96   : > { %984 = dma.hbm_to_vmem [thread:$0]  (!%p1911_p9), %s1910_s6, 32, %s301_s17, [#allocation12]  }
  0x97   : > { %s922_s7 = sshll.u32 %s1555_s8, 4  ;;  %s954_s11 = sshll.u32 %s1378_s28, 8 }
  0x98   : > { %s1914_s0 = sld [smem:[#allocation27_spill]]  ;;  %s315_s16 = scalar_lea.vmem [#allocation2], %s922_s7 }
  0x99   : > { %s324_s24 = sshll.u32 %s315_s16, 4  ;;  %s1686_s9 = scalar_lea.hbm %s1855_s2, %s1572_s15  ;;  %s1680_s24 = int_to_ptr.vmem [resolvable:$true] %s324_s24 }
  0x9a   : > { %s312_s17 = scalar_lea.sflag [#allocation3], %s1555_s8  ;;  %p1915_p10 = scmp.ne.s32.totalorder %s1907_s5, 0 }
  0x9e   : > { %s1678_s22 = scalar_lea.hbm %s1914_s0, %s954_s11  ;;  %s1203_s18 = scalar_lea.hbm %s1914_s0, 512 }
  0x9f   : > { %s1198_s19 = scalar_lea.hbm %s1678_s22, 256  ;;  %p1204_p6 = scmp.lt.u32.totalorder %s1678_s22, %s1914_s0 }
  0xa0   : > { %p1199_p8 = scmp.ne.s32.totalorder %s1678_s22, %s1198_s19  ;;  %p1205_p4 = scmp.lt.u32.totalorder %s1203_s18, %s1198_s19 }
  0xa1   : > { %p1207_p2 = scmp.lt.u32.totalorder %s1198_s19, %s1678_s22 }
  0xa2   : > { %p1201_p9 = pnand %p1199_p8, %p1915_p10  ;;  %p1206_p12 = por %p1205_p4, %p1204_p6 }
  0xa4   : > { %p1202_p3 = pneg %p1201_p9  ;;  %p1208_p11 = por %p1207_p2, %p1206_p12 }
  0xa6   : > { %p1209_p1 = pnand %p1208_p11, %p1202_p3 }
  0xa8   : > { %1212 = shalt.err (!%p1209_p1)
}
  0xa9   : > { %s1213_s16 = scalar_lea.vmem %s1680_s24, 256  ;;  %s1390_s1 = smov [#allocation2]  }
  0xaa   : > { %p1214_p7 = scmp.ne.s32.totalorder %s1680_s24, %s1213_s16  ;;  %s1218_s20 = sshll.u32 %s1390_s1, 4  ;;  %s1219_s20 = int_to_ptr.vmem [resolvable:$false] %s1218_s20 }
  0xab   : > { %s1220_s23 = scalar_lea.vmem %s1219_s20, 512  ;;  %p1221_p0 = scmp.lt.s32.totalorder %s1680_s24, %s1219_s20 }
  0xac   : > { %p1216_p13 = pnand %p1214_p7, %p1915_p10  ;;  %p1222_p8 = scmp.lt.s32.totalorder %s1220_s23, %s1213_s16 }
  0xae   : > { %p1217_p5 = pneg %p1216_p13  ;;  %p1223_p9 = por %p1222_p8, %p1221_p0 }
  0xb0   : > { %p1224_p6 = pnand %p1223_p9, %p1217_p5 }
  0xb2   : > { %1227 = shalt.err (!%p1224_p6)
}
  0xb3   : > { %p1916_p3 = scmp.ne.s32.totalorder %s1903_s12, 0  ;;  %s1917_s19 = smov 8  }
  0xb4   : > { %s1918_s11 = smov 128   ;;  %s354_s18 = scalar_lea.vmem [#allocation7], %s1555_s8 }
  0xb5   : > { %988 = dma.hbm_to_vmem [thread:$0]  (!%p1916_p3), %s1678_s22, 256, %s1680_s24, %s312_s17, %s1918_s11, %s1918_s11, %s1917_s19  }
  0xb6   : > { %s361_s14 = sshll.u32 %s354_s18, 4  ;;  %s1720_s1 = scalar_lea.hbm %s1857_s4, %s1572_s15  ;;  %s362_s14 = int_to_ptr.vmem [resolvable:$true] %s361_s14 }
  0xb7   : > { %s1228_s20 = scalar_lea.hbm %s1686_s9, 16  ;;  %s1233_s3 = scalar_lea.hbm %s1855_s2, 32 }
  0xb8   : > { %p1229_p4 = scmp.ne.s32.totalorder %s1686_s9, %s1228_s20  ;;  %p1234_p11 = scmp.lt.u32.totalorder %s1686_s9, %s1855_s2 }
  0xb9   : > { %p1235_p1 = scmp.lt.u32.totalorder %s1233_s3, %s1228_s20  ;;  %p1237_p13 = scmp.lt.u32.totalorder %s1228_s20, %s1686_s9 }
  0xba   : > { %p1231_p12 = pnand %p1229_p4, %p1915_p10 }
  0xbb   : > { %p1236_p7 = por %p1235_p1, %p1234_p11 }
  0xbc   : > { %p1232_p2 = pneg %p1231_p12 }
  0xbd   : > { %p1238_p5 = por %p1237_p13, %p1236_p7 }
  0xbf   : > { %p1239_p0 = pnand %p1238_p5, %p1232_p2 }
  0xc1   : > { %1242 = shalt.err (!%p1239_p0)
}
  0xc2   : > { %s1243_s15 = scalar_lea.vmem %s362_s14, 16  ;;  %s1391_s22 = smov [#allocation7]  }
  0xc3   : > { %p1244_p8 = scmp.ne.s32.totalorder %s362_s14, %s1243_s15  ;;  %s1248_s24 = sshll.u32 %s1391_s22, 4  ;;  %s1249_s24 = int_to_ptr.vmem [resolvable:$false] %s1248_s24 }
  0xc4   : > { %s1250_s0 = scalar_lea.vmem %s1249_s24, 32  ;;  %p1251_p4 = scmp.lt.s32.totalorder %s362_s14, %s1249_s24 }
  0xc5   : > { %p1246_p9 = pnand %p1244_p8, %p1915_p10  ;;  %p1252_p12 = scmp.lt.s32.totalorder %s1250_s0, %s1243_s15 }
  0xc7   : > { %p1247_p6 = pneg %p1246_p9  ;;  %p1253_p3 = por %p1252_p12, %p1251_p4 }
  0xc9   : > { %p1254_p1 = pnand %p1253_p3, %p1247_p6 }
  0xcb   : > { %1257 = shalt.err (!%p1254_p1)
}
  0xcc   : > { %p1919_p11 = scmp.ne.s32.totalorder %s1903_s12, 0  ;;  %s388_s3 = scalar_lea.vmem [#allocation10], %s1555_s8 }
  0xcd   : > { %s395_s6 = sshll.u32 %s388_s3, 4  ;;  %s1258_s28 = scalar_lea.hbm %s1720_s1, 16  ;;  %s396_s6 = int_to_ptr.vmem [resolvable:$true] %s395_s6 }
  0xce   : > { %994 = dma.hbm_to_vmem [thread:$0]  (!%p1919_p11), %s1686_s9, 16, %s362_s14, %s1585_s21  }
  0xcf   : > { %p1259_p2 = scmp.ne.s32.totalorder %s1720_s1, %s1258_s28  ;;  %s1263_s11 = scalar_lea.hbm %s1857_s4, 32 }
  0xd0   : > { %p1264_p13 = scmp.lt.u32.totalorder %s1720_s1, %s1857_s4  ;;  %p1265_p5 = scmp.lt.u32.totalorder %s1263_s11, %s1258_s28 }
  0xd1   : > { %p1261_p7 = pnand %p1259_p2, %p1915_p10  ;;  %p1267_p8 = scmp.lt.u32.totalorder %s1258_s28, %s1720_s1 }
  0xd2   : > { %p1266_p0 = por %p1265_p5, %p1264_p13 }
  0xd3   : > { %p1262_p3 = pneg %p1261_p7 }
  0xd4   : > { %p1268_p9 = por %p1267_p8, %p1266_p0 }
  0xd6   : > { %p1269_p6 = pnand %p1268_p9, %p1262_p3 }
  0xd8   : > { %1272 = shalt.err (!%p1269_p6)
}
  0xd9   : > { %s1273_s21 = scalar_lea.vmem %s396_s6, 16  ;;  %s1392_s8 = smov [#allocation10]  }
  0xda   : > { %p1274_p4 = scmp.ne.s32.totalorder %s396_s6, %s1273_s21  ;;  %s1278_s9 = sshll.u32 %s1392_s8, 4  ;;  %s1279_s9 = int_to_ptr.vmem [resolvable:$false] %s1278_s9 }
  0xdb   : > { %s1280_s14 = scalar_lea.vmem %s1279_s9, 32  ;;  %p1281_p2 = scmp.lt.s32.totalorder %s396_s6, %s1279_s9 }
  0xdc   : > { %p1276_p12 = pnand %p1274_p4, %p1915_p10  ;;  %p1282_p7 = scmp.lt.s32.totalorder %s1280_s14, %s1273_s21 }
  0xde   : > { %p1277_p1 = pneg %p1276_p12  ;;  %p1283_p11 = por %p1282_p7, %p1281_p2 }
  0xe0   : > { %p1284_p5 = pnand %p1283_p11, %p1277_p1 }
  0xe2   : > { %1287 = shalt.err (!%p1284_p5)
}
  0xe3   : > { %p1920_p13 = scmp.ne.s32.totalorder %s1903_s12, 0  ;;  %p1921_p3 = scmp.ne.s32.totalorder %s1898_s13, 0 }
  0xe4   : > { %s1762_s5 = sand.u32 (!%p1921_p3), 1, %s1366_s25   ;;  %p1922_p10 = scmp.ne.s32.totalorder (!%p1921_p3), %s1893_s10, 0 }
  0xe5   : > { %1000 = dma.hbm_to_vmem [thread:$0]  (!%p1920_p13), %s1720_s1, 16, %s396_s6, %s1628_s26  }
  0xe6   : > { %404 = sbr.rel (%p1921_p3) target bundleno = 800 (0x320), region = 48  ;;  %s930_s16 = sshll.u32 (!%p1921_p3), %s1762_s5, 4 }
  0xe7   : > { %s407_s20 = scalar_lea.sflag (!%p1921_p3), [#allocation3], %s1762_s5  ;;  %s410_s23 = scalar_lea.vmem (!%p1921_p3), [#allocation2], %s930_s16 }
  0xed   : > { %1341 = dma.done.wait (%p1922_p10), %s407_s20, 256  }
  0xee   : > { %1343 = vsyncadd (%p1922_p10), %s407_s20, 4294967040  ;;  %s415_s26 = sand.u32 1, %s1468_s30   ;;  %s418_s13 = scalar_lea.vmem [#allocation5], %s1762_s5 }
  0xef   : > { %s416_s12 = scalar_lea.sflag [#allocation6], %s415_s26 }
  0xf0   : > { %1345 = dma.done.wait (%p1922_p10), %s416_s12, 32  }
  0xf1   : > { %1347 = vsyncadd (%p1922_p10), %s416_s12, 4294967264  ;;  %s426_s1 = scalar_lea.vmem [#allocation7], %s1762_s5  ;;  %s432_s15 = scalar_lea.sflag [#allocation9], %s415_s26 }
  0xf2   : > { %1349 = dma.done.wait (%p1922_p10), %s432_s15, 32  }
  0xf3   : > { %1351 = vsyncadd (%p1922_p10), %s432_s15, 4294967264  ;;  %p1923_p11 = scmp.eq.s32.totalorder %s1468_s30, 0 }
  0xf5   : > { %1353 = dma.done.wait (%p1923_p11), [#allocation12], 1056   ;;  %p1924_p0 = pmov %p1923_p11 }
  0xf6   : > { %vm505_vm0 = vcmask 523264   ;;  %v503_v0 = vld [vmem:[%s410_s23] sm:$0xff]  ;;  %v504_v1 = vld [vmem:[%s410_s23 + $0x8] sm:$0xff]  ;;  %v1393_v22 = vmov 0   ;;  %v595_v41 = vlaneseq  ;;  %vm703_vm1 = vcmask 1043456   ;;  %s957_s30 = sshll.u32 %s1374_s27, 8 }
  0xf7   : > { %1355 = vsyncadd (%p1924_p0), [#allocation12], 4294966240  ;;  %v506_v2 = vsel %vm505_vm0, %v503_v0, 0.0  ;;  %v509_v3 = vsel %vm505_vm0, %v504_v1, 0.0  ;;  %v1066_v14 = vld [vmem:[#allocation11 + $0x4] ss:$8 sps:$4 sm:$0xff]   ;;  %680 = vmatprep.mubr.bf16.mxu0 %v1393_v22 }
  0xf8   : > { %507 = vadd.xlane.f32.xlu0 %v506_v2  ;;  %v1068_v15 = vld [vmem:[#allocation11] ss:$8 sps:$4 sm:$0xff]   ;;  %648 = vmatprep.subr.bf16.mxu0 %v1066_v14  ;;  %v1069_v16 = vld [vmem:[#allocation11 + $0x14] ss:$8 sps:$4 sm:$0xff]   ;;  %v1071_v17 = vld [vmem:[#allocation11 + $0x10] ss:$8 sps:$4 sm:$0xff]  }
  0xf9   : > { %649 = vmatpush1.bf16.msra.mxu0 %v1068_v15  ;;  %v1072_v18 = vld [vmem:[#allocation11 + $0x24] ss:$8 sps:$4 sm:$0xff]   ;;  %v1074_v19 = vld [vmem:[#allocation11 + $0x20] ss:$8 sps:$4 sm:$0xff]   ;;  %v1075_v20 = vld [vmem:[#allocation11 + $0x34] ss:$8 sps:$4 sm:$0xff]  }
  0xfa   : > { %650 = vmatprep.subr.bf16.mxu0 %v1069_v16  ;;  %v1077_v21 = vld [vmem:[#allocation11 + $0x30] ss:$8 sps:$4 sm:$0xff]   ;;  %v596_v42 = vshrl.u32 %v595_v41, 7  ;;  %v593_v44 = vld [vmem:[#allocation13] sm:$0x3]  ;;  %vm704_vm2 = vcmask 523268  }
  0xfb   : > { %v935_v29 = vld [vmem:[%s418_s13] ss:$0 sm:$0xff]  ;;  %s1925_s10 = sld [smem:[#allocation23_spill]]  ;;  %s496_s22 = scalar_lea.vmem [#allocation14], %s930_s16  ;;  %vm705_vm3 = vmor %vm704_vm2, %vm703_vm1 }
  0xfc   : > { %510 = vadd.xlane.f32.xlu0 %v509_v3  ;;  %v578_v32 = vadd.f32 1.0, %v935_v29  ;;  %v937_v36 = vld [vmem:[%s426_s1] ss:$0 sm:$0xff]  ;;  %v597_v43 = vsub.s32 0, %v596_v42  ;;  %v601_v45 = vsub.s32 1, %v596_v42  ;;  %s727_s24 = sshll.u32 %s496_s22, 4  ;;  %s1804_s24 = int_to_ptr.vmem [resolvable:$true] %s727_s24 }
  0xfd   : > { %651 = vmatpush1.bf16.msra.mxu0 %v1071_v17  ;;  %s1926_s6 = sld [smem:[#allocation32_spill]]  ;;  %s709_s27 = scalar_lea.sflag [#allocation4], %s1762_s5 }
  0xfe   : > { %652 = vmatprep.subr.bf16.mxu0 %v1072_v18  ;;  %v598_v46 = vrot.slane %v593_v44, %v597_v43  ;;  %v602_v47 = vrot.slane %v593_v44, %v601_v45  ;;  %s1288_s17 = scalar_lea.vmem %s1804_s24, 256  ;;  %s1394_s19 = smov [#allocation14]  }
  0xff   : > { %p1289_p8 = scmp.ne.s32.totalorder %s1804_s24, %s1288_s17  ;;  %s1292_s11 = sshll.u32 %s1394_s19, 4  ;;  %s1293_s11 = int_to_ptr.vmem [resolvable:$false] %s1292_s11 }
 0x100   : > { %s1294_s18 = scalar_lea.vmem %s1293_s11, 512  ;;  %p1295_p12 = scmp.lt.s32.totalorder %s1804_s24, %s1293_s11 }
 0x101   : > { %653 = vmatpush1.bf16.msra.mxu0 %v1074_v19  ;;  %p1927_p9 = scmp.ne.s32.totalorder %s1925_s10, 0  ;;  %p1296_p1 = scmp.lt.s32.totalorder %s1294_s18, %s1288_s17 }
 0x102   : > { %654 = vmatprep.subr.bf16.mxu0 %v1075_v20 }
 0x103   : > { %s1802_s28 = scalar_lea.hbm %s1926_s6, %s957_s30  ;;  %p1290_p6 = pnand %p1289_p8, %p1927_p9 }
 0x104   : > { %p1297_p2 = por %p1296_p1, %p1295_p12 }
 0x105   : > { %655 = vmatpush1.bf16.msra.mxu0 %v1077_v21  ;;  %p1291_p4 = pneg %p1290_p6 }
 0x107   : > { %p1298_p7 = pnand %p1297_p2, %p1291_p4 }
 0x185   : > { %v508_v4 = vpop.xlane.xlu0 %507 }
 0x186   : > { %v513_v5 = vmul.f32 0.015625, %v508_v4 }
 0x188   : > { %v515_v6 = vsub.f32 %v503_v0, %v513_v5 }
 0x189   : > { %v511_v7 = vpop.xlane.xlu0 %510 }
 0x18a   : > { %v514_v8 = vmul.f32 0.015625, %v511_v7  ;;  %v517_v9 = vmul.f32 %v515_v6, %v515_v6 }
 0x18c   : > { %v516_v10 = vsub.f32 %v504_v1, %v514_v8  ;;  %v519_v11 = vsel %vm505_vm0, %v517_v9, 0.0 }
 0x18d   : > { %520 = vadd.xlane.f32.xlu1 %v519_v11 }
 0x18e   : > { %v518_v12 = vmul.f32 %v516_v10, %v516_v10 }
 0x190   : > { %v522_v13 = vsel %vm505_vm0, %v518_v12, 0.0 }
 0x191   : > { %523 = vadd.xlane.f32.xlu1 %v522_v13 }
 0x21a   : > { %v521_v23 = vpop.xlane.xlu1 %520 }
 0x21b   : > { %v525_v24 = vmul.f32 0.015625, %v521_v23 }
 0x21d   : > { %v527_v25 = vadd.f32 1e-06, %v525_v24 }
 0x21e   : > { %v524_v26 = vpop.xlane.xlu1 %523 }
 0x21f   : > { %1078 = vrsqrt.f32 %v527_v25  ;;  %v526_v27 = vmul.f32 0.015625, %v524_v26 }
 0x221   : > { %v528_v28 = vadd.f32 1e-06, %v526_v27 }
 0x223   : > { %1080 = vrsqrt.f32 %v528_v28 }
 0x229   : > { %v1079_v30 = vpop.eup %1078 }
 0x22a   : > { %v531_v31 = vmul.f32 %v1079_v30, %v515_v6 }
 0x22c   : > { %v580_v35 = vmul.f32 %v578_v32, %v531_v31 }
 0x22d   : > { %v1081_v33 = vpop.eup %1080 }
 0x22e   : > { %v532_v34 = vmul.f32 %v1081_v33, %v516_v10  ;;  %v582_v38 = vadd.f32 %v937_v36, %v580_v35 }
 0x230   : > { %v581_v37 = vmul.f32 %v578_v32, %v532_v34 }
 0x232   : > { %v583_v39 = vadd.f32 %v937_v36, %v581_v37 }
 0x234   : > { %v584_v40 = vpack.c.bf16 %v583_v39, %v582_v38 }
 0x236   : > { %946 = vmatmul.mubr.msk.bf16.vlgmr.msra.gmra.mrb[0].mxu0 %vm505_vm0, %v584_v40 }
 0x309   : > { %v682_v48 = vpop.f32.mrb[0].mxu0 }
 0x30a   : > { %v683_v49 = vadd.f32 %v682_v48, %v598_v46  ;;  %v684_v50 = vpop.f32.mrb[1].mxu0 }
 0x30b   : > { %v685_v51 = vadd.f32 %v684_v50, %v602_v47  ;;  %v686_v52 = vpop.f32.mrb[2].mxu0 }
 0x30c   : > { %v687_v53 = vadd.f32 %v686_v52, %v598_v46  ;;  %v688_v54 = vpop.f32.mrb[3].mxu0 }
 0x30d   : > { %v955_v55 = vpack.c.bf16 %v685_v51, %v683_v49  ;;  %v689_v56 = vadd.f32 %v688_v54, %v602_v47 }
 0x30f   : > { %706 = vst.msk [vmem:[%s496_s22] sm:$0xff] %vm705_vm3, %v955_v55  ;;  %v956_v57 = vpack.c.bf16 %v689_v56, %v687_v53 }
 0x311   : > { %707 = vst.msk [vmem:[%s496_s22 + $0x8] sm:$0xff] %vm705_vm3, %v956_v57 }
 0x312   : > { %1301 = shalt.err (!%p1298_p7)
}
 0x313   : > { %s1302_s7 = scalar_lea.hbm %s1802_s28, 256  ;;  %s1306_s9 = scalar_lea.hbm %s1926_s6, 512 }
 0x314   : > { %p1303_p5 = scmp.ne.s32.totalorder %s1802_s28, %s1302_s7  ;;  %p1307_p10 = scmp.lt.u32.totalorder %s1802_s28, %s1926_s6 }
 0x315   : > { %p1308_p11 = scmp.lt.u32.totalorder %s1306_s9, %s1302_s7  ;;  %p1310_p8 = scmp.lt.u32.totalorder %s1302_s7, %s1802_s28 }
 0x316   : > { %p1304_p13 = pnand %p1303_p5, %p1927_p9 }
 0x317   : > { %p1309_p0 = por %p1308_p11, %p1307_p10 }
 0x318   : > { %p1305_p3 = pneg %p1304_p13 }
 0x319   : > { %p1311_p6 = por %p1310_p8, %p1309_p0 }
 0x31b   : > { %p1312_p4 = pnand %p1311_p6, %p1305_p3 }
 0x31d   : > { %1315 = shalt.err (!%p1312_p4)
}
 0x31e   : > { %s1395_s20 = smov 128   ;;  %s1396_s23 = smov 8  }
 0x31f   : > { %976 = dma.vmem_to_hbm [thread:$0]  (%p1927_p9), %s1804_s24, 256, %s1802_s28, %s709_s27, %s1395_s20, %s1395_s20, %s1396_s23  }
 0x320 PF: > { %s1928_s26 = sld [smem:[#allocation20_spill]]  ;;  %s1929_s12 = sld [smem:[#allocation24_spill]] }
 0x321   : > { %p1931_p1 = scmp.ge.s32.totalorder %s1382_s29, 2 }
 0x326   : > { %s742_s13 = sand.u32 1, %s1928_s26   ;;  %p1930_p12 = scmp.ne.s32.totalorder %s1929_s12, 0 }
 0x327   : > { %s743_s1 = scalar_lea.sflag [#allocation4], %s742_s13 }
 0x328   : > { %p1002_p2 = pnand %p1931_p1, %p1930_p12 }
 0x32a   : > { %1357 = dma.done.wait (!%p1002_p2), %s743_s1, 256  }
 0x32b   : > { %1359 = vsyncadd (!%p1002_p2), %s743_s1, 4294967040  ;;  %s30_s29 = sadd.s32 1, %s1382_s29   ;;  %s1932_s15 = sld [smem:[#allocation21_spill]] }
 0x32c   : > { %p27_p7 = scmp.ge.s32.totalorder %s30_s29, 4   ;;  %s1933_s26 = sld [smem:[#allocation26_spill]] }
 0x32d   : > { %s1934_s27 = sld [smem:[#allocation22_spill]]  ;;  %s1935_s28 = sld [smem:[#allocation25_spill]] }
 0x32e   : > { %s1936_s24 = smov %s1366_s25  ;;  %29 = sbr.rel (!%p27_p7) target bundleno = 18 (0x12), region = 151 }
 0x331   : > { %s1937_s25 = smov %s1932_s15 }
 0x335   :  { %748 = vsyncpa [#allocation3], 1 }
 0x336   :  { %750 = vsyncpa [#allocation3 + $0x1], 1 }
 0x337   :  { %751 = vsyncpa [#allocation6], 1 }
 0x338   :  { %753 = vsyncpa [#allocation6 + $0x1], 1 }
 0x339   :  { %754 = vsyncpa [#allocation9], 1 }
 0x33a   :  { %756 = vsyncpa [#allocation9 + $0x1], 1 }
 0x33b   :  { %757 = vsyncpa [#allocation12], 1 }
 0x33c   :  { %758 = vsyncpa [#allocation4], 1 }
 0x33d   :  { %760 = vsyncpa [#allocation4 + $0x1], 1 }

// kernel: transformer_block_forward.20
= control target key start
LH: loop header
LB: loop body
LE: loop exit
PB: predicated region body
PF: predicated region fallthrough
CT: control target
= control target key end

     0   :  { %vm59_vm0 = vcmask 130048   ;;  %vm260_vm1 = vcmask 125952   ;;  %s605_s0 = inlined_call_operand.vmem [shape: bf16[128,16], index: 0, kind: input, shape index: {}]   ;;  %s606_s1 = inlined_call_operand.vmem [shape: f32[1,16], index: 1, kind: input, shape index: {}]   ;;  %s607_s2 = inlined_call_operand.vmem [shape: bf16[128,16], index: 2, kind: output, shape index: {}]  }
   0x1   :  { %v346_v0 = vld [vmem:[%s605_s0 + $0x8] sm:$0xff]   ;;  %v315_v1 = vld [vmem:[%s605_s0] sm:$0xff]   ;;  %v347_v2 = vld [vmem:[%s605_s0 + $0x10] sm:$0xff]  }
   0x2   :  { %v409_v3 = vunpack.c.l.bf16 %v346_v0  ;;  %v411_v4 = vunpack.c.l.bf16 %v315_v1  ;;  %v413_v5 = vunpack.c.h.bf16 %v346_v0  ;;  %v415_v6 = vunpack.c.h.bf16 %v315_v1  ;;  %v348_v13 = vld [vmem:[%s605_s0 + $0x18] sm:$0xff]   ;;  %v349_v22 = vld [vmem:[%s605_s0 + $0x20] sm:$0xff]   ;;  %v350_v29 = vld [vmem:[%s605_s0 + $0x28] sm:$0xff]  }
   0x3   :  { %v417_v7 = vunpack.c.h.bf16 %v347_v2  ;;  %v419_v8 = vunpack.c.l.bf16 %v347_v2  ;;  %v434_v16 = vunpack.c.h.bf16 %v348_v13  ;;  %v436_v17 = vunpack.c.l.bf16 %v348_v13  ;;  %v351_v36 = vld [vmem:[%s605_s0 + $0x30] sm:$0xff]   ;;  %v352_v43 = vld [vmem:[%s605_s0 + $0x38] sm:$0xff]  }
   0x4   :  { %v45_v9 = vmul.f32 %v409_v3, %v409_v3  ;;  %v43_v10 = vmul.f32 %v411_v4, %v411_v4  ;;  %v46_v11 = vmul.f32 %v413_v5, %v413_v5  ;;  %v44_v12 = vmul.f32 %v415_v6, %v415_v6 }
   0x5   :  { %v48_v20 = vmul.f32 %v417_v7, %v417_v7  ;;  %v47_v21 = vmul.f32 %v419_v8, %v419_v8  ;;  %v50_v23 = vmul.f32 %v434_v16, %v434_v16  ;;  %v49_v24 = vmul.f32 %v436_v17, %v436_v17 }
   0x6   :  { %v66_v14 = vsel %vm59_vm0, %v45_v9, 0.0  ;;  %v60_v15 = vsel %vm59_vm0, %v43_v10, 0.0  ;;  %v69_v18 = vsel %vm59_vm0, %v46_v11, 0.0  ;;  %v63_v19 = vsel %vm59_vm0, %v44_v12, 0.0 }
   0x7   :  { %67 = vadd.xlane.f32.xlu1 %v66_v14  ;;  %61 = vadd.xlane.f32.xlu0 %v60_v15  ;;  %v75_v25 = vsel %vm59_vm0, %v48_v20, 0.0  ;;  %v72_v26 = vsel %vm59_vm0, %v47_v21, 0.0  ;;  %v453_v27 = vunpack.c.h.bf16 %v349_v22  ;;  %v455_v28 = vunpack.c.l.bf16 %v349_v22 }
   0x8   :  { %v81_v30 = vsel %vm59_vm0, %v50_v23, 0.0  ;;  %v78_v31 = vsel %vm59_vm0, %v49_v24, 0.0  ;;  %v466_v34 = vunpack.c.h.bf16 %v350_v29  ;;  %v468_v35 = vunpack.c.l.bf16 %v350_v29  ;;  %v507_v23 = vld [vmem:[%s606_s1] ss:$0 sm:$0xff] }
   0x9   :  { %v52_v32 = vmul.f32 %v453_v27, %v453_v27  ;;  %v51_v33 = vmul.f32 %v455_v28, %v455_v28  ;;  %v473_v37 = vunpack.c.h.bf16 %v351_v36  ;;  %v475_v38 = vunpack.c.l.bf16 %v351_v36 }
   0xa   :  { %v54_v41 = vmul.f32 %v466_v34, %v466_v34  ;;  %v53_v42 = vmul.f32 %v468_v35, %v468_v35  ;;  %v486_v44 = vunpack.c.h.bf16 %v352_v43  ;;  %v488_v45 = vunpack.c.l.bf16 %v352_v43 }
   0xb   :  { %70 = vadd.xlane.f32.xlu1 %v69_v18  ;;  %64 = vadd.xlane.f32.xlu0 %v63_v19  ;;  %v87_v39 = vsel %vm59_vm0, %v52_v32, 0.0  ;;  %v84_v40 = vsel %vm59_vm0, %v51_v33, 0.0  ;;  %v56_v48 = vmul.f32 %v473_v37, %v473_v37  ;;  %v55_v49 = vmul.f32 %v475_v38, %v475_v38 }
   0xc   :  { %v93_v46 = vsel %vm59_vm0, %v54_v41, 0.0  ;;  %v90_v47 = vsel %vm59_vm0, %v53_v42, 0.0  ;;  %v58_v52 = vmul.f32 %v486_v44, %v486_v44  ;;  %v57_v53 = vmul.f32 %v488_v45, %v488_v45 }
   0xd   :  { %v99_v50 = vsel %vm59_vm0, %v56_v48, 0.0  ;;  %v96_v51 = vsel %vm59_vm0, %v55_v49, 0.0 }
   0xe   :  { %v105_v54 = vsel %vm59_vm0, %v58_v52, 0.0  ;;  %v102_v55 = vsel %vm59_vm0, %v57_v53, 0.0 }
   0xf   :  { %76 = vadd.xlane.f32.xlu1 %v75_v25  ;;  %73 = vadd.xlane.f32.xlu0 %v72_v26 }
  0x13   :  { %82 = vadd.xlane.f32.xlu1 %v81_v30  ;;  %79 = vadd.xlane.f32.xlu0 %v78_v31 }
  0x17   :  { %88 = vadd.xlane.f32.xlu1 %v87_v39  ;;  %85 = vadd.xlane.f32.xlu0 %v84_v40 }
  0x1b   :  { %94 = vadd.xlane.f32.xlu1 %v93_v46  ;;  %91 = vadd.xlane.f32.xlu0 %v90_v47 }
  0x1f   :  { %100 = vadd.xlane.f32.xlu1 %v99_v50  ;;  %97 = vadd.xlane.f32.xlu0 %v96_v51 }
  0x23   :  { %106 = vadd.xlane.f32.xlu1 %v105_v54  ;;  %103 = vadd.xlane.f32.xlu0 %v102_v55 }
  0x94   :  { %v68_v56 = vpop.xlane.xlu1 %67  ;;  %v62_v57 = vpop.xlane.xlu0 %61 }
  0x95   :  { %v111_v58 = vmul.f32 0.0625, %v68_v56  ;;  %v109_v59 = vmul.f32 0.0625, %v62_v57 }
  0x97   :  { %v127_v60 = vadd.f32 1e-06, %v111_v58  ;;  %v125_v61 = vadd.f32 1e-06, %v109_v59 }
  0x98   :  { %v71_v62 = vpop.xlane.xlu1 %70  ;;  %v65_v63 = vpop.xlane.xlu0 %64 }
  0x99   :  { %353 = vrsqrt.f32 %v127_v60  ;;  %v112_v0 = vmul.f32 0.0625, %v71_v62  ;;  %v110_v1 = vmul.f32 0.0625, %v65_v63 }
  0x9a   :  { %355 = vrsqrt.f32 %v125_v61 }
  0x9b   :  { %v128_v2 = vadd.f32 1e-06, %v112_v0  ;;  %v126_v9 = vadd.f32 1e-06, %v110_v1 }
  0x9c   :  { %v77_v10 = vpop.xlane.xlu1 %76  ;;  %v74_v11 = vpop.xlane.xlu0 %73 }
  0x9d   :  { %357 = vrsqrt.f32 %v128_v2  ;;  %v114_v12 = vmul.f32 0.0625, %v77_v10  ;;  %v113_v13 = vmul.f32 0.0625, %v74_v11 }
  0x9e   :  { %359 = vrsqrt.f32 %v126_v9 }
  0x9f   :  { %v130_v14 = vadd.f32 1e-06, %v114_v12  ;;  %v129_v15 = vadd.f32 1e-06, %v113_v13 }
  0xa0   :  { %v83_v18 = vpop.xlane.xlu1 %82  ;;  %v80_v19 = vpop.xlane.xlu0 %79 }
  0xa1   :  { %361 = vrsqrt.f32 %v130_v14  ;;  %v116_v20 = vmul.f32 0.0625, %v83_v18  ;;  %v115_v21 = vmul.f32 0.0625, %v80_v19 }
  0xa2   :  { %363 = vrsqrt.f32 %v129_v15 }
  0xa3   :  { %v354_v22 = vpop.eup %353  ;;  %v132_v24 = vadd.f32 1e-06, %v116_v20  ;;  %v131_v25 = vadd.f32 1e-06, %v115_v21 }
  0xa4   :  { %v356_v26 = vpop.eup %355  ;;  %v159_v29 = vmul.f32 %v354_v22, %v409_v3  ;;  %v89_v30 = vpop.xlane.xlu1 %88 }
  0xa5   :  { %v86_v31 = vpop.xlane.xlu0 %85  ;;  %v157_v32 = vmul.f32 %v356_v26, %v411_v4  ;;  %365 = vrsqrt.f32 %v132_v24  ;;  %v118_v33 = vmul.f32 0.0625, %v89_v30 }
  0xa6   :  { %v117_v36 = vmul.f32 0.0625, %v86_v31  ;;  %v182_v39 = vmul.f32 %v507_v23, %v159_v29  ;;  %367 = vrsqrt.f32 %v131_v25 }
  0xa7   :  { %v358_v40 = vpop.eup %357  ;;  %v180_v41 = vmul.f32 %v507_v23, %v157_v32  ;;  %v134_v42 = vadd.f32 1e-06, %v118_v33 }
  0xa8   :  { %v133_v43 = vadd.f32 1e-06, %v117_v36  ;;  %v360_v46 = vpop.eup %359  ;;  %v300_v47 = vpack.c.bf16 %v182_v39, %v182_v39  ;;  %v160_v3 = vmul.f32 %v358_v40, %v413_v5  ;;  %v95_v48 = vpop.xlane.xlu1 %94 }
  0xa9   :  { %v92_v49 = vpop.xlane.xlu0 %91  ;;  %v298_v50 = vpack.c.bf16 %v180_v41, %v180_v41  ;;  %v158_v4 = vmul.f32 %v360_v46, %v415_v6  ;;  %369 = vrsqrt.f32 %v134_v42  ;;  %v120_v51 = vmul.f32 0.0625, %v95_v48 }
  0xaa   :  { %263 = vst.msk [vmem:[%s607_s2 + $0x8] sm:$0xf] %vm260_vm1, %v300_v47  ;;  %v183_v52 = vmul.f32 %v507_v23, %v160_v3  ;;  %371 = vrsqrt.f32 %v133_v43  ;;  %v119_v53 = vmul.f32 0.0625, %v92_v49 }
  0xab   :  { %v362_v54 = vpop.eup %361  ;;  %261 = vst.msk [vmem:[%s607_s2] sm:$0xf] %vm260_vm1, %v298_v50  ;;  %v181_v5 = vmul.f32 %v507_v23, %v158_v4  ;;  %v136_v6 = vadd.f32 1e-06, %v120_v51 }
  0xac   :  { %v364_v55 = vpop.eup %363  ;;  %v301_v56 = vpack.c.bf16 %v183_v52, %v183_v52  ;;  %v162_v57 = vmul.f32 %v362_v54, %v417_v7  ;;  %v135_v58 = vadd.f32 1e-06, %v119_v53  ;;  %v101_v59 = vpop.xlane.xlu1 %100 }
  0xad   :  { %v98_v60 = vpop.xlane.xlu0 %97  ;;  %v299_v61 = vpack.c.bf16 %v181_v5, %v181_v5  ;;  %v161_v62 = vmul.f32 %v364_v55, %v419_v8  ;;  %373 = vrsqrt.f32 %v136_v6  ;;  %v122_v63 = vmul.f32 0.0625, %v101_v59 }
  0xae   :  { %264 = vst.msk [vmem:[%s607_s2 + $0xc] sm:$0xf] %vm260_vm1, %v301_v56  ;;  %v185_v0 = vmul.f32 %v507_v23, %v162_v57  ;;  %375 = vrsqrt.f32 %v135_v58  ;;  %v121_v1 = vmul.f32 0.0625, %v98_v60 }
  0xaf   :  { %v366_v2 = vpop.eup %365  ;;  %262 = vst.msk [vmem:[%s607_s2 + $0x4] sm:$0xf] %vm260_vm1, %v299_v61  ;;  %v184_v7 = vmul.f32 %v507_v23, %v161_v62  ;;  %v138_v8 = vadd.f32 1e-06, %v122_v63 }
  0xb0   :  { %v368_v9 = vpop.eup %367  ;;  %v303_v10 = vpack.c.bf16 %v185_v0, %v185_v0  ;;  %v164_v11 = vmul.f32 %v366_v2, %v434_v16  ;;  %v137_v12 = vadd.f32 1e-06, %v121_v1  ;;  %v107_v13 = vpop.xlane.xlu1 %106 }
  0xb1   :  { %v104_v14 = vpop.xlane.xlu0 %103  ;;  %v302_v15 = vpack.c.bf16 %v184_v7, %v184_v7  ;;  %v163_v18 = vmul.f32 %v368_v9, %v436_v17  ;;  %377 = vrsqrt.f32 %v138_v8  ;;  %v124_v19 = vmul.f32 0.0625, %v107_v13 }
  0xb2   :  { %266 = vst.msk [vmem:[%s607_s2 + $0x14] sm:$0xf] %vm260_vm1, %v303_v10  ;;  %v187_v20 = vmul.f32 %v507_v23, %v164_v11  ;;  %379 = vrsqrt.f32 %v137_v12  ;;  %v123_v21 = vmul.f32 0.0625, %v104_v14 }
  0xb3   :  { %v370_v22 = vpop.eup %369  ;;  %265 = vst.msk [vmem:[%s607_s2 + $0x10] sm:$0xf] %vm260_vm1, %v302_v15  ;;  %v186_v16 = vmul.f32 %v507_v23, %v163_v18  ;;  %v140_v17 = vadd.f32 1e-06, %v124_v19 }
  0xb4   :  { %v372_v24 = vpop.eup %371  ;;  %v305_v25 = vpack.c.bf16 %v187_v20, %v187_v20  ;;  %v166_v26 = vmul.f32 %v370_v22, %v453_v27  ;;  %v139_v29 = vadd.f32 1e-06, %v123_v21 }
  0xb5   :  { %v304_v30 = vpack.c.bf16 %v186_v16, %v186_v16  ;;  %v165_v31 = vmul.f32 %v372_v24, %v455_v28  ;;  %381 = vrsqrt.f32 %v140_v17 }
  0xb6   :  { %268 = vst.msk [vmem:[%s607_s2 + $0x1c] sm:$0xf] %vm260_vm1, %v305_v25  ;;  %v189_v32 = vmul.f32 %v507_v23, %v166_v26  ;;  %383 = vrsqrt.f32 %v139_v29 }
  0xb7   :  { %v374_v33 = vpop.eup %373  ;;  %267 = vst.msk [vmem:[%s607_s2 + $0x18] sm:$0xf] %vm260_vm1, %v304_v30  ;;  %v188_v27 = vmul.f32 %v507_v23, %v165_v31 }
  0xb8   :  { %v376_v36 = vpop.eup %375  ;;  %v307_v39 = vpack.c.bf16 %v189_v32, %v189_v32  ;;  %v168_v28 = vmul.f32 %v374_v33, %v466_v34 }
  0xb9   :  { %v306_v40 = vpack.c.bf16 %v188_v27, %v188_v27  ;;  %v167_v41 = vmul.f32 %v376_v36, %v468_v35 }
  0xba   :  { %270 = vst.msk [vmem:[%s607_s2 + $0x24] sm:$0xf] %vm260_vm1, %v307_v39  ;;  %v191_v42 = vmul.f32 %v507_v23, %v168_v28 }
  0xbb   :  { %v378_v43 = vpop.eup %377  ;;  %269 = vst.msk [vmem:[%s607_s2 + $0x20] sm:$0xf] %vm260_vm1, %v306_v40  ;;  %v190_v46 = vmul.f32 %v507_v23, %v167_v41 }
  0xbc   :  { %v380_v47 = vpop.eup %379  ;;  %v309_v34 = vpack.c.bf16 %v191_v42, %v191_v42  ;;  %v170_v3 = vmul.f32 %v378_v43, %v473_v37 }
  0xbd   :  { %v308_v35 = vpack.c.bf16 %v190_v46, %v190_v46  ;;  %v169_v48 = vmul.f32 %v380_v47, %v475_v38 }
  0xbe   :  { %272 = vst.msk [vmem:[%s607_s2 + $0x2c] sm:$0xf] %vm260_vm1, %v309_v34  ;;  %v193_v49 = vmul.f32 %v507_v23, %v170_v3 }
  0xbf   :  { %v382_v50 = vpop.eup %381  ;;  %271 = vst.msk [vmem:[%s607_s2 + $0x28] sm:$0xf] %vm260_vm1, %v308_v35  ;;  %v192_v4 = vmul.f32 %v507_v23, %v169_v48 }
  0xc0   :  { %v384_v51 = vpop.eup %383  ;;  %v311_v37 = vpack.c.bf16 %v193_v49, %v193_v49  ;;  %v172_v52 = vmul.f32 %v382_v50, %v486_v44 }
  0xc1   :  { %v310_v38 = vpack.c.bf16 %v192_v4, %v192_v4  ;;  %v171_v53 = vmul.f32 %v384_v51, %v488_v45 }
  0xc2   :  { %274 = vst.msk [vmem:[%s607_s2 + $0x34] sm:$0xf] %vm260_vm1, %v311_v37  ;;  %v195_v54 = vmul.f32 %v507_v23, %v172_v52 }
  0xc3   :  { %273 = vst.msk [vmem:[%s607_s2 + $0x30] sm:$0xf] %vm260_vm1, %v310_v38  ;;  %v194_v5 = vmul.f32 %v507_v23, %v171_v53 }
  0xc4   :  { %v313_v6 = vpack.c.bf16 %v195_v54, %v195_v54 }
  0xc5   :  { %v312_v55 = vpack.c.bf16 %v194_v5, %v194_v5 }
  0xc6   :  { %276 = vst.msk [vmem:[%s607_s2 + $0x3c] sm:$0xf] %vm260_vm1, %v313_v6 }
  0xc7   :  { %275 = vst.msk [vmem:[%s607_s2 + $0x38] sm:$0xf] %vm260_vm1, %v312_v55 }

// kernel: transformer_block_forward.21
= control target key start
LH: loop header
LB: loop body
LE: loop exit
PB: predicated region body
PF: predicated region fallthrough
CT: control target
= control target key end

     0   :  { %s1998_s0 = inlined_call_operand.hbm [shape: bf16[2,4,48,16], index: 0, kind: input, shape index: {}]   ;;  %s1999_s1 = inlined_call_operand.hbm [shape: bf16[2,4,48,16], index: 1, kind: input, shape index: {}]   ;;  %s2000_s2 = inlined_call_operand.hbm [shape: bf16[2,4,48,16], index: 2, kind: input, shape index: {}]   ;;  %s2001_s3 = inlined_call_operand.hbm [shape: bf16[2,4,48,16], index: 3, kind: output, shape index: {}]  }
   0x1   :  { %2013 = sst [smem:[#allocation19_spill]] %s1998_s0 }
   0x2   :  { %2014 = sst [smem:[#allocation20_spill]] %s1999_s1 }
   0x3   :  { %8 = vsyncpa [#allocation6], 0 }
   0x4   :  { %10 = vsyncpa [#allocation6 + $0x1], 0 }
   0x5   :  { %11 = vsyncpa [#allocation9], 0 }
   0x6   :  { %13 = vsyncpa [#allocation9 + $0x1], 0 }
   0x7   :  { %14 = vsyncpa [#allocation7], 0 }
   0x8   :  { %16 = vsyncpa [#allocation7 + $0x1], 0  ;;  %s1494_s12 = smov 0   ;;  %s1496_s13 = smov 0  }
   0x9   :  { %s1498_s14 = smov 0   ;;  %s1500_s15 = smov 0  }
   0xa   :  { %s1502_s16 = smov 0   ;;  %s1504_s17 = smov 0  }
   0xb   :  { %s1506_s18 = smov 0   ;;  %s1508_s19 = smov 0  }
   0xc LB: > { %2015 = sst [smem:[#allocation15_spill]] %s1452_s17  ;;  %s1535_s20 = sadd.s32 4294967295, %s1460_s19   ;;  %s1460_s19 = sphi %s1508_s19, %s22_s19   ;;  %s1456_s18 = sphi %s1506_s18, %s2039_s18   ;;  %s1452_s17 = sphi %s1504_s17, %s2038_s17   ;;  %s1448_s16 = sphi %s1502_s16, %s2037_s16   ;;  %s1444_s15 = sphi %s1500_s15, %s2036_s15   ;;  %s1440_s14 = sphi %s1498_s14, %s2042_s14   ;;  %s1436_s13 = sphi %s1496_s13, %s2041_s13   ;;  %s1432_s12 = sphi %s1494_s12, %s2040_s12  }
   0xd   : > { %2016 = sst [smem:[#allocation16_spill]] %s1456_s18  ;;  %s1020_s21 = sadd.s32 4294967294, %s1460_s19  }
   0xe   : > { %s44_s22 = sadd.s32 1, %s1452_s17  ;;  %s48_s23 = sadd.s32 1, %s1456_s18 }
   0xf   : > { %p46_p0 = scmp.ge.s32.totalorder %s44_s22, 4  ;;  %s59_s24 = sadd.s32 1, %s1440_s14 }
  0x10   : > { %p66_p1 = scmp.ne.s32.totalorder %s1440_s14, %s1436_s13  ;;  %p67_p2 = scmp.eq.s32.totalorder %s1460_s19, 0 }
  0x11   : > { %s2044_s22 = smov (%p46_p0, %s44_s22), 0  ;;  %s2046_s23 = smov (!%p46_p0, %s48_s23), %s1456_s18 }
  0x12   : > { %2017 = sst [smem:[#allocation17_spill]] %s2044_s22  ;;  %s53_s25 = ssub.s32 %s1452_s17, %s2044_s22 }
  0x13   : > { %p1549_p3 = por %p67_p2, %p66_p1  ;;  %p50_p4 = scmp.ge.s32.totalorder %s2046_s23, 2 }
  0x14   : > { %p72_p5 = scmp.ne.s32.totalorder %s1436_s13, %s1432_s12  ;;  %p73_p6 = scmp.eq.s32.totalorder %s1535_s20, 0 }
  0x15   : > { %p160_p7 = scmp.eq.s32.totalorder %s1535_s20, 7  ;;  %s2048_s23 = smov (%p50_p4, %s2046_s23), 0 }
  0x16   : > { %2019 = sst [smem:[#allocation18_spill]] %s2048_s23  ;;  %p1559_p8 = por %p73_p6, %p72_p5 }
  0x17   : > { %p1563_p9 = por %p160_p7, %p66_p1  ;;  %s52_s29 = ssub.s32 %s1456_s18, %s2048_s23 }
  0x18   : > { %s2020_s27 = scalar_select %p1559_p8, 1, 0 }
  0x19   : > { %s2021_s28 = scalar_select %p1563_p9, 1, 0 }
  0x1a   : > { %p166_p10 = scmp.eq.s32.totalorder %s1020_s21, 7  ;;  %s54_s30 = sor.u32 %s53_s25, %s52_s29 }
  0x1b   : > { %p57_p11 = scmp.eq.s32.totalorder %s54_s30, 0  ;;  %p1150_p13 = scmp.lt.s32.totalorder %s1460_s19, 8 }
  0x1c   : > { %p1569_p12 = por %p166_p10, %p72_p5  ;;  %s2002_s5 = sand.u32 1, %s1440_s14  }
  0x1d   : > { %s1576_s6 = scalar_select %p57_p11, %s1440_s14, %s59_s24  }
  0x1e   : > { %s2022_s4 = scalar_select %p1569_p12, 1, 0 }
  0x1f   : > { %s1580_s7 = smul.u32 24, %s2002_s5  ;;  %p1584_p0 = pnand %p1150_p13, %p1549_p3 }
  0x20   : > { %s1117_s9 = smul.u32 6, %s1452_s17  ;;  %s211_s11 = sand.u32 1, %s1460_s19  }
  0x21   : > { %s1118_s10 = smul.u32 24, %s1456_s18  ;;  %s2024_s1 = sld [smem:[#allocation20_spill]] }
  0x22   : > { %s215_s26 = scalar_lea.vmem [#allocation8], %s1580_s7  ;;  %s1603_s23 = scalar_lea.sflag [#allocation9], %s211_s11 }
  0x23   : > { %s198_s21 = sadd.s32 %s1118_s10, %s1117_s9  ;;  %s226_s5 = sshll.u32 %s215_s26, 4  ;;  %s1600_s5 = int_to_ptr.vmem [resolvable:$true] %s226_s5 }
  0x24   : > { %s1591_s25 = sshll.u32 %s198_s21, 6  ;;  %p1609_p3 = pneg %p1584_p0 }
  0x27   : > { %s1597_s30 = scalar_lea.hbm %s2024_s1, %s1591_s25  ;;  %s1273_s24 = scalar_lea.hbm %s2024_s1, 3072 }
  0x28   : > { %s1268_s9 = scalar_lea.hbm %s1597_s30, 384  ;;  %p1274_p6 = scmp.lt.u32.totalorder %s1597_s30, %s2024_s1 }
  0x29   : > { %p1269_p2 = scmp.ne.s32.totalorder %s1597_s30, %s1268_s9  ;;  %p1275_p7 = scmp.lt.u32.totalorder %s1273_s24, %s1268_s9 }
  0x2a   : > { %p1277_p11 = scmp.lt.u32.totalorder %s1268_s9, %s1597_s30 }
  0x2b   : > { %p1271_p4 = pnand %p1609_p3, %p1269_p2  ;;  %p1276_p10 = por %p1275_p7, %p1274_p6 }
  0x2d   : > { %p1272_p5 = pneg %p1271_p4  ;;  %p1278_p13 = por %p1277_p11, %p1276_p10 }
  0x2f   : > { %p1279_p1 = pnand %p1278_p13, %p1272_p5 }
  0x31   : > { %1282 = shalt.err (!%p1279_p1)
}
  0x32   : > { %s1283_s11 = scalar_lea.vmem %s1600_s5, 384  ;;  %s1462_s21 = smov [#allocation8]  }
  0x33   : > { %p1284_p2 = scmp.ne.s32.totalorder %s1600_s5, %s1283_s11  ;;  %s1288_s29 = sshll.u32 %s1462_s21, 4  ;;  %s1289_s29 = int_to_ptr.vmem [resolvable:$false] %s1288_s29 }
  0x34   : > { %s1290_s22 = scalar_lea.vmem %s1289_s29, 768  ;;  %p1291_p9 = scmp.lt.s32.totalorder %s1600_s5, %s1289_s29 }
  0x35   : > { %p1286_p4 = pnand %p1284_p2, %p1609_p3  ;;  %p1292_p8 = scmp.lt.s32.totalorder %s1290_s22, %s1283_s11 }
  0x37   : > { %p1287_p12 = pneg %p1286_p4  ;;  %p1293_p6 = por %p1292_p8, %p1291_p9 }
  0x39   : > { %p1294_p7 = pnand %p1293_p6, %p1287_p12 }
  0x3b   : > { %1297 = shalt.err (!%p1294_p7)
}
  0x3c   : > { %s2007_s9 = smov 64   ;;  %s2009_s24 = smov 4  }
  0x3d   : > { %1142 = dma.hbm_to_vmem [thread:$0]  (!%p1584_p0), %s1597_s30, 384, %s1600_s5, %s1603_s23, %s2007_s9, %s2007_s9, %s2009_s24  }
  0x3e   : > { %p259_p8 = scmp.lt.s32.totalorder %s1460_s19, 9  ;;  %p2026_p9 = scmp.ge.s32.totalorder %s1460_s19, 1 }
  0x3f   : > { %s2028_s0 = sld [smem:[#allocation19_spill]]  ;;  %s190_s22 = scalar_lea.vmem [#allocation5], %s1580_s7 }
  0x40   : > { %p1639_p12 = pnand %p2026_p9, %p259_p8  ;;  %s201_s1 = sshll.u32 %s190_s22, 4  ;;  %s1650_s1 = int_to_ptr.vmem [resolvable:$true] %s201_s1 }
  0x41   : > { %s2029_s5 = sand.u32 1, %s1440_s14  }
  0x42   : > { %s2027_s26 = scalar_select %p1639_p12, 1, 0 }
  0x43   : > { %s1654_s30 = scalar_lea.sflag [#allocation6], %s2029_s5 }
  0x45   : > { %s1647_s29 = scalar_lea.hbm %s2028_s0, %s1591_s25  ;;  %s1303_s21 = scalar_lea.hbm %s2028_s0, 3072 }
  0x46   : > { %s1298_s9 = scalar_lea.hbm %s1647_s29, 384  ;;  %p1304_p11 = scmp.lt.u32.totalorder %s1647_s29, %s2028_s0 }
  0x47   : > { %p1299_p1 = scmp.ne.s32.totalorder %s1647_s29, %s1298_s9  ;;  %p1305_p13 = scmp.lt.u32.totalorder %s1303_s21, %s1298_s9 }
  0x48   : > { %p1307_p4 = scmp.lt.u32.totalorder %s1298_s9, %s1647_s29 }
  0x49   : > { %p1301_p5 = pnand %p1299_p1, %p1609_p3  ;;  %p1306_p2 = por %p1305_p13, %p1304_p11 }
  0x4b   : > { %p1302_p10 = pneg %p1301_p5  ;;  %p1308_p6 = por %p1307_p4, %p1306_p2 }
  0x4d   : > { %p1309_p7 = pnand %p1308_p6, %p1302_p10 }
  0x4f   : > { %1312 = shalt.err (!%p1309_p7)
}
  0x50   : > { %s1313_s22 = scalar_lea.vmem %s1650_s1, 384  ;;  %s1465_s24 = smov [#allocation5]  }
  0x51   : > { %p1314_p8 = scmp.ne.s32.totalorder %s1650_s1, %s1313_s22  ;;  %s1318_s5 = sshll.u32 %s1465_s24, 4  ;;  %s1319_s5 = int_to_ptr.vmem [resolvable:$false] %s1318_s5 }
  0x52   : > { %s1320_s17 = scalar_lea.vmem %s1319_s5, 768  ;;  %p1321_p5 = scmp.lt.s32.totalorder %s1650_s1, %s1319_s5 }
  0x53   : > { %p1316_p9 = pnand %p1314_p8, %p1609_p3  ;;  %p1322_p12 = scmp.lt.s32.totalorder %s1320_s17, %s1313_s22 }
  0x55   : > { %p1317_p1 = pneg %p1316_p9  ;;  %p1323_p11 = por %p1322_p12, %p1321_p5 }
  0x57   : > { %p1324_p13 = pnand %p1323_p11, %p1317_p1 }
  0x59   : > { %1327 = shalt.err (!%p1324_p13)
}
  0x5a   : > { %s2030_s18 = smov 4   ;;  %s2031_s9 = smov 64  }
  0x5b   : > { %1139 = dma.hbm_to_vmem [thread:$0]  (!%p1584_p0), %s1647_s29, 384, %s1650_s1, %s1654_s30, %s2031_s9, %s2031_s9, %s2030_s18  }
  0x5c   : > { %s1685_s24 = scalar_lea.hbm %s2000_s2, %s1591_s25  ;;  %s240_s22 = scalar_lea.vmem [#allocation10], %s1580_s7 }
  0x5d   : > { %s251_s5 = sshll.u32 %s240_s22, 4  ;;  %s1328_s17 = scalar_lea.hbm %s1685_s24, 384  ;;  %s1688_s5 = int_to_ptr.vmem [resolvable:$true] %s251_s5 }
  0x5e   : > { %p1329_p12 = scmp.ne.s32.totalorder %s1685_s24, %s1328_s17  ;;  %s1333_s29 = scalar_lea.hbm %s2000_s2, 3072 }
  0x5f   : > { %p1334_p4 = scmp.lt.u32.totalorder %s1685_s24, %s2000_s2  ;;  %p1335_p6 = scmp.lt.u32.totalorder %s1333_s29, %s1328_s17 }
  0x60   : > { %p1331_p10 = pnand %p1329_p12, %p1609_p3  ;;  %p1337_p8 = scmp.lt.u32.totalorder %s1328_s17, %s1685_s24 }
  0x61   : > { %p1336_p7 = por %p1335_p6, %p1334_p4 }
  0x62   : > { %p1332_p2 = pneg %p1331_p10 }
  0x63   : > { %p1338_p9 = por %p1337_p8, %p1336_p7 }
  0x65   : > { %p1339_p1 = pnand %p1338_p9, %p1332_p2 }
  0x67   : > { %1342 = shalt.err (!%p1339_p1)
}
  0x68   : > { %s1343_s7 = scalar_lea.vmem %s1688_s5, 384  ;;  %s1466_s0 = smov [#allocation10]  }
  0x69   : > { %p1344_p5 = scmp.ne.s32.totalorder %s1688_s5, %s1343_s7  ;;  %s1348_s11 = sshll.u32 %s1466_s0, 4  ;;  %s1349_s11 = int_to_ptr.vmem [resolvable:$false] %s1348_s11 }
  0x6a   : > { %s1350_s21 = scalar_lea.vmem %s1349_s11, 768  ;;  %p1351_p12 = scmp.lt.s32.totalorder %s1688_s5, %s1349_s11 }
  0x6b   : > { %p1346_p11 = pnand %p1344_p5, %p1609_p3  ;;  %p1352_p10 = scmp.lt.s32.totalorder %s1350_s21, %s1343_s7 }
  0x6d   : > { %p1347_p13 = pneg %p1346_p11  ;;  %p1353_p4 = por %p1352_p10, %p1351_p12 }
  0x6f   : > { %p1354_p6 = pnand %p1353_p4, %p1347_p13 }
  0x71   : > { %1357 = shalt.err (!%p1354_p6)
}
  0x72   : > { %1145 = dma.hbm_to_vmem [thread:$0]  (!%p1584_p0), %s1685_s24, 384, %s1688_s5, %s1603_s23, %s2031_s9, %s2031_s9, %s2030_s18  }
  0x73   : > { %p2032_p3 = scmp.ne.s32.totalorder %s2027_s26, 0 }
  0x74   : > { %s1718_s10 = sand.u32 (!%p2032_p3), 1, %s1436_s13   ;;  %p2033_p2 = scmp.ne.s32.totalorder (!%p2032_p3), %s2020_s27, 0 }
  0x75   : > { %263 = sbr.rel (%p2032_p3) target bundleno = 985 (0x3d9), region = 32  ;;  %s266_s8 = scalar_lea.sflag (!%p2032_p3), [#allocation6], %s1718_s10 }
  0x76   : > { %s1721_s22 = smul.u32 (!%p2032_p3), 24, %s1718_s10 }
  0x78   : > { %s1725_s17 = scalar_lea.vmem (!%p2032_p3), [#allocation5], %s1721_s22 }
  0x7c   : > { %1419 = dma.done.wait (%p2033_p2), %s266_s8, 384  }
  0x7d   : > { %1421 = vsyncadd (%p2033_p2), %s266_s8, 4294966912  ;;  %s274_s23 = sand.u32 1, %s1535_s20   ;;  %s278_s18 = scalar_lea.vmem [#allocation8], %s1721_s22 }
  0x7e   : > { %s275_s26 = scalar_lea.sflag [#allocation9], %s274_s23 }
  0x7f   : > { %1423 = dma.done.wait (%p2033_p2), %s275_s26, 768  }
  0x80   : > { %1425 = vsyncadd (%p2033_p2), %s275_s26, 4294966528  ;;  %vm342_vm0 = vcmask 130048   ;;  %v1467_v0 = vmov 0.0   ;;  %vm1468_vm1 = vmmov 0   ;;  %v1226_v1 = vld [vmem:[%s278_s18] sm:$0xff]   ;;  %v1227_v3 = vld [vmem:[%s278_s18 + $0x8] sm:$0xff]  }
  0x81   : > { %1080 = vmatprep.subr.bf16.mxu0 %v1467_v0  ;;  %343 = vst.msk [vmem:[#allocation4] sm:$0xff] %vm342_vm0, %v1467_v0  ;;  %344 = vst.msk [vmem:[#allocation4 + $0x8] sm:$0xff] %vm342_vm0, %v1467_v0  ;;  %1086 = vmatprep.mubr.msk.bf16.mxu0 %vm1468_vm1, %v1467_v0  ;;  %v408_v2 = vsel %vm342_vm0, %v1226_v1, 0  ;;  %v411_v4 = vsel %vm342_vm0, %v1227_v3, 0  ;;  %v1055_v5 = vld [vmem:[%s1725_s17] sm:$0xff]   ;;  %v1066_v12 = vld [vmem:[%s1725_s17 + $0x8] sm:$0xff]  }
  0x82   : > { %345 = vst.msk [vmem:[#allocation4 + $0x10] sm:$0xff] %vm342_vm0, %v1467_v0  ;;  %346 = vst.msk [vmem:[#allocation4 + $0x18] sm:$0xff] %vm342_vm0, %v1467_v0  ;;  %1098 = vmatprep.subr.bf16.mxu1 %v1467_v0  ;;  %1104 = vmatprep.mubr.msk.bf16.mxu1 %vm1468_vm1, %v1467_v0  ;;  %v1228_v6 = vld [vmem:[%s278_s18 + $0x10] sm:$0xff]   ;;  %v1056_v7 = vunpack.c.l.bf16 %v1055_v5  ;;  %v1057_v8 = vunpack.c.h.bf16 %v1055_v5  ;;  %v1060_v14 = vunpack.c.l.bf16 %v1066_v12  ;;  %v1061_v15 = vunpack.c.h.bf16 %v1066_v12  ;;  %v1067_v18 = vld [vmem:[%s1725_s17 + $0x10] sm:$0xff]   ;;  %s287_s20 = scalar_lea.vmem [#allocation10], %s1721_s22  ;;  %s1922_s27 = scalar_lea.vmem [#allocation11], %s1721_s22 }
  0x83   : > { %347 = vst.msk [vmem:[#allocation4 + $0x20] sm:$0xff] %vm342_vm0, %v1467_v0  ;;  %348 = vst.msk [vmem:[#allocation4 + $0x28] sm:$0xff] %vm342_vm0, %v1467_v0  ;;  %1081 = vmatpush3.bf16.xpose.msra.mxu0 %v408_v2  ;;  %v414_v9 = vsel %vm342_vm0, %v1228_v6, 0  ;;  %v1064_v20 = vunpack.c.l.bf16 %v1067_v18  ;;  %v1065_v21 = vunpack.c.h.bf16 %v1067_v18  ;;  %vm329_vm2 = vcmask 7168   ;;  %v1229_v58 = vld [vmem:[%s287_s20] sm:$0xff]   ;;  %v1230_v63 = vld [vmem:[%s287_s20 + $0x8] sm:$0xff]  }
  0x84   : > { %1082 = vmatprep.subr.bf16.mxu0 %v1467_v0  ;;  %v361_v10 = vmul.f32 0.25, %v1056_v7  ;;  %v362_v11 = vmul.f32 0.25, %v1057_v8  ;;  %v363_v16 = vmul.f32 0.25, %v1060_v14  ;;  %v364_v17 = vmul.f32 0.25, %v1061_v15  ;;  %336 = vst.msk [vmem:[#allocation3] sm:$0xff] %vm329_vm2, %v1467_v0  ;;  %337 = vst.msk [vmem:[#allocation3 + $0x8] sm:$0xff] %vm329_vm2, %v1467_v0  ;;  %1099 = vmatpush3.bf16.msra.mxu1 %v1229_v58 }
  0x85   : > { %v365_v22 = vmul.f32 0.25, %v1064_v20  ;;  %v366_v23 = vmul.f32 0.25, %v1065_v21  ;;  %v1469_v25 = vmov -inf   ;;  %338 = vst.msk [vmem:[#allocation3 + $0x10] sm:$0xff] %vm329_vm2, %v1467_v0  ;;  %339 = vst.msk [vmem:[#allocation3 + $0x18] sm:$0xff] %vm329_vm2, %v1467_v0  ;;  %vm479_vm3 = vcmask 392192   ;;  %1100 = vmatprep.subr.bf16.mxu1 %v1467_v0 }
  0x86   : > { %v367_v13 = vpack.c.bf16 %v362_v11, %v361_v10  ;;  %v368_v19 = vpack.c.bf16 %v364_v17, %v363_v16  ;;  %330 = vst.msk [vmem:[#allocation2] sm:$0xff] %vm329_vm2, %v1469_v25  ;;  %331 = vst.msk [vmem:[#allocation2 + $0x8] sm:$0xff] %vm329_vm2, %v1469_v25  ;;  %v1470_v41 = vmov 0   ;;  %v1231_v7 = vld [vmem:[%s287_s20 + $0x10] sm:$0xff]   ;;  %vm841_vm4 = vcmask 125952   ;;  %s1126_s9 = smul.u32 6, %s1444_s15 }
  0x87   : > { %v369_v24 = vpack.c.bf16 %v366_v23, %v365_v22  ;;  %332 = vst.msk [vmem:[#allocation2 + $0x10] sm:$0xff] %vm329_vm2, %v1469_v25  ;;  %333 = vst.msk [vmem:[#allocation2 + $0x18] sm:$0xff] %vm329_vm2, %v1469_v25  ;;  %1224 = vset.pattern.permute.xlu0 %v1470_v41  ;;  %1225 = vset.pattern.permute.xlu1 %v1470_v41  ;;  %s1127_s24 = smul.u32 24, %s1448_s16  ;;  %s866_s1 = sshll.u32 %s1922_s27, 4  ;;  %s1935_s1 = int_to_ptr.vmem [resolvable:$true] %s866_s1 }
  0x88   : > { %334 = vst.msk [vmem:[#allocation2 + $0x20] sm:$0xff] %vm329_vm2, %v1469_v25  ;;  %335 = vst.msk [vmem:[#allocation2 + $0x28] sm:$0xff] %vm329_vm2, %v1469_v25  ;;  %1101 = vmatpush3.bf16.msra.mxu1 %v1230_v63  ;;  %s849_s25 = scalar_lea.sflag [#allocation7], %s1718_s10  ;;  %s1358_s7 = scalar_lea.vmem %s1935_s1, 384 }
  0x89   : > { %340 = vst.msk [vmem:[#allocation3 + $0x20] sm:$0xff] %vm329_vm2, %v1467_v0  ;;  %341 = vst.msk [vmem:[#allocation3 + $0x28] sm:$0xff] %vm329_vm2, %v1467_v0  ;;  %1102 = vmatprep.subr.bf16.mxu1 %v1467_v0  ;;  %s863_s5 = sadd.s32 %s1127_s24, %s1126_s9  ;;  %p1359_p0 = scmp.ne.s32.totalorder %s1935_s1, %s1358_s7 }
  0x8a   : > { %s1045_s15 = sshll.u32 %s863_s5, 6  ;;  %p2034_p7 = scmp.ne.s32.totalorder %s2021_s28, 0 }
  0x8b   : > { %1083 = vmatpush3.bf16.xpose.msra.mxu0 %v411_v4  ;;  %s1942_s30 = scalar_lea.hbm %s2001_s3, %s1045_s15  ;;  %s1471_s0 = smov [#allocation11]  }
  0x8c   : > { %1084 = vmatprep.subr.bf16.mxu0 %v1467_v0  ;;  %1103 = vmatpush3.bf16.msra.mxu1 %v1231_v7  ;;  %p1360_p8 = pnand %p1359_p0, %p2034_p7  ;;  %s1362_s11 = sshll.u32 %s1471_s0, 4  ;;  %s1363_s11 = int_to_ptr.vmem [resolvable:$false] %s1362_s11 }
  0x8d   : > { %v1812_v45 = vld [vmem:[#allocation2] sm:$0xff]  ;;  %v1817_v48 = vld [vmem:[#allocation2 + $0x8] sm:$0xff]  ;;  %s1364_s21 = scalar_lea.vmem %s1363_s11, 768  ;;  %p1365_p1 = scmp.lt.s32.totalorder %s1935_s1, %s1363_s11 }
  0x8e   : > { %v1827_v52 = vld [vmem:[#allocation2 + $0x10] sm:$0xff]  ;;  %v1837_v56 = vld [vmem:[#allocation2 + $0x18] sm:$0xff]  ;;  %p1361_p9 = pneg %p1360_p8  ;;  %p1366_p5 = scmp.lt.s32.totalorder %s1364_s21, %s1358_s7 }
  0x8f   : > { %v1848_v61 = vld [vmem:[#allocation2 + $0x20] sm:$0xff]  ;;  %v1856_v2 = vld [vmem:[#allocation2 + $0x28] sm:$0xff] }
  0x90   : > { %p1367_p11 = por %p1366_p5, %p1365_p1 }
  0x92   : > { %p1368_p13 = pnand %p1367_p11, %p1361_p9 }
  0x93   : > { %1085 = vmatpush3.bf16.xpose.msra.mxu0 %v414_v9 }
  0x9a   : > { %1087 = vmatmul.mubr.msk.bf16.vlgmr.msra.gmra.mrb[0].mxu0 %vm342_vm0, %v367_v13 }
  0x9b   : > { %1090 = vmatprep.mubr.msk.bf16.mxu0 %vm1468_vm1, %v1467_v0 }
  0xa2   : > { %1091 = vmatmul.mubr.msk.bf16.gmra.mrb[4].mxu0 %vm342_vm0, %v368_v19 }
  0xa3   : > { %1094 = vmatprep.mubr.msk.bf16.mxu0 %vm1468_vm1, %v1467_v0 }
  0xaa   : > { %1095 = vmatmul.mubr.msk.bf16.gmra.mrb[8].mxu0 %vm342_vm0, %v369_v24 }
 0x16d   : > { %v1788_v26 = vpop.f32.mrb[0].mxu0 }
 0x16e   : > { %v1088_v27 = vpop.f32.mrb[1].mxu0  ;;  %v480_v28 = vsel %vm479_vm3, %v1788_v26, -inf }
 0x16f   : > { %481 = vmax.xlane.f32.xlu0 %v480_v28  ;;  %v1792_v29 = vpop.f32.mrb[2].mxu0 }
 0x170   : > { %v1089_v30 = vpop.f32.mrb[3].mxu0  ;;  %v483_v31 = vsel %vm479_vm3, %v1792_v29, -inf }
 0x173   : > { %484 = vmax.xlane.f32.xlu0 %v483_v31 }
 0x175   : > { %v1796_v32 = vpop.f32.mrb[4].mxu0 }
 0x176   : > { %v1092_v33 = vpop.f32.mrb[5].mxu0  ;;  %v486_v34 = vsel %vm479_vm3, %v1796_v32, -inf }
 0x177   : > { %487 = vmax.xlane.f32.xlu1 %v486_v34  ;;  %v1800_v35 = vpop.f32.mrb[6].mxu0 }
 0x178   : > { %v1093_v36 = vpop.f32.mrb[7].mxu0  ;;  %v489_v37 = vsel %vm479_vm3, %v1800_v35, -inf }
 0x17b   : > { %490 = vmax.xlane.f32.xlu1 %v489_v37 }
 0x17d   : > { %v1804_v38 = vpop.f32.mrb[8].mxu0 }
 0x17e   : > { %v1096_v39 = vpop.f32.mrb[9].mxu0  ;;  %v492_v40 = vsel %vm479_vm3, %v1804_v38, -inf }
 0x17f   : > { %493 = vmax.xlane.f32.xlu0 %v492_v40  ;;  %v1808_v42 = vpop.f32.mrb[10].mxu0 }
 0x180   : > { %v1097_v43 = vpop.f32.mrb[11].mxu0  ;;  %v495_v44 = vsel %vm479_vm3, %v1808_v42, -inf }
 0x181   : > { %496 = vmax.xlane.f32.xlu1 %v495_v44 }
 0x1fc   : > { %v482_v46 = vpop.xlane.xlu0 %481 }
 0x1fd   : > { %v1815_v47 = vmax.f32 %v1812_v45, %v482_v46 }
 0x1ff   : > { %v504_v49 = vsub.f32 %v1812_v45, %v1815_v47  ;;  %754 = vst.msk [vmem:[#allocation2] sm:$0xff] %vm329_vm2, %v1815_v47  ;;  %524 = vperm.xlu0 %1224, %v1815_v47  }
 0x200   : > { %v485_v50 = vpop.xlane.xlu0 %484 }
 0x201   : > { %v1825_v51 = vmax.f32 %v1817_v48, %v485_v50  ;;  %v510_v43 = vmul.f32 1.442695, %v504_v49 }
 0x203   : > { %v505_v53 = vsub.f32 %v1817_v48, %v1825_v51  ;;  %755 = vst.msk [vmem:[#allocation2 + $0x8] sm:$0xff] %vm329_vm2, %v1825_v51  ;;  %529 = vperm.xlu1 %1225, %v1825_v51  }
 0x204   : > { %v488_v54 = vpop.xlane.xlu1 %487 }
 0x205   : > { %v1835_v55 = vmax.f32 %v1827_v52, %v488_v54 }
 0x207   : > { %v506_v57 = vsub.f32 %v1827_v52, %v1835_v55  ;;  %756 = vst.msk [vmem:[#allocation2 + $0x10] sm:$0xff] %vm329_vm2, %v1835_v55  ;;  %534 = vperm.xlu1 %1225, %v1835_v55  }
 0x208   : > { %v491_v59 = vpop.xlane.xlu1 %490 }
 0x209   : > { %v1846_v60 = vmax.f32 %v1837_v56, %v491_v59 }
 0x20b   : > { %v507_v62 = vsub.f32 %v1837_v56, %v1846_v60  ;;  %757 = vst.msk [vmem:[#allocation2 + $0x18] sm:$0xff] %vm329_vm2, %v1846_v60  ;;  %539 = vperm.xlu1 %1225, %v1846_v60   ;;  %v571_v56 = vld [vmem:[#allocation3 + $0x8] sm:$0xff]  ;;  %v572_v60 = vld [vmem:[#allocation3 + $0x10] sm:$0xff] }
 0x20c   : > { %v494_v1 = vpop.xlane.xlu0 %493 }
 0x20d   : > { %v1859_v3 = vmax.f32 %v1848_v61, %v494_v1  ;;  %v516_v44 = vmul.f32 1.442695, %v507_v62  ;;  %v573_v1 = vld [vmem:[#allocation3 + $0x18] sm:$0xff] }
 0x20e   : > { %v497_v4 = vpop.xlane.xlu1 %496 }
 0x20f   : > { %v508_v5 = vsub.f32 %v1848_v61, %v1859_v3  ;;  %758 = vst.msk [vmem:[#allocation2 + $0x20] sm:$0xff] %vm329_vm2, %v1859_v3  ;;  %v1867_v6 = vmax.f32 %v1856_v2, %v497_v4  ;;  %544 = vperm.xlu1 %1225, %v1859_v3  }
 0x211   : > { %v509_v8 = vsub.f32 %v1856_v2, %v1867_v6  ;;  %759 = vst.msk [vmem:[#allocation2 + $0x28] sm:$0xff] %vm329_vm2, %v1867_v6  ;;  %v518_v46 = vmul.f32 1.442695, %v508_v5 }
 0x213   : > { %549 = vperm.xlu1 %1225, %v1867_v6   ;;  %v520_v48 = vmul.f32 1.442695, %v509_v8  ;;  %v574_v6 = vld [vmem:[#allocation3 + $0x20] sm:$0xff] }
 0x27e   : > { %v525_v9 = vpop.permute.xlu0 %524 }
 0x27f   : > { %v552_v10 = vsub.f32 %v1788_v26, %v525_v9 }
 0x281   : > { %v558_v11 = vmul.f32 1.442695, %v552_v10 }
 0x282   : > { %v530_v12 = vpop.permute.xlu1 %529 }
 0x283   : > { %1232 = vpow2.f32 %v558_v11  ;;  %v553_v13 = vsub.f32 %v1792_v29, %v530_v12  ;;  %v575_v11 = vld [vmem:[#allocation3 + $0x28] sm:$0xff] }
 0x285   : > { %v560_v14 = vmul.f32 1.442695, %v553_v13 }
 0x286   : > { %v535_v15 = vpop.permute.xlu1 %534 }
 0x287   : > { %1234 = vpow2.f32 %v560_v14  ;;  %v554_v16 = vsub.f32 %v1796_v32, %v535_v15 }
 0x289   : > { %v562_v17 = vmul.f32 1.442695, %v554_v16 }
 0x28a   : > { %v540_v18 = vpop.permute.xlu1 %539 }
 0x28b   : > { %1236 = vpow2.f32 %v562_v17  ;;  %v555_v19 = vsub.f32 %v1800_v35, %v540_v18 }
 0x28d   : > { %v1233_v20 = vpop.eup %1232  ;;  %v564_v21 = vmul.f32 1.442695, %v555_v19 }
 0x28e   : > { %v545_v22 = vpop.permute.xlu1 %544  ;;  %v582_v23 = vsel %vm479_vm3, %v1233_v20, 0.0 }
 0x28f   : > { %1238 = vpow2.f32 %v564_v21  ;;  %v556_v24 = vsub.f32 %v1804_v38, %v545_v22  ;;  %583 = vadd.xlane.f32.xlu1 %v582_v23 }
 0x291   : > { %v1235_v25 = vpop.eup %1234  ;;  %v566_v26 = vmul.f32 1.442695, %v556_v24 }
 0x292   : > { %v550_v27 = vpop.permute.xlu1 %549  ;;  %v585_v28 = vsel %vm479_vm3, %v1235_v25, 0.0  ;;  %v655_v29 = vpack.c.bf16 %v1235_v25, %v1233_v20 }
 0x293   : > { %1240 = vpow2.f32 %v566_v26  ;;  %v557_v30 = vsub.f32 %v1808_v42, %v550_v27  ;;  %586 = vadd.xlane.f32.xlu0 %v585_v28  ;;  %v512_v42 = vmul.f32 1.442695, %v505_v53  ;;  %v570_v53 = vld [vmem:[#allocation3] sm:$0xff]  ;;  %v613_v26 = vld [vmem:[#allocation4] sm:$0xff]  ;;  %v614_v28 = vld [vmem:[#allocation4 + $0x8] sm:$0xff] }
 0x294   : > { %1105 = vmatmul.mubr.msk.bf16.vlgmr.msra.gmra.mrb[0].mxu1 %vm479_vm3, %v655_v29 }
 0x295   : > { %v1237_v31 = vpop.eup %1236  ;;  %v568_v32 = vmul.f32 1.442695, %v557_v30  ;;  %1108 = vmatprep.mubr.msk.bf16.mxu1 %vm1468_vm1, %v1467_v0 }
 0x296   : > { %v588_v33 = vsel %vm479_vm3, %v1237_v31, 0.0 }
 0x297   : > { %1242 = vpow2.f32 %v568_v32  ;;  %589 = vadd.xlane.f32.xlu1 %v588_v33 }
 0x298   : > { %1244 = vpow2.f32 %v512_v42 }
 0x299   : > { %v1239_v34 = vpop.eup %1238  ;;  %1246 = vpow2.f32 %v510_v43 }
 0x29a   : > { %v591_v35 = vsel %vm479_vm3, %v1239_v34, 0.0  ;;  %v656_v36 = vpack.c.bf16 %v1239_v34, %v1237_v31 }
 0x29b   : > { %592 = vadd.xlane.f32.xlu1 %v591_v35 }
 0x29c   : > { %1109 = vmatmul.mubr.msk.bf16.gmra.mrb[4].mxu1 %vm479_vm3, %v656_v36 }
 0x29d   : > { %v1241_v37 = vpop.eup %1240  ;;  %1112 = vmatprep.mubr.msk.bf16.mxu1 %vm1468_vm1, %v1467_v0  ;;  %v514_v0 = vmul.f32 1.442695, %v506_v57 }
 0x29e   : > { %v594_v38 = vsel %vm479_vm3, %v1241_v37, 0.0 }
 0x29f   : > { %595 = vadd.xlane.f32.xlu0 %v594_v38  ;;  %1248 = vpow2.f32 %v514_v0  ;;  %v615_v38 = vld [vmem:[#allocation4 + $0x10] sm:$0xff] }
 0x2a0   : > { %1250 = vpow2.f32 %v516_v44 }
 0x2a1   : > { %v1243_v39 = vpop.eup %1242  ;;  %1252 = vpow2.f32 %v518_v46 }
 0x2a2   : > { %v597_v40 = vsel %vm479_vm3, %v1243_v39, 0.0  ;;  %v657_v41 = vpack.c.bf16 %v1243_v39, %v1241_v37  ;;  %1254 = vpow2.f32 %v520_v48  ;;  %v1245_v45 = vpop.eup %1244 }
 0x2a3   : > { %598 = vadd.xlane.f32.xlu1 %v597_v40  ;;  %v1247_v47 = vpop.eup %1246  ;;  %v577_v58 = vmul.f32 %v1245_v45, %v571_v56  ;;  %v616_v40 = vld [vmem:[#allocation4 + $0x18] sm:$0xff] }
 0x2a4   : > { %1113 = vmatmul.mubr.msk.bf16.gmra.mrb[8].mxu1 %vm479_vm3, %v657_v41  ;;  %v576_v54 = vmul.f32 %v1247_v47, %v570_v53 }
 0x2a9   : > { %v1249_v49 = vpop.eup %1248 }
 0x2aa   : > { %v1251_v50 = vpop.eup %1250  ;;  %v578_v62 = vmul.f32 %v1249_v49, %v572_v60 }
 0x2ab   : > { %v1253_v51 = vpop.eup %1252  ;;  %v579_v4 = vmul.f32 %v1251_v50, %v573_v1 }
 0x2ac   : > { %v1255_v52 = vpop.eup %1254  ;;  %v580_v9 = vmul.f32 %v1253_v51, %v574_v6 }
 0x2ad   : > { %v581_v14 = vmul.f32 %v1255_v52, %v575_v11 }
 0x2b4   : > { %626 = vperm.xlu1 %1225, %v1245_v45  }
 0x2b5   : > { %621 = vperm.xlu0 %1224, %v1247_v47  }
 0x2b8   : > { %631 = vperm.xlu1 %1225, %v1249_v49   ;;  %v617_v49 = vld [vmem:[#allocation4 + $0x20] sm:$0xff] }
 0x2b9   : > { %636 = vperm.xlu0 %1224, %v1251_v50  }
 0x2bc   : > { %641 = vperm.xlu1 %1225, %v1253_v51   ;;  %v618_v51 = vld [vmem:[#allocation4 + $0x28] sm:$0xff] }
 0x2bd   : > { %646 = vperm.xlu0 %1224, %v1255_v52  }
 0x31c   : > { %v584_v55 = vpop.xlane.xlu1 %583 }
 0x31d   : > { %v600_v57 = vadd.f32 %v584_v55, %v576_v54 }
 0x31f   : > { %607 = vst.msk [vmem:[#allocation3] sm:$0xff] %vm329_vm2, %v600_v57 }
 0x320   : > { %v587_v59 = vpop.xlane.xlu0 %586 }
 0x321   : > { %v601_v61 = vadd.f32 %v587_v59, %v577_v58 }
 0x323   : > { %608 = vst.msk [vmem:[#allocation3 + $0x8] sm:$0xff] %vm329_vm2, %v601_v61 }
 0x324   : > { %v590_v63 = vpop.xlane.xlu1 %589 }
 0x325   : > { %v602_v2 = vadd.f32 %v590_v63, %v578_v62 }
 0x326   : > { %v769_v3 = vld [vmem:[#allocation3] sm:$0xff] }
 0x327   : > { %609 = vst.msk [vmem:[#allocation3 + $0x10] sm:$0xff] %vm329_vm2, %v602_v2  ;;  %1256 = vrcp.f32 %v769_v3 }
 0x328   : > { %v593_v5 = vpop.xlane.xlu1 %592 }
 0x329   : > { %v603_v7 = vadd.f32 %v593_v5, %v579_v4 }
 0x32a   : > { %v770_v8 = vld [vmem:[#allocation3 + $0x8] sm:$0xff] }
 0x32b   : > { %610 = vst.msk [vmem:[#allocation3 + $0x18] sm:$0xff] %vm329_vm2, %v603_v7  ;;  %1258 = vrcp.f32 %v770_v8 }
 0x32c   : > { %v596_v10 = vpop.xlane.xlu0 %595 }
 0x32d   : > { %v604_v12 = vadd.f32 %v596_v10, %v580_v9 }
 0x32e   : > { %v771_v13 = vld [vmem:[#allocation3 + $0x10] sm:$0xff] }
 0x32f   : > { %611 = vst.msk [vmem:[#allocation3 + $0x20] sm:$0xff] %vm329_vm2, %v604_v12  ;;  %1260 = vrcp.f32 %v771_v13 }
 0x330   : > { %v599_v15 = vpop.xlane.xlu1 %598 }
 0x331   : > { %v1257_v16 = vpop.eup %1256  ;;  %v605_v17 = vadd.f32 %v599_v15, %v581_v14 }
 0x332   : > { %783 = vperm.xlu1 %1225, %v1257_v16   ;;  %v772_v18 = vld [vmem:[#allocation3 + $0x18] sm:$0xff] }
 0x333   : > { %612 = vst.msk [vmem:[#allocation3 + $0x28] sm:$0xff] %vm329_vm2, %v605_v17  ;;  %1262 = vrcp.f32 %v772_v18 }
 0x334   : > { %v622_v27 = vpop.permute.xlu0 %621  ;;  %v627_v29 = vpop.permute.xlu1 %626 }
 0x335   : > { %v1259_v19 = vpop.eup %1258  ;;  %v649_v30 = vmul.f32 %v622_v27, %v613_v26  ;;  %v650_v32 = vmul.f32 %v627_v29, %v614_v28 }
 0x336   : > { %788 = vperm.xlu0 %1224, %v1259_v19   ;;  %v773_v20 = vld [vmem:[#allocation3 + $0x20] sm:$0xff] }
 0x337   : > { %1264 = vrcp.f32 %v773_v20 }
 0x338   : > { %v632_v39 = vpop.permute.xlu1 %631  ;;  %v637_v41 = vpop.permute.xlu0 %636 }
 0x339   : > { %v1261_v21 = vpop.eup %1260  ;;  %v651_v42 = vmul.f32 %v632_v39, %v615_v38  ;;  %v652_v0 = vmul.f32 %v637_v41, %v616_v40 }
 0x33a   : > { %793 = vperm.xlu1 %1225, %v1261_v21   ;;  %v774_v22 = vld [vmem:[#allocation3 + $0x28] sm:$0xff] }
 0x33b   : > { %1266 = vrcp.f32 %v774_v22 }
 0x33c   : > { %v642_v50 = vpop.permute.xlu1 %641  ;;  %v647_v52 = vpop.permute.xlu0 %646 }
 0x33d   : > { %v1263_v23 = vpop.eup %1262  ;;  %v653_v53 = vmul.f32 %v642_v50, %v617_v49  ;;  %v654_v55 = vmul.f32 %v647_v52, %v618_v51 }
 0x33e   : > { %798 = vperm.xlu0 %1224, %v1263_v23  }
 0x341   : > { %v1265_v24 = vpop.eup %1264 }
 0x342   : > { %803 = vperm.xlu1 %1225, %v1265_v24  }
 0x345   : > { %v1267_v25 = vpop.eup %1266 }
 0x346   : > { %808 = vperm.xlu0 %1224, %v1267_v25  }
 0x367   : > { %v719_v31 = vpop.f32.mrb[0].mxu1 }
 0x368   : > { %v742_v33 = vadd.f32 %v719_v31, %v649_v30  ;;  %v1106_v34 = vpop.f32.mrb[1].mxu1 }
 0x369   : > { %v722_v35 = vpop.f32.mrb[2].mxu1 }
 0x36a   : > { %748 = vst.msk [vmem:[#allocation4] sm:$0xff] %vm342_vm0, %v742_v33  ;;  %v743_v36 = vadd.f32 %v722_v35, %v650_v32  ;;  %v1107_v37 = vpop.f32.mrb[3].mxu1 }
 0x36c   : > { %749 = vst.msk [vmem:[#allocation4 + $0x8] sm:$0xff] %vm342_vm0, %v743_v36 }
 0x36f   : > { %v727_v43 = vpop.f32.mrb[4].mxu1 }
 0x370   : > { %v744_v44 = vadd.f32 %v727_v43, %v651_v42  ;;  %v1110_v46 = vpop.f32.mrb[5].mxu1 }
 0x371   : > { %v730_v48 = vpop.f32.mrb[6].mxu1  ;;  %v763_v61 = vld [vmem:[#allocation4] sm:$0xff] }
 0x372   : > { %750 = vst.msk [vmem:[#allocation4 + $0x10] sm:$0xff] %vm342_vm0, %v744_v44  ;;  %v745_v45 = vadd.f32 %v730_v48, %v652_v0  ;;  %v1111_v47 = vpop.f32.mrb[7].mxu1 }
 0x373   : > { %v764_v2 = vld [vmem:[#allocation4 + $0x8] sm:$0xff] }
 0x374   : > { %751 = vst.msk [vmem:[#allocation4 + $0x18] sm:$0xff] %vm342_vm0, %v745_v45 }
 0x377   : > { %v735_v54 = vpop.f32.mrb[8].mxu1 }
 0x378   : > { %v746_v56 = vadd.f32 %v735_v54, %v653_v53  ;;  %v1114_v57 = vpop.f32.mrb[9].mxu1 }
 0x379   : > { %v738_v58 = vpop.f32.mrb[10].mxu1  ;;  %v765_v6 = vld [vmem:[#allocation4 + $0x10] sm:$0xff] }
 0x37a   : > { %752 = vst.msk [vmem:[#allocation4 + $0x20] sm:$0xff] %vm342_vm0, %v746_v56  ;;  %v747_v59 = vadd.f32 %v738_v58, %v654_v55  ;;  %v1115_v60 = vpop.f32.mrb[11].mxu1 }
 0x37b   : > { %v766_v10 = vld [vmem:[#allocation4 + $0x18] sm:$0xff] }
 0x37c   : > { %753 = vst.msk [vmem:[#allocation4 + $0x28] sm:$0xff] %vm342_vm0, %v747_v59 }
 0x381   : > { %v767_v14 = vld [vmem:[#allocation4 + $0x20] sm:$0xff] }
 0x383   : > { %v768_v18 = vld [vmem:[#allocation4 + $0x28] sm:$0xff] }
 0x3b1   : > { %v784_v62 = vpop.permute.xlu1 %783 }
 0x3b2   : > { %v811_v63 = vmul.f32 %v784_v62, %v763_v61 }
 0x3b4   : > { %v1048_v1 = vpack.c.bf16 %v811_v63, %v811_v63 }
 0x3b5   : > { %v789_v3 = vpop.permute.xlu0 %788 }
 0x3b6   : > { %842 = vst.msk [vmem:[%s1922_s27] sm:$0xf] %vm841_vm4, %v1048_v1  ;;  %v812_v4 = vmul.f32 %v789_v3, %v764_v2 }
 0x3b8   : > { %v1049_v5 = vpack.c.bf16 %v812_v4, %v812_v4 }
 0x3b9   : > { %v794_v7 = vpop.permute.xlu1 %793 }
 0x3ba   : > { %843 = vst.msk [vmem:[%s1922_s27 + $0x4] sm:$0xf] %vm841_vm4, %v1049_v5  ;;  %v813_v8 = vmul.f32 %v794_v7, %v765_v6 }
 0x3bc   : > { %v1050_v9 = vpack.c.bf16 %v813_v8, %v813_v8 }
 0x3bd   : > { %v799_v11 = vpop.permute.xlu0 %798 }
 0x3be   : > { %844 = vst.msk [vmem:[%s1922_s27 + $0x8] sm:$0xf] %vm841_vm4, %v1050_v9  ;;  %v814_v12 = vmul.f32 %v799_v11, %v766_v10 }
 0x3c0   : > { %v1051_v13 = vpack.c.bf16 %v814_v12, %v814_v12 }
 0x3c1   : > { %v804_v15 = vpop.permute.xlu1 %803 }
 0x3c2   : > { %845 = vst.msk [vmem:[%s1922_s27 + $0xc] sm:$0xf] %vm841_vm4, %v1051_v13  ;;  %v815_v16 = vmul.f32 %v804_v15, %v767_v14 }
 0x3c4   : > { %v1052_v17 = vpack.c.bf16 %v815_v16, %v815_v16 }
 0x3c5   : > { %v809_v19 = vpop.permute.xlu0 %808 }
 0x3c6   : > { %846 = vst.msk [vmem:[%s1922_s27 + $0x10] sm:$0xf] %vm841_vm4, %v1052_v17  ;;  %v816_v20 = vmul.f32 %v809_v19, %v768_v18 }
 0x3c8   : > { %v1053_v21 = vpack.c.bf16 %v816_v20, %v816_v20 }
 0x3ca   : > { %847 = vst.msk [vmem:[%s1922_s27 + $0x14] sm:$0xf] %vm841_vm4, %v1053_v21 }
 0x3cb   : > { %1371 = shalt.err (!%p1368_p13)
}
 0x3cc   : > { %s1372_s22 = scalar_lea.hbm %s1942_s30, 384  ;;  %s1376_s23 = scalar_lea.hbm %s2001_s3, 3072 }
 0x3cd   : > { %p1373_p12 = scmp.ne.s32.totalorder %s1942_s30, %s1372_s22  ;;  %p1377_p6 = scmp.lt.u32.totalorder %s1942_s30, %s2001_s3 }
 0x3ce   : > { %p1378_p3 = scmp.lt.u32.totalorder %s1376_s23, %s1372_s22  ;;  %p1380_p0 = scmp.lt.u32.totalorder %s1372_s22, %s1942_s30 }
 0x3cf   : > { %p1374_p10 = pnand %p1373_p12, %p2034_p7 }
 0x3d0   : > { %p1379_p2 = por %p1378_p3, %p1377_p6 }
 0x3d1   : > { %p1375_p4 = pneg %p1374_p10 }
 0x3d2   : > { %p1381_p8 = por %p1380_p0, %p1379_p2 }
 0x3d4   : > { %p1382_p9 = pnand %p1381_p8, %p1375_p4 }
 0x3d6   : > { %1385 = shalt.err (!%p1382_p9)
}
 0x3d7   : > { %s1472_s20 = smov 64   ;;  %s1473_s27 = smov 4  }
 0x3d8   : > { %1134 = dma.vmem_to_hbm [thread:$0]  (%p2034_p7), %s1935_s1, 384, %s1942_s30, %s849_s25, %s1472_s20, %s1472_s20, %s1473_s27  }
 0x3d9 PF: > { %p1151_p1 = scmp.ge.s32.totalorder %s1460_s19, 2  ;;  %s881_s9 = sand.u32 1, %s1432_s12  }
 0x3da   : > { %p2035_p5 = scmp.ne.s32.totalorder %s2022_s4, 0  ;;  %s882_s24 = scalar_lea.sflag [#allocation7], %s881_s9 }
 0x3dc   : > { %p1147_p11 = pnand %p1151_p1, %p2035_p5 }
 0x3de   : > { %1427 = dma.done.wait (!%p1147_p11), %s882_s24, 384  }
 0x3df   : > { %1429 = vsyncadd (!%p1147_p11), %s882_s24, 4294966912  ;;  %s22_s19 = sadd.s32 1, %s1460_s19   ;;  %s2036_s15 = sld [smem:[#allocation15_spill]] }
 0x3e0   : > { %p19_p13 = scmp.ge.s32.totalorder %s22_s19, 10   ;;  %s2037_s16 = sld [smem:[#allocation16_spill]] }
 0x3e1   : > { %s2038_s17 = sld [smem:[#allocation17_spill]]  ;;  %s2039_s18 = sld [smem:[#allocation18_spill]] }
 0x3e2   : > { %s2040_s12 = smov %s1436_s13  ;;  %s2041_s13 = smov %s1440_s14 }
 0x3e3   : > { %s2042_s14 = smov %s1576_s6  ;;  %21 = sbr.rel (!%p19_p13) target bundleno = 12 (0xc), region = 109 }
 0x3ea   :  { %887 = vsyncpa [#allocation6], 1 }
 0x3eb   :  { %889 = vsyncpa [#allocation6 + $0x1], 1 }
 0x3ec   :  { %890 = vsyncpa [#allocation9], 1 }
 0x3ed   :  { %892 = vsyncpa [#allocation9 + $0x1], 1 }
 0x3ee   :  { %893 = vsyncpa [#allocation7], 1 }
 0x3ef   :  { %895 = vsyncpa [#allocation7 + $0x1], 1 }

// kernel: transformer_block_forward.23
= control target key start
LH: loop header
LB: loop body
LE: loop exit
PB: predicated region body
PF: predicated region fallthrough
CT: control target
= control target key end

     0   :  { %s1662_s0 = inlined_call_operand.hbm [shape: bf16[2,16,64], index: 0, kind: input, shape index: {}]   ;;  %s1663_s1 = inlined_call_operand.hbm [shape: f32[2,16,64], index: 1, kind: input, shape index: {}]   ;;  %s1664_s2 = inlined_call_operand.hbm [shape: f32[2,1,64], index: 2, kind: input, shape index: {}, may-alias: {2,3}]   ;;  %s1665_s3 = inlined_call_operand.hbm [shape: f32[2,1,64], index: 3, kind: input, shape index: {}, may-alias: {2,3}]   ;;  %s1666_s4 = inlined_call_operand.hbm [shape: bf16[64,64], index: 4, kind: input, shape index: {}]   ;;  %s1667_s5 = inlined_call_operand.hbm [shape: f32[1,64], index: 5, kind: input, shape index: {}]   ;;  %s1668_s6 = inlined_call_operand.hbm [shape: f32[2,16,64], index: 6, kind: output, shape index: {}]  }
   0x1   :  { %1689 = sst [smem:[#allocation25_spill]] %s1663_s1 }
   0x2   :  { %1690 = sst [smem:[#allocation26_spill]] %s1666_s4 }
   0x3   :  { %1691 = sst [smem:[#allocation27_spill]] %s1668_s6 }
   0x4   :  { %11 = vsyncpa [#allocation3], 0 }
   0x5   :  { %13 = vsyncpa [#allocation3 + $0x1], 0 }
   0x6   :  { %14 = vsyncpa [#allocation6], 0 }
   0x7   :  { %16 = vsyncpa [#allocation6 + $0x1], 0 }
   0x8   :  { %17 = vsyncpa [#allocation9], 0 }
   0x9   :  { %19 = vsyncpa [#allocation9 + $0x1], 0 }
   0xa   :  { %20 = vsyncpa [#allocation12], 0 }
   0xb   :  { %21 = vsyncpa [#allocation4], 0 }
   0xc   :  { %23 = vsyncpa [#allocation4 + $0x1], 0  ;;  %s1276_s21 = smov 0   ;;  %s1278_s22 = smov 0  }
   0xd   :  { %s1280_s23 = smov 0   ;;  %s1282_s24 = smov 0  }
   0xe   :  { %s1284_s25 = smov 0   ;;  %s1286_s26 = smov 0  }
   0xf LB: > { %1692 = sst [smem:[#allocation20_spill]] %s1204_s21  ;;  %s1307_s27 = sadd.s32 4294967295, %s1224_s26   ;;  %s1224_s26 = sphi %s1286_s26, %s29_s26   ;;  %s1220_s25 = sphi %s1284_s25, %s1739_s25   ;;  %s1216_s24 = sphi %s1282_s24, %s1738_s24   ;;  %s1212_s23 = sphi %s1280_s23, %s1737_s23   ;;  %s1208_s22 = sphi %s1278_s22, %s1736_s22   ;;  %s1204_s21 = sphi %s1276_s21, %s1735_s21  }
  0x10   : > { %s786_s28 = sadd.s32 4294967294, %s1224_s26   ;;  %p64_p0 = scmp.ne.s32.totalorder %s1212_s23, %s1208_s22 }
  0x11   : > { %p65_p1 = scmp.eq.s32.totalorder %s1224_s26, 0  ;;  %p70_p2 = scmp.ne.s32.totalorder %s1208_s22, %s1204_s21 }
  0x12   : > { %p1669_p3 = scmp.eq.s32.totalorder %s1307_s27, 0  ;;  %p236_p4 = scmp.eq.s32.totalorder %s1307_s27, 1 }
  0x13   : > { %p1318_p5 = por %p65_p1, %p64_p0  ;;  %p242_p6 = scmp.eq.s32.totalorder %s786_s28, 1 }
  0x14   : > { %p1324_p7 = por %p1669_p3, %p70_p2  ;;  %p1328_p8 = por %p236_p4, %p64_p0 }
  0x15   : > { %p1332_p9 = por %p242_p6, %p70_p2  ;;  %p787_p10 = scmp.ge.s32.totalorder %s1224_s26, 1 }
  0x16   : > { %s1694_s7 = scalar_select %p1324_p7, 1, 0 }
  0x17   : > { %s1695_s8 = scalar_select %p1328_p8, 1, 0 }
  0x18   : > { %s1697_s9 = scalar_select %p1332_p9, 1, 0 }
  0x19   : > { %1696 = sst [smem:[#allocation21_spill]] %s1695_s8  ;;  %p249_p11 = scmp.lt.s32.totalorder %s1224_s26, 3 }
  0x1a   : > { %1698 = sst [smem:[#allocation22_spill]] %s1697_s9  ;;  %s1226_s11 = smov [#allocation10]  }
  0x1b   : > { %p1338_p12 = pnand %p787_p10, %p249_p11  ;;  %s263_s12 = sshll.u32 %s1226_s11, 4  ;;  %s1342_s12 = int_to_ptr.vmem [resolvable:$true] %s263_s12 }
  0x1c   : > { %s48_s14 = sadd.s32 1, %s1220_s25  ;;  %s1356_s15 = sand.u32 1, %s1212_s23  }
  0x1d   : > { %s1699_s10 = scalar_select %p1338_p12, 1, 0 }
  0x1e   : > { %p857_p13 = pneg %p1338_p12  ;;  %p1358_p4 = scmp.ge.s32.totalorder %s48_s14, 2 }
  0x1f   : > { %s1702_s4 = sld [smem:[#allocation26_spill]] }
  0x20   : > { %p1350_p2 = pnand %p857_p13, %p1669_p3 }
  0x22   : > { %s1700_s13 = scalar_select %p1350_p2, 1, 0 }
  0x23   : > { %p1680_p10 = pneg %p1350_p2 }
  0x25   : > { %s950_s19 = scalar_lea.hbm %s1702_s4, 512 }
  0x26   : > { %p951_p6 = scmp.ne.s32.totalorder %s1702_s4, %s950_s19  ;;  %p957_p0 = scmp.lt.u32.totalorder %s950_s19, %s1702_s4 }
  0x28   : > { %p953_p11 = pnand %p1680_p10, %p951_p6 }
  0x2a   : > { %p954_p13 = pneg %p953_p11 }
  0x2c   : > { %p959_p3 = pnand %p957_p0, %p954_p13 }
  0x2e   : > { %962 = shalt.err (!%p959_p3)
}
  0x2f   : > { %s963_s17 = scalar_lea.vmem %s1342_s12, 512  ;;  %p971_p7 = scmp.lt.s32.totalorder %s1342_s12, %s1342_s12 }
  0x30   : > { %p964_p1 = scmp.ne.s32.totalorder %s1342_s12, %s963_s17  ;;  %p972_p6 = scmp.lt.s32.totalorder %s963_s17, %s963_s17 }
  0x32   : > { %p966_p9 = pnand %p964_p1, %p1680_p10  ;;  %p973_p11 = por %p972_p6, %p971_p7 }
  0x34   : > { %p967_p8 = pneg %p966_p9 }
  0x36   : > { %p974_p12 = pnand %p973_p11, %p967_p8 }
  0x38   : > { %977 = shalt.err (!%p974_p12)
}
  0x39   : > { %s1678_s29 = smov 64   ;;  %s1683_s18 = smov 4  }
  0x3a   : > { %860 = dma.hbm_to_vmem [thread:$0]  (!%p1350_p2), %s1702_s4, 512, %s1342_s12, [#allocation9], %s1678_s29, %s1678_s29, %s1683_s18  }
  0x3b   : > { %s1741_s14 = smov (%p1358_p4, %s48_s14), 0  ;;  %p1704_p3 = scmp.lt.s32.totalorder %s1224_s26, 2 }
  0x3c   : > { %1703 = sst [smem:[#allocation23_spill]] %s1741_s14  ;;  %s1679_s11 = sand.u32 1, %s1224_s26  }
  0x3d   : > { %p1400_p7 = pnand %p1704_p3, %p1318_p5  ;;  %s52_s17 = ssub.s32 %s1220_s25, %s1741_s14 }
  0x3e   : > { %p55_p8 = scmp.eq.s32.totalorder %s52_s17, 0  ;;  %s794_s9 = sshll.u32 %s1356_s15, 4 }
  0x3f   : > { %s1705_s28 = scalar_select %p1400_p7, 1, 0 }
  0x40   : > { %s820_s21 = sshll.u32 %s1220_s25, 8  ;;  %s1706_s6 = sadd.s32 1, %s1212_s23 }
  0x41   : > { %s1412_s8 = scalar_select %p55_p8, %s1212_s23, %s1706_s6  }
  0x42   : > { %s1708_s1 = sld [smem:[#allocation25_spill]]  ;;  %s317_s30 = scalar_lea.vmem [#allocation5], %s794_s9 }
  0x43   : > { %1707 = sst [smem:[#allocation24_spill]] %s1412_s8  ;;  %s327_s20 = sshll.u32 %s317_s30, 4  ;;  %s1419_s20 = int_to_ptr.vmem [resolvable:$true] %s327_s20 }
  0x44   : > { %s1423_s17 = scalar_lea.sflag [#allocation6], %s1679_s11  ;;  %p1429_p9 = pneg %p1400_p7 }
  0x46   : > { %s1709_s6 = scalar_select %p1429_p9, 1, 0 }
  0x48   : > { %s1417_s19 = scalar_lea.hbm %s1708_s1, %s820_s21  ;;  %s983_s9 = scalar_lea.hbm %s1708_s1, 512 }
  0x49   : > { %s978_s29 = scalar_lea.hbm %s1417_s19, 256  ;;  %p984_p1 = scmp.lt.u32.totalorder %s1417_s19, %s1708_s1 }
  0x4a   : > { %p979_p5 = scmp.ne.s32.totalorder %s1417_s19, %s978_s29  ;;  %p985_p4 = scmp.lt.u32.totalorder %s983_s9, %s978_s29 }
  0x4b   : > { %p987_p6 = scmp.lt.u32.totalorder %s978_s29, %s1417_s19 }
  0x4c   : > { %p981_p12 = pnand %p1429_p9, %p979_p5  ;;  %p986_p13 = por %p985_p4, %p984_p1 }
  0x4e   : > { %p982_p0 = pneg %p981_p12  ;;  %p988_p11 = por %p987_p6, %p986_p13 }
  0x50   : > { %p989_p3 = pnand %p988_p11, %p982_p0 }
  0x52   : > { %992 = shalt.err (!%p989_p3)
}
  0x53   : > { %s993_s11 = scalar_lea.vmem %s1419_s20, 256  ;;  %s1229_s21 = smov [#allocation5]  }
  0x54   : > { %p994_p8 = scmp.ne.s32.totalorder %s1419_s20, %s993_s11  ;;  %s998_s12 = sshll.u32 %s1229_s21, 4  ;;  %s999_s12 = int_to_ptr.vmem [resolvable:$false] %s998_s12 }
  0x55   : > { %s1000_s16 = scalar_lea.vmem %s999_s12, 512  ;;  %p1001_p10 = scmp.lt.s32.totalorder %s1419_s20, %s999_s12 }
  0x56   : > { %p996_p5 = pnand %p994_p8, %p1429_p9  ;;  %p1002_p2 = scmp.lt.s32.totalorder %s1000_s16, %s993_s11 }
  0x58   : > { %p997_p12 = pneg %p996_p5  ;;  %p1003_p1 = por %p1002_p2, %p1001_p10 }
  0x5a   : > { %p1004_p4 = pnand %p1003_p1, %p997_p12 }
  0x5c   : > { %1007 = shalt.err (!%p1004_p4)
}
  0x5d   : > { %s1230_s29 = smov 128   ;;  %s1231_s9 = smov 8  }
  0x5e   : > { %870 = dma.hbm_to_vmem [thread:$0]  (!%p1400_p7), %s1417_s19, 256, %s1419_s20, %s1423_s17, %s1230_s29, %s1230_s29, %s1231_s9  }
  0x5f   : > { %s1232_s30 = smov [#allocation11]   ;;  %s791_s21 = sshll.u32 %s1356_s15, 3 }
  0x60   : > { %s279_s18 = sshll.u32 %s1232_s30, 4  ;;  %s1008_s11 = scalar_lea.hbm %s1667_s5, 16  ;;  %s280_s18 = int_to_ptr.vmem [resolvable:$true] %s279_s18 }
  0x61   : > { %p1009_p2 = scmp.ne.s32.totalorder %s1667_s5, %s1008_s11  ;;  %p1710_p10 = scmp.ne.s32.totalorder %s1700_s13, 0 }
  0x62   : > { %p1015_p11 = scmp.lt.u32.totalorder %s1008_s11, %s1667_s5 }
  0x63   : > { %p1711_p0 = pneg %p1710_p10 }
  0x65   : > { %p1011_p13 = pnand %p1009_p2, %p1711_p0 }
  0x67   : > { %p1012_p6 = pneg %p1011_p13 }
  0x69   : > { %p1017_p3 = pnand %p1015_p11, %p1012_p6 }
  0x6b   : > { %1020 = shalt.err (!%p1017_p3)
}
  0x6c   : > { %s1021_s19 = scalar_lea.vmem %s280_s18, 16  ;;  %p1712_p5 = pmov %p1711_p0 }
  0x6d   : > { %p1022_p8 = scmp.ne.s32.totalorder %s280_s18, %s1021_s19  ;;  %s1028_s1 = scalar_lea.vmem %s280_s18, 32 }
  0x6e   : > { %p1029_p4 = scmp.lt.s32.totalorder %s280_s18, %s280_s18  ;;  %p1030_p7 = scmp.lt.s32.totalorder %s1028_s1, %s1021_s19 }
  0x6f   : > { %p1024_p12 = pnand %p1022_p8, %p1712_p5 }
  0x70   : > { %p1031_p9 = por %p1030_p7, %p1029_p4 }
  0x71   : > { %p1025_p1 = pneg %p1024_p12 }
  0x73   : > { %p1032_p0 = pnand %p1031_p9, %p1025_p1 }
  0x75   : > { %1035 = shalt.err (!%p1032_p0)
}
  0x76   : > { %863 = dma.hbm_to_vmem [thread:$0]  (!%p1710_p10), %s1667_s5, 16, %s280_s18, [#allocation12]  }
  0x77   : > { %s819_s14 = sshll.u32 %s1220_s25, 7  ;;  %s294_s20 = scalar_lea.vmem [#allocation2], %s791_s21 }
  0x78   : > { %s303_s29 = sshll.u32 %s294_s20, 4  ;;  %s1478_s12 = scalar_lea.hbm %s1662_s0, %s819_s14  ;;  %s1480_s29 = int_to_ptr.vmem [resolvable:$true] %s303_s29 }
  0x79   : > { %s291_s13 = scalar_lea.sflag [#allocation3], %s1356_s15  ;;  %s1036_s11 = scalar_lea.hbm %s1478_s12, 128 }
  0x7a   : > { %p1037_p7 = scmp.ne.s32.totalorder %s1478_s12, %s1036_s11  ;;  %p1713_p9 = scmp.ne.s32.totalorder %s1709_s6, 0 }
  0x7b   : > { %s1041_s16 = scalar_lea.hbm %s1662_s0, 256  ;;  %p1042_p13 = scmp.lt.u32.totalorder %s1478_s12, %s1662_s0 }
  0x7c   : > { %p1039_p2 = pnand %p1037_p7, %p1713_p9  ;;  %p1043_p6 = scmp.lt.u32.totalorder %s1041_s16, %s1036_s11 }
  0x7d   : > { %p1045_p3 = scmp.lt.u32.totalorder %s1036_s11, %s1478_s12 }
  0x7e   : > { %p1040_p10 = pneg %p1039_p2  ;;  %p1044_p11 = por %p1043_p6, %p1042_p13 }
  0x80   : > { %p1046_p8 = por %p1045_p3, %p1044_p11 }
  0x82   : > { %p1047_p5 = pnand %p1046_p8, %p1040_p10 }
  0x84   : > { %1050 = shalt.err (!%p1047_p5)
}
  0x85   : > { %s1051_s4 = scalar_lea.vmem %s1480_s29, 128  ;;  %s1233_s8 = smov [#allocation2]  }
  0x86   : > { %p1052_p12 = scmp.ne.s32.totalorder %s1480_s29, %s1051_s4  ;;  %s1056_s14 = sshll.u32 %s1233_s8, 4  ;;  %s1057_s14 = int_to_ptr.vmem [resolvable:$false] %s1056_s14 }
  0x87   : > { %s1058_s20 = scalar_lea.vmem %s1057_s14, 256  ;;  %p1059_p0 = scmp.lt.s32.totalorder %s1480_s29, %s1057_s14 }
  0x88   : > { %p1054_p1 = pnand %p1052_p12, %p1713_p9  ;;  %p1060_p7 = scmp.lt.s32.totalorder %s1058_s20, %s1051_s4 }
  0x8a   : > { %p1055_p4 = pneg %p1054_p1  ;;  %p1061_p2 = por %p1060_p7, %p1059_p0 }
  0x8c   : > { %p1062_p13 = pnand %p1061_p2, %p1055_p4 }
  0x8e   : > { %1065 = shalt.err (!%p1062_p13)
}
  0x8f   : > { %p1714_p10 = scmp.ne.s32.totalorder %s1705_s28, 0  ;;  %s1715_s9 = smov 4  }
  0x90   : > { %s1716_s30 = smov 64   ;;  %s797_s11 = sshll.u32 %s1220_s25, 4 }
  0x91   : > { %867 = dma.hbm_to_vmem [thread:$0]  (!%p1714_p10), %s1478_s12, 128, %s1480_s29, %s291_s13, %s1716_s30, %s1716_s30, %s1715_s9  }
  0x92   : > { %s1515_s16 = scalar_lea.hbm %s1664_s2, %s797_s11  ;;  %s340_s19 = scalar_lea.vmem [#allocation7], %s1356_s15 }
  0x93   : > { %s348_s1 = sshll.u32 %s340_s19, 4  ;;  %s1066_s4 = scalar_lea.hbm %s1515_s16, 16  ;;  %s349_s1 = int_to_ptr.vmem [resolvable:$true] %s348_s1 }
  0x94   : > { %p1067_p6 = scmp.ne.s32.totalorder %s1515_s16, %s1066_s4  ;;  %s1071_s13 = scalar_lea.hbm %s1664_s2, 32 }
  0x95   : > { %p1072_p8 = scmp.lt.u32.totalorder %s1515_s16, %s1664_s2  ;;  %p1073_p5 = scmp.lt.u32.totalorder %s1071_s13, %s1066_s4 }
  0x96   : > { %p1069_p11 = pnand %p1067_p6, %p1713_p9  ;;  %p1075_p1 = scmp.lt.u32.totalorder %s1066_s4, %s1515_s16 }
  0x97   : > { %p1074_p12 = por %p1073_p5, %p1072_p8 }
  0x98   : > { %p1070_p3 = pneg %p1069_p11 }
  0x99   : > { %p1076_p4 = por %p1075_p1, %p1074_p12 }
  0x9b   : > { %p1077_p0 = pnand %p1076_p4, %p1070_p3 }
  0x9d   : > { %1080 = shalt.err (!%p1077_p0)
}
  0x9e   : > { %s1081_s20 = scalar_lea.vmem %s349_s1, 16  ;;  %s1234_s9 = smov [#allocation7]  }
  0x9f   : > { %p1082_p7 = scmp.ne.s32.totalorder %s349_s1, %s1081_s20  ;;  %s1086_s30 = sshll.u32 %s1234_s9, 4  ;;  %s1087_s30 = int_to_ptr.vmem [resolvable:$false] %s1086_s30 }
  0xa0   : > { %s1088_s18 = scalar_lea.vmem %s1087_s30, 32  ;;  %p1089_p6 = scmp.lt.s32.totalorder %s349_s1, %s1087_s30 }
  0xa1   : > { %p1084_p2 = pnand %p1082_p7, %p1713_p9  ;;  %p1090_p11 = scmp.lt.s32.totalorder %s1088_s18, %s1081_s20 }
  0xa3   : > { %p1085_p13 = pneg %p1084_p2  ;;  %p1091_p10 = por %p1090_p11, %p1089_p6 }
  0xa5   : > { %p1092_p5 = pnand %p1091_p10, %p1085_p13 }
  0xa7   : > { %1095 = shalt.err (!%p1092_p5)
}
  0xa8   : > { %p1717_p8 = scmp.ne.s32.totalorder %s1705_s28, 0  ;;  %s1541_s4 = scalar_lea.hbm %s1665_s3, %s797_s11 }
  0xa9   : > { %s358_s29 = scalar_lea.vmem [#allocation8], %s1356_s15  ;;  %s1718_s13 = sand.u32 1, %s1224_s26  }
  0xaa   : > { %873 = dma.hbm_to_vmem [thread:$0]  (!%p1717_p8), %s1515_s16, 16, %s349_s1, %s1423_s17  }
  0xab   : > { %s366_s12 = sshll.u32 %s358_s29, 4  ;;  %s356_s8 = scalar_lea.sflag [#allocation9], %s1718_s13  ;;  %s367_s12 = int_to_ptr.vmem [resolvable:$true] %s366_s12 }
  0xac   : > { %s1096_s14 = scalar_lea.hbm %s1541_s4, 16  ;;  %s1101_s1 = scalar_lea.hbm %s1665_s3, 32 }
  0xad   : > { %p1097_p10 = scmp.ne.s32.totalorder %s1541_s4, %s1096_s14  ;;  %p1102_p1 = scmp.lt.u32.totalorder %s1541_s4, %s1665_s3 }
  0xae   : > { %p1103_p4 = scmp.lt.u32.totalorder %s1101_s1, %s1096_s14  ;;  %p1105_p7 = scmp.lt.u32.totalorder %s1096_s14, %s1541_s4 }
  0xaf   : > { %p1099_p3 = pnand %p1097_p10, %p1713_p9 }
  0xb0   : > { %p1104_p0 = por %p1103_p4, %p1102_p1 }
  0xb1   : > { %p1100_p12 = pneg %p1099_p3 }
  0xb2   : > { %p1106_p2 = por %p1105_p7, %p1104_p0 }
  0xb4   : > { %p1107_p13 = pnand %p1106_p2, %p1100_p12 }
  0xb6   : > { %1110 = shalt.err (!%p1107_p13)
}
  0xb7   : > { %s1111_s15 = scalar_lea.vmem %s367_s12, 16  ;;  %s1235_s9 = smov [#allocation8]  }
  0xb8   : > { %p1112_p6 = scmp.ne.s32.totalorder %s367_s12, %s1111_s15  ;;  %s1116_s30 = sshll.u32 %s1235_s9, 4  ;;  %s1117_s30 = int_to_ptr.vmem [resolvable:$false] %s1116_s30 }
  0xb9   : > { %s1118_s18 = scalar_lea.vmem %s1117_s30, 32  ;;  %p1119_p10 = scmp.lt.s32.totalorder %s367_s12, %s1117_s30 }
  0xba   : > { %p1114_p11 = pnand %p1112_p6, %p1713_p9  ;;  %p1120_p3 = scmp.lt.s32.totalorder %s1118_s18, %s1111_s15 }
  0xbc   : > { %p1115_p5 = pneg %p1114_p11  ;;  %p1121_p8 = por %p1120_p3, %p1119_p10 }
  0xbe   : > { %p1122_p1 = pnand %p1121_p8, %p1115_p5 }
  0xc0   : > { %1125 = shalt.err (!%p1122_p1)
}
  0xc1   : > { %p1719_p4 = scmp.ne.s32.totalorder %s1705_s28, 0  ;;  %p1720_p12 = scmp.ne.s32.totalorder %s1699_s10, 0 }
  0xc2   : > { %s1566_s6 = sand.u32 (!%p1720_p12), 1, %s1208_s22   ;;  %p1721_p9 = scmp.ne.s32.totalorder (!%p1720_p12), %s1694_s7, 0 }
  0xc3   : > { %876 = dma.hbm_to_vmem [thread:$0]  (!%p1719_p4), %s1541_s4, 16, %s367_s12, %s356_s8  }
  0xc4   : > { %375 = sbr.rel (%p1720_p12) target bundleno = 468 (0x1d4), region = 44  ;;  %s800_s21 = sshll.u32 (!%p1720_p12), %s1566_s6, 3 }
  0xc5   : > { %s378_s19 = scalar_lea.sflag (!%p1720_p12), [#allocation3], %s1566_s6  ;;  %s1570_s29 = scalar_lea.vmem (!%p1720_p12), [#allocation2], %s800_s21 }
  0xcb   : > { %1179 = dma.done.wait (%p1721_p9), %s378_s19, 128  }
  0xcc   : > { %1181 = vsyncadd (%p1721_p9), %s378_s19, 4294967168  ;;  %s386_s10 = sand.u32 1, %s1307_s27   ;;  %s801_s28 = sshll.u32 %s1566_s6, 4 }
  0xcd   : > { %s387_s4 = scalar_lea.sflag [#allocation6], %s386_s10  ;;  %s1580_s12 = scalar_lea.vmem [#allocation5], %s801_s28 }
  0xce   : > { %1183 = dma.done.wait (%p1721_p9), %s387_s4, 272  }
  0xcf   : > { %1185 = vsyncadd (%p1721_p9), %s387_s4, 4294967024  ;;  %s398_s13 = scalar_lea.vmem [#allocation7], %s1566_s6  ;;  %s404_s8 = scalar_lea.sflag [#allocation9], %s386_s10 }
  0xd0   : > { %1187 = dma.done.wait (%p1721_p9), %s404_s8, 16  }
  0xd1   : > { %1189 = vsyncadd (%p1721_p9), %s404_s8, 4294967280  ;;  %p1722_p8 = scmp.eq.s32.totalorder %s1307_s27, 0 }
  0xd3   : > { %1191 = dma.done.wait (%p1722_p8), [#allocation9], 512   ;;  %p1723_p0 = pmov %p1722_p8 }
  0xd5   : > { %1193 = vsyncadd (%p1723_p0), [#allocation9], 4294966784  ;;  %p1724_p7 = pmov %p1723_p0 }
  0xd6   : > { %p1725_p2 = pmov %p1723_p0 }
  0xd7   : > { %1195 = dma.done.wait (%p1724_p7), [#allocation12], 16  }
  0xd8   : > { %1197 = vsyncadd (%p1725_p2), [#allocation12], 4294967280  ;;  %v1236_v0 = vmov 0.0   ;;  %vm1237_vm0 = vmmov 0   ;;  %v945_v1 = vld [vmem:[#allocation10] sm:$0xff]   ;;  %v946_v2 = vld [vmem:[#allocation10 + $0x8] sm:$0xff]  }
  0xd9   : > { %827 = vmatprep.subr.bf16.mxu0 %v1236_v0  ;;  %835 = vmatprep.mubr.msk.bf16.mxu0 %vm1237_vm0, %v1236_v0  ;;  %v947_v3 = vld [vmem:[#allocation10 + $0x10] sm:$0xff]   ;;  %v948_v4 = vld [vmem:[#allocation10 + $0x18] sm:$0xff]   ;;  %vm506_vm1 = vcmask 523264   ;;  %v805_v6 = vld [vmem:[#allocation11] ss:$0 sm:$0xff]  ;;  %s1726_s27 = sld [smem:[#allocation21_spill]] }
  0xda   : > { %828 = vmatpush3.bf16.msra.mxu0 %v945_v1  ;;  %v949_v5 = vld [vmem:[%s1570_s29] sm:$0xff]   ;;  %v580_v11 = vld [vmem:[%s1580_s12] sm:$0xff]  ;;  %s821_s7 = sshll.u32 %s1216_s24, 8  ;;  %s455_s14 = scalar_lea.vmem [#allocation13], %s801_s28 }
  0xdb   : > { %829 = vmatprep.subr.bf16.mxu0 %v1236_v0  ;;  %v813_v8 = vld [vmem:[%s398_s13] ss:$0 sm:$0xff]  ;;  %s605_s17 = sshll.u32 %s455_s14, 4  ;;  %v581_v16 = vld [vmem:[%s1580_s12 + $0x8] sm:$0xff]  ;;  %s1727_s11 = sld [smem:[#allocation27_spill]]  ;;  %s1611_s17 = int_to_ptr.vmem [resolvable:$true] %s605_s17 }
  0xdc   : > { %s589_s24 = scalar_lea.sflag [#allocation4], %s1566_s6  ;;  %s1126_s15 = scalar_lea.vmem %s1611_s17, 256 }
  0xdd   : > { %p1127_p13 = scmp.ne.s32.totalorder %s1611_s17, %s1126_s15  ;;  %s1238_s9 = smov [#allocation13]  }
  0xde   : > { %830 = vmatpush3.bf16.msra.mxu0 %v946_v2  ;;  %s1130_s30 = sshll.u32 %s1238_s9, 4  ;;  %s1131_s30 = int_to_ptr.vmem [resolvable:$false] %s1130_s30 }
  0xdf   : > { %831 = vmatprep.subr.bf16.mxu0 %v1236_v0  ;;  %p1728_p6 = scmp.ne.s32.totalorder %s1726_s27, 0  ;;  %s1132_s18 = scalar_lea.vmem %s1131_s30, 512 }
  0xe0   : > { %p1133_p10 = scmp.lt.s32.totalorder %s1611_s17, %s1131_s30  ;;  %p1134_p3 = scmp.lt.s32.totalorder %s1132_s18, %s1126_s15 }
  0xe1   : > { %s1609_s20 = scalar_lea.hbm %s1727_s11, %s821_s7  ;;  %p1128_p11 = pnand %p1127_p13, %p1728_p6 }
  0xe2   : > { %832 = vmatpush3.bf16.msra.mxu0 %v947_v3  ;;  %p1135_p1 = por %p1134_p3, %p1133_p10 }
  0xe3   : > { %833 = vmatprep.subr.bf16.mxu0 %v1236_v0  ;;  %p1129_p5 = pneg %p1128_p11 }
  0xe5   : > { %p1136_p4 = pnand %p1135_p1, %p1129_p5 }
  0xe6   : > { %834 = vmatpush3.bf16.msra.mxu0 %v948_v4 }
  0xe9   : > { %836 = vmatmul.mubr.msk.bf16.vlgmr.msra.gmra.mrb[0].mxu0 %vm506_vm1, %v949_v5 }
 0x1bc   : > { %v544_v7 = vpop.f32.mrb[0].mxu0 }
 0x1bd   : > { %v545_v9 = vadd.f32 %v805_v6, %v544_v7  ;;  %v837_v10 = vpop.f32.mrb[1].mxu0 }
 0x1be   : > { %v547_v12 = vpop.f32.mrb[2].mxu0 }
 0x1bf   : > { %v582_v13 = vmul.f32 %v813_v8, %v545_v9  ;;  %v548_v14 = vadd.f32 %v805_v6, %v547_v12  ;;  %v838_v15 = vpop.f32.mrb[3].mxu0 }
 0x1c1   : > { %v584_v17 = vadd.f32 %v582_v13, %v580_v11  ;;  %v583_v18 = vmul.f32 %v813_v8, %v548_v14 }
 0x1c3   : > { %586 = vst.msk [vmem:[%s455_s14] sm:$0xff] %vm506_vm1, %v584_v17  ;;  %v585_v19 = vadd.f32 %v583_v18, %v581_v16 }
 0x1c5   : > { %587 = vst.msk [vmem:[%s455_s14 + $0x8] sm:$0xff] %vm506_vm1, %v585_v19 }
 0x1c6   : > { %1139 = shalt.err (!%p1136_p4)
}
 0x1c7   : > { %s1140_s21 = scalar_lea.hbm %s1609_s20, 256  ;;  %s1144_s10 = scalar_lea.hbm %s1727_s11, 512 }
 0x1c8   : > { %p1141_p12 = scmp.ne.s32.totalorder %s1609_s20, %s1140_s21  ;;  %p1145_p0 = scmp.lt.u32.totalorder %s1609_s20, %s1727_s11 }
 0x1c9   : > { %p1146_p7 = scmp.lt.u32.totalorder %s1144_s10, %s1140_s21  ;;  %p1148_p13 = scmp.lt.u32.totalorder %s1140_s21, %s1609_s20 }
 0x1ca   : > { %p1142_p9 = pnand %p1141_p12, %p1728_p6 }
 0x1cb   : > { %p1147_p2 = por %p1146_p7, %p1145_p0 }
 0x1cc   : > { %p1143_p8 = pneg %p1142_p9 }
 0x1cd   : > { %p1149_p11 = por %p1148_p13, %p1147_p2 }
 0x1cf   : > { %p1150_p5 = pnand %p1149_p11, %p1143_p8 }
 0x1d1   : > { %1153 = shalt.err (!%p1150_p5)
}
 0x1d2   : > { %s1239_s12 = smov 128   ;;  %s1240_s13 = smov 8  }
 0x1d3   : > { %855 = dma.vmem_to_hbm [thread:$0]  (%p1728_p6), %s1611_s17, 256, %s1609_s20, %s589_s24, %s1239_s12, %s1239_s12, %s1240_s13  }
 0x1d4 PF: > { %s1729_s8 = sld [smem:[#allocation20_spill]]  ;;  %s1730_s7 = sld [smem:[#allocation22_spill]] }
 0x1d5   : > { %p1732_p3 = scmp.ge.s32.totalorder %s1224_s26, 2 }
 0x1da   : > { %s620_s14 = sand.u32 1, %s1729_s8   ;;  %p1731_p10 = scmp.ne.s32.totalorder %s1730_s7, 0 }
 0x1db   : > { %s621_s16 = scalar_lea.sflag [#allocation4], %s620_s14 }
 0x1dc   : > { %p878_p1 = pnand %p1732_p3, %p1731_p10 }
 0x1de   : > { %1199 = dma.done.wait (!%p878_p1), %s621_s16, 256  }
 0x1df   : > { %1201 = vsyncadd (!%p878_p1), %s621_s16, 4294967040  ;;  %s29_s26 = sadd.s32 1, %s1224_s26   ;;  %s1733_s1 = sld [smem:[#allocation24_spill]] }
 0x1e0   : > { %p26_p4 = scmp.ge.s32.totalorder %s29_s26, 4   ;;  %s1734_s6 = sld [smem:[#allocation23_spill]] }
 0x1e1   : > { %s1735_s21 = smov %s1208_s22  ;;  %s1736_s22 = smov %s1212_s23 }
 0x1e2   : > { %s1738_s24 = smov %s1220_s25  ;;  %28 = sbr.rel (!%p26_p4) target bundleno = 15 (0xf), region = 136 }
 0x1e5   : > { %s1737_s23 = smov %s1733_s1 }
 0x1e6   : > { %s1739_s25 = smov %s1734_s6 }
 0x1e9   :  { %626 = vsyncpa [#allocation3], 1 }
 0x1ea   :  { %628 = vsyncpa [#allocation3 + $0x1], 1 }
 0x1eb   :  { %629 = vsyncpa [#allocation6], 1 }
 0x1ec   :  { %631 = vsyncpa [#allocation6 + $0x1], 1 }
 0x1ed   :  { %632 = vsyncpa [#allocation9], 1 }
 0x1ee   :  { %634 = vsyncpa [#allocation9 + $0x1], 1 }
 0x1ef   :  { %635 = vsyncpa [#allocation12], 1 }
 0x1f0   :  { %636 = vsyncpa [#allocation4], 1 }
 0x1f1   :  { %638 = vsyncpa [#allocation4 + $0x1], 1 }

// kernel: transformer_block_forward.25
= control target key start
LH: loop header
LB: loop body
LE: loop exit
PB: predicated region body
PF: predicated region fallthrough
CT: control target
= control target key end

     0   :  { %s2725_s0 = inlined_call_operand.hbm [shape: f32[2,16,64], index: 0, kind: input, shape index: {}]   ;;  %s2726_s1 = inlined_call_operand.hbm [shape: f32[2,1,64], index: 1, kind: input, shape index: {}, may-alias: {1,4}]   ;;  %s2727_s2 = inlined_call_operand.hbm [shape: f32[2,1,64], index: 2, kind: input, shape index: {}, may-alias: {2,5}]   ;;  %s2728_s3 = inlined_call_operand.hbm [shape: f32[2,1,64], index: 3, kind: input, shape index: {}, may-alias: {3,6}]   ;;  %s2729_s4 = inlined_call_operand.hbm [shape: f32[2,1,64], index: 4, kind: input, shape index: {}, may-alias: {1,4}]   ;;  %s2730_s5 = inlined_call_operand.hbm [shape: f32[2,1,64], index: 5, kind: input, shape index: {}, may-alias: {2,5}]   ;;  %s2731_s6 = inlined_call_operand.hbm [shape: f32[2,1,64], index: 6, kind: input, shape index: {}, may-alias: {3,6}]   ;;  %s2732_s7 = inlined_call_operand.hbm [shape: bf16[64,256], index: 7, kind: input, shape index: {}]   ;;  %s2733_s8 = inlined_call_operand.hbm [shape: f32[1,256], index: 8, kind: input, shape index: {}]   ;;  %s2734_s9 = inlined_call_operand.hbm [shape: bf16[256,64], index: 9, kind: input, shape index: {}]   ;;  %s2735_s10 = inlined_call_operand.hbm [shape: f32[1,64], index: 10, kind: input, shape index: {}]   ;;  %s2736_s11 = inlined_call_operand.hbm [shape: f32[2,16,64], index: 11, kind: output, shape index: {}]  }
   0x1   :  { %2767 = sst [smem:[#allocation38_spill]] %s2726_s1 }
   0x2   :  { %2768 = sst [smem:[#allocation39_spill]] %s2732_s7 }
   0x3   :  { %2769 = sst [smem:[#allocation40_spill]] %s2734_s9 }
   0x4   :  { %2770 = sst [smem:[#allocation41_spill]] %s2736_s11 }
   0x5   :  { %16 = vsyncpa [#allocation4], 0 }
   0x6   :  { %18 = vsyncpa [#allocation4 + $0x1], 0 }
   0x7   :  { %19 = vsyncpa [#allocation7], 0 }
   0x8   :  { %21 = vsyncpa [#allocation7 + $0x1], 0 }
   0x9   :  { %22 = vsyncpa [#allocation10], 0 }
   0xa   :  { %24 = vsyncpa [#allocation10 + $0x1], 0 }
   0xb   :  { %25 = vsyncpa [#allocation13], 0 }
   0xc   :  { %27 = vsyncpa [#allocation13 + $0x1], 0 }
   0xd   :  { %28 = vsyncpa [#allocation16], 0 }
   0xe   :  { %29 = vsyncpa [#allocation19], 0 }
   0xf   :  { %30 = vsyncpa [#allocation5], 0 }
  0x10   :  { %32 = vsyncpa [#allocation5 + $0x1], 0  ;;  %s2186_s17 = smov 0   ;;  %s2188_s18 = smov 0  }
  0x11   :  { %s2190_s19 = smov 0   ;;  %s2192_s20 = smov 0  }
  0x12   :  { %s2194_s21 = smov 0   ;;  %s2196_s22 = smov 0  }
  0x13 LB: > { %2771 = sst [smem:[#allocation29_spill]] %s2084_s17  ;;  %s2217_s23 = sadd.s32 4294967295, %s2104_s22   ;;  %s2104_s22 = sphi %s2196_s22, %s38_s22   ;;  %s2100_s21 = sphi %s2194_s21, %s2832_s21   ;;  %s2096_s20 = sphi %s2192_s20, %s2831_s20   ;;  %s2092_s19 = sphi %s2190_s19, %s2830_s19   ;;  %s2088_s18 = sphi %s2188_s18, %s2829_s18   ;;  %s2084_s17 = sphi %s2186_s17, %s2827_s17  }
  0x14   : > { %2772 = sst [smem:[#allocation30_spill]] %s2088_s18  ;;  %s1415_s24 = sadd.s32 4294967294, %s2104_s22  }
  0x15   : > { %2773 = sst [smem:[#allocation31_spill]] %s2096_s20  ;;  %p73_p0 = scmp.ne.s32.totalorder %s2092_s19, %s2088_s18 }
  0x16   : > { %2774 = sst [smem:[#allocation32_spill]] %s2104_s22  ;;  %p74_p1 = scmp.eq.s32.totalorder %s2104_s22, 0 }
  0x17   : > { %2775 = sst [smem:[#allocation33_spill]] %s2217_s23  ;;  %p79_p2 = scmp.ne.s32.totalorder %s2088_s18, %s2084_s17 }
  0x18   : > { %p2742_p3 = scmp.eq.s32.totalorder %s2217_s23, 0  ;;  %p2226_p4 = por %p74_p1, %p73_p0 }
  0x19   : > { %p360_p5 = scmp.eq.s32.totalorder %s2217_s23, 1  ;;  %p366_p7 = scmp.eq.s32.totalorder %s1415_s24, 1 }
  0x1a   : > { %p2233_p6 = por %p2742_p3, %p79_p2  ;;  %p1416_p9 = scmp.ge.s32.totalorder %s2104_s22, 1 }
  0x1b   : > { %p2237_p8 = por %p360_p5, %p73_p0  ;;  %p2242_p10 = por %p366_p7, %p79_p2 }
  0x1c   : > { %s2777_s26 = scalar_select %p2233_p6, 1, 0 }
  0x1d   : > { %s2779_s27 = scalar_select %p2237_p8, 1, 0 }
  0x1e   : > { %2778 = sst [smem:[#allocation34_spill]] %s2777_s26  ;;  %p373_p11 = scmp.lt.s32.totalorder %s2104_s22, 3 }
  0x1f   : > { %2780 = sst [smem:[#allocation35_spill]] %s2779_s27  ;;  %s2106_s30 = smov [#allocation15]  }
  0x20   : > { %s2781_s28 = scalar_select %p2242_p10, 1, 0 }
  0x21   : > { %p2247_p12 = pnand %p1416_p9, %p373_p11  ;;  %s388_s12 = sshll.u32 %s2106_s30, 4  ;;  %s2251_s12 = int_to_ptr.vmem [resolvable:$true] %s388_s12 }
  0x22   : > { %2782 = sst [smem:[#allocation36_spill]] %s2781_s28  ;;  %p1574_p1 = scmp.lt.s32.totalorder %s2104_s22, 2 }
  0x23   : > { %s2783_s29 = scalar_select %p2247_p12, 1, 0 }
  0x24   : > { %p1531_p13 = pneg %p2247_p12  ;;  %p2265_p2 = pnand %p1574_p1, %p2226_p4 }
  0x25   : > { %s2107_s15 = smov [#allocation18]   ;;  %s2786_s7 = sld [smem:[#allocation39_spill]] }
  0x26   : > { %p2259_p5 = pnand %p1531_p13, %p2742_p3  ;;  %s418_s16 = sshll.u32 %s2107_s15, 4  ;;  %s2269_s16 = int_to_ptr.vmem [resolvable:$true] %s418_s16 }
  0x27   : > { %s2785_s14 = scalar_select %p2265_p2, 1, 0 }
  0x28   : > { %s2784_s13 = scalar_select %p2259_p5, 1, 0 }
  0x29   : > { %p2279_p9 = pneg %p2259_p5 }
  0x2b   : > { %s1680_s28 = scalar_lea.hbm %s2786_s7, 1024 }
  0x2c   : > { %p1681_p7 = scmp.ne.s32.totalorder %s2786_s7, %s1680_s28  ;;  %p1687_p13 = scmp.lt.u32.totalorder %s1680_s28, %s2786_s7 }
  0x2d   : > { %s2787_s25 = scalar_select %p2279_p9, 1, 0 }
  0x2e   : > { %p1683_p4 = pnand %p2279_p9, %p1681_p7 }
  0x30   : > { %p1684_p11 = pneg %p1683_p4 }
  0x32   : > { %p1689_p1 = pnand %p1687_p13, %p1684_p11 }
  0x34   : > { %1692 = shalt.err (!%p1689_p1)
}
  0x35   : > { %s1693_s11 = scalar_lea.vmem %s2251_s12, 1024  ;;  %p1701_p8 = scmp.lt.s32.totalorder %s2251_s12, %s2251_s12 }
  0x36   : > { %p1694_p0 = scmp.ne.s32.totalorder %s2251_s12, %s1693_s11  ;;  %p1702_p6 = scmp.lt.s32.totalorder %s1693_s11, %s1693_s11 }
  0x38   : > { %p1696_p3 = pnand %p1694_p0, %p2279_p9  ;;  %p1703_p7 = por %p1702_p6, %p1701_p8 }
  0x3a   : > { %p1697_p10 = pneg %p1696_p3 }
  0x3c   : > { %p1704_p4 = pnand %p1703_p7, %p1697_p10 }
  0x3e   : > { %1707 = shalt.err (!%p1704_p4)
}
  0x3f   : > { %s2750_s17 = smov 128   ;;  %s2751_s27 = smov 8  }
  0x40   : > { %1534 = dma.hbm_to_vmem [thread:$0]  (!%p2259_p5), %s2786_s7, 1024, %s2251_s12, [#allocation16], %s2750_s17, %s2750_s17, %s2751_s27  }
  0x41   : > { %s2788_s9 = sld [smem:[#allocation40_spill]] }
  0x47   : > { %s1708_s11 = scalar_lea.hbm %s2788_s9, 2048 }
  0x48   : > { %p1709_p3 = scmp.ne.s32.totalorder %s2788_s9, %s1708_s11  ;;  %p1715_p10 = scmp.lt.u32.totalorder %s1708_s11, %s2788_s9 }
  0x4a   : > { %p1711_p6 = pnand %p1709_p3, %p2279_p9 }
  0x4c   : > { %p1712_p8 = pneg %p1711_p6 }
  0x4e   : > { %p1717_p0 = pnand %p1715_p10, %p1712_p8 }
  0x50   : > { %1720 = shalt.err (!%p1717_p0)
}
  0x51   : > { %s1721_s12 = scalar_lea.vmem %s2269_s16, 2048  ;;  %p1729_p7 = scmp.lt.s32.totalorder %s2269_s16, %s2269_s16 }
  0x52   : > { %p1722_p11 = scmp.ne.s32.totalorder %s2269_s16, %s1721_s12  ;;  %p1730_p4 = scmp.lt.s32.totalorder %s1721_s12, %s1721_s12 }
  0x54   : > { %p1724_p13 = pnand %p1722_p11, %p2279_p9  ;;  %p1731_p3 = por %p1730_p4, %p1729_p7 }
  0x56   : > { %p1725_p1 = pneg %p1724_p13 }
  0x58   : > { %p1732_p6 = pnand %p1731_p3, %p1725_p1 }
  0x5a   : > { %1735 = shalt.err (!%p1732_p6)
}
  0x5b   : > { %s2110_s20 = smov 64   ;;  %s2111_s18 = smov 4  }
  0x5c   : > { %1540 = dma.hbm_to_vmem [thread:$0]  (!%p2259_p5), %s2788_s9, 2048, %s2269_s16, [#allocation19], %s2110_s20, %s2110_s20, %s2111_s18  }
  0x5d   : > { %s57_s24 = sadd.s32 1, %s2100_s21  ;;  %s2329_s30 = sand.u32 1, %s2092_s19  }
  0x5e   : > { %p59_p8 = scmp.ge.s32.totalorder %s57_s24, 2  ;;  %s2332_s15 = sand.u32 1, %s2104_s22  }
  0x5f   : > { %s2337_s11 = sshll.u32 %s2100_s21, 4  ;;  %s469_s12 = scalar_lea.vmem [#allocation6], %s2329_s30 }
  0x60   : > { %s2834_s24 = smov (%p59_p8, %s57_s24), 0  ;;  %s476_s17 = sshll.u32 %s469_s12, 4  ;;  %s2352_s17 = int_to_ptr.vmem [resolvable:$true] %s476_s17 }
  0x61   : > { %2789 = sst [smem:[#allocation37_spill]] %s2834_s24  ;;  %s61_s23 = ssub.s32 %s2100_s21, %s2834_s24 }
  0x62   : > { %s2790_s1 = sld [smem:[#allocation38_spill]]  ;;  %p2348_p10 = scmp.eq.s32.totalorder %s61_s23, 0 }
  0x63   : > { %p2359_p11 = pneg %p2265_p2 }
  0x64   : > { %s2791_s26 = scalar_select %p2348_p10, 1, 0 }
  0x65   : > { %s2792_s12 = scalar_select %p2359_p11, 1, 0 }
  0x68   : > { %s2346_s18 = scalar_lea.hbm %s2790_s1, %s2337_s11  ;;  %s1741_s23 = scalar_lea.hbm %s2790_s1, 32 }
  0x69   : > { %s1736_s28 = scalar_lea.hbm %s2346_s18, 16  ;;  %p1742_p7 = scmp.lt.u32.totalorder %s2346_s18, %s2790_s1 }
  0x6a   : > { %p1737_p0 = scmp.ne.s32.totalorder %s2346_s18, %s1736_s28  ;;  %p1743_p4 = scmp.lt.u32.totalorder %s1741_s23, %s1736_s28 }
  0x6b   : > { %p1745_p6 = scmp.lt.u32.totalorder %s1736_s28, %s2346_s18 }
  0x6c   : > { %p1739_p13 = pnand %p2359_p11, %p1737_p0  ;;  %p1744_p3 = por %p1743_p4, %p1742_p7 }
  0x6e   : > { %p1740_p1 = pneg %p1739_p13  ;;  %p1746_p8 = por %p1745_p6, %p1744_p3 }
  0x70   : > { %p1747_p12 = pnand %p1746_p8, %p1740_p1 }
  0x72   : > { %1750 = shalt.err (!%p1747_p12)
}
  0x73   : > { %s1751_s27 = scalar_lea.vmem %s2352_s17, 16  ;;  %s2112_s16 = smov [#allocation6]  }
  0x74   : > { %p1752_p0 = scmp.ne.s32.totalorder %s2352_s17, %s1751_s27  ;;  %s1756_s20 = sshll.u32 %s2112_s16, 4  ;;  %s1757_s20 = int_to_ptr.vmem [resolvable:$false] %s1756_s20 }
  0x75   : > { %s1758_s7 = scalar_lea.vmem %s1757_s20, 32  ;;  %p1759_p9 = scmp.lt.s32.totalorder %s2352_s17, %s1757_s20 }
  0x76   : > { %p1754_p13 = pnand %p1752_p0, %p2359_p11  ;;  %p1760_p10 = scmp.lt.s32.totalorder %s1758_s7, %s1751_s27 }
  0x78   : > { %p1755_p5 = pneg %p1754_p13  ;;  %p1761_p7 = por %p1760_p10, %p1759_p9 }
  0x7a   : > { %p1762_p4 = pnand %p1761_p7, %p1755_p5 }
  0x7c   : > { %1765 = shalt.err (!%p1762_p4)
}
  0x7d   : > { %s2793_s9 = scalar_lea.sflag [#allocation7], %s2332_s15  ;;  %s2794_s28 = sadd.s32 1, %s2092_s19 }
  0x7e   : > { %1550 = dma.hbm_to_vmem [thread:$0]  (!%p2265_p2), %s2346_s18, 16, %s2352_s17, %s2793_s9  }
  0x7f   : > { %p2795_p12 = scmp.ne.s32.totalorder %s2791_s26, 0  ;;  %s2395_s20 = scalar_lea.hbm %s2728_s3, %s2337_s11 }
  0x80   : > { %s503_s7 = scalar_lea.vmem [#allocation9], %s2329_s30  ;;  %s2762_s24 = scalar_lea.sflag [#allocation10], %s2332_s15 }
  0x81   : > { %s2389_s27 = scalar_select %p2795_p12, %s2092_s19, %s2794_s28  }
  0x82   : > { %s510_s1 = sshll.u32 %s503_s7, 4  ;;  %s1766_s22 = scalar_lea.hbm %s2395_s20, 16  ;;  %s511_s1 = int_to_ptr.vmem [resolvable:$true] %s510_s1 }
  0x83   : > { %p1767_p5 = scmp.ne.s32.totalorder %s2395_s20, %s1766_s22  ;;  %s1771_s26 = scalar_lea.hbm %s2728_s3, 32 }
  0x84   : > { %p1772_p1 = scmp.lt.u32.totalorder %s2395_s20, %s2728_s3  ;;  %p1773_p3 = scmp.lt.u32.totalorder %s1771_s26, %s1766_s22 }
  0x85   : > { %p1769_p9 = pnand %p1767_p5, %p2359_p11  ;;  %p1775_p8 = scmp.lt.u32.totalorder %s1766_s22, %s2395_s20 }
  0x86   : > { %p1774_p6 = por %p1773_p3, %p1772_p1 }
  0x87   : > { %p1770_p10 = pneg %p1769_p9 }
  0x88   : > { %p1776_p0 = por %p1775_p8, %p1774_p6 }
  0x8a   : > { %p1777_p13 = pnand %p1776_p0, %p1770_p10 }
  0x8c   : > { %1780 = shalt.err (!%p1777_p13)
}
  0x8d   : > { %s1781_s23 = scalar_lea.vmem %s511_s1, 16  ;;  %s2113_s16 = smov [#allocation9]  }
  0x8e   : > { %p1782_p7 = scmp.ne.s32.totalorder %s511_s1, %s1781_s23  ;;  %s1786_s7 = sshll.u32 %s2113_s16, 4  ;;  %s1787_s7 = int_to_ptr.vmem [resolvable:$false] %s1786_s7 }
  0x8f   : > { %s1788_s17 = scalar_lea.vmem %s1787_s7, 32  ;;  %p1789_p5 = scmp.lt.s32.totalorder %s511_s1, %s1787_s7 }
  0x90   : > { %p1784_p4 = pnand %p1782_p7, %p2359_p11  ;;  %p1790_p9 = scmp.lt.s32.totalorder %s1788_s17, %s1781_s23 }
  0x92   : > { %p1785_p12 = pneg %p1784_p4  ;;  %p1791_p2 = por %p1790_p9, %p1789_p5 }
  0x94   : > { %p1792_p1 = pnand %p1791_p2, %p1785_p12 }
  0x96   : > { %1795 = shalt.err (!%p1792_p1)
}
  0x97   : > { %p2796_p3 = scmp.ne.s32.totalorder %s2785_s14, 0  ;;  %s2422_s26 = scalar_lea.hbm %s2730_s5, %s2337_s11 }
  0x98   : > { %s537_s9 = scalar_lea.vmem [#allocation12], %s2329_s30  ;;  %s2114_s23 = smov [#allocation17]  }
  0x99   : > { %1556 = dma.hbm_to_vmem [thread:$0]  (!%p2796_p3), %s2395_s20, 16, %s511_s1, %s2762_s24  }
  0x9a   : > { %s544_s28 = sshll.u32 %s537_s9, 4  ;;  %s2427_s16 = sshll.u32 %s2114_s23, 4  ;;  %s2425_s28 = int_to_ptr.vmem [resolvable:$true] %s544_s28  ;;  %s406_s16 = int_to_ptr.vmem [resolvable:$true] %s2427_s16 }
  0x9b   : > { %s2764_s7 = scalar_lea.sflag [#allocation13], %s2332_s15  ;;  %s1796_s17 = scalar_lea.hbm %s2422_s26, 16 }
  0x9c   : > { %p1797_p2 = scmp.ne.s32.totalorder %s2422_s26, %s1796_s17  ;;  %s1801_s22 = scalar_lea.hbm %s2730_s5, 32 }
  0x9d   : > { %p1802_p8 = scmp.lt.u32.totalorder %s2422_s26, %s2730_s5  ;;  %p1803_p0 = scmp.lt.u32.totalorder %s1801_s22, %s1796_s17 }
  0x9e   : > { %p1799_p10 = pnand %p1797_p2, %p2359_p11  ;;  %p1805_p7 = scmp.lt.u32.totalorder %s1796_s17, %s2422_s26 }
  0x9f   : > { %p1804_p13 = por %p1803_p0, %p1802_p8 }
  0xa0   : > { %p1800_p6 = pneg %p1799_p10 }
  0xa1   : > { %p1806_p4 = por %p1805_p7, %p1804_p13 }
  0xa3   : > { %p1807_p12 = pnand %p1806_p4, %p1800_p6 }
  0xa5   : > { %1810 = shalt.err (!%p1807_p12)
}
  0xa6   : > { %s1811_s9 = scalar_lea.vmem %s2425_s28, 16  ;;  %s2115_s23 = smov [#allocation12]  }
  0xa7   : > { %p1812_p5 = scmp.ne.s32.totalorder %s2425_s28, %s1811_s9  ;;  %s1816_s1 = sshll.u32 %s2115_s23, 4  ;;  %s1817_s1 = int_to_ptr.vmem [resolvable:$false] %s1816_s1 }
  0xa8   : > { %s1818_s24 = scalar_lea.vmem %s1817_s1, 32  ;;  %p1819_p2 = scmp.lt.s32.totalorder %s2425_s28, %s1817_s1 }
  0xa9   : > { %p1814_p9 = pnand %p1812_p5, %p2359_p11  ;;  %p1820_p10 = scmp.lt.s32.totalorder %s1818_s24, %s1811_s9 }
  0xab   : > { %p1815_p1 = pneg %p1814_p9  ;;  %p1821_p8 = por %p1820_p10, %p1819_p2 }
  0xad   : > { %p1822_p0 = pnand %p1821_p8, %p1815_p1 }
  0xaf   : > { %1825 = shalt.err (!%p1822_p0)
}
  0xb0   : > { %1562 = dma.hbm_to_vmem [thread:$0]  (!%p2796_p3), %s2422_s26, 16, %s2425_s28, %s2764_s7  }
  0xb1   : > { %s1826_s22 = scalar_lea.hbm %s2733_s8, 32  ;;  %p2797_p13 = scmp.ne.s32.totalorder %s2787_s25, 0 }
  0xb2   : > { %p1827_p6 = scmp.ne.s32.totalorder %s2733_s8, %s1826_s22  ;;  %p1833_p12 = scmp.lt.u32.totalorder %s1826_s22, %s2733_s8 }
  0xb4   : > { %p1829_p7 = pnand %p1827_p6, %p2797_p13 }
  0xb6   : > { %p1830_p4 = pneg %p1829_p7 }
  0xb8   : > { %p1835_p5 = pnand %p1833_p12, %p1830_p4 }
  0xba   : > { %1838 = shalt.err (!%p1835_p5)
}
  0xbb   : > { %s1839_s24 = scalar_lea.vmem %s406_s16, 32  ;;  %p1847_p10 = scmp.lt.s32.totalorder %s406_s16, %s406_s16 }
  0xbc   : > { %p1840_p9 = scmp.ne.s32.totalorder %s406_s16, %s1839_s24  ;;  %p1848_p8 = scmp.lt.s32.totalorder %s1839_s24, %s1839_s24 }
  0xbe   : > { %p1842_p1 = pnand %p1840_p9, %p2797_p13  ;;  %p1849_p0 = por %p1848_p8, %p1847_p10 }
  0xc0   : > { %p1843_p2 = pneg %p1842_p1 }
  0xc2   : > { %p1850_p3 = pnand %p1849_p0, %p1843_p2 }
  0xc4   : > { %1853 = shalt.err (!%p1850_p3)
}
  0xc5   : > { %p2798_p6 = scmp.ne.s32.totalorder %s2784_s13, 0  ;;  %s2116_s17 = smov [#allocation20]  }
  0xc6   : > { %s432_s20 = sshll.u32 %s2116_s17, 4  ;;  %s1422_s22 = sshll.u32 %s2329_s30, 4  ;;  %s433_s20 = int_to_ptr.vmem [resolvable:$true] %s432_s20 }
  0xc7   : > { %1537 = dma.hbm_to_vmem [thread:$0]  (!%p2798_p6), %s2733_s8, 32, %s406_s16, [#allocation16]  }
  0xc8   : > { %s1854_s9 = scalar_lea.hbm %s2735_s10, 16 }
  0xc9   : > { %p1855_p3 = scmp.ne.s32.totalorder %s2735_s10, %s1854_s9  ;;  %p1861_p12 = scmp.lt.u32.totalorder %s1854_s9, %s2735_s10 }
  0xcb   : > { %p1857_p7 = pnand %p1855_p3, %p2797_p13 }
  0xcd   : > { %p1858_p4 = pneg %p1857_p7 }
  0xcf   : > { %p1863_p5 = pnand %p1861_p12, %p1858_p4 }
  0xd1   : > { %1866 = shalt.err (!%p1863_p5)
}
  0xd2   : > { %s1867_s16 = scalar_lea.vmem %s433_s20, 16  ;;  %s1874_s28 = scalar_lea.vmem %s433_s20, 32 }
  0xd3   : > { %p1868_p9 = scmp.ne.s32.totalorder %s433_s20, %s1867_s16  ;;  %p1875_p10 = scmp.lt.s32.totalorder %s433_s20, %s433_s20 }
  0xd4   : > { %p1876_p8 = scmp.lt.s32.totalorder %s1874_s28, %s1867_s16 }
  0xd5   : > { %p1870_p1 = pnand %p1868_p9, %p2797_p13 }
  0xd6   : > { %p1877_p0 = por %p1876_p8, %p1875_p10 }
  0xd7   : > { %p1871_p2 = pneg %p1870_p1 }
  0xd9   : > { %p1878_p11 = pnand %p1877_p0, %p1871_p2 }
  0xdb   : > { %1881 = shalt.err (!%p1878_p11)
}
  0xdc   : > { %1543 = dma.hbm_to_vmem [thread:$0]  (!%p2798_p6), %s2735_s10, 16, %s433_s20, [#allocation19]  }
  0xdd   : > { %s1475_s7 = sshll.u32 %s2100_s21, 8  ;;  %s447_s1 = scalar_lea.vmem [#allocation3], %s1422_s22 }
  0xde   : > { %s2495_s9 = scalar_lea.hbm %s2725_s0, %s1475_s7  ;;  %s456_s24 = sshll.u32 %s447_s1, 4  ;;  %s2497_s24 = int_to_ptr.vmem [resolvable:$true] %s456_s24 }
  0xdf   : > { %s444_s13 = scalar_lea.sflag [#allocation4], %s2329_s30  ;;  %s1882_s26 = scalar_lea.hbm %s2495_s9, 256 }
  0xe0   : > { %p1883_p11 = scmp.ne.s32.totalorder %s2495_s9, %s1882_s26  ;;  %p2799_p13 = scmp.ne.s32.totalorder %s2792_s12, 0 }
  0xe1   : > { %s1887_s28 = scalar_lea.hbm %s2725_s0, 512  ;;  %p1888_p7 = scmp.lt.u32.totalorder %s2495_s9, %s2725_s0 }
  0xe2   : > { %p1885_p3 = pnand %p1883_p11, %p2799_p13  ;;  %p1889_p4 = scmp.lt.u32.totalorder %s1887_s28, %s1882_s26 }
  0xe3   : > { %p1891_p5 = scmp.lt.u32.totalorder %s1882_s26, %s2495_s9 }
  0xe4   : > { %p1886_p6 = pneg %p1885_p3  ;;  %p1890_p12 = por %p1889_p4, %p1888_p7 }
  0xe6   : > { %p1892_p9 = por %p1891_p5, %p1890_p12 }
  0xe8   : > { %p1893_p1 = pnand %p1892_p9, %p1886_p6 }
  0xea   : > { %1896 = shalt.err (!%p1893_p1)
}
  0xeb   : > { %s1897_s22 = scalar_lea.vmem %s2497_s24, 256  ;;  %s2117_s7 = smov [#allocation3]  }
  0xec   : > { %p1898_p2 = scmp.ne.s32.totalorder %s2497_s24, %s1897_s22  ;;  %s1902_s23 = sshll.u32 %s2117_s7, 4  ;;  %s1903_s23 = int_to_ptr.vmem [resolvable:$false] %s1902_s23 }
  0xed   : > { %s1904_s25 = scalar_lea.vmem %s1903_s23, 512  ;;  %p1905_p0 = scmp.lt.s32.totalorder %s2497_s24, %s1903_s23 }
  0xee   : > { %p1900_p10 = pnand %p1898_p2, %p2799_p13  ;;  %p1906_p11 = scmp.lt.s32.totalorder %s1904_s25, %s1897_s22 }
  0xf0   : > { %p1901_p8 = pneg %p1900_p10  ;;  %p1907_p3 = por %p1906_p11, %p1905_p0 }
  0xf2   : > { %p1908_p7 = pnand %p1907_p3, %p1901_p8 }
  0xf4   : > { %1911 = shalt.err (!%p1908_p7)
}
  0xf5   : > { %p2800_p6 = scmp.ne.s32.totalorder %s2785_s14, 0  ;;  %s2801_s1 = smov 8  }
  0xf6   : > { %s2802_s26 = smov 128   ;;  %s2530_s28 = scalar_lea.hbm %s2727_s2, %s2337_s11 }
  0xf7   : > { %1547 = dma.hbm_to_vmem [thread:$0]  (!%p2800_p6), %s2495_s9, 256, %s2497_s24, %s444_s13, %s2802_s26, %s2802_s26, %s2801_s1  }
  0xf8   : > { %s486_s17 = scalar_lea.vmem [#allocation8], %s2329_s30  ;;  %s1912_s22 = scalar_lea.hbm %s2530_s28, 16 }
  0xf9   : > { %s493_s18 = sshll.u32 %s486_s17, 4  ;;  %p1913_p4 = scmp.ne.s32.totalorder %s2530_s28, %s1912_s22  ;;  %s494_s18 = int_to_ptr.vmem [resolvable:$true] %s493_s18 }
  0xfa   : > { %s1917_s9 = scalar_lea.hbm %s2727_s2, 32  ;;  %p1918_p9 = scmp.lt.u32.totalorder %s2530_s28, %s2727_s2 }
  0xfb   : > { %p1915_p12 = pnand %p1913_p4, %p2799_p13  ;;  %p1919_p1 = scmp.lt.u32.totalorder %s1917_s9, %s1912_s22 }
  0xfc   : > { %p1921_p10 = scmp.lt.u32.totalorder %s1912_s22, %s2530_s28 }
  0xfd   : > { %p1916_p5 = pneg %p1915_p12  ;;  %p1920_p2 = por %p1919_p1, %p1918_p9 }
  0xff   : > { %p1922_p8 = por %p1921_p10, %p1920_p2 }
 0x101   : > { %p1923_p0 = pnand %p1922_p8, %p1916_p5 }
 0x103   : > { %1926 = shalt.err (!%p1923_p0)
}
 0x104   : > { %s1927_s25 = scalar_lea.vmem %s494_s18, 16  ;;  %s2118_s1 = smov [#allocation8]  }
 0x105   : > { %p1928_p11 = scmp.ne.s32.totalorder %s494_s18, %s1927_s25  ;;  %s1932_s26 = sshll.u32 %s2118_s1, 4  ;;  %s1933_s26 = int_to_ptr.vmem [resolvable:$false] %s1932_s26 }
 0x106   : > { %s1934_s20 = scalar_lea.vmem %s1933_s26, 32  ;;  %p1935_p4 = scmp.lt.s32.totalorder %s494_s18, %s1933_s26 }
 0x107   : > { %p1930_p3 = pnand %p1928_p11, %p2799_p13  ;;  %p1936_p12 = scmp.lt.s32.totalorder %s1934_s20, %s1927_s25 }
 0x109   : > { %p1931_p7 = pneg %p1930_p3  ;;  %p1937_p6 = por %p1936_p12, %p1935_p4 }
 0x10b   : > { %p1938_p1 = pnand %p1937_p6, %p1931_p7 }
 0x10d   : > { %1941 = shalt.err (!%p1938_p1)
}
 0x10e   : > { %p2803_p9 = scmp.ne.s32.totalorder %s2785_s14, 0  ;;  %s2804_s16 = scalar_lea.sflag [#allocation7], %s2332_s15 }
 0x10f   : > { %s2556_s7 = scalar_lea.hbm %s2729_s4, %s2337_s11  ;;  %s520_s23 = scalar_lea.vmem [#allocation11], %s2329_s30 }
 0x110   : > { %1553 = dma.hbm_to_vmem [thread:$0]  (!%p2803_p9), %s2530_s28, 16, %s494_s18, %s2804_s16  }
 0x111   : > { %s527_s9 = sshll.u32 %s520_s23, 4  ;;  %s1942_s24 = scalar_lea.hbm %s2556_s7, 16  ;;  %s528_s9 = int_to_ptr.vmem [resolvable:$true] %s527_s9 }
 0x112   : > { %p1943_p6 = scmp.ne.s32.totalorder %s2556_s7, %s1942_s24  ;;  %s1947_s28 = scalar_lea.hbm %s2729_s4, 32 }
 0x113   : > { %p1948_p10 = scmp.lt.u32.totalorder %s2556_s7, %s2729_s4  ;;  %p1949_p8 = scmp.lt.u32.totalorder %s1947_s28, %s1942_s24 }
 0x114   : > { %p1945_p5 = pnand %p1943_p6, %p2799_p13  ;;  %p1951_p11 = scmp.lt.u32.totalorder %s1942_s24, %s2556_s7 }
 0x115   : > { %p1950_p0 = por %p1949_p8, %p1948_p10 }
 0x116   : > { %p1946_p2 = pneg %p1945_p5 }
 0x117   : > { %p1952_p3 = por %p1951_p11, %p1950_p0 }
 0x119   : > { %p1953_p7 = pnand %p1952_p3, %p1946_p2 }
 0x11b   : > { %1956 = shalt.err (!%p1953_p7)
}
 0x11c   : > { %s1957_s26 = scalar_lea.vmem %s528_s9, 16  ;;  %s2119_s20 = smov [#allocation11]  }
 0x11d   : > { %p1958_p4 = scmp.ne.s32.totalorder %s528_s9, %s1957_s26  ;;  %s1962_s16 = sshll.u32 %s2119_s20, 4  ;;  %s1963_s16 = int_to_ptr.vmem [resolvable:$false] %s1962_s16 }
 0x11e   : > { %s1964_s17 = scalar_lea.vmem %s1963_s16, 32  ;;  %p1965_p6 = scmp.lt.s32.totalorder %s528_s9, %s1963_s16 }
 0x11f   : > { %p1960_p12 = pnand %p1958_p4, %p2799_p13  ;;  %p1966_p5 = scmp.lt.s32.totalorder %s1964_s17, %s1957_s26 }
 0x121   : > { %p1961_p1 = pneg %p1960_p12  ;;  %p1967_p9 = por %p1966_p5, %p1965_p6 }
 0x123   : > { %p1968_p8 = pnand %p1967_p9, %p1961_p1 }
 0x125   : > { %1971 = shalt.err (!%p1968_p8)
}
 0x126   : > { %p2805_p10 = scmp.ne.s32.totalorder %s2785_s14, 0  ;;  %s2806_s22 = scalar_lea.sflag [#allocation10], %s2332_s15 }
 0x127   : > { %s2582_s13 = scalar_lea.hbm %s2731_s6, %s2337_s11  ;;  %s554_s25 = scalar_lea.vmem [#allocation14], %s2329_s30 }
 0x128   : > { %1559 = dma.hbm_to_vmem [thread:$0]  (!%p2805_p10), %s2556_s7, 16, %s528_s9, %s2806_s22  }
 0x129   : > { %s561_s28 = sshll.u32 %s554_s25, 4  ;;  %s1972_s18 = scalar_lea.hbm %s2582_s13, 16  ;;  %s562_s28 = int_to_ptr.vmem [resolvable:$true] %s561_s28 }
 0x12a   : > { %p1973_p9 = scmp.ne.s32.totalorder %s2582_s13, %s1972_s18  ;;  %s1977_s7 = scalar_lea.hbm %s2731_s6, 32 }
 0x12b   : > { %p1978_p11 = scmp.lt.u32.totalorder %s2582_s13, %s2731_s6  ;;  %p1979_p3 = scmp.lt.u32.totalorder %s1977_s7, %s1972_s18 }
 0x12c   : > { %p1975_p2 = pnand %p1973_p9, %p2799_p13  ;;  %p1981_p4 = scmp.lt.u32.totalorder %s1972_s18, %s2582_s13 }
 0x12d   : > { %p1980_p7 = por %p1979_p3, %p1978_p11 }
 0x12e   : > { %p1976_p0 = pneg %p1975_p2 }
 0x12f   : > { %p1982_p12 = por %p1981_p4, %p1980_p7 }
 0x131   : > { %p1983_p1 = pnand %p1982_p12, %p1976_p0 }
 0x133   : > { %1986 = shalt.err (!%p1983_p1)
}
 0x134   : > { %s1987_s30 = scalar_lea.vmem %s562_s28, 16  ;;  %s2120_s11 = smov [#allocation14]  }
 0x135   : > { %p1988_p6 = scmp.ne.s32.totalorder %s562_s28, %s1987_s30  ;;  %s1992_s16 = sshll.u32 %s2120_s11, 4  ;;  %s1993_s16 = int_to_ptr.vmem [resolvable:$false] %s1992_s16 }
 0x136   : > { %s1994_s17 = scalar_lea.vmem %s1993_s16, 32  ;;  %p1995_p9 = scmp.lt.s32.totalorder %s562_s28, %s1993_s16 }
 0x137   : > { %p1990_p5 = pnand %p1988_p6, %p2799_p13  ;;  %p1996_p2 = scmp.lt.s32.totalorder %s1994_s17, %s1987_s30 }
 0x139   : > { %p1991_p8 = pneg %p1990_p5  ;;  %p1997_p10 = por %p1996_p2, %p1995_p9 }
 0x13b   : > { %p1998_p3 = pnand %p1997_p10, %p1991_p8 }
 0x13d   : > { %2001 = shalt.err (!%p1998_p3)
}
 0x13e   : > { %p2807_p11 = scmp.ne.s32.totalorder %s2785_s14, 0  ;;  %s2808_s22 = scalar_lea.sflag [#allocation13], %s2332_s15 }
 0x13f   : > { %p2809_p0 = scmp.ne.s32.totalorder %s2783_s29, 0 }
 0x140   : > { %1565 = dma.hbm_to_vmem [thread:$0]  (!%p2807_p11), %s2582_s13, 16, %s562_s28, %s2808_s22  }
 0x141   : > { %570 = sbr.rel (%p2809_p0) target bundleno = 1166 (0x48e), region = 64  ;;  %s2810_s12 = sld [smem:[#allocation30_spill]] (!%p2809_p0) }
 0x142   : > { %s2811_s23 = sld [smem:[#allocation34_spill]] (!%p2809_p0) }
 0x147   : > { %s2607_s24 = sand.u32 (!%p2809_p0), 1, %s2810_s12  }
 0x148   : > { %s1432_s25 = sshll.u32 %s2607_s24, 4  ;;  %s573_s18 = scalar_lea.sflag [#allocation4], %s2607_s24 }
 0x149   : > { %s576_s1 = scalar_lea.vmem [#allocation3], %s1432_s25  ;;  %p2812_p13 = scmp.ne.s32.totalorder %s2811_s23, 0 }
 0x14b   : > { %2055 = dma.done.wait (%p2812_p13), %s573_s18, 256  }
 0x14c   : > { %2057 = vsyncadd (%p2812_p13), %s573_s18, 4294967040  ;;  %s2813_s14 = sld [smem:[#allocation33_spill]]  ;;  %s584_s13 = scalar_lea.vmem [#allocation6], %s2607_s24 }
 0x152   : > { %s581_s29 = sand.u32 1, %s2813_s14  }
 0x153   : > { %s582_s15 = scalar_lea.sflag [#allocation7], %s581_s29 }
 0x154   : > { %2059 = dma.done.wait (%p2812_p13), %s582_s15, 32  }
 0x155   : > { %2061 = vsyncadd (%p2812_p13), %s582_s15, 4294967264  ;;  %s592_s28 = scalar_lea.vmem [#allocation8], %s2607_s24  ;;  %s598_s26 = scalar_lea.sflag [#allocation10], %s581_s29 }
 0x156   : > { %s600_s7 = scalar_lea.vmem [#allocation9], %s2607_s24 }
 0x157   : > { %2063 = dma.done.wait (%p2812_p13), %s598_s26, 32  }
 0x158   : > { %2065 = vsyncadd (%p2812_p13), %s598_s26, 4294967264  ;;  %s614_s9 = scalar_lea.sflag [#allocation13], %s581_s29 }
 0x159   : > { %2067 = dma.done.wait (%p2812_p13), %s614_s9, 32  }
 0x15a   : > { %2069 = vsyncadd (%p2812_p13), %s614_s9, 4294967264  ;;  %p2814_p10 = scmp.eq.s32.totalorder %s2813_s14, 0 }
 0x15c   : > { %2071 = dma.done.wait (%p2814_p10), [#allocation16], 1056   ;;  %p2815_p7 = pmov %p2814_p10 }
 0x15e   : > { %2073 = vsyncadd (%p2815_p7), [#allocation16], 4294966240  ;;  %p2816_p4 = pmov %p2815_p7 }
 0x160   : > { %2075 = dma.done.wait (%p2816_p4), [#allocation19], 2064   ;;  %p2817_p12 = pmov %p2816_p4 }
 0x161   : > { %vm713_vm0 = vcmask 523264   ;;  %v2641_v0 = vld [vmem:[%s576_s1] sm:$0xff]  ;;  %v2643_v1 = vld [vmem:[%s576_s1 + $0x8] sm:$0xff]  ;;  %v2121_v22 = vmov 0   ;;  %v808_v57 = vlaneseq  ;;  %s2818_s20 = sld [smem:[#allocation31_spill]]  ;;  %s2819_s30 = sld [smem:[#allocation35_spill]] }
 0x162   : > { %2077 = vsyncadd (%p2817_p12), [#allocation19], 4294965232  ;;  %v719_v2 = vsel %vm713_vm0, %v2641_v0, 0.0  ;;  %v722_v3 = vsel %vm713_vm0, %v2643_v1, 0.0  ;;  %v1640_v14 = vld [vmem:[#allocation15 + $0x4] ss:$8 sps:$4 sm:$0xff]   ;;  %893 = vmatprep.mubr.bf16.mxu0 %v2121_v22 }
 0x163   : > { %720 = vadd.xlane.f32.xlu0 %v719_v2  ;;  %v1642_v15 = vld [vmem:[#allocation15] ss:$8 sps:$4 sm:$0xff]   ;;  %861 = vmatprep.subr.bf16.mxu0 %v1640_v14  ;;  %v1643_v16 = vld [vmem:[#allocation15 + $0x14] ss:$8 sps:$4 sm:$0xff]   ;;  %v1645_v17 = vld [vmem:[#allocation15 + $0x10] ss:$8 sps:$4 sm:$0xff]  }
 0x164   : > { %862 = vmatpush1.bf16.msra.mxu0 %v1642_v15  ;;  %v1646_v18 = vld [vmem:[#allocation15 + $0x24] ss:$8 sps:$4 sm:$0xff]   ;;  %v1648_v19 = vld [vmem:[#allocation15 + $0x20] ss:$8 sps:$4 sm:$0xff]   ;;  %v1649_v20 = vld [vmem:[#allocation15 + $0x34] ss:$8 sps:$4 sm:$0xff]  }
 0x165   : > { %863 = vmatprep.subr.bf16.mxu0 %v1643_v16  ;;  %v1651_v21 = vld [vmem:[#allocation15 + $0x30] ss:$8 sps:$4 sm:$0xff]   ;;  %v1439_v29 = vld [vmem:[%s584_s13] ss:$0 sm:$0xff]  ;;  %v809_v58 = vshrl.u32 %v808_v57, 7  ;;  %s702_s16 = scalar_lea.vmem [#allocation21], %s1432_s25 }
 0x166   : > { %v791_v32 = vadd.f32 1.0, %v1439_v29  ;;  %v1441_v36 = vld [vmem:[%s592_s28] ss:$0 sm:$0xff]  ;;  %v1654_v43 = vld [vmem:[#allocation18 + $0x48] sm:$0xff]   ;;  %v1656_v45 = vld [vmem:[#allocation18 + $0x50] sm:$0xff]   ;;  %s1169_s17 = sshll.u32 %s702_s16, 4  ;;  %s2673_s17 = int_to_ptr.vmem [resolvable:$true] %s1169_s17 }
 0x167   : > { %723 = vadd.xlane.f32.xlu0 %v722_v3  ;;  %v1652_v41 = vld [vmem:[#allocation18 + $0x40] sm:$0xff]   ;;  %v1655_v44 = vld [vmem:[#allocation18 + $0x8] sm:$0xff]   ;;  %v1657_v46 = vld [vmem:[#allocation18 + $0x10] sm:$0xff]   ;;  %v810_v59 = vsub.s32 0, %v809_v58  ;;  %v814_v61 = vsub.s32 1, %v809_v58  ;;  %s1476_s11 = sshll.u32 %s2818_s20, 8 }
 0x168   : > { %864 = vmatpush1.bf16.msra.mxu0 %v1645_v17  ;;  %v1653_v42 = vld [vmem:[#allocation18] sm:$0xff]   ;;  %1477 = vmatprep.subr.bf16.mxu1 %v1652_v41  ;;  %v1658_v47 = vld [vmem:[#allocation18 + $0x58] sm:$0xff]   ;;  %v1662_v51 = vld [vmem:[#allocation18 + $0x68] sm:$0xff]   ;;  %s2820_s23 = sld [smem:[#allocation41_spill]]  ;;  %s1154_s25 = scalar_lea.sflag [#allocation5], %s2607_s24 }
 0x169   : > { %865 = vmatprep.subr.bf16.mxu0 %v1646_v18  ;;  %1478 = vmatpush3.bf16.msra.mxu1 %v1653_v42  ;;  %v1659_v48 = vld [vmem:[#allocation18 + $0x18] sm:$0xff]   ;;  %v1660_v49 = vld [vmem:[#allocation18 + $0x60] sm:$0xff]   ;;  %v1663_v52 = vld [vmem:[#allocation18 + $0x28] sm:$0xff]   ;;  %s2002_s1 = scalar_lea.vmem %s2673_s17, 256  ;;  %p2821_p6 = scmp.ne.s32.totalorder %s2819_s30, 0 }
 0x16a   : > { %1479 = vmatprep.subr.bf16.mxu1 %v1654_v43  ;;  %v1661_v50 = vld [vmem:[#allocation18 + $0x20] sm:$0xff]   ;;  %v1664_v53 = vld [vmem:[#allocation18 + $0x70] sm:$0xff]   ;;  %v1666_v55 = vld [vmem:[#allocation18 + $0x78] sm:$0xff]   ;;  %p2003_p1 = scmp.ne.s32.totalorder %s2673_s17, %s2002_s1  ;;  %s2123_s14 = smov [#allocation21]  }
 0x16b   : > { %v1665_v54 = vld [vmem:[#allocation18 + $0x30] sm:$0xff]   ;;  %v1667_v56 = vld [vmem:[#allocation18 + $0x38] sm:$0xff]   ;;  %s2006_s29 = sshll.u32 %s2123_s14, 4  ;;  %s2007_s29 = int_to_ptr.vmem [resolvable:$false] %s2006_s29 }
 0x16c   : > { %866 = vmatpush1.bf16.msra.mxu0 %v1648_v19  ;;  %v806_v60 = vld [vmem:[#allocation17] sm:$0x3]  ;;  %p2004_p5 = pnand %p2003_p1, %p2821_p6  ;;  %s2008_s15 = scalar_lea.vmem %s2007_s29, 512 }
 0x16d   : > { %867 = vmatprep.subr.bf16.mxu0 %v1649_v20  ;;  %1480 = vmatpush3.bf16.msra.mxu1 %v1655_v44  ;;  %v811_v62 = vrot.slane %v806_v60, %v810_v59  ;;  %v815_v63 = vrot.slane %v806_v60, %v814_v61  ;;  %v1467_v59 = vld [vmem:[#allocation20] ss:$0 sm:$0xff]  ;;  %v1469_v61 = vld [vmem:[%s600_s7] ss:$0 sm:$0xff]  ;;  %p2009_p9 = scmp.lt.s32.totalorder %s2673_s17, %s2007_s29  ;;  %p2010_p2 = scmp.lt.s32.totalorder %s2008_s15, %s2002_s1 }
 0x16e   : > { %1481 = vmatprep.subr.bf16.mxu1 %v1656_v45  ;;  %s2671_s18 = scalar_lea.hbm %s2820_s23, %s1476_s11  ;;  %p2005_p8 = pneg %p2004_p5 }
 0x16f   : > { %p2011_p3 = por %p2010_p2, %p2009_p9 }
 0x170   : > { %868 = vmatpush1.bf16.msra.mxu0 %v1651_v21 }
 0x171   : > { %1482 = vmatpush3.bf16.msra.mxu1 %v1657_v46  ;;  %p2012_p11 = pnand %p2011_p3, %p2005_p8 }
 0x172   : > { %1483 = vmatprep.subr.bf16.mxu1 %v1658_v47 }
 0x175   : > { %1484 = vmatpush3.bf16.msra.mxu1 %v1659_v48  ;;  %v2122_v48 = vmov 0.0  }
 0x176   : > { %1485 = vmatprep.subr.bf16.mxu1 %v1660_v49  ;;  %714 = vst.msk [vmem:[#allocation2] sm:$0xff] %vm713_vm0, %v2122_v48  ;;  %715 = vst.msk [vmem:[#allocation2 + $0x8] sm:$0xff] %vm713_vm0, %v2122_v48 }
 0x179   : > { %1486 = vmatpush3.bf16.msra.mxu1 %v1661_v50 }
 0x17a   : > { %1487 = vmatprep.subr.bf16.mxu1 %v1662_v51 }
 0x17d   : > { %1488 = vmatpush3.bf16.msra.mxu1 %v1663_v52  ;;  %v940_v50 = vld [vmem:[#allocation2] sm:$0xff] }
 0x17e   : > { %1489 = vmatprep.subr.bf16.mxu1 %v1664_v53 }
 0x181   : > { %1490 = vmatpush3.bf16.msra.mxu1 %v1665_v54  ;;  %v941_v54 = vld [vmem:[#allocation2 + $0x8] sm:$0xff] }
 0x182   : > { %1491 = vmatprep.subr.bf16.mxu1 %v1666_v55 }
 0x185   : > { %1492 = vmatpush3.bf16.msra.mxu1 %v1667_v56 }
 0x1f0   : > { %v721_v4 = vpop.xlane.xlu0 %720 }
 0x1f1   : > { %v726_v5 = vmul.f32 0.015625, %v721_v4 }
 0x1f3   : > { %v728_v6 = vsub.f32 %v2641_v0, %v726_v5 }
 0x1f4   : > { %v724_v7 = vpop.xlane.xlu0 %723 }
 0x1f5   : > { %v727_v8 = vmul.f32 0.015625, %v724_v7  ;;  %v730_v9 = vmul.f32 %v728_v6, %v728_v6 }
 0x1f7   : > { %v729_v10 = vsub.f32 %v2643_v1, %v727_v8  ;;  %v732_v11 = vsel %vm713_vm0, %v730_v9, 0.0 }
 0x1f8   : > { %733 = vadd.xlane.f32.xlu1 %v732_v11 }
 0x1f9   : > { %v731_v12 = vmul.f32 %v729_v10, %v729_v10 }
 0x1fb   : > { %v735_v13 = vsel %vm713_vm0, %v731_v12, 0.0 }
 0x1fc   : > { %736 = vadd.xlane.f32.xlu1 %v735_v13 }
 0x285   : > { %v734_v23 = vpop.xlane.xlu1 %733 }
 0x286   : > { %v738_v24 = vmul.f32 0.015625, %v734_v23 }
 0x288   : > { %v740_v25 = vadd.f32 1e-06, %v738_v24 }
 0x289   : > { %v737_v26 = vpop.xlane.xlu1 %736 }
 0x28a   : > { %1668 = vrsqrt.f32 %v740_v25  ;;  %v739_v27 = vmul.f32 0.015625, %v737_v26 }
 0x28c   : > { %v741_v28 = vadd.f32 1e-06, %v739_v27 }
 0x28e   : > { %1670 = vrsqrt.f32 %v741_v28 }
 0x294   : > { %v1669_v30 = vpop.eup %1668 }
 0x295   : > { %v744_v31 = vmul.f32 %v1669_v30, %v728_v6 }
 0x297   : > { %v793_v35 = vmul.f32 %v791_v32, %v744_v31 }
 0x298   : > { %v1671_v33 = vpop.eup %1670 }
 0x299   : > { %v745_v34 = vmul.f32 %v1671_v33, %v729_v10  ;;  %v795_v38 = vadd.f32 %v1441_v36, %v793_v35 }
 0x29b   : > { %v794_v37 = vmul.f32 %v791_v32, %v745_v34 }
 0x29d   : > { %v796_v39 = vadd.f32 %v1441_v36, %v794_v37 }
 0x29f   : > { %v797_v40 = vpack.c.bf16 %v796_v39, %v795_v38 }
 0x2a1   : > { %1450 = vmatmul.mubr.msk.bf16.vlgmr.msra.gmra.mrb[0].mxu0 %vm713_vm0, %v797_v40 }
 0x374   : > { %v895_v2 = vpop.f32.mrb[0].mxu0 }
 0x375   : > { %v896_v3 = vadd.f32 %v895_v2, %v811_v62  ;;  %v897_v4 = vpop.f32.mrb[1].mxu0 }
 0x376   : > { %v898_v5 = vadd.f32 %v897_v4, %v815_v63  ;;  %v899_v6 = vpop.f32.mrb[2].mxu0 }
 0x377   : > { %v908_v7 = vmul.f32 0.044715, %v896_v3  ;;  %v900_v8 = vadd.f32 %v899_v6, %v811_v62  ;;  %v901_v9 = vpop.f32.mrb[3].mxu0  ;;  %v904_v36 = vmul.f32 0.5, %v896_v3 }
 0x378   : > { %v909_v10 = vmul.f32 0.044715, %v898_v5  ;;  %v902_v11 = vadd.f32 %v901_v9, %v815_v63  ;;  %v905_v39 = vmul.f32 0.5, %v898_v5 }
 0x379   : > { %v912_v12 = vmul.f32 %v908_v7, %v896_v3  ;;  %v910_v13 = vmul.f32 0.044715, %v900_v8  ;;  %v906_v37 = vmul.f32 0.5, %v900_v8 }
 0x37a   : > { %v911_v14 = vmul.f32 0.044715, %v902_v11  ;;  %v913_v15 = vmul.f32 %v909_v10, %v898_v5  ;;  %v907_v40 = vmul.f32 0.5, %v902_v11 }
 0x37b   : > { %v916_v16 = vmul.f32 %v912_v12, %v896_v3  ;;  %v914_v17 = vmul.f32 %v910_v13, %v900_v8 }
 0x37c   : > { %v915_v18 = vmul.f32 %v911_v14, %v902_v11  ;;  %v917_v19 = vmul.f32 %v913_v15, %v898_v5 }
 0x37d   : > { %v918_v20 = vmul.f32 %v914_v17, %v900_v8  ;;  %v920_v21 = vadd.f32 %v916_v16, %v896_v3 }
 0x37e   : > { %v919_v22 = vmul.f32 %v915_v18, %v902_v11  ;;  %v921_v23 = vadd.f32 %v917_v19, %v898_v5 }
 0x37f   : > { %v922_v24 = vadd.f32 %v918_v20, %v900_v8  ;;  %v924_v25 = vmul.f32 0.7978846, %v920_v21 }
 0x380   : > { %v923_v26 = vadd.f32 %v919_v22, %v902_v11  ;;  %v925_v27 = vmul.f32 0.7978846, %v921_v23 }
 0x381   : > { %v926_v28 = vmul.f32 0.7978846, %v922_v24  ;;  %1672 = vtanh.f32 %v924_v25 }
 0x382   : > { %v927_v29 = vmul.f32 0.7978846, %v923_v26  ;;  %1674 = vtanh.f32 %v925_v27 }
 0x383   : > { %1676 = vtanh.f32 %v926_v28 }
 0x384   : > { %1678 = vtanh.f32 %v927_v29 }
 0x38b   : > { %v1673_v30 = vpop.eup %1672 }
 0x38c   : > { %v1675_v31 = vpop.eup %1674  ;;  %v932_v32 = vadd.f32 1.0, %v1673_v30 }
 0x38d   : > { %v1677_v33 = vpop.eup %1676  ;;  %v933_v34 = vadd.f32 1.0, %v1675_v31 }
 0x38e   : > { %v1679_v35 = vpop.eup %1678  ;;  %v934_v38 = vadd.f32 1.0, %v1677_v33  ;;  %v936_v42 = vmul.f32 %v932_v32, %v904_v36 }
 0x38f   : > { %v935_v41 = vadd.f32 1.0, %v1679_v35  ;;  %v937_v44 = vmul.f32 %v933_v34, %v905_v39 }
 0x390   : > { %v938_v43 = vmul.f32 %v934_v38, %v906_v37 }
 0x391   : > { %v939_v45 = vmul.f32 %v935_v41, %v907_v40 }
 0x392   : > { %v942_v46 = vpack.c.bf16 %v938_v43, %v936_v42 }
 0x393   : > { %v943_v47 = vpack.c.bf16 %v939_v45, %v937_v44 }
 0x395   : > { %1104 = vmatprep.mubr.bf16.mxu1 %v943_v47 }
 0x396   : > { %1105 = vmatmul.mubr.bf16.vlgmr.msra.gmra.mrb[0].mxu1 %v942_v46 }
 0x469   : > { %v1493_v49 = vpop.f32.mrb[0].mxu1 }
 0x46a   : > { %v1494_v51 = vpop.f32.mrb[1].mxu1 }
 0x46b   : > { %v1495_v52 = vadd.f32 %v1494_v51, %v1493_v49  ;;  %v1496_v53 = vpop.f32.mrb[2].mxu1 }
 0x46c   : > { %v1497_v55 = vpop.f32.mrb[3].mxu1 }
 0x46d   : > { %v1113_v56 = vadd.f32 %v1495_v52, %v940_v50  ;;  %v1498_v57 = vadd.f32 %v1497_v55, %v1496_v53 }
 0x46f   : > { %1115 = vst.msk [vmem:[#allocation2] sm:$0xff] %vm713_vm0, %v1113_v56  ;;  %v1114_v58 = vadd.f32 %v1498_v57, %v941_v54 }
 0x471   : > { %1116 = vst.msk [vmem:[#allocation2 + $0x8] sm:$0xff] %vm713_vm0, %v1114_v58 }
 0x476   : > { %v1120_v60 = vld [vmem:[#allocation2] sm:$0xff] }
 0x477   : > { %v1129_v62 = vadd.f32 %v1467_v59, %v1120_v60 }
 0x478   : > { %v1121_v63 = vld [vmem:[#allocation2 + $0x8] sm:$0xff] }
 0x479   : > { %v1130_v2 = vadd.f32 %v1467_v59, %v1121_v63  ;;  %v1147_v3 = vmul.f32 %v1469_v61, %v1129_v62 }
 0x47b   : > { %v1148_v4 = vmul.f32 %v1469_v61, %v1130_v2  ;;  %v1149_v5 = vadd.f32 %v1147_v3, %v2641_v0 }
 0x47d   : > { %v1150_v6 = vadd.f32 %v1148_v4, %v2643_v1  ;;  %1151 = vst.msk [vmem:[%s702_s16] sm:$0xff] %vm713_vm0, %v1149_v5 }
 0x47f   : > { %1152 = vst.msk [vmem:[%s702_s16 + $0x8] sm:$0xff] %vm713_vm0, %v1150_v6 }
 0x480   : > { %2015 = shalt.err (!%p2012_p11)
}
 0x481   : > { %s2016_s13 = scalar_lea.hbm %s2671_s18, 256  ;;  %s2020_s7 = scalar_lea.hbm %s2820_s23, 512 }
 0x482   : > { %p2017_p0 = scmp.ne.s32.totalorder %s2671_s18, %s2016_s13  ;;  %p2021_p7 = scmp.lt.u32.totalorder %s2671_s18, %s2820_s23 }
 0x483   : > { %p2022_p4 = scmp.lt.u32.totalorder %s2020_s7, %s2016_s13  ;;  %p2024_p1 = scmp.lt.u32.totalorder %s2016_s13, %s2671_s18 }
 0x484   : > { %p2018_p13 = pnand %p2017_p0, %p2821_p6 }
 0x485   : > { %p2023_p12 = por %p2022_p4, %p2021_p7 }
 0x486   : > { %p2019_p10 = pneg %p2018_p13 }
 0x487   : > { %p2025_p5 = por %p2024_p1, %p2023_p12 }
 0x489   : > { %p2026_p8 = pnand %p2025_p5, %p2019_p10 }
 0x48b   : > { %2029 = shalt.err (!%p2026_p8)
}
 0x48c   : > { %s2124_s11 = smov 128   ;;  %s2125_s16 = smov 8  }
 0x48d   : > { %1529 = dma.vmem_to_hbm [thread:$0]  (%p2821_p6), %s2673_s17, 256, %s2671_s18, %s1154_s25, %s2124_s11, %s2124_s11, %s2125_s16  }
 0x48e PF: > { %s2822_s22 = sld [smem:[#allocation29_spill]]  ;;  %s2823_s12 = sld [smem:[#allocation36_spill]] }
 0x48f   : > { %s2824_s1 = sld [smem:[#allocation32_spill]] }
 0x494   : > { %s1184_s14 = sand.u32 1, %s2822_s22   ;;  %p2825_p9 = scmp.ne.s32.totalorder %s2823_s12, 0 }
 0x495   : > { %p2826_p2 = scmp.ge.s32.totalorder %s2824_s1, 2  ;;  %s1185_s29 = scalar_lea.sflag [#allocation5], %s1184_s14 }
 0x497   : > { %p1567_p3 = pnand %p2826_p2, %p2825_p9 }
 0x499   : > { %2079 = dma.done.wait (!%p1567_p3), %s1185_s29, 256  }
 0x49a   : > { %2081 = vsyncadd (!%p1567_p3), %s1185_s29, 4294967040  ;;  %s38_s22 = sadd.s32 1, %s2824_s1   ;;  %s2827_s17 = sld [smem:[#allocation30_spill]] }
 0x49b   : > { %p35_p11 = scmp.ge.s32.totalorder %s38_s22, 4   ;;  %s2828_s24 = sld [smem:[#allocation37_spill]] }
 0x49c   : > { %s2829_s18 = smov %s2092_s19  ;;  %s2830_s19 = smov %s2389_s27 }
 0x49d   : > { %s2831_s20 = smov %s2100_s21  ;;  %37 = sbr.rel (!%p35_p11) target bundleno = 19 (0x13), region = 208 }
 0x4a1   : > { %s2832_s21 = smov %s2828_s24 }
 0x4a4   :  { %1190 = vsyncpa [#allocation4], 1 }
 0x4a5   :  { %1192 = vsyncpa [#allocation4 + $0x1], 1 }
 0x4a6   :  { %1193 = vsyncpa [#allocation7], 1 }
 0x4a7   :  { %1195 = vsyncpa [#allocation7 + $0x1], 1 }
 0x4a8   :  { %1196 = vsyncpa [#allocation10], 1 }
 0x4a9   :  { %1198 = vsyncpa [#allocation10 + $0x1], 1 }
 0x4aa   :  { %1199 = vsyncpa [#allocation13], 1 }
 0x4ab   :  { %1201 = vsyncpa [#allocation13 + $0x1], 1 }
 0x4ac   :  { %1202 = vsyncpa [#allocation16], 1 }
 0x4ad   :  { %1203 = vsyncpa [#allocation19], 1 }
 0x4ae   :  { %1204 = vsyncpa [#allocation5], 1 }
 0x4af   :  { %1206 = vsyncpa [#allocation5 + $0x1], 1 }

// kernel: transformer_block_forward.22
= control target key start
LH: loop header
LB: loop body
LE: loop exit
PB: predicated region body
PF: predicated region fallthrough
CT: control target
= control target key end

     0   :  { %s1707_s0 = inlined_call_operand.hbm [shape: bf16[2,32,64], index: 0, kind: input, shape index: {}]   ;;  %s1708_s1 = inlined_call_operand.hbm [shape: f32[2,32,64], index: 1, kind: input, shape index: {}]   ;;  %s1709_s2 = inlined_call_operand.hbm [shape: f32[2,1,64], index: 2, kind: input, shape index: {}]   ;;  %s1710_s3 = inlined_call_operand.hbm [shape: f32[2,1,64], index: 3, kind: input, shape index: {}]   ;;  %s1711_s4 = inlined_call_operand.hbm [shape: bf16[64,64], index: 4, kind: input, shape index: {}]   ;;  %s1712_s5 = inlined_call_operand.hbm [shape: f32[1,64], index: 5, kind: input, shape index: {}]   ;;  %s1713_s6 = inlined_call_operand.hbm [shape: f32[2,32,64], index: 6, kind: output, shape index: {}]  }
   0x1   :  { %1734 = sst [smem:[#allocation25_spill]] %s1708_s1 }
   0x2   :  { %1735 = sst [smem:[#allocation26_spill]] %s1711_s4 }
   0x3   :  { %1736 = sst [smem:[#allocation27_spill]] %s1713_s6 }
   0x4   :  { %11 = vsyncpa [#allocation3], 0 }
   0x5   :  { %13 = vsyncpa [#allocation3 + $0x1], 0 }
   0x6   :  { %14 = vsyncpa [#allocation6], 0 }
   0x7   :  { %16 = vsyncpa [#allocation6 + $0x1], 0 }
   0x8   :  { %17 = vsyncpa [#allocation9], 0 }
   0x9   :  { %19 = vsyncpa [#allocation9 + $0x1], 0 }
   0xa   :  { %20 = vsyncpa [#allocation12], 0 }
   0xb   :  { %21 = vsyncpa [#allocation4], 0 }
   0xc   :  { %23 = vsyncpa [#allocation4 + $0x1], 0  ;;  %s1314_s21 = smov 0   ;;  %s1316_s22 = smov 0  }
   0xd   :  { %s1318_s23 = smov 0   ;;  %s1320_s24 = smov 0  }
   0xe   :  { %s1322_s25 = smov 0   ;;  %s1324_s26 = smov 0  }
   0xf LB: > { %1737 = sst [smem:[#allocation20_spill]] %s1244_s21  ;;  %s1345_s27 = sadd.s32 4294967295, %s1264_s26   ;;  %s1264_s26 = sphi %s1324_s26, %s29_s26   ;;  %s1260_s25 = sphi %s1322_s25, %s1784_s25   ;;  %s1256_s24 = sphi %s1320_s24, %s1783_s24   ;;  %s1252_s23 = sphi %s1318_s23, %s1782_s23   ;;  %s1248_s22 = sphi %s1316_s22, %s1781_s22   ;;  %s1244_s21 = sphi %s1314_s21, %s1780_s21  }
  0x10   : > { %s824_s28 = sadd.s32 4294967294, %s1264_s26   ;;  %p64_p0 = scmp.ne.s32.totalorder %s1252_s23, %s1248_s22 }
  0x11   : > { %p65_p1 = scmp.eq.s32.totalorder %s1264_s26, 0  ;;  %p70_p2 = scmp.ne.s32.totalorder %s1248_s22, %s1244_s21 }
  0x12   : > { %p1714_p3 = scmp.eq.s32.totalorder %s1345_s27, 0  ;;  %p236_p4 = scmp.eq.s32.totalorder %s1345_s27, 1 }
  0x13   : > { %p1356_p5 = por %p65_p1, %p64_p0  ;;  %p242_p6 = scmp.eq.s32.totalorder %s824_s28, 1 }
  0x14   : > { %p1362_p7 = por %p1714_p3, %p70_p2  ;;  %p1366_p8 = por %p236_p4, %p64_p0 }
  0x15   : > { %p1370_p9 = por %p242_p6, %p70_p2  ;;  %p825_p10 = scmp.ge.s32.totalorder %s1264_s26, 1 }
  0x16   : > { %s1739_s7 = scalar_select %p1362_p7, 1, 0 }
  0x17   : > { %s1740_s8 = scalar_select %p1366_p8, 1, 0 }
  0x18   : > { %s1742_s9 = scalar_select %p1370_p9, 1, 0 }
  0x19   : > { %1741 = sst [smem:[#allocation21_spill]] %s1740_s8  ;;  %p249_p11 = scmp.lt.s32.totalorder %s1264_s26, 3 }
  0x1a   : > { %1743 = sst [smem:[#allocation22_spill]] %s1742_s9  ;;  %s1266_s11 = smov [#allocation10]  }
  0x1b   : > { %p1376_p12 = pnand %p825_p10, %p249_p11  ;;  %s263_s12 = sshll.u32 %s1266_s11, 4  ;;  %s1380_s12 = int_to_ptr.vmem [resolvable:$true] %s263_s12 }
  0x1c   : > { %s48_s14 = sadd.s32 1, %s1260_s25  ;;  %s1394_s15 = sand.u32 1, %s1252_s23  }
  0x1d   : > { %s1744_s10 = scalar_select %p1376_p12, 1, 0 }
  0x1e   : > { %p898_p13 = pneg %p1376_p12  ;;  %p1396_p4 = scmp.ge.s32.totalorder %s48_s14, 2 }
  0x1f   : > { %s1747_s4 = sld [smem:[#allocation26_spill]] }
  0x20   : > { %p1388_p2 = pnand %p898_p13, %p1714_p3 }
  0x22   : > { %s1745_s13 = scalar_select %p1388_p2, 1, 0 }
  0x23   : > { %p1725_p10 = pneg %p1388_p2 }
  0x25   : > { %s990_s19 = scalar_lea.hbm %s1747_s4, 512 }
  0x26   : > { %p991_p6 = scmp.ne.s32.totalorder %s1747_s4, %s990_s19  ;;  %p997_p0 = scmp.lt.u32.totalorder %s990_s19, %s1747_s4 }
  0x28   : > { %p993_p11 = pnand %p1725_p10, %p991_p6 }
  0x2a   : > { %p994_p13 = pneg %p993_p11 }
  0x2c   : > { %p999_p3 = pnand %p997_p0, %p994_p13 }
  0x2e   : > { %1002 = shalt.err (!%p999_p3)
}
  0x2f   : > { %s1003_s17 = scalar_lea.vmem %s1380_s12, 512  ;;  %p1011_p7 = scmp.lt.s32.totalorder %s1380_s12, %s1380_s12 }
  0x30   : > { %p1004_p1 = scmp.ne.s32.totalorder %s1380_s12, %s1003_s17  ;;  %p1012_p6 = scmp.lt.s32.totalorder %s1003_s17, %s1003_s17 }
  0x32   : > { %p1006_p9 = pnand %p1004_p1, %p1725_p10  ;;  %p1013_p11 = por %p1012_p6, %p1011_p7 }
  0x34   : > { %p1007_p8 = pneg %p1006_p9 }
  0x36   : > { %p1014_p12 = pnand %p1013_p11, %p1007_p8 }
  0x38   : > { %1017 = shalt.err (!%p1014_p12)
}
  0x39   : > { %s1723_s29 = smov 64   ;;  %s1728_s18 = smov 4  }
  0x3a   : > { %901 = dma.hbm_to_vmem [thread:$0]  (!%p1388_p2), %s1747_s4, 512, %s1380_s12, [#allocation9], %s1723_s29, %s1723_s29, %s1728_s18  }
  0x3b   : > { %s1786_s14 = smov (%p1396_p4, %s48_s14), 0  ;;  %p1749_p3 = scmp.lt.s32.totalorder %s1264_s26, 2 }
  0x3c   : > { %1748 = sst [smem:[#allocation23_spill]] %s1786_s14  ;;  %s1724_s11 = sand.u32 1, %s1264_s26  }
  0x3d   : > { %p1438_p7 = pnand %p1749_p3, %p1356_p5  ;;  %s52_s17 = ssub.s32 %s1260_s25, %s1786_s14 }
  0x3e   : > { %p55_p8 = scmp.eq.s32.totalorder %s52_s17, 0  ;;  %s832_s9 = sshll.u32 %s1394_s15, 5 }
  0x3f   : > { %s1750_s28 = scalar_select %p1438_p7, 1, 0 }
  0x40   : > { %s860_s21 = sshll.u32 %s1260_s25, 9  ;;  %s1751_s6 = sadd.s32 1, %s1252_s23 }
  0x41   : > { %s1450_s8 = scalar_select %p55_p8, %s1252_s23, %s1751_s6  }
  0x42   : > { %s1753_s1 = sld [smem:[#allocation25_spill]]  ;;  %s317_s30 = scalar_lea.vmem [#allocation5], %s832_s9 }
  0x43   : > { %1752 = sst [smem:[#allocation24_spill]] %s1450_s8  ;;  %s327_s20 = sshll.u32 %s317_s30, 4  ;;  %s1457_s20 = int_to_ptr.vmem [resolvable:$true] %s327_s20 }
  0x44   : > { %s1461_s17 = scalar_lea.sflag [#allocation6], %s1724_s11  ;;  %p1467_p9 = pneg %p1438_p7 }
  0x46   : > { %s1754_s6 = scalar_select %p1467_p9, 1, 0 }
  0x48   : > { %s1455_s19 = scalar_lea.hbm %s1753_s1, %s860_s21  ;;  %s1023_s9 = scalar_lea.hbm %s1753_s1, 1024 }
  0x49   : > { %s1018_s29 = scalar_lea.hbm %s1455_s19, 512  ;;  %p1024_p1 = scmp.lt.u32.totalorder %s1455_s19, %s1753_s1 }
  0x4a   : > { %p1019_p5 = scmp.ne.s32.totalorder %s1455_s19, %s1018_s29  ;;  %p1025_p4 = scmp.lt.u32.totalorder %s1023_s9, %s1018_s29 }
  0x4b   : > { %p1027_p6 = scmp.lt.u32.totalorder %s1018_s29, %s1455_s19 }
  0x4c   : > { %p1021_p12 = pnand %p1467_p9, %p1019_p5  ;;  %p1026_p13 = por %p1025_p4, %p1024_p1 }
  0x4e   : > { %p1022_p0 = pneg %p1021_p12  ;;  %p1028_p11 = por %p1027_p6, %p1026_p13 }
  0x50   : > { %p1029_p3 = pnand %p1028_p11, %p1022_p0 }
  0x52   : > { %1032 = shalt.err (!%p1029_p3)
}
  0x53   : > { %s1033_s11 = scalar_lea.vmem %s1457_s20, 512  ;;  %s1269_s21 = smov [#allocation5]  }
  0x54   : > { %p1034_p8 = scmp.ne.s32.totalorder %s1457_s20, %s1033_s11  ;;  %s1038_s12 = sshll.u32 %s1269_s21, 4  ;;  %s1039_s12 = int_to_ptr.vmem [resolvable:$false] %s1038_s12 }
  0x55   : > { %s1040_s16 = scalar_lea.vmem %s1039_s12, 1024  ;;  %p1041_p10 = scmp.lt.s32.totalorder %s1457_s20, %s1039_s12 }
  0x56   : > { %p1036_p5 = pnand %p1034_p8, %p1467_p9  ;;  %p1042_p2 = scmp.lt.s32.totalorder %s1040_s16, %s1033_s11 }
  0x58   : > { %p1037_p12 = pneg %p1036_p5  ;;  %p1043_p1 = por %p1042_p2, %p1041_p10 }
  0x5a   : > { %p1044_p4 = pnand %p1043_p1, %p1037_p12 }
  0x5c   : > { %1047 = shalt.err (!%p1044_p4)
}
  0x5d   : > { %s1270_s29 = smov 128   ;;  %s1271_s9 = smov 8  }
  0x5e   : > { %911 = dma.hbm_to_vmem [thread:$0]  (!%p1438_p7), %s1455_s19, 512, %s1457_s20, %s1461_s17, %s1270_s29, %s1270_s29, %s1271_s9  }
  0x5f   : > { %s1272_s30 = smov [#allocation11]   ;;  %s829_s21 = sshll.u32 %s1394_s15, 4 }
  0x60   : > { %s279_s18 = sshll.u32 %s1272_s30, 4  ;;  %s1048_s11 = scalar_lea.hbm %s1712_s5, 16  ;;  %s280_s18 = int_to_ptr.vmem [resolvable:$true] %s279_s18 }
  0x61   : > { %p1049_p2 = scmp.ne.s32.totalorder %s1712_s5, %s1048_s11  ;;  %p1755_p10 = scmp.ne.s32.totalorder %s1745_s13, 0 }
  0x62   : > { %p1055_p11 = scmp.lt.u32.totalorder %s1048_s11, %s1712_s5 }
  0x63   : > { %p1756_p0 = pneg %p1755_p10 }
  0x65   : > { %p1051_p13 = pnand %p1049_p2, %p1756_p0 }
  0x67   : > { %p1052_p6 = pneg %p1051_p13 }
  0x69   : > { %p1057_p3 = pnand %p1055_p11, %p1052_p6 }
  0x6b   : > { %1060 = shalt.err (!%p1057_p3)
}
  0x6c   : > { %s1061_s19 = scalar_lea.vmem %s280_s18, 16  ;;  %p1757_p5 = pmov %p1756_p0 }
  0x6d   : > { %p1062_p8 = scmp.ne.s32.totalorder %s280_s18, %s1061_s19  ;;  %s1068_s1 = scalar_lea.vmem %s280_s18, 32 }
  0x6e   : > { %p1069_p4 = scmp.lt.s32.totalorder %s280_s18, %s280_s18  ;;  %p1070_p7 = scmp.lt.s32.totalorder %s1068_s1, %s1061_s19 }
  0x6f   : > { %p1064_p12 = pnand %p1062_p8, %p1757_p5 }
  0x70   : > { %p1071_p9 = por %p1070_p7, %p1069_p4 }
  0x71   : > { %p1065_p1 = pneg %p1064_p12 }
  0x73   : > { %p1072_p0 = pnand %p1071_p9, %p1065_p1 }
  0x75   : > { %1075 = shalt.err (!%p1072_p0)
}
  0x76   : > { %904 = dma.hbm_to_vmem [thread:$0]  (!%p1755_p10), %s1712_s5, 16, %s280_s18, [#allocation12]  }
  0x77   : > { %s859_s14 = sshll.u32 %s1260_s25, 8  ;;  %s294_s20 = scalar_lea.vmem [#allocation2], %s829_s21 }
  0x78   : > { %s303_s29 = sshll.u32 %s294_s20, 4  ;;  %s1516_s12 = scalar_lea.hbm %s1707_s0, %s859_s14  ;;  %s1518_s29 = int_to_ptr.vmem [resolvable:$true] %s303_s29 }
  0x79   : > { %s291_s13 = scalar_lea.sflag [#allocation3], %s1394_s15  ;;  %s1076_s11 = scalar_lea.hbm %s1516_s12, 256 }
  0x7a   : > { %p1077_p7 = scmp.ne.s32.totalorder %s1516_s12, %s1076_s11  ;;  %p1758_p9 = scmp.ne.s32.totalorder %s1754_s6, 0 }
  0x7b   : > { %s1081_s16 = scalar_lea.hbm %s1707_s0, 512  ;;  %p1082_p13 = scmp.lt.u32.totalorder %s1516_s12, %s1707_s0 }
  0x7c   : > { %p1079_p2 = pnand %p1077_p7, %p1758_p9  ;;  %p1083_p6 = scmp.lt.u32.totalorder %s1081_s16, %s1076_s11 }
  0x7d   : > { %p1085_p3 = scmp.lt.u32.totalorder %s1076_s11, %s1516_s12 }
  0x7e   : > { %p1080_p10 = pneg %p1079_p2  ;;  %p1084_p11 = por %p1083_p6, %p1082_p13 }
  0x80   : > { %p1086_p8 = por %p1085_p3, %p1084_p11 }
  0x82   : > { %p1087_p5 = pnand %p1086_p8, %p1080_p10 }
  0x84   : > { %1090 = shalt.err (!%p1087_p5)
}
  0x85   : > { %s1091_s4 = scalar_lea.vmem %s1518_s29, 256  ;;  %s1273_s8 = smov [#allocation2]  }
  0x86   : > { %p1092_p12 = scmp.ne.s32.totalorder %s1518_s29, %s1091_s4  ;;  %s1096_s14 = sshll.u32 %s1273_s8, 4  ;;  %s1097_s14 = int_to_ptr.vmem [resolvable:$false] %s1096_s14 }
  0x87   : > { %s1098_s20 = scalar_lea.vmem %s1097_s14, 512  ;;  %p1099_p0 = scmp.lt.s32.totalorder %s1518_s29, %s1097_s14 }
  0x88   : > { %p1094_p1 = pnand %p1092_p12, %p1758_p9  ;;  %p1100_p7 = scmp.lt.s32.totalorder %s1098_s20, %s1091_s4 }
  0x8a   : > { %p1095_p4 = pneg %p1094_p1  ;;  %p1101_p2 = por %p1100_p7, %p1099_p0 }
  0x8c   : > { %p1102_p13 = pnand %p1101_p2, %p1095_p4 }
  0x8e   : > { %1105 = shalt.err (!%p1102_p13)
}
  0x8f   : > { %p1759_p10 = scmp.ne.s32.totalorder %s1750_s28, 0  ;;  %s1760_s9 = smov 4  }
  0x90   : > { %s1761_s30 = smov 64   ;;  %s835_s11 = sshll.u32 %s1260_s25, 4 }
  0x91   : > { %908 = dma.hbm_to_vmem [thread:$0]  (!%p1759_p10), %s1516_s12, 256, %s1518_s29, %s291_s13, %s1761_s30, %s1761_s30, %s1760_s9  }
  0x92   : > { %s1553_s16 = scalar_lea.hbm %s1709_s2, %s835_s11  ;;  %s340_s19 = scalar_lea.vmem [#allocation7], %s1394_s15 }
  0x93   : > { %s348_s1 = sshll.u32 %s340_s19, 4  ;;  %s1106_s4 = scalar_lea.hbm %s1553_s16, 16  ;;  %s349_s1 = int_to_ptr.vmem [resolvable:$true] %s348_s1 }
  0x94   : > { %p1107_p6 = scmp.ne.s32.totalorder %s1553_s16, %s1106_s4  ;;  %s1111_s13 = scalar_lea.hbm %s1709_s2, 32 }
  0x95   : > { %p1112_p8 = scmp.lt.u32.totalorder %s1553_s16, %s1709_s2  ;;  %p1113_p5 = scmp.lt.u32.totalorder %s1111_s13, %s1106_s4 }
  0x96   : > { %p1109_p11 = pnand %p1107_p6, %p1758_p9  ;;  %p1115_p1 = scmp.lt.u32.totalorder %s1106_s4, %s1553_s16 }
  0x97   : > { %p1114_p12 = por %p1113_p5, %p1112_p8 }
  0x98   : > { %p1110_p3 = pneg %p1109_p11 }
  0x99   : > { %p1116_p4 = por %p1115_p1, %p1114_p12 }
  0x9b   : > { %p1117_p0 = pnand %p1116_p4, %p1110_p3 }
  0x9d   : > { %1120 = shalt.err (!%p1117_p0)
}
  0x9e   : > { %s1121_s20 = scalar_lea.vmem %s349_s1, 16  ;;  %s1274_s9 = smov [#allocation7]  }
  0x9f   : > { %p1122_p7 = scmp.ne.s32.totalorder %s349_s1, %s1121_s20  ;;  %s1126_s30 = sshll.u32 %s1274_s9, 4  ;;  %s1127_s30 = int_to_ptr.vmem [resolvable:$false] %s1126_s30 }
  0xa0   : > { %s1128_s18 = scalar_lea.vmem %s1127_s30, 32  ;;  %p1129_p6 = scmp.lt.s32.totalorder %s349_s1, %s1127_s30 }
  0xa1   : > { %p1124_p2 = pnand %p1122_p7, %p1758_p9  ;;  %p1130_p11 = scmp.lt.s32.totalorder %s1128_s18, %s1121_s20 }
  0xa3   : > { %p1125_p13 = pneg %p1124_p2  ;;  %p1131_p10 = por %p1130_p11, %p1129_p6 }
  0xa5   : > { %p1132_p5 = pnand %p1131_p10, %p1125_p13 }
  0xa7   : > { %1135 = shalt.err (!%p1132_p5)
}
  0xa8   : > { %p1762_p8 = scmp.ne.s32.totalorder %s1750_s28, 0  ;;  %s1579_s4 = scalar_lea.hbm %s1710_s3, %s835_s11 }
  0xa9   : > { %s358_s29 = scalar_lea.vmem [#allocation8], %s1394_s15  ;;  %s1763_s13 = sand.u32 1, %s1264_s26  }
  0xaa   : > { %914 = dma.hbm_to_vmem [thread:$0]  (!%p1762_p8), %s1553_s16, 16, %s349_s1, %s1461_s17  }
  0xab   : > { %s366_s12 = sshll.u32 %s358_s29, 4  ;;  %s356_s8 = scalar_lea.sflag [#allocation9], %s1763_s13  ;;  %s367_s12 = int_to_ptr.vmem [resolvable:$true] %s366_s12 }
  0xac   : > { %s1136_s14 = scalar_lea.hbm %s1579_s4, 16  ;;  %s1141_s1 = scalar_lea.hbm %s1710_s3, 32 }
  0xad   : > { %p1137_p10 = scmp.ne.s32.totalorder %s1579_s4, %s1136_s14  ;;  %p1142_p1 = scmp.lt.u32.totalorder %s1579_s4, %s1710_s3 }
  0xae   : > { %p1143_p4 = scmp.lt.u32.totalorder %s1141_s1, %s1136_s14  ;;  %p1145_p7 = scmp.lt.u32.totalorder %s1136_s14, %s1579_s4 }
  0xaf   : > { %p1139_p3 = pnand %p1137_p10, %p1758_p9 }
  0xb0   : > { %p1144_p0 = por %p1143_p4, %p1142_p1 }
  0xb1   : > { %p1140_p12 = pneg %p1139_p3 }
  0xb2   : > { %p1146_p2 = por %p1145_p7, %p1144_p0 }
  0xb4   : > { %p1147_p13 = pnand %p1146_p2, %p1140_p12 }
  0xb6   : > { %1150 = shalt.err (!%p1147_p13)
}
  0xb7   : > { %s1151_s15 = scalar_lea.vmem %s367_s12, 16  ;;  %s1275_s9 = smov [#allocation8]  }
  0xb8   : > { %p1152_p6 = scmp.ne.s32.totalorder %s367_s12, %s1151_s15  ;;  %s1156_s30 = sshll.u32 %s1275_s9, 4  ;;  %s1157_s30 = int_to_ptr.vmem [resolvable:$false] %s1156_s30 }
  0xb9   : > { %s1158_s18 = scalar_lea.vmem %s1157_s30, 32  ;;  %p1159_p10 = scmp.lt.s32.totalorder %s367_s12, %s1157_s30 }
  0xba   : > { %p1154_p11 = pnand %p1152_p6, %p1758_p9  ;;  %p1160_p3 = scmp.lt.s32.totalorder %s1158_s18, %s1151_s15 }
  0xbc   : > { %p1155_p5 = pneg %p1154_p11  ;;  %p1161_p8 = por %p1160_p3, %p1159_p10 }
  0xbe   : > { %p1162_p1 = pnand %p1161_p8, %p1155_p5 }
  0xc0   : > { %1165 = shalt.err (!%p1162_p1)
}
  0xc1   : > { %p1764_p4 = scmp.ne.s32.totalorder %s1750_s28, 0  ;;  %p1765_p12 = scmp.ne.s32.totalorder %s1744_s10, 0 }
  0xc2   : > { %s1604_s6 = sand.u32 (!%p1765_p12), 1, %s1248_s22   ;;  %p1766_p9 = scmp.ne.s32.totalorder (!%p1765_p12), %s1739_s7, 0 }
  0xc3   : > { %917 = dma.hbm_to_vmem [thread:$0]  (!%p1764_p4), %s1579_s4, 16, %s367_s12, %s356_s8  }
  0xc4   : > { %375 = sbr.rel (%p1765_p12) target bundleno = 470 (0x1d6), region = 44  ;;  %s838_s21 = sshll.u32 (!%p1765_p12), %s1604_s6, 4 }
  0xc5   : > { %s378_s19 = scalar_lea.sflag (!%p1765_p12), [#allocation3], %s1604_s6  ;;  %s1608_s29 = scalar_lea.vmem (!%p1765_p12), [#allocation2], %s838_s21 }
  0xcb   : > { %1219 = dma.done.wait (%p1766_p9), %s378_s19, 256  }
  0xcc   : > { %1221 = vsyncadd (%p1766_p9), %s378_s19, 4294967040  ;;  %s386_s10 = sand.u32 1, %s1345_s27   ;;  %s839_s28 = sshll.u32 %s1604_s6, 5 }
  0xcd   : > { %s387_s4 = scalar_lea.sflag [#allocation6], %s386_s10  ;;  %s1618_s12 = scalar_lea.vmem [#allocation5], %s839_s28 }
  0xce   : > { %1223 = dma.done.wait (%p1766_p9), %s387_s4, 528  }
  0xcf   : > { %1225 = vsyncadd (%p1766_p9), %s387_s4, 4294966768  ;;  %s398_s13 = scalar_lea.vmem [#allocation7], %s1604_s6  ;;  %s404_s8 = scalar_lea.sflag [#allocation9], %s386_s10 }
  0xd0   : > { %s406_s14 = scalar_lea.vmem [#allocation8], %s1604_s6 }
  0xd1   : > { %1227 = dma.done.wait (%p1766_p9), %s404_s8, 16  }
  0xd2   : > { %1229 = vsyncadd (%p1766_p9), %s404_s8, 4294967280  ;;  %p1767_p8 = scmp.eq.s32.totalorder %s1345_s27, 0 }
  0xd4   : > { %1231 = dma.done.wait (%p1767_p8), [#allocation9], 512   ;;  %p1768_p0 = pmov %p1767_p8 }
  0xd6   : > { %1233 = vsyncadd (%p1768_p0), [#allocation9], 4294966784  ;;  %p1769_p7 = pmov %p1768_p0 }
  0xd7   : > { %p1770_p2 = pmov %p1768_p0 }
  0xd8   : > { %1235 = dma.done.wait (%p1769_p7), [#allocation12], 16  }
  0xd9   : > { %1237 = vsyncadd (%p1770_p2), [#allocation12], 4294967280  ;;  %v984_v0 = vld [vmem:[#allocation10] sm:$0xff]   ;;  %v985_v1 = vld [vmem:[#allocation10 + $0x8] sm:$0xff]   ;;  %vm513_vm0 = vcmask 523264   ;;  %s861_s27 = sshll.u32 %s1256_s24, 9 }
  0xda   : > { %868 = vmatprep.subr.bf16.mxu0 %v984_v0  ;;  %v986_v2 = vld [vmem:[#allocation10 + $0x10] sm:$0xff]   ;;  %v987_v4 = vld [vmem:[#allocation10 + $0x18] sm:$0xff]   ;;  %v843_v6 = vld [vmem:[#allocation11] ss:$0 sm:$0xff]  ;;  %s455_s7 = scalar_lea.vmem [#allocation13], %s839_s28  ;;  %s1771_s16 = sld [smem:[#allocation21_spill]] }
  0xdb   : > { %869 = vmatpush3.bf16.msra.mxu0 %v984_v0  ;;  %v988_v3 = vld [vmem:[%s1608_s29] sm:$0xff]   ;;  %v989_v5 = vld [vmem:[%s1608_s29 + $0x8] sm:$0xff]   ;;  %s643_s17 = sshll.u32 %s455_s7, 4  ;;  %s1772_s20 = sld [smem:[#allocation27_spill]]  ;;  %s1655_s17 = int_to_ptr.vmem [resolvable:$true] %s643_s17 }
  0xdc   : > { %870 = vmatprep.subr.bf16.mxu0 %v985_v1  ;;  %876 = vmatprep.mubr.msk.bf16.mxu0 %vm513_vm0, %v988_v3  ;;  %v853_v8 = vld [vmem:[%s398_s13] ss:$0 sm:$0xff]  ;;  %v612_v12 = vld [vmem:[%s1618_s12 + $0x10] sm:$0xff]  ;;  %v613_v20 = vld [vmem:[%s1618_s12 + $0x18] sm:$0xff]  ;;  %s627_s24 = scalar_lea.sflag [#allocation4], %s1604_s6  ;;  %s1166_s9 = scalar_lea.vmem %s1655_s17, 512 }
  0xdd   : > { %v852_v11 = vld [vmem:[%s406_s14] ss:$0 sm:$0xff]  ;;  %v611_v24 = vld [vmem:[%s1618_s12 + $0x8] sm:$0xff]  ;;  %p1167_p13 = scmp.ne.s32.totalorder %s1655_s17, %s1166_s9  ;;  %s1276_s30 = smov [#allocation13]  }
  0xde   : > { %v610_v16 = vld [vmem:[%s1618_s12] sm:$0xff]  ;;  %s1170_s18 = sshll.u32 %s1276_s30, 4  ;;  %s1171_s18 = int_to_ptr.vmem [resolvable:$false] %s1170_s18 }
  0xdf   : > { %871 = vmatpush3.bf16.msra.mxu0 %v985_v1  ;;  %s1172_s21 = scalar_lea.vmem %s1171_s18, 1024  ;;  %p1173_p10 = scmp.lt.s32.totalorder %s1655_s17, %s1171_s18 }
  0xe0   : > { %872 = vmatprep.subr.bf16.mxu0 %v986_v2  ;;  %p1773_p6 = scmp.ne.s32.totalorder %s1771_s16, 0  ;;  %p1174_p3 = scmp.lt.s32.totalorder %s1172_s21, %s1166_s9 }
  0xe1   : > { %s1653_s15 = scalar_lea.hbm %s1772_s20, %s861_s27 }
  0xe2   : > { %p1168_p11 = pnand %p1167_p13, %p1773_p6  ;;  %p1175_p1 = por %p1174_p3, %p1173_p10 }
  0xe3   : > { %873 = vmatpush3.bf16.msra.mxu0 %v986_v2 }
  0xe4   : > { %874 = vmatprep.subr.bf16.mxu0 %v987_v4  ;;  %p1169_p5 = pneg %p1168_p11 }
  0xe6   : > { %p1176_p4 = pnand %p1175_p1, %p1169_p5 }
  0xe7   : > { %875 = vmatpush3.bf16.msra.mxu0 %v987_v4 }
  0xea   : > { %877 = vmatmul.mubr.msk.bf16.vlgmr.msra.gmra.mrb[0].mxu0 %vm513_vm0, %v989_v5 }
 0x1bd   : > { %v878_v7 = vpop.f32.mrb[0].mxu0 }
 0x1be   : > { %v563_v9 = vadd.f32 %v878_v7, %v843_v6  ;;  %v554_v10 = vpop.f32.mrb[1].mxu0 }
 0x1bf   : > { %v555_v13 = vadd.f32 %v843_v6, %v554_v10  ;;  %v879_v14 = vpop.f32.mrb[2].mxu0 }
 0x1c0   : > { %v616_v15 = vmul.f32 %v853_v8, %v563_v9  ;;  %v566_v17 = vadd.f32 %v879_v14, %v843_v6  ;;  %v557_v18 = vpop.f32.mrb[3].mxu0 }
 0x1c1   : > { %v614_v19 = vmul.f32 %v852_v11, %v555_v13  ;;  %v558_v21 = vadd.f32 %v843_v6, %v557_v18 }
 0x1c2   : > { %v620_v22 = vadd.f32 %v616_v15, %v612_v12  ;;  %v617_v23 = vmul.f32 %v853_v8, %v566_v17 }
 0x1c3   : > { %v618_v25 = vadd.f32 %v614_v19, %v610_v16  ;;  %v615_v26 = vmul.f32 %v853_v8, %v558_v21 }
 0x1c4   : > { %624 = vst.msk [vmem:[%s455_s7 + $0x10] sm:$0xff] %vm513_vm0, %v620_v22  ;;  %v621_v27 = vadd.f32 %v617_v23, %v613_v20 }
 0x1c5   : > { %622 = vst.msk [vmem:[%s455_s7] sm:$0xff] %vm513_vm0, %v618_v25  ;;  %v619_v28 = vadd.f32 %v615_v26, %v611_v24 }
 0x1c6   : > { %625 = vst.msk [vmem:[%s455_s7 + $0x18] sm:$0xff] %vm513_vm0, %v621_v27 }
 0x1c7   : > { %623 = vst.msk [vmem:[%s455_s7 + $0x8] sm:$0xff] %vm513_vm0, %v619_v28 }
 0x1c8   : > { %1179 = shalt.err (!%p1176_p4)
}
 0x1c9   : > { %s1180_s19 = scalar_lea.hbm %s1653_s15, 512  ;;  %s1184_s28 = scalar_lea.hbm %s1772_s20, 1024 }
 0x1ca   : > { %p1181_p12 = scmp.ne.s32.totalorder %s1653_s15, %s1180_s19  ;;  %p1185_p0 = scmp.lt.u32.totalorder %s1653_s15, %s1772_s20 }
 0x1cb   : > { %p1186_p7 = scmp.lt.u32.totalorder %s1184_s28, %s1180_s19  ;;  %p1188_p13 = scmp.lt.u32.totalorder %s1180_s19, %s1653_s15 }
 0x1cc   : > { %p1182_p9 = pnand %p1181_p12, %p1773_p6 }
 0x1cd   : > { %p1187_p2 = por %p1186_p7, %p1185_p0 }
 0x1ce   : > { %p1183_p8 = pneg %p1182_p9 }
 0x1cf   : > { %p1189_p11 = por %p1188_p13, %p1187_p2 }
 0x1d1   : > { %p1190_p5 = pnand %p1189_p11, %p1183_p8 }
 0x1d3   : > { %1193 = shalt.err (!%p1190_p5)
}
 0x1d4   : > { %s1277_s13 = smov 128   ;;  %s1278_s8 = smov 8  }
 0x1d5   : > { %896 = dma.vmem_to_hbm [thread:$0]  (%p1773_p6), %s1655_s17, 512, %s1653_s15, %s627_s24, %s1277_s13, %s1277_s13, %s1278_s8  }
 0x1d6 PF: > { %s1774_s14 = sld [smem:[#allocation20_spill]]  ;;  %s1775_s27 = sld [smem:[#allocation22_spill]] }
 0x1d7   : > { %p1777_p3 = scmp.ge.s32.totalorder %s1264_s26, 2 }
 0x1dc   : > { %s658_s7 = sand.u32 1, %s1774_s14   ;;  %p1776_p10 = scmp.ne.s32.totalorder %s1775_s27, 0 }
 0x1dd   : > { %s659_s1 = scalar_lea.sflag [#allocation4], %s658_s7 }
 0x1de   : > { %p919_p1 = pnand %p1777_p3, %p1776_p10 }
 0x1e0   : > { %1239 = dma.done.wait (!%p919_p1), %s659_s1, 512  }
 0x1e1   : > { %1241 = vsyncadd (!%p919_p1), %s659_s1, 4294966784  ;;  %s29_s26 = sadd.s32 1, %s1264_s26   ;;  %s1778_s11 = sld [smem:[#allocation24_spill]] }
 0x1e2   : > { %p26_p4 = scmp.ge.s32.totalorder %s29_s26, 4   ;;  %s1779_s6 = sld [smem:[#allocation23_spill]] }
 0x1e3   : > { %s1780_s21 = smov %s1248_s22  ;;  %s1781_s22 = smov %s1252_s23 }
 0x1e4   : > { %s1783_s24 = smov %s1260_s25  ;;  %28 = sbr.rel (!%p26_p4) target bundleno = 15 (0xf), region = 136 }
 0x1e7   : > { %s1782_s23 = smov %s1778_s11 }
 0x1e8   : > { %s1784_s25 = smov %s1779_s6 }
 0x1eb   :  { %664 = vsyncpa [#allocation3], 1 }
 0x1ec   :  { %666 = vsyncpa [#allocation3 + $0x1], 1 }
 0x1ed   :  { %667 = vsyncpa [#allocation6], 1 }
 0x1ee   :  { %669 = vsyncpa [#allocation6 + $0x1], 1 }
 0x1ef   :  { %670 = vsyncpa [#allocation9], 1 }
 0x1f0   :  { %672 = vsyncpa [#allocation9 + $0x1], 1 }
 0x1f1   :  { %673 = vsyncpa [#allocation12], 1 }
 0x1f2   :  { %674 = vsyncpa [#allocation4], 1 }
 0x1f3   :  { %676 = vsyncpa [#allocation4 + $0x1], 1 }

// kernel: transformer_block_forward.24
= control target key start
LH: loop header
LB: loop body
LE: loop exit
PB: predicated region body
PF: predicated region fallthrough
CT: control target
= control target key end

     0   :  { %s2949_s0 = inlined_call_operand.hbm [shape: f32[2,32,64], index: 0, kind: input, shape index: {}]   ;;  %s2950_s1 = inlined_call_operand.hbm [shape: f32[2,1,64], index: 1, kind: input, shape index: {}]   ;;  %s2951_s2 = inlined_call_operand.hbm [shape: f32[2,1,64], index: 2, kind: input, shape index: {}]   ;;  %s2952_s3 = inlined_call_operand.hbm [shape: f32[2,1,64], index: 3, kind: input, shape index: {}]   ;;  %s2953_s4 = inlined_call_operand.hbm [shape: f32[2,1,64], index: 4, kind: input, shape index: {}]   ;;  %s2954_s5 = inlined_call_operand.hbm [shape: f32[2,1,64], index: 5, kind: input, shape index: {}]   ;;  %s2955_s6 = inlined_call_operand.hbm [shape: f32[2,1,64], index: 6, kind: input, shape index: {}]   ;;  %s2956_s7 = inlined_call_operand.hbm [shape: bf16[64,256], index: 7, kind: input, shape index: {}]   ;;  %s2957_s8 = inlined_call_operand.hbm [shape: f32[1,256], index: 8, kind: input, shape index: {}]   ;;  %s2958_s9 = inlined_call_operand.hbm [shape: bf16[256,64], index: 9, kind: input, shape index: {}]   ;;  %s2959_s10 = inlined_call_operand.hbm [shape: f32[1,64], index: 10, kind: input, shape index: {}]   ;;  %s2960_s11 = inlined_call_operand.hbm [shape: f32[2,32,64], index: 11, kind: output, shape index: {}]  }
   0x1   :  { %2991 = sst [smem:[#allocation38_spill]] %s2950_s1 }
   0x2   :  { %2992 = sst [smem:[#allocation39_spill]] %s2956_s7 }
   0x3   :  { %2993 = sst [smem:[#allocation40_spill]] %s2958_s9 }
   0x4   :  { %2994 = sst [smem:[#allocation41_spill]] %s2960_s11 }
   0x5   :  { %16 = vsyncpa [#allocation4], 0 }
   0x6   :  { %18 = vsyncpa [#allocation4 + $0x1], 0 }
   0x7   :  { %19 = vsyncpa [#allocation7], 0 }
   0x8   :  { %21 = vsyncpa [#allocation7 + $0x1], 0 }
   0x9   :  { %22 = vsyncpa [#allocation10], 0 }
   0xa   :  { %24 = vsyncpa [#allocation10 + $0x1], 0 }
   0xb   :  { %25 = vsyncpa [#allocation13], 0 }
   0xc   :  { %27 = vsyncpa [#allocation13 + $0x1], 0 }
   0xd   :  { %28 = vsyncpa [#allocation16], 0 }
   0xe   :  { %29 = vsyncpa [#allocation19], 0 }
   0xf   :  { %30 = vsyncpa [#allocation5], 0 }
  0x10   :  { %32 = vsyncpa [#allocation5 + $0x1], 0  ;;  %s2333_s17 = smov 0   ;;  %s2335_s18 = smov 0  }
  0x11   :  { %s2337_s19 = smov 0   ;;  %s2339_s20 = smov 0  }
  0x12   :  { %s2341_s21 = smov 0   ;;  %s2343_s22 = smov 0  }
  0x13 LB: > { %2995 = sst [smem:[#allocation29_spill]] %s2231_s17  ;;  %s2364_s23 = sadd.s32 4294967295, %s2251_s22   ;;  %s2251_s22 = sphi %s2343_s22, %s38_s22   ;;  %s2247_s21 = sphi %s2341_s21, %s3056_s21   ;;  %s2243_s20 = sphi %s2339_s20, %s3055_s20   ;;  %s2239_s19 = sphi %s2337_s19, %s3054_s19   ;;  %s2235_s18 = sphi %s2335_s18, %s3053_s18   ;;  %s2231_s17 = sphi %s2333_s17, %s3051_s17  }
  0x14   : > { %2996 = sst [smem:[#allocation30_spill]] %s2235_s18  ;;  %s1543_s24 = sadd.s32 4294967294, %s2251_s22  }
  0x15   : > { %2997 = sst [smem:[#allocation31_spill]] %s2243_s20  ;;  %p73_p0 = scmp.ne.s32.totalorder %s2239_s19, %s2235_s18 }
  0x16   : > { %2998 = sst [smem:[#allocation32_spill]] %s2251_s22  ;;  %p74_p1 = scmp.eq.s32.totalorder %s2251_s22, 0 }
  0x17   : > { %2999 = sst [smem:[#allocation33_spill]] %s2364_s23  ;;  %p79_p2 = scmp.ne.s32.totalorder %s2235_s18, %s2231_s17 }
  0x18   : > { %p2966_p3 = scmp.eq.s32.totalorder %s2364_s23, 0  ;;  %p2373_p4 = por %p74_p1, %p73_p0 }
  0x19   : > { %p360_p5 = scmp.eq.s32.totalorder %s2364_s23, 1  ;;  %p366_p7 = scmp.eq.s32.totalorder %s1543_s24, 1 }
  0x1a   : > { %p2380_p6 = por %p2966_p3, %p79_p2  ;;  %p1544_p9 = scmp.ge.s32.totalorder %s2251_s22, 1 }
  0x1b   : > { %p2384_p8 = por %p360_p5, %p73_p0  ;;  %p2389_p10 = por %p366_p7, %p79_p2 }
  0x1c   : > { %s3001_s26 = scalar_select %p2380_p6, 1, 0 }
  0x1d   : > { %s3003_s27 = scalar_select %p2384_p8, 1, 0 }
  0x1e   : > { %3002 = sst [smem:[#allocation34_spill]] %s3001_s26  ;;  %p373_p11 = scmp.lt.s32.totalorder %s2251_s22, 3 }
  0x1f   : > { %3004 = sst [smem:[#allocation35_spill]] %s3003_s27  ;;  %s2253_s30 = smov [#allocation15]  }
  0x20   : > { %s3005_s28 = scalar_select %p2389_p10, 1, 0 }
  0x21   : > { %p2394_p12 = pnand %p1544_p9, %p373_p11  ;;  %s388_s12 = sshll.u32 %s2253_s30, 4  ;;  %s2398_s12 = int_to_ptr.vmem [resolvable:$true] %s388_s12 }
  0x22   : > { %3006 = sst [smem:[#allocation36_spill]] %s3005_s28  ;;  %p1709_p1 = scmp.lt.s32.totalorder %s2251_s22, 2 }
  0x23   : > { %s3007_s29 = scalar_select %p2394_p12, 1, 0 }
  0x24   : > { %p1666_p13 = pneg %p2394_p12  ;;  %p2412_p2 = pnand %p1709_p1, %p2373_p4 }
  0x25   : > { %s2254_s15 = smov [#allocation18]   ;;  %s3010_s7 = sld [smem:[#allocation39_spill]] }
  0x26   : > { %p2406_p5 = pnand %p1666_p13, %p2966_p3  ;;  %s418_s16 = sshll.u32 %s2254_s15, 4  ;;  %s2416_s16 = int_to_ptr.vmem [resolvable:$true] %s418_s16 }
  0x27   : > { %s3009_s14 = scalar_select %p2412_p2, 1, 0 }
  0x28   : > { %s3008_s13 = scalar_select %p2406_p5, 1, 0 }
  0x29   : > { %p2426_p9 = pneg %p2406_p5 }
  0x2b   : > { %s1827_s28 = scalar_lea.hbm %s3010_s7, 1024 }
  0x2c   : > { %p1828_p7 = scmp.ne.s32.totalorder %s3010_s7, %s1827_s28  ;;  %p1834_p13 = scmp.lt.u32.totalorder %s1827_s28, %s3010_s7 }
  0x2d   : > { %s3011_s25 = scalar_select %p2426_p9, 1, 0 }
  0x2e   : > { %p1830_p4 = pnand %p2426_p9, %p1828_p7 }
  0x30   : > { %p1831_p11 = pneg %p1830_p4 }
  0x32   : > { %p1836_p1 = pnand %p1834_p13, %p1831_p11 }
  0x34   : > { %1839 = shalt.err (!%p1836_p1)
}
  0x35   : > { %s1840_s11 = scalar_lea.vmem %s2398_s12, 1024  ;;  %p1848_p8 = scmp.lt.s32.totalorder %s2398_s12, %s2398_s12 }
  0x36   : > { %p1841_p0 = scmp.ne.s32.totalorder %s2398_s12, %s1840_s11  ;;  %p1849_p6 = scmp.lt.s32.totalorder %s1840_s11, %s1840_s11 }
  0x38   : > { %p1843_p3 = pnand %p1841_p0, %p2426_p9  ;;  %p1850_p7 = por %p1849_p6, %p1848_p8 }
  0x3a   : > { %p1844_p10 = pneg %p1843_p3 }
  0x3c   : > { %p1851_p4 = pnand %p1850_p7, %p1844_p10 }
  0x3e   : > { %1854 = shalt.err (!%p1851_p4)
}
  0x3f   : > { %s2974_s17 = smov 128   ;;  %s2975_s27 = smov 8  }
  0x40   : > { %1669 = dma.hbm_to_vmem [thread:$0]  (!%p2406_p5), %s3010_s7, 1024, %s2398_s12, [#allocation16], %s2974_s17, %s2974_s17, %s2975_s27  }
  0x41   : > { %s3012_s9 = sld [smem:[#allocation40_spill]] }
  0x47   : > { %s1855_s11 = scalar_lea.hbm %s3012_s9, 2048 }
  0x48   : > { %p1856_p3 = scmp.ne.s32.totalorder %s3012_s9, %s1855_s11  ;;  %p1862_p10 = scmp.lt.u32.totalorder %s1855_s11, %s3012_s9 }
  0x4a   : > { %p1858_p6 = pnand %p1856_p3, %p2426_p9 }
  0x4c   : > { %p1859_p8 = pneg %p1858_p6 }
  0x4e   : > { %p1864_p0 = pnand %p1862_p10, %p1859_p8 }
  0x50   : > { %1867 = shalt.err (!%p1864_p0)
}
  0x51   : > { %s1868_s12 = scalar_lea.vmem %s2416_s16, 2048  ;;  %p1876_p7 = scmp.lt.s32.totalorder %s2416_s16, %s2416_s16 }
  0x52   : > { %p1869_p11 = scmp.ne.s32.totalorder %s2416_s16, %s1868_s12  ;;  %p1877_p4 = scmp.lt.s32.totalorder %s1868_s12, %s1868_s12 }
  0x54   : > { %p1871_p13 = pnand %p1869_p11, %p2426_p9  ;;  %p1878_p3 = por %p1877_p4, %p1876_p7 }
  0x56   : > { %p1872_p1 = pneg %p1871_p13 }
  0x58   : > { %p1879_p6 = pnand %p1878_p3, %p1872_p1 }
  0x5a   : > { %1882 = shalt.err (!%p1879_p6)
}
  0x5b   : > { %s2257_s20 = smov 64   ;;  %s2258_s18 = smov 4  }
  0x5c   : > { %1675 = dma.hbm_to_vmem [thread:$0]  (!%p2406_p5), %s3012_s9, 2048, %s2416_s16, [#allocation19], %s2257_s20, %s2257_s20, %s2258_s18  }
  0x5d   : > { %s57_s24 = sadd.s32 1, %s2247_s21  ;;  %s2476_s30 = sand.u32 1, %s2239_s19  }
  0x5e   : > { %p59_p8 = scmp.ge.s32.totalorder %s57_s24, 2  ;;  %s2479_s15 = sand.u32 1, %s2251_s22  }
  0x5f   : > { %s2484_s11 = sshll.u32 %s2247_s21, 4  ;;  %s469_s12 = scalar_lea.vmem [#allocation6], %s2476_s30 }
  0x60   : > { %s3058_s24 = smov (%p59_p8, %s57_s24), 0  ;;  %s476_s17 = sshll.u32 %s469_s12, 4  ;;  %s2499_s17 = int_to_ptr.vmem [resolvable:$true] %s476_s17 }
  0x61   : > { %3013 = sst [smem:[#allocation37_spill]] %s3058_s24  ;;  %s61_s23 = ssub.s32 %s2247_s21, %s3058_s24 }
  0x62   : > { %s3014_s1 = sld [smem:[#allocation38_spill]]  ;;  %p2495_p10 = scmp.eq.s32.totalorder %s61_s23, 0 }
  0x63   : > { %p2506_p11 = pneg %p2412_p2 }
  0x64   : > { %s3015_s26 = scalar_select %p2495_p10, 1, 0 }
  0x65   : > { %s3016_s12 = scalar_select %p2506_p11, 1, 0 }
  0x68   : > { %s2493_s18 = scalar_lea.hbm %s3014_s1, %s2484_s11  ;;  %s1888_s23 = scalar_lea.hbm %s3014_s1, 32 }
  0x69   : > { %s1883_s28 = scalar_lea.hbm %s2493_s18, 16  ;;  %p1889_p7 = scmp.lt.u32.totalorder %s2493_s18, %s3014_s1 }
  0x6a   : > { %p1884_p0 = scmp.ne.s32.totalorder %s2493_s18, %s1883_s28  ;;  %p1890_p4 = scmp.lt.u32.totalorder %s1888_s23, %s1883_s28 }
  0x6b   : > { %p1892_p6 = scmp.lt.u32.totalorder %s1883_s28, %s2493_s18 }
  0x6c   : > { %p1886_p13 = pnand %p2506_p11, %p1884_p0  ;;  %p1891_p3 = por %p1890_p4, %p1889_p7 }
  0x6e   : > { %p1887_p1 = pneg %p1886_p13  ;;  %p1893_p8 = por %p1892_p6, %p1891_p3 }
  0x70   : > { %p1894_p12 = pnand %p1893_p8, %p1887_p1 }
  0x72   : > { %1897 = shalt.err (!%p1894_p12)
}
  0x73   : > { %s1898_s27 = scalar_lea.vmem %s2499_s17, 16  ;;  %s2259_s16 = smov [#allocation6]  }
  0x74   : > { %p1899_p0 = scmp.ne.s32.totalorder %s2499_s17, %s1898_s27  ;;  %s1903_s20 = sshll.u32 %s2259_s16, 4  ;;  %s1904_s20 = int_to_ptr.vmem [resolvable:$false] %s1903_s20 }
  0x75   : > { %s1905_s7 = scalar_lea.vmem %s1904_s20, 32  ;;  %p1906_p9 = scmp.lt.s32.totalorder %s2499_s17, %s1904_s20 }
  0x76   : > { %p1901_p13 = pnand %p1899_p0, %p2506_p11  ;;  %p1907_p10 = scmp.lt.s32.totalorder %s1905_s7, %s1898_s27 }
  0x78   : > { %p1902_p5 = pneg %p1901_p13  ;;  %p1908_p7 = por %p1907_p10, %p1906_p9 }
  0x7a   : > { %p1909_p4 = pnand %p1908_p7, %p1902_p5 }
  0x7c   : > { %1912 = shalt.err (!%p1909_p4)
}
  0x7d   : > { %s3017_s9 = scalar_lea.sflag [#allocation7], %s2479_s15  ;;  %s3018_s28 = sadd.s32 1, %s2239_s19 }
  0x7e   : > { %1685 = dma.hbm_to_vmem [thread:$0]  (!%p2412_p2), %s2493_s18, 16, %s2499_s17, %s3017_s9  }
  0x7f   : > { %p3019_p12 = scmp.ne.s32.totalorder %s3015_s26, 0  ;;  %s2542_s20 = scalar_lea.hbm %s2952_s3, %s2484_s11 }
  0x80   : > { %s503_s7 = scalar_lea.vmem [#allocation9], %s2476_s30  ;;  %s2986_s24 = scalar_lea.sflag [#allocation10], %s2479_s15 }
  0x81   : > { %s2536_s27 = scalar_select %p3019_p12, %s2239_s19, %s3018_s28  }
  0x82   : > { %s510_s1 = sshll.u32 %s503_s7, 4  ;;  %s1913_s22 = scalar_lea.hbm %s2542_s20, 16  ;;  %s511_s1 = int_to_ptr.vmem [resolvable:$true] %s510_s1 }
  0x83   : > { %p1914_p5 = scmp.ne.s32.totalorder %s2542_s20, %s1913_s22  ;;  %s1918_s26 = scalar_lea.hbm %s2952_s3, 32 }
  0x84   : > { %p1919_p1 = scmp.lt.u32.totalorder %s2542_s20, %s2952_s3  ;;  %p1920_p3 = scmp.lt.u32.totalorder %s1918_s26, %s1913_s22 }
  0x85   : > { %p1916_p9 = pnand %p1914_p5, %p2506_p11  ;;  %p1922_p8 = scmp.lt.u32.totalorder %s1913_s22, %s2542_s20 }
  0x86   : > { %p1921_p6 = por %p1920_p3, %p1919_p1 }
  0x87   : > { %p1917_p10 = pneg %p1916_p9 }
  0x88   : > { %p1923_p0 = por %p1922_p8, %p1921_p6 }
  0x8a   : > { %p1924_p13 = pnand %p1923_p0, %p1917_p10 }
  0x8c   : > { %1927 = shalt.err (!%p1924_p13)
}
  0x8d   : > { %s1928_s23 = scalar_lea.vmem %s511_s1, 16  ;;  %s2260_s16 = smov [#allocation9]  }
  0x8e   : > { %p1929_p7 = scmp.ne.s32.totalorder %s511_s1, %s1928_s23  ;;  %s1933_s7 = sshll.u32 %s2260_s16, 4  ;;  %s1934_s7 = int_to_ptr.vmem [resolvable:$false] %s1933_s7 }
  0x8f   : > { %s1935_s17 = scalar_lea.vmem %s1934_s7, 32  ;;  %p1936_p5 = scmp.lt.s32.totalorder %s511_s1, %s1934_s7 }
  0x90   : > { %p1931_p4 = pnand %p1929_p7, %p2506_p11  ;;  %p1937_p9 = scmp.lt.s32.totalorder %s1935_s17, %s1928_s23 }
  0x92   : > { %p1932_p12 = pneg %p1931_p4  ;;  %p1938_p2 = por %p1937_p9, %p1936_p5 }
  0x94   : > { %p1939_p1 = pnand %p1938_p2, %p1932_p12 }
  0x96   : > { %1942 = shalt.err (!%p1939_p1)
}
  0x97   : > { %p3020_p3 = scmp.ne.s32.totalorder %s3009_s14, 0  ;;  %s2569_s26 = scalar_lea.hbm %s2954_s5, %s2484_s11 }
  0x98   : > { %s537_s9 = scalar_lea.vmem [#allocation12], %s2476_s30  ;;  %s2261_s23 = smov [#allocation17]  }
  0x99   : > { %1691 = dma.hbm_to_vmem [thread:$0]  (!%p3020_p3), %s2542_s20, 16, %s511_s1, %s2986_s24  }
  0x9a   : > { %s544_s28 = sshll.u32 %s537_s9, 4  ;;  %s2574_s16 = sshll.u32 %s2261_s23, 4  ;;  %s2572_s28 = int_to_ptr.vmem [resolvable:$true] %s544_s28  ;;  %s406_s16 = int_to_ptr.vmem [resolvable:$true] %s2574_s16 }
  0x9b   : > { %s2988_s7 = scalar_lea.sflag [#allocation13], %s2479_s15  ;;  %s1943_s17 = scalar_lea.hbm %s2569_s26, 16 }
  0x9c   : > { %p1944_p2 = scmp.ne.s32.totalorder %s2569_s26, %s1943_s17  ;;  %s1948_s22 = scalar_lea.hbm %s2954_s5, 32 }
  0x9d   : > { %p1949_p8 = scmp.lt.u32.totalorder %s2569_s26, %s2954_s5  ;;  %p1950_p0 = scmp.lt.u32.totalorder %s1948_s22, %s1943_s17 }
  0x9e   : > { %p1946_p10 = pnand %p1944_p2, %p2506_p11  ;;  %p1952_p7 = scmp.lt.u32.totalorder %s1943_s17, %s2569_s26 }
  0x9f   : > { %p1951_p13 = por %p1950_p0, %p1949_p8 }
  0xa0   : > { %p1947_p6 = pneg %p1946_p10 }
  0xa1   : > { %p1953_p4 = por %p1952_p7, %p1951_p13 }
  0xa3   : > { %p1954_p12 = pnand %p1953_p4, %p1947_p6 }
  0xa5   : > { %1957 = shalt.err (!%p1954_p12)
}
  0xa6   : > { %s1958_s9 = scalar_lea.vmem %s2572_s28, 16  ;;  %s2262_s23 = smov [#allocation12]  }
  0xa7   : > { %p1959_p5 = scmp.ne.s32.totalorder %s2572_s28, %s1958_s9  ;;  %s1963_s1 = sshll.u32 %s2262_s23, 4  ;;  %s1964_s1 = int_to_ptr.vmem [resolvable:$false] %s1963_s1 }
  0xa8   : > { %s1965_s24 = scalar_lea.vmem %s1964_s1, 32  ;;  %p1966_p2 = scmp.lt.s32.totalorder %s2572_s28, %s1964_s1 }
  0xa9   : > { %p1961_p9 = pnand %p1959_p5, %p2506_p11  ;;  %p1967_p10 = scmp.lt.s32.totalorder %s1965_s24, %s1958_s9 }
  0xab   : > { %p1962_p1 = pneg %p1961_p9  ;;  %p1968_p8 = por %p1967_p10, %p1966_p2 }
  0xad   : > { %p1969_p0 = pnand %p1968_p8, %p1962_p1 }
  0xaf   : > { %1972 = shalt.err (!%p1969_p0)
}
  0xb0   : > { %1697 = dma.hbm_to_vmem [thread:$0]  (!%p3020_p3), %s2569_s26, 16, %s2572_s28, %s2988_s7  }
  0xb1   : > { %s1973_s22 = scalar_lea.hbm %s2957_s8, 32  ;;  %p3021_p13 = scmp.ne.s32.totalorder %s3011_s25, 0 }
  0xb2   : > { %p1974_p6 = scmp.ne.s32.totalorder %s2957_s8, %s1973_s22  ;;  %p1980_p12 = scmp.lt.u32.totalorder %s1973_s22, %s2957_s8 }
  0xb4   : > { %p1976_p7 = pnand %p1974_p6, %p3021_p13 }
  0xb6   : > { %p1977_p4 = pneg %p1976_p7 }
  0xb8   : > { %p1982_p5 = pnand %p1980_p12, %p1977_p4 }
  0xba   : > { %1985 = shalt.err (!%p1982_p5)
}
  0xbb   : > { %s1986_s24 = scalar_lea.vmem %s406_s16, 32  ;;  %p1994_p10 = scmp.lt.s32.totalorder %s406_s16, %s406_s16 }
  0xbc   : > { %p1987_p9 = scmp.ne.s32.totalorder %s406_s16, %s1986_s24  ;;  %p1995_p8 = scmp.lt.s32.totalorder %s1986_s24, %s1986_s24 }
  0xbe   : > { %p1989_p1 = pnand %p1987_p9, %p3021_p13  ;;  %p1996_p0 = por %p1995_p8, %p1994_p10 }
  0xc0   : > { %p1990_p2 = pneg %p1989_p1 }
  0xc2   : > { %p1997_p3 = pnand %p1996_p0, %p1990_p2 }
  0xc4   : > { %2000 = shalt.err (!%p1997_p3)
}
  0xc5   : > { %p3022_p6 = scmp.ne.s32.totalorder %s3008_s13, 0  ;;  %s2263_s17 = smov [#allocation20]  }
  0xc6   : > { %s432_s20 = sshll.u32 %s2263_s17, 4  ;;  %s1550_s22 = sshll.u32 %s2476_s30, 5  ;;  %s433_s20 = int_to_ptr.vmem [resolvable:$true] %s432_s20 }
  0xc7   : > { %1672 = dma.hbm_to_vmem [thread:$0]  (!%p3022_p6), %s2957_s8, 32, %s406_s16, [#allocation16]  }
  0xc8   : > { %s2001_s9 = scalar_lea.hbm %s2959_s10, 16 }
  0xc9   : > { %p2002_p3 = scmp.ne.s32.totalorder %s2959_s10, %s2001_s9  ;;  %p2008_p12 = scmp.lt.u32.totalorder %s2001_s9, %s2959_s10 }
  0xcb   : > { %p2004_p7 = pnand %p2002_p3, %p3021_p13 }
  0xcd   : > { %p2005_p4 = pneg %p2004_p7 }
  0xcf   : > { %p2010_p5 = pnand %p2008_p12, %p2005_p4 }
  0xd1   : > { %2013 = shalt.err (!%p2010_p5)
}
  0xd2   : > { %s2014_s16 = scalar_lea.vmem %s433_s20, 16  ;;  %s2021_s28 = scalar_lea.vmem %s433_s20, 32 }
  0xd3   : > { %p2015_p9 = scmp.ne.s32.totalorder %s433_s20, %s2014_s16  ;;  %p2022_p10 = scmp.lt.s32.totalorder %s433_s20, %s433_s20 }
  0xd4   : > { %p2023_p8 = scmp.lt.s32.totalorder %s2021_s28, %s2014_s16 }
  0xd5   : > { %p2017_p1 = pnand %p2015_p9, %p3021_p13 }
  0xd6   : > { %p2024_p0 = por %p2023_p8, %p2022_p10 }
  0xd7   : > { %p2018_p2 = pneg %p2017_p1 }
  0xd9   : > { %p2025_p11 = pnand %p2024_p0, %p2018_p2 }
  0xdb   : > { %2028 = shalt.err (!%p2025_p11)
}
  0xdc   : > { %1678 = dma.hbm_to_vmem [thread:$0]  (!%p3022_p6), %s2959_s10, 16, %s433_s20, [#allocation19]  }
  0xdd   : > { %s1604_s7 = sshll.u32 %s2247_s21, 9  ;;  %s447_s1 = scalar_lea.vmem [#allocation3], %s1550_s22 }
  0xde   : > { %s2642_s9 = scalar_lea.hbm %s2949_s0, %s1604_s7  ;;  %s456_s24 = sshll.u32 %s447_s1, 4  ;;  %s2644_s24 = int_to_ptr.vmem [resolvable:$true] %s456_s24 }
  0xdf   : > { %s444_s13 = scalar_lea.sflag [#allocation4], %s2476_s30  ;;  %s2029_s26 = scalar_lea.hbm %s2642_s9, 512 }
  0xe0   : > { %p2030_p11 = scmp.ne.s32.totalorder %s2642_s9, %s2029_s26  ;;  %p3023_p13 = scmp.ne.s32.totalorder %s3016_s12, 0 }
  0xe1   : > { %s2034_s28 = scalar_lea.hbm %s2949_s0, 1024  ;;  %p2035_p7 = scmp.lt.u32.totalorder %s2642_s9, %s2949_s0 }
  0xe2   : > { %p2032_p3 = pnand %p2030_p11, %p3023_p13  ;;  %p2036_p4 = scmp.lt.u32.totalorder %s2034_s28, %s2029_s26 }
  0xe3   : > { %p2038_p5 = scmp.lt.u32.totalorder %s2029_s26, %s2642_s9 }
  0xe4   : > { %p2033_p6 = pneg %p2032_p3  ;;  %p2037_p12 = por %p2036_p4, %p2035_p7 }
  0xe6   : > { %p2039_p9 = por %p2038_p5, %p2037_p12 }
  0xe8   : > { %p2040_p1 = pnand %p2039_p9, %p2033_p6 }
  0xea   : > { %2043 = shalt.err (!%p2040_p1)
}
  0xeb   : > { %s2044_s22 = scalar_lea.vmem %s2644_s24, 512  ;;  %s2264_s7 = smov [#allocation3]  }
  0xec   : > { %p2045_p2 = scmp.ne.s32.totalorder %s2644_s24, %s2044_s22  ;;  %s2049_s23 = sshll.u32 %s2264_s7, 4  ;;  %s2050_s23 = int_to_ptr.vmem [resolvable:$false] %s2049_s23 }
  0xed   : > { %s2051_s25 = scalar_lea.vmem %s2050_s23, 1024  ;;  %p2052_p0 = scmp.lt.s32.totalorder %s2644_s24, %s2050_s23 }
  0xee   : > { %p2047_p10 = pnand %p2045_p2, %p3023_p13  ;;  %p2053_p11 = scmp.lt.s32.totalorder %s2051_s25, %s2044_s22 }
  0xf0   : > { %p2048_p8 = pneg %p2047_p10  ;;  %p2054_p3 = por %p2053_p11, %p2052_p0 }
  0xf2   : > { %p2055_p7 = pnand %p2054_p3, %p2048_p8 }
  0xf4   : > { %2058 = shalt.err (!%p2055_p7)
}
  0xf5   : > { %p3024_p6 = scmp.ne.s32.totalorder %s3009_s14, 0  ;;  %s3025_s1 = smov 8  }
  0xf6   : > { %s3026_s26 = smov 128   ;;  %s2677_s28 = scalar_lea.hbm %s2951_s2, %s2484_s11 }
  0xf7   : > { %1682 = dma.hbm_to_vmem [thread:$0]  (!%p3024_p6), %s2642_s9, 512, %s2644_s24, %s444_s13, %s3026_s26, %s3026_s26, %s3025_s1  }
  0xf8   : > { %s486_s17 = scalar_lea.vmem [#allocation8], %s2476_s30  ;;  %s2059_s22 = scalar_lea.hbm %s2677_s28, 16 }
  0xf9   : > { %s493_s18 = sshll.u32 %s486_s17, 4  ;;  %p2060_p4 = scmp.ne.s32.totalorder %s2677_s28, %s2059_s22  ;;  %s494_s18 = int_to_ptr.vmem [resolvable:$true] %s493_s18 }
  0xfa   : > { %s2064_s9 = scalar_lea.hbm %s2951_s2, 32  ;;  %p2065_p9 = scmp.lt.u32.totalorder %s2677_s28, %s2951_s2 }
  0xfb   : > { %p2062_p12 = pnand %p2060_p4, %p3023_p13  ;;  %p2066_p1 = scmp.lt.u32.totalorder %s2064_s9, %s2059_s22 }
  0xfc   : > { %p2068_p10 = scmp.lt.u32.totalorder %s2059_s22, %s2677_s28 }
  0xfd   : > { %p2063_p5 = pneg %p2062_p12  ;;  %p2067_p2 = por %p2066_p1, %p2065_p9 }
  0xff   : > { %p2069_p8 = por %p2068_p10, %p2067_p2 }
 0x101   : > { %p2070_p0 = pnand %p2069_p8, %p2063_p5 }
 0x103   : > { %2073 = shalt.err (!%p2070_p0)
}
 0x104   : > { %s2074_s25 = scalar_lea.vmem %s494_s18, 16  ;;  %s2265_s1 = smov [#allocation8]  }
 0x105   : > { %p2075_p11 = scmp.ne.s32.totalorder %s494_s18, %s2074_s25  ;;  %s2079_s26 = sshll.u32 %s2265_s1, 4  ;;  %s2080_s26 = int_to_ptr.vmem [resolvable:$false] %s2079_s26 }
 0x106   : > { %s2081_s20 = scalar_lea.vmem %s2080_s26, 32  ;;  %p2082_p4 = scmp.lt.s32.totalorder %s494_s18, %s2080_s26 }
 0x107   : > { %p2077_p3 = pnand %p2075_p11, %p3023_p13  ;;  %p2083_p12 = scmp.lt.s32.totalorder %s2081_s20, %s2074_s25 }
 0x109   : > { %p2078_p7 = pneg %p2077_p3  ;;  %p2084_p6 = por %p2083_p12, %p2082_p4 }
 0x10b   : > { %p2085_p1 = pnand %p2084_p6, %p2078_p7 }
 0x10d   : > { %2088 = shalt.err (!%p2085_p1)
}
 0x10e   : > { %p3027_p9 = scmp.ne.s32.totalorder %s3009_s14, 0  ;;  %s3028_s16 = scalar_lea.sflag [#allocation7], %s2479_s15 }
 0x10f   : > { %s2703_s7 = scalar_lea.hbm %s2953_s4, %s2484_s11  ;;  %s520_s23 = scalar_lea.vmem [#allocation11], %s2476_s30 }
 0x110   : > { %1688 = dma.hbm_to_vmem [thread:$0]  (!%p3027_p9), %s2677_s28, 16, %s494_s18, %s3028_s16  }
 0x111   : > { %s527_s9 = sshll.u32 %s520_s23, 4  ;;  %s2089_s24 = scalar_lea.hbm %s2703_s7, 16  ;;  %s528_s9 = int_to_ptr.vmem [resolvable:$true] %s527_s9 }
 0x112   : > { %p2090_p6 = scmp.ne.s32.totalorder %s2703_s7, %s2089_s24  ;;  %s2094_s28 = scalar_lea.hbm %s2953_s4, 32 }
 0x113   : > { %p2095_p10 = scmp.lt.u32.totalorder %s2703_s7, %s2953_s4  ;;  %p2096_p8 = scmp.lt.u32.totalorder %s2094_s28, %s2089_s24 }
 0x114   : > { %p2092_p5 = pnand %p2090_p6, %p3023_p13  ;;  %p2098_p11 = scmp.lt.u32.totalorder %s2089_s24, %s2703_s7 }
 0x115   : > { %p2097_p0 = por %p2096_p8, %p2095_p10 }
 0x116   : > { %p2093_p2 = pneg %p2092_p5 }
 0x117   : > { %p2099_p3 = por %p2098_p11, %p2097_p0 }
 0x119   : > { %p2100_p7 = pnand %p2099_p3, %p2093_p2 }
 0x11b   : > { %2103 = shalt.err (!%p2100_p7)
}
 0x11c   : > { %s2104_s26 = scalar_lea.vmem %s528_s9, 16  ;;  %s2266_s20 = smov [#allocation11]  }
 0x11d   : > { %p2105_p4 = scmp.ne.s32.totalorder %s528_s9, %s2104_s26  ;;  %s2109_s16 = sshll.u32 %s2266_s20, 4  ;;  %s2110_s16 = int_to_ptr.vmem [resolvable:$false] %s2109_s16 }
 0x11e   : > { %s2111_s17 = scalar_lea.vmem %s2110_s16, 32  ;;  %p2112_p6 = scmp.lt.s32.totalorder %s528_s9, %s2110_s16 }
 0x11f   : > { %p2107_p12 = pnand %p2105_p4, %p3023_p13  ;;  %p2113_p5 = scmp.lt.s32.totalorder %s2111_s17, %s2104_s26 }
 0x121   : > { %p2108_p1 = pneg %p2107_p12  ;;  %p2114_p9 = por %p2113_p5, %p2112_p6 }
 0x123   : > { %p2115_p8 = pnand %p2114_p9, %p2108_p1 }
 0x125   : > { %2118 = shalt.err (!%p2115_p8)
}
 0x126   : > { %p3029_p10 = scmp.ne.s32.totalorder %s3009_s14, 0  ;;  %s3030_s22 = scalar_lea.sflag [#allocation10], %s2479_s15 }
 0x127   : > { %s2729_s13 = scalar_lea.hbm %s2955_s6, %s2484_s11  ;;  %s554_s25 = scalar_lea.vmem [#allocation14], %s2476_s30 }
 0x128   : > { %1694 = dma.hbm_to_vmem [thread:$0]  (!%p3029_p10), %s2703_s7, 16, %s528_s9, %s3030_s22  }
 0x129   : > { %s561_s28 = sshll.u32 %s554_s25, 4  ;;  %s2119_s18 = scalar_lea.hbm %s2729_s13, 16  ;;  %s562_s28 = int_to_ptr.vmem [resolvable:$true] %s561_s28 }
 0x12a   : > { %p2120_p9 = scmp.ne.s32.totalorder %s2729_s13, %s2119_s18  ;;  %s2124_s7 = scalar_lea.hbm %s2955_s6, 32 }
 0x12b   : > { %p2125_p11 = scmp.lt.u32.totalorder %s2729_s13, %s2955_s6  ;;  %p2126_p3 = scmp.lt.u32.totalorder %s2124_s7, %s2119_s18 }
 0x12c   : > { %p2122_p2 = pnand %p2120_p9, %p3023_p13  ;;  %p2128_p4 = scmp.lt.u32.totalorder %s2119_s18, %s2729_s13 }
 0x12d   : > { %p2127_p7 = por %p2126_p3, %p2125_p11 }
 0x12e   : > { %p2123_p0 = pneg %p2122_p2 }
 0x12f   : > { %p2129_p12 = por %p2128_p4, %p2127_p7 }
 0x131   : > { %p2130_p1 = pnand %p2129_p12, %p2123_p0 }
 0x133   : > { %2133 = shalt.err (!%p2130_p1)
}
 0x134   : > { %s2134_s30 = scalar_lea.vmem %s562_s28, 16  ;;  %s2267_s11 = smov [#allocation14]  }
 0x135   : > { %p2135_p6 = scmp.ne.s32.totalorder %s562_s28, %s2134_s30  ;;  %s2139_s16 = sshll.u32 %s2267_s11, 4  ;;  %s2140_s16 = int_to_ptr.vmem [resolvable:$false] %s2139_s16 }
 0x136   : > { %s2141_s17 = scalar_lea.vmem %s2140_s16, 32  ;;  %p2142_p9 = scmp.lt.s32.totalorder %s562_s28, %s2140_s16 }
 0x137   : > { %p2137_p5 = pnand %p2135_p6, %p3023_p13  ;;  %p2143_p2 = scmp.lt.s32.totalorder %s2141_s17, %s2134_s30 }
 0x139   : > { %p2138_p8 = pneg %p2137_p5  ;;  %p2144_p10 = por %p2143_p2, %p2142_p9 }
 0x13b   : > { %p2145_p3 = pnand %p2144_p10, %p2138_p8 }
 0x13d   : > { %2148 = shalt.err (!%p2145_p3)
}
 0x13e   : > { %p3031_p11 = scmp.ne.s32.totalorder %s3009_s14, 0  ;;  %s3032_s22 = scalar_lea.sflag [#allocation13], %s2479_s15 }
 0x13f   : > { %p3033_p0 = scmp.ne.s32.totalorder %s3007_s29, 0 }
 0x140   : > { %1700 = dma.hbm_to_vmem [thread:$0]  (!%p3031_p11), %s2729_s13, 16, %s562_s28, %s3032_s22  }
 0x141   : > { %570 = sbr.rel (%p3033_p0) target bundleno = 1175 (0x497), region = 64  ;;  %s3034_s12 = sld [smem:[#allocation30_spill]] (!%p3033_p0) }
 0x142   : > { %s3035_s23 = sld [smem:[#allocation34_spill]] (!%p3033_p0) }
 0x147   : > { %s2754_s24 = sand.u32 (!%p3033_p0), 1, %s3034_s12  }
 0x148   : > { %s1560_s25 = sshll.u32 %s2754_s24, 5  ;;  %s573_s18 = scalar_lea.sflag [#allocation4], %s2754_s24 }
 0x149   : > { %s576_s1 = scalar_lea.vmem [#allocation3], %s1560_s25  ;;  %p3036_p13 = scmp.ne.s32.totalorder %s3035_s23, 0 }
 0x14b   : > { %2202 = dma.done.wait (%p3036_p13), %s573_s18, 512  }
 0x14c   : > { %2204 = vsyncadd (%p3036_p13), %s573_s18, 4294966784  ;;  %s3037_s14 = sld [smem:[#allocation33_spill]]  ;;  %s584_s13 = scalar_lea.vmem [#allocation6], %s2754_s24 }
 0x152   : > { %s581_s29 = sand.u32 1, %s3037_s14  }
 0x153   : > { %s582_s15 = scalar_lea.sflag [#allocation7], %s581_s29 }
 0x154   : > { %2206 = dma.done.wait (%p3036_p13), %s582_s15, 32  }
 0x155   : > { %2208 = vsyncadd (%p3036_p13), %s582_s15, 4294967264  ;;  %s592_s28 = scalar_lea.vmem [#allocation8], %s2754_s24  ;;  %s598_s26 = scalar_lea.sflag [#allocation10], %s581_s29 }
 0x156   : > { %s600_s7 = scalar_lea.vmem [#allocation9], %s2754_s24 }
 0x157   : > { %2210 = dma.done.wait (%p3036_p13), %s598_s26, 32  }
 0x158   : > { %2212 = vsyncadd (%p3036_p13), %s598_s26, 4294967264  ;;  %s608_s9 = scalar_lea.vmem [#allocation11], %s2754_s24  ;;  %s614_s20 = scalar_lea.sflag [#allocation13], %s581_s29 }
 0x159   : > { %s616_s30 = scalar_lea.vmem [#allocation12], %s2754_s24 }
 0x15a   : > { %2214 = dma.done.wait (%p3036_p13), %s614_s20, 32  }
 0x15b   : > { %2216 = vsyncadd (%p3036_p13), %s614_s20, 4294967264  ;;  %s624_s11 = scalar_lea.vmem [#allocation14], %s2754_s24  ;;  %p3038_p10 = scmp.eq.s32.totalorder %s3037_s14, 0 }
 0x15d   : > { %2218 = dma.done.wait (%p3038_p10), [#allocation16], 1056   ;;  %p3039_p7 = pmov %p3038_p10 }
 0x15f   : > { %2220 = vsyncadd (%p3039_p7), [#allocation16], 4294966240  ;;  %p3040_p4 = pmov %p3039_p7 }
 0x161   : > { %2222 = dma.done.wait (%p3040_p4), [#allocation19], 2064   ;;  %p3041_p12 = pmov %p3040_p4 }
 0x162   : > { %vm713_vm0 = vcmask 523264   ;;  %v2791_v0 = vld [vmem:[%s576_s1] sm:$0xff]  ;;  %v2793_v1 = vld [vmem:[%s576_s1 + $0x10] sm:$0xff]  ;;  %v2795_v2 = vld [vmem:[%s576_s1 + $0x8] sm:$0xff]  ;;  %v2268_v36 = vmov 0   ;;  %s3042_s16 = sld [smem:[#allocation31_spill]] }
 0x163   : > { %2224 = vsyncadd (%p3041_p12), [#allocation19], 4294965232  ;;  %v723_v3 = vsel %vm713_vm0, %v2791_v0, 0.0  ;;  %v729_v4 = vsel %vm713_vm0, %v2793_v1, 0.0  ;;  %v2801_v5 = vld [vmem:[%s576_s1 + $0x18] sm:$0xff]  ;;  %v726_v6 = vsel %vm713_vm0, %v2795_v2, 0.0  ;;  %947 = vmatprep.mubr.bf16.mxu0 %v2268_v36 }
 0x164   : > { %724 = vadd.xlane.f32.xlu0 %v723_v3  ;;  %730 = vadd.xlane.f32.xlu1 %v729_v4  ;;  %v732_v7 = vsel %vm713_vm0, %v2801_v5, 0.0  ;;  %v1775_v28 = vld [vmem:[#allocation15 + $0x4] ss:$8 sps:$4 sm:$0xff]   ;;  %v1777_v29 = vld [vmem:[#allocation15] ss:$8 sps:$4 sm:$0xff]   ;;  %s702_s17 = scalar_lea.vmem [#allocation21], %s1560_s25 }
 0x165   : > { %915 = vmatprep.subr.bf16.mxu0 %v1775_v28  ;;  %v1778_v30 = vld [vmem:[#allocation15 + $0x14] ss:$8 sps:$4 sm:$0xff]   ;;  %v1780_v31 = vld [vmem:[#allocation15 + $0x10] ss:$8 sps:$4 sm:$0xff]   ;;  %v1781_v32 = vld [vmem:[#allocation15 + $0x24] ss:$8 sps:$4 sm:$0xff]  }
 0x166   : > { %916 = vmatpush1.bf16.msra.mxu0 %v1777_v29  ;;  %v1783_v33 = vld [vmem:[#allocation15 + $0x20] ss:$8 sps:$4 sm:$0xff]   ;;  %v1784_v34 = vld [vmem:[#allocation15 + $0x34] ss:$8 sps:$4 sm:$0xff]   ;;  %v1786_v35 = vld [vmem:[#allocation15 + $0x30] ss:$8 sps:$4 sm:$0xff]   ;;  %v859_v29 = vlaneseq }
 0x167   : > { %917 = vmatprep.subr.bf16.mxu0 %v1778_v30  ;;  %v1566_v49 = vld [vmem:[%s608_s9] ss:$0 sm:$0xff]  ;;  %v1802_v28 = vld [vmem:[#allocation18 + $0x38] sm:$0xff]   ;;  %s3043_s22 = sld [smem:[#allocation35_spill]]  ;;  %s1297_s23 = sshll.u32 %s702_s17, 4  ;;  %s2897_s23 = int_to_ptr.vmem [resolvable:$true] %s1297_s23 }
 0x168   : > { %727 = vadd.xlane.f32.xlu0 %v726_v6  ;;  %733 = vadd.xlane.f32.xlu1 %v732_v7  ;;  %v1567_v51 = vld [vmem:[%s584_s13] ss:$0 sm:$0xff]  ;;  %v835_v53 = vadd.f32 1.0, %v1566_v49  ;;  %v860_v30 = vshrl.u32 %v859_v29, 7  ;;  %s1605_s12 = sshll.u32 %s3042_s16, 9  ;;  %s3044_s14 = sld [smem:[#allocation41_spill]] }
 0x169   : > { %v836_v54 = vadd.f32 1.0, %v1567_v51  ;;  %v1568_v59 = vld [vmem:[%s616_s30] ss:$0 sm:$0xff]  ;;  %s1282_s29 = scalar_lea.sflag [#allocation5], %s2754_s24  ;;  %s2149_s15 = scalar_lea.vmem %s2897_s23, 512 }
 0x16a   : > { %918 = vmatpush1.bf16.msra.mxu0 %v1780_v31  ;;  %v1569_v60 = vld [vmem:[%s592_s28] ss:$0 sm:$0xff]  ;;  %v861_v31 = vsub.s32 0, %v860_v30  ;;  %p2150_p1 = scmp.ne.s32.totalorder %s2897_s23, %s2149_s15  ;;  %s2270_s13 = smov [#allocation21]  }
 0x16b   : > { %919 = vmatprep.subr.bf16.mxu0 %v1781_v32  ;;  %v857_v32 = vld [vmem:[#allocation17] sm:$0x3]  ;;  %s2153_s28 = sshll.u32 %s2270_s13, 4  ;;  %s2154_s28 = int_to_ptr.vmem [resolvable:$false] %s2153_s28 }
 0x16c   : > { %s2155_s26 = scalar_lea.vmem %s2154_s28, 1024  ;;  %p2156_p9 = scmp.lt.s32.totalorder %s2897_s23, %s2154_s28 }
 0x16d   : > { %p3045_p6 = scmp.ne.s32.totalorder %s3043_s22, 0  ;;  %p2157_p2 = scmp.lt.s32.totalorder %s2155_s26, %s2149_s15 }
 0x16e   : > { %920 = vmatpush1.bf16.msra.mxu0 %v1783_v33  ;;  %v865_v33 = vsub.s32 1, %v860_v30  ;;  %s2895_s25 = scalar_lea.hbm %s3044_s14, %s1605_s12 }
 0x16f   : > { %921 = vmatprep.subr.bf16.mxu0 %v1784_v34  ;;  %v862_v34 = vrot.slane %v857_v32, %v861_v31  ;;  %p2151_p5 = pnand %p2150_p1, %p3045_p6  ;;  %p2158_p3 = por %p2157_p2, %p2156_p9 }
 0x171   : > { %p2152_p8 = pneg %p2151_p5 }
 0x172   : > { %922 = vmatpush1.bf16.msra.mxu0 %v1786_v35  ;;  %v866_v35 = vrot.slane %v857_v32, %v865_v33 }
 0x173   : > { %p2159_p11 = pnand %p2158_p3, %p2152_p8 }
 0x1f1   : > { %v725_v8 = vpop.xlane.xlu0 %724  ;;  %v731_v9 = vpop.xlane.xlu1 %730 }
 0x1f2   : > { %v736_v10 = vmul.f32 0.015625, %v725_v8  ;;  %v738_v11 = vmul.f32 0.015625, %v731_v9 }
 0x1f4   : > { %v740_v12 = vsub.f32 %v2791_v0, %v736_v10  ;;  %v2809_v13 = vsub.f32 %v2793_v1, %v738_v11 }
 0x1f5   : > { %v728_v14 = vpop.xlane.xlu0 %727  ;;  %v734_v15 = vpop.xlane.xlu1 %733 }
 0x1f6   : > { %v737_v16 = vmul.f32 0.015625, %v728_v14  ;;  %v739_v17 = vmul.f32 0.015625, %v734_v15  ;;  %v744_v18 = vmul.f32 %v740_v12, %v740_v12  ;;  %v746_v19 = vmul.f32 %v2809_v13, %v2809_v13  ;;  %v1787_v14 = vld [vmem:[#allocation18 + $0x40] sm:$0xff]  }
 0x1f7   : > { %v1788_v15 = vld [vmem:[#allocation18] sm:$0xff]   ;;  %1606 = vmatprep.subr.bf16.mxu1 %v1787_v14 }
 0x1f8   : > { %v741_v20 = vsub.f32 %v2795_v2, %v737_v16  ;;  %v743_v21 = vsub.f32 %v2801_v5, %v739_v17  ;;  %v748_v22 = vsel %vm713_vm0, %v744_v18, 0.0  ;;  %v754_v23 = vsel %vm713_vm0, %v746_v19, 0.0  ;;  %1607 = vmatpush3.bf16.msra.mxu1 %v1788_v15  ;;  %v1789_v16 = vld [vmem:[#allocation18 + $0x48] sm:$0xff]   ;;  %v1791_v17 = vld [vmem:[#allocation18 + $0x50] sm:$0xff]   ;;  %v1793_v19 = vld [vmem:[#allocation18 + $0x58] sm:$0xff]  }
 0x1f9   : > { %749 = vadd.xlane.f32.xlu0 %v748_v22  ;;  %1608 = vmatprep.subr.bf16.mxu1 %v1789_v16  ;;  %v1792_v18 = vld [vmem:[#allocation18 + $0x10] sm:$0xff]   ;;  %v1796_v22 = vld [vmem:[#allocation18 + $0x20] sm:$0xff]  }
 0x1fa   : > { %v745_v24 = vmul.f32 %v741_v20, %v741_v20  ;;  %v747_v25 = vmul.f32 %v743_v21, %v743_v21 }
 0x1fc   : > { %v751_v26 = vsel %vm713_vm0, %v745_v24, 0.0  ;;  %v757_v27 = vsel %vm713_vm0, %v747_v25, 0.0  ;;  %v1798_v24 = vld [vmem:[#allocation18 + $0x28] sm:$0xff]   ;;  %v1799_v25 = vld [vmem:[#allocation18 + $0x70] sm:$0xff]  }
 0x1fd   : > { %755 = vadd.xlane.f32.xlu0 %v754_v23  ;;  %752 = vadd.xlane.f32.xlu1 %v751_v26  ;;  %v1797_v23 = vld [vmem:[#allocation18 + $0x68] sm:$0xff]   ;;  %v1800_v26 = vld [vmem:[#allocation18 + $0x30] sm:$0xff]  }
 0x201   : > { %758 = vadd.xlane.f32.xlu1 %v757_v27  ;;  %v1801_v27 = vld [vmem:[#allocation18 + $0x78] sm:$0xff]  }
 0x286   : > { %v750_v37 = vpop.xlane.xlu0 %749 }
 0x287   : > { %v760_v38 = vmul.f32 0.015625, %v750_v37 }
 0x289   : > { %v764_v39 = vadd.f32 1e-06, %v760_v38 }
 0x28a   : > { %v753_v40 = vpop.xlane.xlu1 %752  ;;  %v756_v41 = vpop.xlane.xlu0 %755 }
 0x28b   : > { %1803 = vrsqrt.f32 %v764_v39  ;;  %v761_v42 = vmul.f32 0.015625, %v753_v40  ;;  %v762_v43 = vmul.f32 0.015625, %v756_v41 }
 0x28d   : > { %v765_v44 = vadd.f32 1e-06, %v761_v42  ;;  %v766_v45 = vadd.f32 1e-06, %v762_v43 }
 0x28e   : > { %v759_v46 = vpop.xlane.xlu1 %758 }
 0x28f   : > { %1805 = vrsqrt.f32 %v765_v44  ;;  %v763_v47 = vmul.f32 0.015625, %v759_v46 }
 0x290   : > { %1807 = vrsqrt.f32 %v766_v45 }
 0x291   : > { %v767_v48 = vadd.f32 1e-06, %v763_v47 }
 0x293   : > { %1809 = vrsqrt.f32 %v767_v48 }
 0x295   : > { %v1804_v50 = vpop.eup %1803 }
 0x296   : > { %v772_v52 = vmul.f32 %v1804_v50, %v740_v12 }
 0x298   : > { %v839_v57 = vmul.f32 %v835_v53, %v772_v52 }
 0x299   : > { %v1806_v55 = vpop.eup %1805 }
 0x29a   : > { %v773_v56 = vmul.f32 %v1806_v55, %v741_v20  ;;  %v1808_v58 = vpop.eup %1807  ;;  %v843_v4 = vadd.f32 %v1568_v59, %v839_v57  ;;  %v1794_v20 = vld [vmem:[#allocation18 + $0x18] sm:$0xff]  }
 0x29b   : > { %v774_v63 = vmul.f32 %v1808_v58, %v2809_v13  ;;  %v1790_v13 = vld [vmem:[#allocation18 + $0x8] sm:$0xff]  }
 0x29c   : > { %v840_v61 = vmul.f32 %v836_v54, %v773_v56  ;;  %1609 = vmatpush3.bf16.msra.mxu1 %v1790_v13 }
 0x29d   : > { %v1810_v62 = vpop.eup %1809  ;;  %v841_v9 = vmul.f32 %v836_v54, %v774_v63  ;;  %1610 = vmatprep.subr.bf16.mxu1 %v1791_v17 }
 0x29e   : > { %v775_v3 = vmul.f32 %v1810_v62, %v743_v21  ;;  %v844_v6 = vadd.f32 %v1569_v60, %v840_v61  ;;  %v1795_v21 = vld [vmem:[#allocation18 + $0x60] sm:$0xff]  }
 0x29f   : > { %v845_v11 = vadd.f32 %v1569_v60, %v841_v9 }
 0x2a0   : > { %v847_v7 = vpack.c.bf16 %v844_v6, %v843_v4  ;;  %v842_v8 = vmul.f32 %v836_v54, %v775_v3  ;;  %1611 = vmatpush3.bf16.msra.mxu1 %v1792_v18 }
 0x2a1   : > { %1612 = vmatprep.subr.bf16.mxu1 %v1793_v19 }
 0x2a2   : > { %1578 = vmatmul.mubr.msk.bf16.vlgmr.msra.gmra.mrb[0].mxu0 %vm713_vm0, %v847_v7  ;;  %v846_v10 = vadd.f32 %v1569_v60, %v842_v8 }
 0x2a3   : > { %957 = vmatprep.mubr.bf16.mxu0 %v2268_v36 }
 0x2a4   : > { %v848_v12 = vpack.c.bf16 %v846_v10, %v845_v11  ;;  %1613 = vmatpush3.bf16.msra.mxu1 %v1794_v20 }
 0x2a5   : > { %1614 = vmatprep.subr.bf16.mxu1 %v1795_v21 }
 0x2a8   : > { %1615 = vmatpush3.bf16.msra.mxu1 %v1796_v22 }
 0x2a9   : > { %1616 = vmatprep.subr.bf16.mxu1 %v1797_v23 }
 0x2aa   : > { %1579 = vmatmul.mubr.msk.bf16.gmra.mrb[4].mxu0 %vm713_vm0, %v848_v12 }
 0x2ac   : > { %1617 = vmatpush3.bf16.msra.mxu1 %v1798_v24 }
 0x2ad   : > { %1618 = vmatprep.subr.bf16.mxu1 %v1799_v25 }
 0x2b0   : > { %1619 = vmatpush3.bf16.msra.mxu1 %v1800_v26 }
 0x2b1   : > { %1620 = vmatprep.subr.bf16.mxu1 %v1801_v27 }
 0x2b4   : > { %1621 = vmatpush3.bf16.msra.mxu1 %v1802_v28 }
 0x375   : > { %v949_v36 = vpop.f32.mrb[0].mxu0 }
 0x376   : > { %v2830_v37 = vadd.f32 %v949_v36, %v862_v34  ;;  %v951_v38 = vpop.f32.mrb[1].mxu0 }
 0x377   : > { %v2832_v39 = vadd.f32 %v951_v38, %v866_v35  ;;  %v953_v40 = vpop.f32.mrb[2].mxu0 }
 0x378   : > { %v976_v41 = vmul.f32 0.044715, %v2830_v37  ;;  %v2835_v42 = vadd.f32 %v953_v40, %v862_v34  ;;  %v955_v43 = vpop.f32.mrb[3].mxu0  ;;  %v968_v40 = vmul.f32 0.5, %v2830_v37 }
 0x379   : > { %v977_v44 = vmul.f32 0.044715, %v2832_v39  ;;  %v2838_v45 = vadd.f32 %v955_v43, %v866_v35 }
 0x37a   : > { %v984_v46 = vmul.f32 %v976_v41, %v2830_v37  ;;  %v978_v47 = vmul.f32 0.044715, %v2835_v42  ;;  %v970_v41 = vmul.f32 0.5, %v2835_v42 }
 0x37b   : > { %v979_v48 = vmul.f32 0.044715, %v2838_v45  ;;  %v985_v49 = vmul.f32 %v977_v44, %v2832_v39  ;;  %v969_v44 = vmul.f32 0.5, %v2832_v39 }
 0x37c   : > { %v992_v50 = vmul.f32 %v984_v46, %v2830_v37  ;;  %v986_v51 = vmul.f32 %v978_v47, %v2835_v42  ;;  %v971_v46 = vmul.f32 0.5, %v2838_v45 }
 0x37d   : > { %v959_v52 = vpop.f32.mrb[4].mxu0  ;;  %v987_v53 = vmul.f32 %v979_v48, %v2838_v45  ;;  %v993_v54 = vmul.f32 %v985_v49, %v2832_v39 }
 0x37e   : > { %v994_v55 = vmul.f32 %v986_v51, %v2835_v42  ;;  %v2849_v56 = vadd.f32 %v959_v52, %v862_v34  ;;  %v961_v57 = vpop.f32.mrb[5].mxu0  ;;  %v1000_v58 = vadd.f32 %v992_v50, %v2830_v37 }
 0x37f   : > { %v2852_v59 = vadd.f32 %v961_v57, %v866_v35  ;;  %v963_v60 = vpop.f32.mrb[6].mxu0  ;;  %v995_v61 = vmul.f32 %v987_v53, %v2838_v45  ;;  %v1001_v62 = vadd.f32 %v993_v54, %v2832_v39 }
 0x380   : > { %v980_v63 = vmul.f32 0.044715, %v2849_v56  ;;  %v964_v3 = vadd.f32 %v963_v60, %v862_v34  ;;  %v965_v4 = vpop.f32.mrb[7].mxu0  ;;  %v1002_v6 = vadd.f32 %v994_v55, %v2835_v42  ;;  %v1008_v7 = vmul.f32 0.7978846, %v1000_v58 }
 0x381   : > { %v981_v8 = vmul.f32 0.044715, %v2852_v59  ;;  %v966_v9 = vadd.f32 %v965_v4, %v866_v35  ;;  %v1003_v10 = vadd.f32 %v995_v61, %v2838_v45  ;;  %v1009_v11 = vmul.f32 0.7978846, %v1001_v62 }
 0x382   : > { %v988_v12 = vmul.f32 %v980_v63, %v2849_v56  ;;  %v982_v14 = vmul.f32 0.044715, %v964_v3  ;;  %v1010_v15 = vmul.f32 0.7978846, %v1002_v6  ;;  %1811 = vtanh.f32 %v1008_v7 }
 0x383   : > { %v989_v16 = vmul.f32 %v981_v8, %v2852_v59  ;;  %v983_v13 = vmul.f32 0.044715, %v966_v9  ;;  %v1011_v17 = vmul.f32 0.7978846, %v1003_v10  ;;  %1813 = vtanh.f32 %v1009_v11 }
 0x384   : > { %v996_v18 = vmul.f32 %v988_v12, %v2849_v56  ;;  %v990_v19 = vmul.f32 %v982_v14, %v964_v3  ;;  %1815 = vtanh.f32 %v1010_v15  ;;  %v972_v42 = vmul.f32 0.5, %v2849_v56 }
 0x385   : > { %v997_v20 = vmul.f32 %v989_v16, %v2852_v59  ;;  %v991_v21 = vmul.f32 %v983_v13, %v966_v9  ;;  %1817 = vtanh.f32 %v1011_v17  ;;  %v974_v39 = vmul.f32 0.5, %v964_v3 }
 0x386   : > { %v998_v22 = vmul.f32 %v990_v19, %v964_v3  ;;  %v1004_v23 = vadd.f32 %v996_v18, %v2849_v56  ;;  %v973_v45 = vmul.f32 0.5, %v2852_v59  ;;  %v975_v62 = vmul.f32 0.5, %v966_v9 }
 0x387   : > { %v999_v24 = vmul.f32 %v991_v21, %v966_v9  ;;  %v1005_v25 = vadd.f32 %v997_v20, %v2852_v59  ;;  %v2269_v12 = vmov 0.0  }
 0x388   : > { %v1006_v26 = vadd.f32 %v998_v22, %v964_v3  ;;  %v1012_v27 = vmul.f32 0.7978846, %v1004_v23  ;;  %714 = vst.msk [vmem:[#allocation2] sm:$0xff] %vm713_vm0, %v2269_v12  ;;  %715 = vst.msk [vmem:[#allocation2 + $0x8] sm:$0xff] %vm713_vm0, %v2269_v12 }
 0x389   : > { %v1007_v28 = vadd.f32 %v999_v24, %v966_v9  ;;  %v1013_v29 = vmul.f32 0.7978846, %v1005_v25  ;;  %716 = vst.msk [vmem:[#allocation2 + $0x10] sm:$0xff] %vm713_vm0, %v2269_v12  ;;  %717 = vst.msk [vmem:[#allocation2 + $0x18] sm:$0xff] %vm713_vm0, %v2269_v12 }
 0x38a   : > { %v1014_v30 = vmul.f32 0.7978846, %v1006_v26  ;;  %1819 = vtanh.f32 %v1012_v27  ;;  %v1596_v26 = vld [vmem:[#allocation20] ss:$0 sm:$0xff] }
 0x38b   : > { %v1015_v31 = vmul.f32 0.7978846, %v1007_v28  ;;  %1821 = vtanh.f32 %v1013_v29 }
 0x38c   : > { %v1812_v32 = vpop.eup %1811  ;;  %1823 = vtanh.f32 %v1014_v30  ;;  %v1597_v30 = vld [vmem:[%s624_s11] ss:$0 sm:$0xff] }
 0x38d   : > { %v1814_v33 = vpop.eup %1813  ;;  %v1024_v34 = vadd.f32 1.0, %v1812_v32  ;;  %1825 = vtanh.f32 %v1015_v31 }
 0x38e   : > { %v1816_v35 = vpop.eup %1815  ;;  %v1025_v36 = vadd.f32 1.0, %v1814_v33 }
 0x38f   : > { %v1818_v38 = vpop.eup %1817  ;;  %v1026_v43 = vadd.f32 1.0, %v1816_v35  ;;  %v1032_v48 = vmul.f32 %v1024_v34, %v968_v40  ;;  %v1040_v59 = vld [vmem:[#allocation2] sm:$0xff]  ;;  %v1041_v15 = vld [vmem:[#allocation2 + $0x8] sm:$0xff] }
 0x390   : > { %v1027_v47 = vadd.f32 1.0, %v1818_v38  ;;  %v1033_v50 = vmul.f32 %v1025_v36, %v969_v44  ;;  %v1042_v20 = vld [vmem:[#allocation2 + $0x10] sm:$0xff]  ;;  %v1043_v24 = vld [vmem:[#allocation2 + $0x18] sm:$0xff]  ;;  %v1598_v34 = vld [vmem:[%s600_s7] ss:$0 sm:$0xff] }
 0x391   : > { %v1034_v49 = vmul.f32 %v1026_v43, %v970_v41 }
 0x392   : > { %v1035_v51 = vmul.f32 %v1027_v47, %v971_v46 }
 0x393   : > { %v1044_v52 = vpack.c.bf16 %v1034_v49, %v1032_v48 }
 0x394   : > { %v1820_v53 = vpop.eup %1819  ;;  %v1045_v54 = vpack.c.bf16 %v1035_v51, %v1033_v50 }
 0x395   : > { %v1822_v55 = vpop.eup %1821  ;;  %v1028_v57 = vadd.f32 1.0, %v1820_v53 }
 0x396   : > { %v1824_v58 = vpop.eup %1823  ;;  %1208 = vmatprep.mubr.bf16.mxu1 %v1045_v54  ;;  %v1029_v37 = vadd.f32 1.0, %v1822_v55 }
 0x397   : > { %v1826_v60 = vpop.eup %1825  ;;  %1209 = vmatmul.mubr.bf16.vlgmr.msra.gmra.mrb[0].mxu1 %v1044_v52  ;;  %v1030_v61 = vadd.f32 1.0, %v1824_v58  ;;  %v1036_v4 = vmul.f32 %v1028_v57, %v972_v42 }
 0x398   : > { %v1031_v63 = vadd.f32 1.0, %v1826_v60  ;;  %v1037_v7 = vmul.f32 %v1029_v37, %v973_v45 }
 0x399   : > { %v1038_v6 = vmul.f32 %v1030_v61, %v974_v39 }
 0x39a   : > { %v1039_v8 = vmul.f32 %v1031_v63, %v975_v62 }
 0x39b   : > { %v1046_v10 = vpack.c.bf16 %v1038_v6, %v1036_v4 }
 0x39c   : > { %v1047_v11 = vpack.c.bf16 %v1039_v8, %v1037_v7 }
 0x39e   : > { %1216 = vmatprep.mubr.bf16.mxu1 %v1047_v11 }
 0x39f   : > { %1217 = vmatmul.mubr.bf16.gmra.mrb[4].mxu1 %v1046_v10 }
 0x46a   : > { %v1622_v56 = vpop.f32.mrb[0].mxu1 }
 0x46b   : > { %v1623_v3 = vpop.f32.mrb[1].mxu1 }
 0x46c   : > { %v1624_v9 = vadd.f32 %v1623_v3, %v1622_v56  ;;  %v1625_v14 = vpop.f32.mrb[2].mxu1 }
 0x46d   : > { %v1626_v16 = vpop.f32.mrb[3].mxu1 }
 0x46e   : > { %v1225_v13 = vadd.f32 %v1624_v9, %v1040_v59  ;;  %v1627_v17 = vadd.f32 %v1626_v16, %v1625_v14 }
 0x470   : > { %1229 = vst.msk [vmem:[#allocation2] sm:$0xff] %vm713_vm0, %v1225_v13  ;;  %v1226_v18 = vadd.f32 %v1627_v17, %v1041_v15 }
 0x472   : > { %1230 = vst.msk [vmem:[#allocation2 + $0x8] sm:$0xff] %vm713_vm0, %v1226_v18  ;;  %v1628_v19 = vpop.f32.mrb[4].mxu1 }
 0x473   : > { %v1629_v21 = vpop.f32.mrb[5].mxu1 }
 0x474   : > { %v1630_v22 = vadd.f32 %v1629_v21, %v1628_v19  ;;  %v1631_v23 = vpop.f32.mrb[6].mxu1 }
 0x475   : > { %v1632_v25 = vpop.f32.mrb[7].mxu1 }
 0x476   : > { %v1227_v27 = vadd.f32 %v1630_v22, %v1042_v20  ;;  %v1633_v28 = vadd.f32 %v1632_v25, %v1631_v23 }
 0x477   : > { %v1236_v29 = vld [vmem:[#allocation2] sm:$0xff] }
 0x478   : > { %1231 = vst.msk [vmem:[#allocation2 + $0x10] sm:$0xff] %vm713_vm0, %v1227_v27  ;;  %v1228_v31 = vadd.f32 %v1633_v28, %v1043_v24  ;;  %v1247_v32 = vadd.f32 %v1596_v26, %v1236_v29 }
 0x479   : > { %v1237_v33 = vld [vmem:[#allocation2 + $0x8] sm:$0xff] }
 0x47a   : > { %1232 = vst.msk [vmem:[#allocation2 + $0x18] sm:$0xff] %vm713_vm0, %v1228_v31  ;;  %v1248_v35 = vadd.f32 %v1596_v26, %v1237_v33  ;;  %v1269_v36 = vmul.f32 %v1597_v30, %v1247_v32 }
 0x47c   : > { %v1270_v38 = vmul.f32 %v1598_v34, %v1248_v35  ;;  %v1273_v40 = vadd.f32 %v1269_v36, %v2791_v0 }
 0x47e   : > { %v1274_v41 = vadd.f32 %v1270_v38, %v2795_v2  ;;  %1277 = vst.msk [vmem:[%s702_s17] sm:$0xff] %vm713_vm0, %v1273_v40 }
 0x47f   : > { %v1238_v43 = vld [vmem:[#allocation2 + $0x10] sm:$0xff] }
 0x480   : > { %v1249_v44 = vadd.f32 %v1596_v26, %v1238_v43  ;;  %1278 = vst.msk [vmem:[%s702_s17 + $0x8] sm:$0xff] %vm713_vm0, %v1274_v41 }
 0x481   : > { %v1239_v46 = vld [vmem:[#allocation2 + $0x18] sm:$0xff] }
 0x482   : > { %v1250_v47 = vadd.f32 %v1596_v26, %v1239_v46  ;;  %v1271_v48 = vmul.f32 %v1598_v34, %v1249_v44 }
 0x484   : > { %v1272_v49 = vmul.f32 %v1598_v34, %v1250_v47  ;;  %v1275_v0 = vadd.f32 %v1271_v48, %v2793_v1 }
 0x486   : > { %v1276_v2 = vadd.f32 %v1272_v49, %v2801_v5  ;;  %1279 = vst.msk [vmem:[%s702_s17 + $0x10] sm:$0xff] %vm713_vm0, %v1275_v0 }
 0x488   : > { %1280 = vst.msk [vmem:[%s702_s17 + $0x18] sm:$0xff] %vm713_vm0, %v1276_v2 }
 0x489   : > { %2162 = shalt.err (!%p2159_p11)
}
 0x48a   : > { %s2163_s7 = scalar_lea.hbm %s2895_s25, 512  ;;  %s2167_s30 = scalar_lea.hbm %s3044_s14, 1024 }
 0x48b   : > { %p2164_p0 = scmp.ne.s32.totalorder %s2895_s25, %s2163_s7  ;;  %p2168_p7 = scmp.lt.u32.totalorder %s2895_s25, %s3044_s14 }
 0x48c   : > { %p2169_p4 = scmp.lt.u32.totalorder %s2167_s30, %s2163_s7  ;;  %p2171_p1 = scmp.lt.u32.totalorder %s2163_s7, %s2895_s25 }
 0x48d   : > { %p2165_p13 = pnand %p2164_p0, %p3045_p6 }
 0x48e   : > { %p2170_p12 = por %p2169_p4, %p2168_p7 }
 0x48f   : > { %p2166_p10 = pneg %p2165_p13 }
 0x490   : > { %p2172_p5 = por %p2171_p1, %p2170_p12 }
 0x492   : > { %p2173_p8 = pnand %p2172_p5, %p2166_p10 }
 0x494   : > { %2176 = shalt.err (!%p2173_p8)
}
 0x495   : > { %s2271_s17 = smov 128   ;;  %s2272_s12 = smov 8  }
 0x496   : > { %1664 = dma.vmem_to_hbm [thread:$0]  (%p3045_p6), %s2897_s23, 512, %s2895_s25, %s1282_s29, %s2271_s17, %s2271_s17, %s2272_s12  }
 0x497 PF: > { %s3046_s18 = sld [smem:[#allocation29_spill]]  ;;  %s3047_s1 = sld [smem:[#allocation36_spill]] }
 0x498   : > { %s3048_s15 = sld [smem:[#allocation32_spill]] }
 0x49d   : > { %s1312_s13 = sand.u32 1, %s3046_s18   ;;  %p3049_p9 = scmp.ne.s32.totalorder %s3047_s1, 0 }
 0x49e   : > { %p3050_p2 = scmp.ge.s32.totalorder %s3048_s15, 2  ;;  %s1313_s28 = scalar_lea.sflag [#allocation5], %s1312_s13 }
 0x4a0   : > { %p1702_p3 = pnand %p3050_p2, %p3049_p9 }
 0x4a2   : > { %2226 = dma.done.wait (!%p1702_p3), %s1313_s28, 512  }
 0x4a3   : > { %2228 = vsyncadd (!%p1702_p3), %s1313_s28, 4294966784  ;;  %s38_s22 = sadd.s32 1, %s3048_s15   ;;  %s3051_s17 = sld [smem:[#allocation30_spill]] }
 0x4a4   : > { %p35_p11 = scmp.ge.s32.totalorder %s38_s22, 4   ;;  %s3052_s24 = sld [smem:[#allocation37_spill]] }
 0x4a5   : > { %s3053_s18 = smov %s2239_s19  ;;  %s3054_s19 = smov %s2536_s27 }
 0x4a6   : > { %s3055_s20 = smov %s2247_s21  ;;  %37 = sbr.rel (!%p35_p11) target bundleno = 19 (0x13), region = 208 }
 0x4aa   : > { %s3056_s21 = smov %s3052_s24 }
 0x4ad   :  { %1318 = vsyncpa [#allocation4], 1 }
 0x4ae   :  { %1320 = vsyncpa [#allocation4 + $0x1], 1 }
 0x4af   :  { %1321 = vsyncpa [#allocation7], 1 }
 0x4b0   :  { %1323 = vsyncpa [#allocation7 + $0x1], 1 }
 0x4b1   :  { %1324 = vsyncpa [#allocation10], 1 }
 0x4b2   :  { %1326 = vsyncpa [#allocation10 + $0x1], 1 }
 0x4b3   :  { %1327 = vsyncpa [#allocation13], 1 }
 0x4b4   :  { %1329 = vsyncpa [#allocation13 + $0x1], 1 }
 0x4b5   :  { %1330 = vsyncpa [#allocation16], 1 }
 0x4b6   :  { %1331 = vsyncpa [#allocation19], 1 }
 0x4b7   :  { %1332 = vsyncpa [#allocation5], 1 }
 0x4b8   :  { %1334 = vsyncpa [#allocation5 + $0x1], 1 }

</bundles_post_ra>
